<compile_context>
chip_gen: v5e
topology: v5e:2x2
jax: 0.10.0
libtpu: 0.0.40
codegen_flags: <defaults>
</compile_context>

<pallas_src>
import functools

import jax
import jax.numpy as jnp
from jax.experimental import pallas as pl
from jax.experimental.pallas import tpu as pltpu

N_PW = 16  # number of linear pieces in each PiecewiseLin


def _piecewise_multi(pw_ref, heads, x):
    """Evaluate several PiecewiseLin heads f_h(x) on the SAME argument x in [0, 1].

    Closed form of the csum/gather formulation (valid for non-negative normalized
    weights w and x in [0, 1]):
        f_h(x) = w_h[0] + sum_{k=1..16} w_h[k] * clip(16*x - (k-1), 0, 1)
    The clip terms depend only on x, so they are computed once and shared across all
    heads (CSE: dist feeds f1/f4/f6, rel feeds f0/f3).
    """
    y = float(N_PW) * x
    outs = [jnp.zeros_like(x) + pw_ref[h, 0] for h in heads]
    for k in range(1, N_PW + 1):
        c = jnp.clip(y - float(k - 1), 0.0, 1.0)
        outs = [o + pw_ref[h, k] * c for o, h in zip(outs, heads)]
    return outs


def _counter_kernel(pw_ref, a_row_ref, a_col_ref, box_row_ref, box_col_ref,
                    sel_ref, grp_ones_ref, grp_sum_ref, out_ref, *, n_obj, tb):
    """One grid step = TB batch elements, lane-packed: lane t*N+k <-> (batch t, object k)."""
    N = n_obj
    C = N + 1
    f = functools.partial(_piecewise_multi, pw_ref)

    a_r = a_row_ref[0]                 # (1, L)  a_r[0, t*N+k] = att[t, k]
    a_c = a_col_ref[0]                 # (N, L)  a_c[j, t*N+k] = att[t, j]
    br = box_row_ref[0]                # (4, L)  br[c, t*N+k]  = box[t, c, k]

    x1_r, y1_r, x2_r, y2_r = br[0:1, :], br[1:2, :], br[2:3, :], br[3:4, :]
    x1_c = box_col_ref[0, 0]           # (N, L)  box[t, 0, j]
    y1_c = box_col_ref[0, 1]
    x2_c = box_col_ref[0, 2]
    y2_c = box_col_ref[0, 3]

    # box areas, both orientations
    area_r = jnp.maximum(x2_r - x1_r, 0.0) * jnp.maximum(y2_r - y1_r, 0.0)   # (1, L)
    area_c = jnp.maximum(x2_c - x1_c, 0.0) * jnp.maximum(y2_c - y1_c, 0.0)   # (N, L)

    # pairwise IoU -> distance (per batch group, packed along lanes)
    ix = jnp.maximum(jnp.minimum(x2_c, x2_r) - jnp.maximum(x1_c, x1_r), 0.0)
    iy = jnp.maximum(jnp.minimum(y2_c, y2_r) - jnp.maximum(y1_c, y1_r), 0.0)
    inter = ix * iy                                                          # (N, L)
    iou = inter / (area_c + area_r - inter + 1e-12)
    dist = 1.0 - iou                                                         # (N, L)

    # pairwise relevancy (outer product of attention)
    rel = a_c * a_r                                                          # (N, L)

    # shared piecewise evaluations (clip terms CSE'd across heads)
    f0_rel, f3_rel = f((0, 3), rel)
    f1_d, f4_d, f6_d = f((1, 4, 6), dist)

    score = f0_rel * f1_d                                                    # (N, L) intra-object dedup
    dscore = f3_rel * f4_d                                                   # (N, L) inter-object dedup score

    # confidence terms that only need dist / attention (reduce early, free f6_d)
    dist_conf_sum = jnp.sum(jnp.abs(f6_d - 0.5), axis=0, keepdims=True)      # (1, L)
    (f5_a,) = f((5,), a_r)
    att_conf = jnp.abs(f5_a - 0.5)                                           # (1, L)

    # inter-object dedup:
    #   sim[t,j,k] = f2(1-|a_j-a_k|) * prod_i f2(1-|dscore[t,i,j]-dscore[t,i,k]|)
    # dscore[t,i,k] = sublane-broadcast of row i; dscore[t,i,j] (broadcast over k within
    # each batch group) is produced via an MXU matmul with a constant 0/1 selection
    # matrix, using the symmetry of dscore (rel and IoU-derived dist are symmetric).
    (sim,) = f((2,), 1.0 - jnp.abs(a_c - a_r))                               # (N, L)
    for i in range(N):
        row_i = dscore[i:i + 1, :]                                           # (1, L) dscore[t, i, k]
        col_i = jnp.dot(dscore, sel_ref[i],
                        preferred_element_type=jnp.float32)                  # (N, L) dscore[t, i, j]
        (fi,) = f((2,), 1.0 - jnp.abs(col_i - row_i))
        sim = sim * fi

    # row similarity sums, both packed orientations (symmetry of sim)
    rs_row = jnp.sum(sim, axis=0, keepdims=True)                             # (1, L) row_sims[t, k]
    rs_col = jnp.dot(sim, grp_ones_ref[...],
                     preferred_element_type=jnp.float32)                     # (N, L) row_sims[t, j]

    score = score / (rs_col * rs_row)                                        # / dedup_per_entry
    (f0_aa,) = f((0,), a_r * a_r)
    corr = f0_aa / rs_row                                                    # / dedup_per_row

    # per-batch count: sum score over (j, k) plus corr over k
    t_row = jnp.sum(score, axis=0, keepdims=True) + corr                     # (1, L)
    total = jnp.dot(t_row, grp_sum_ref[...],
                    preferred_element_type=jnp.float32)                      # (1, TB)
    count = jnp.sqrt(total + 1e-20)                                          # (1, TB)

    # confidence
    conf_row = att_conf / float(N) + dist_conf_sum / float(N * N)            # (1, L)
    conf_in = jnp.dot(conf_row, grp_sum_ref[...],
                      preferred_element_type=jnp.float32)                    # (1, TB)
    (conf,) = f((7,), conf_in)                                               # (1, TB)

    # to_one_hot (linear interpolation between floor/ceil one-hots), laid out (C, TB)
    s = jnp.clip(count, 0.0, float(N))
    i_f = jnp.floor(s)
    frac = s - i_f
    i_l = i_f.astype(jnp.int32)
    i_r = jnp.minimum(i_l + 1, N)
    rows = jax.lax.broadcasted_iota(jnp.int32, (C, tb), 0)                   # (C, TB)
    one_hot = ((1.0 - frac) * (rows == i_l).astype(jnp.float32)
               + frac * (rows == i_r).astype(jnp.float32))                   # (C, TB)

    out_ref[0] = (one_hot * conf).astype(out_ref.dtype)                      # (C, TB)


def _make_constants(n_obj, tb):
    """Constant 0/1 matrices for within-batch-group lane broadcast / reduction."""
    N = n_obj
    L = tb * N
    lane = jnp.arange(L, dtype=jnp.int32)
    group = lane // N
    within = lane % N
    same_group = group[:, None] == group[None, :]                            # (L, L)
    # sel[i, q, l] = 1 iff q is lane i of l's batch group
    sel = (same_group[None, :, :]
           & (within[None, :, None] == jnp.arange(N, dtype=jnp.int32)[:, None, None]))
    sel = sel.astype(jnp.float32)                                            # (N, L, L)
    grp_ones = same_group.astype(jnp.float32)                                # (L, L)
    grp_sum = (group[:, None]
               == jnp.arange(tb, dtype=jnp.int32)[None, :]).astype(jnp.float32)  # (L, TB)
    return sel, grp_ones, grp_sum


def init_params(cf, key):
    """Deterministic parameter init matching the module __init__."""
    C = cf + 1
    # PiecewiseLin: weight = ones(n+1), weight[0] = 0   (only f[0..7] are used)
    pw = jnp.ones((8, N_PW + 1), jnp.float32).at[:, 0].set(0.0)
    cls_w = jnp.eye(C, dtype=jnp.float32)                # init.eye_(classifier.weight)
    bound = 1.0 / (C ** 0.5)                             # nn.Linear default bias init
    cls_b = jax.random.uniform(key, (C,), jnp.float32, -bound, bound)
    return {"pw": pw, "cls_w": cls_w, "cls_b": cls_b}


@functools.partial(jax.jit, static_argnames=("cf", "tb"))
def net_forward(a, b, params, *, cf, tb=None):
    """a: attention (B, M) in [0,1]; b: boxes (B, 4, M) [x1,y1,x2,y2]. Returns (B, cf+1)."""
    B, M = a.shape
    N = cf
    C = N + 1
    if tb is None:
        tb = max(1, pl.cdiv(128, N))        # TB batch elements per grid step (TB*N >= 128 lanes)
    L = tb * N

    # filter_most_important: keep top-N proposals by attention (glue — data-dependent
    # selection; everything downstream is permutation-invariant over objects).
    att, idx = jax.lax.top_k(a, N)                                     # (B, N)
    boxes = jnp.take_along_axis(b, idx[:, None, :], axis=2)            # (B, 4, N)

    # pad batch to a multiple of the batch tile (padded zero-attention rows produce
    # finite features and are sliced off after the kernel).
    G = pl.cdiv(B, tb)
    Bp = G * tb
    if Bp != B:
        att = jnp.pad(att, ((0, Bp - B), (0, 0)))
        boxes = jnp.pad(boxes, ((0, Bp - B), (0, 0), (0, 0)))

    # lane-packed layouts: each of the TB batch elements of a grid step owns N
    # consecutive lanes, so all pairwise math runs on (N, TB*N) tiles.
    att_g = att.reshape(G, tb, N)
    box_g = boxes.reshape(G, tb, 4, N)
    a_row = att_g.reshape(G, 1, L)                                     # [g,0,t*N+k] = att[t,k]
    a_col = jnp.broadcast_to(att_g.transpose(0, 2, 1)[:, :, :, None],
                             (G, N, tb, N)).reshape(G, N, L)           # [g,j,t*N+k] = att[t,j]
    box_row = box_g.transpose(0, 2, 1, 3).reshape(G, 4, L)             # [g,c,t*N+k] = box[t,c,k]
    box_col = jnp.broadcast_to(box_g.transpose(0, 2, 3, 1)[..., None],
                               (G, 4, N, tb, N)).reshape(G, 4, N, L)   # [g,c,j,t*N+k] = box[t,c,j]

    sel, grp_ones, grp_sum = _make_constants(N, tb)

    # PiecewiseLin weight preprocessing (abs + normalize) — parameter glue.
    w = jnp.abs(params["pw"])
    w = w / jnp.sum(w, axis=1, keepdims=True)                          # (8, 17)

    kernel = functools.partial(_counter_kernel, n_obj=N, tb=tb)
    out = pl.pallas_call(
        kernel,
        out_shape=jax.ShapeDtypeStruct((G, C, tb), jnp.float32),
        grid=(G,),
        in_specs=[
            pl.BlockSpec(memory_space=pltpu.MemorySpace.SMEM),         # piecewise weights (8, 17)
            pl.BlockSpec((1, 1, L), lambda g: (g, 0, 0)),              # attention, row packed
            pl.BlockSpec((1, N, L), lambda g: (g, 0, 0)),              # attention, col packed
            pl.BlockSpec((1, 4, L), lambda g: (g, 0, 0)),              # boxes, row packed
            pl.BlockSpec((1, 4, N, L), lambda g: (g, 0, 0, 0)),        # boxes, col packed
            pl.BlockSpec((N, L, L), lambda g: (0, 0, 0)),              # lane-selection matrices
            pl.BlockSpec((L, L), lambda g: (0, 0)),                    # within-group all-ones
            pl.BlockSpec((L, tb), lambda g: (0, 0)),                   # group-sum matrix
        ],
        out_specs=pl.BlockSpec((1, C, tb), lambda g: (g, 0, 0)),
        compiler_params=pltpu.CompilerParams(dimension_semantics=("parallel",)),
    )(w, a_row, a_col, box_row, box_col, sel, grp_ones, grp_sum)

    feat = out.transpose(0, 2, 1).reshape(Bp, C)[:B]                   # (B, C) count features

    # classifier (eye-initialized Linear) hoisted out of the kernel: tiny (B,C)@(C,C) in XLA.
    return feat @ params["cls_w"].T + params["cls_b"][None, :]


if __name__ == "__main__":
    key = jax.random.PRNGKey(0)
    k1, k2, k3, k4 = jax.random.split(key, 4)

    B, M, CF = 2, 12, 8                     # batch, #proposals, #objects to count (cf)

    # attention weights, already sigmoided -> in [0, 1]
    a = jax.random.uniform(k1, (B, M), jnp.float32)
    # boxes (B, 4, M): [x1, y1, x2, y2] with x2 >= x1, y2 >= y1, coords in [0, 1]
    xy = jax.random.uniform(k2, (B, 2, M), jnp.float32, 0.0, 0.6)
    wh = jax.random.uniform(k3, (B, 2, M), jnp.float32, 0.05, 0.4)
    b = jnp.concatenate([xy, xy + wh], axis=1)

    params = init_params(CF, k4)

    out = net_forward(a, b, params, cf=CF)
    out = jax.block_until_ready(out)
    assert out.shape == (B, CF + 1) and out.dtype == jnp.float32
    assert bool(jnp.all(jnp.isfinite(out)))
    print("KERNEL_OK")
</pallas_src>

<mosaic_0001>
module attributes {stable_mosaic.version = 11 : i64} {
  func.func @_counter_kernel(%arg0: i32, %arg1: memref<8x17xf32, #tpu.memory_space<smem>>, %arg2: memref<1x1x128xf32, #tpu.memory_space<vmem>>, %arg3: memref<1x8x128xf32, #tpu.memory_space<vmem>>, %arg4: memref<1x4x128xf32, #tpu.memory_space<vmem>>, %arg5: memref<1x4x8x128xf32, #tpu.memory_space<vmem>>, %arg6: memref<8x128x128xf32, #tpu.memory_space<vmem>>, %arg7: memref<128x128xf32, #tpu.memory_space<vmem>>, %arg8: memref<128x16xf32, #tpu.memory_space<vmem>>, %arg9: memref<1x9x16xf32, #tpu.memory_space<vmem>>) attributes {dimension_semantics = [#tpu.dimension_semantics<parallel>], iteration_bounds = array<i64: 1>, scalar_prefetch = 0 : i64, scratch_operands = 0 : i64, tpu.core_type = #tpu.core_type<tc>, window_params = [{transform_indices = @transform_0, window_bounds = array<i64: 8, 17>}, {transform_indices = @transform_1, window_bounds = array<i64: 1, 1, 128>}, {transform_indices = @transform_2, window_bounds = array<i64: 1, 8, 128>}, {transform_indices = @transform_3, window_bounds = array<i64: 1, 4, 128>}, {transform_indices = @transform_4, window_bounds = array<i64: 1, 4, 8, 128>}, {pipeline_mode = #tpu.pipeline_mode<synchronous>, transform_indices = @transform_5, window_bounds = array<i64: 8, 128, 128>}, {pipeline_mode = #tpu.pipeline_mode<synchronous>, transform_indices = @transform_6, window_bounds = array<i64: 128, 128>}, {pipeline_mode = #tpu.pipeline_mode<synchronous>, transform_indices = @transform_7, window_bounds = array<i64: 128, 16>}, {transform_indices = @transform_8, window_bounds = array<i64: 1, 9, 16>}]} {
    %c0 = arith.constant 0 : index
    %c0_0 = arith.constant 0 : index
    %c0_1 = arith.constant 0 : index
    %0 = vector.load %arg2[%c0, %c0_0, %c0_1] : memref<1x1x128xf32, #tpu.memory_space<vmem>>, vector<1x1x128xf32>
    %1 = vector.shape_cast %0 : vector<1x1x128xf32> to vector<1x128xf32>
    %c0_2 = arith.constant 0 : index
    %c0_3 = arith.constant 0 : index
    %c0_4 = arith.constant 0 : index
    %2 = vector.load %arg3[%c0_2, %c0_3, %c0_4] : memref<1x8x128xf32, #tpu.memory_space<vmem>>, vector<1x8x128xf32>
    %3 = vector.shape_cast %2 : vector<1x8x128xf32> to vector<8x128xf32>
    %c0_5 = arith.constant 0 : index
    %c0_6 = arith.constant 0 : index
    %c0_7 = arith.constant 0 : index
    %4 = vector.load %arg4[%c0_5, %c0_6, %c0_7] : memref<1x4x128xf32, #tpu.memory_space<vmem>>, vector<1x4x128xf32>
    %5 = vector.shape_cast %4 : vector<1x4x128xf32> to vector<4x128xf32>
    %6 = vector.extract_strided_slice %5 {offsets = [0, 0], sizes = [1, 128], strides = [1, 1]} : vector<4x128xf32> to vector<1x128xf32>
    %7 = vector.extract_strided_slice %5 {offsets = [1, 0], sizes = [1, 128], strides = [1, 1]} : vector<4x128xf32> to vector<1x128xf32>
    %8 = vector.extract_strided_slice %5 {offsets = [2, 0], sizes = [1, 128], strides = [1, 1]} : vector<4x128xf32> to vector<1x128xf32>
    %9 = vector.extract_strided_slice %5 {offsets = [3, 0], sizes = [1, 128], strides = [1, 1]} : vector<4x128xf32> to vector<1x128xf32>
    %c0_8 = arith.constant 0 : index
    %c0_9 = arith.constant 0 : index
    %c0_10 = arith.constant 0 : index
    %c0_11 = arith.constant 0 : index
    %10 = vector.load %arg5[%c0_8, %c0_9, %c0_10, %c0_11] : memref<1x4x8x128xf32, #tpu.memory_space<vmem>>, vector<1x1x8x128xf32>
    %11 = vector.shape_cast %10 : vector<1x1x8x128xf32> to vector<8x128xf32>
    %c0_12 = arith.constant 0 : index
    %c1 = arith.constant 1 : index
    %c0_13 = arith.constant 0 : index
    %c0_14 = arith.constant 0 : index
    %12 = vector.load %arg5[%c0_12, %c1, %c0_13, %c0_14] : memref<1x4x8x128xf32, #tpu.memory_space<vmem>>, vector<1x1x8x128xf32>
    %13 = vector.shape_cast %12 : vector<1x1x8x128xf32> to vector<8x128xf32>
    %c0_15 = arith.constant 0 : index
    %c2 = arith.constant 2 : index
    %c0_16 = arith.constant 0 : index
    %c0_17 = arith.constant 0 : index
    %14 = vector.load %arg5[%c0_15, %c2, %c0_16, %c0_17] : memref<1x4x8x128xf32, #tpu.memory_space<vmem>>, vector<1x1x8x128xf32>
    %15 = vector.shape_cast %14 : vector<1x1x8x128xf32> to vector<8x128xf32>
    %c0_18 = arith.constant 0 : index
    %c3 = arith.constant 3 : index
    %c0_19 = arith.constant 0 : index
    %c0_20 = arith.constant 0 : index
    %16 = vector.load %arg5[%c0_18, %c3, %c0_19, %c0_20] : memref<1x4x8x128xf32, #tpu.memory_space<vmem>>, vector<1x1x8x128xf32>
    %17 = vector.shape_cast %16 : vector<1x1x8x128xf32> to vector<8x128xf32>
    %18 = arith.subf %8, %6 : vector<1x128xf32>
    %cst = arith.constant 0.000000e+00 : f32
    %19 = vector.broadcast %cst : f32 to vector<1x128xf32>
    %20 = arith.maximumf %18, %19 : vector<1x128xf32>
    %21 = arith.subf %9, %7 : vector<1x128xf32>
    %cst_21 = arith.constant 0.000000e+00 : f32
    %22 = vector.broadcast %cst_21 : f32 to vector<1x128xf32>
    %23 = arith.maximumf %21, %22 : vector<1x128xf32>
    %24 = arith.mulf %20, %23 : vector<1x128xf32>
    %25 = arith.subf %15, %11 : vector<8x128xf32>
    %cst_22 = arith.constant 0.000000e+00 : f32
    %26 = vector.broadcast %cst_22 : f32 to vector<8x128xf32>
    %27 = arith.maximumf %25, %26 : vector<8x128xf32>
    %28 = arith.subf %17, %13 : vector<8x128xf32>
    %cst_23 = arith.constant 0.000000e+00 : f32
    %29 = vector.broadcast %cst_23 : f32 to vector<8x128xf32>
    %30 = arith.maximumf %28, %29 : vector<8x128xf32>
    %31 = arith.mulf %27, %30 : vector<8x128xf32>
    %32 = vector.broadcast %8 : vector<1x128xf32> to vector<8x128xf32>
    %33 = arith.minimumf %15, %32 : vector<8x128xf32>
    %34 = vector.broadcast %6 : vector<1x128xf32> to vector<8x128xf32>
    %35 = arith.maximumf %11, %34 : vector<8x128xf32>
    %36 = arith.subf %33, %35 : vector<8x128xf32>
    %cst_24 = arith.constant 0.000000e+00 : f32
    %37 = vector.broadcast %cst_24 : f32 to vector<8x128xf32>
    %38 = arith.maximumf %36, %37 : vector<8x128xf32>
    %39 = vector.broadcast %9 : vector<1x128xf32> to vector<8x128xf32>
    %40 = arith.minimumf %17, %39 : vector<8x128xf32>
    %41 = vector.broadcast %7 : vector<1x128xf32> to vector<8x128xf32>
    %42 = arith.maximumf %13, %41 : vector<8x128xf32>
    %43 = arith.subf %40, %42 : vector<8x128xf32>
    %cst_25 = arith.constant 0.000000e+00 : f32
    %44 = vector.broadcast %cst_25 : f32 to vector<8x128xf32>
    %45 = arith.maximumf %43, %44 : vector<8x128xf32>
    %46 = arith.mulf %38, %45 : vector<8x128xf32>
    %47 = vector.broadcast %24 : vector<1x128xf32> to vector<8x128xf32>
    %48 = arith.addf %31, %47 : vector<8x128xf32>
    %49 = arith.subf %48, %46 : vector<8x128xf32>
    %cst_26 = arith.constant 9.99999996E-13 : f32
    %50 = vector.broadcast %cst_26 : f32 to vector<8x128xf32>
    %51 = arith.addf %49, %50 : vector<8x128xf32>
    %52 = arith.divf %46, %51 : vector<8x128xf32>
    %cst_27 = arith.constant 1.000000e+00 : f32
    %53 = vector.broadcast %cst_27 : f32 to vector<8x128xf32>
    %54 = arith.subf %53, %52 : vector<8x128xf32>
    %55 = vector.broadcast %1 : vector<1x128xf32> to vector<8x128xf32>
    %56 = arith.mulf %3, %55 : vector<8x128xf32>
    %cst_28 = arith.constant 1.600000e+01 : f32
    %57 = vector.broadcast %cst_28 : f32 to vector<8x128xf32>
    %58 = arith.mulf %57, %56 : vector<8x128xf32>
    %cst_29 = arith.constant 0.000000e+00 : f32
    %59 = vector.broadcast %cst_29 : f32 to vector<8x128xf32>
    %c0_30 = arith.constant 0 : index
    %c0_31 = arith.constant 0 : index
    %60 = memref.load %arg1[%c0_30, %c0_31] : memref<8x17xf32, #tpu.memory_space<smem>>
    %61 = vector.broadcast %60 : f32 to vector<8x128xf32>
    %62 = arith.addf %59, %61 : vector<8x128xf32>
    %cst_32 = arith.constant 0.000000e+00 : f32
    %63 = vector.broadcast %cst_32 : f32 to vector<8x128xf32>
    %c3_33 = arith.constant 3 : index
    %c0_34 = arith.constant 0 : index
    %64 = memref.load %arg1[%c3_33, %c0_34] : memref<8x17xf32, #tpu.memory_space<smem>>
    %65 = vector.broadcast %64 : f32 to vector<8x128xf32>
    %66 = arith.addf %63, %65 : vector<8x128xf32>
    %cst_35 = arith.constant 0.000000e+00 : f32
    %67 = vector.broadcast %cst_35 : f32 to vector<8x128xf32>
    %68 = arith.subf %58, %67 : vector<8x128xf32>
    %cst_36 = arith.constant 0.000000e+00 : f32
    %cst_37 = arith.constant 1.000000e+00 : f32
    %69 = vector.broadcast %cst_36 : f32 to vector<8x128xf32>
    %70 = arith.maximumf %69, %68 : vector<8x128xf32>
    %71 = vector.broadcast %cst_37 : f32 to vector<8x128xf32>
    %72 = arith.minimumf %71, %70 : vector<8x128xf32>
    %c0_38 = arith.constant 0 : index
    %c1_39 = arith.constant 1 : index
    %73 = memref.load %arg1[%c0_38, %c1_39] : memref<8x17xf32, #tpu.memory_space<smem>>
    %74 = vector.broadcast %73 : f32 to vector<8x128xf32>
    %75 = arith.mulf %74, %72 : vector<8x128xf32>
    %76 = arith.addf %62, %75 : vector<8x128xf32>
    %c3_40 = arith.constant 3 : index
    %c1_41 = arith.constant 1 : index
    %77 = memref.load %arg1[%c3_40, %c1_41] : memref<8x17xf32, #tpu.memory_space<smem>>
    %78 = vector.broadcast %77 : f32 to vector<8x128xf32>
    %79 = arith.mulf %78, %72 : vector<8x128xf32>
    %80 = arith.addf %66, %79 : vector<8x128xf32>
    %cst_42 = arith.constant 1.000000e+00 : f32
    %81 = vector.broadcast %cst_42 : f32 to vector<8x128xf32>
    %82 = arith.subf %58, %81 : vector<8x128xf32>
    %cst_43 = arith.constant 0.000000e+00 : f32
    %cst_44 = arith.constant 1.000000e+00 : f32
    %83 = vector.broadcast %cst_43 : f32 to vector<8x128xf32>
    %84 = arith.maximumf %83, %82 : vector<8x128xf32>
    %85 = vector.broadcast %cst_44 : f32 to vector<8x128xf32>
    %86 = arith.minimumf %85, %84 : vector<8x128xf32>
    %c0_45 = arith.constant 0 : index
    %c2_46 = arith.constant 2 : index
    %87 = memref.load %arg1[%c0_45, %c2_46] : memref<8x17xf32, #tpu.memory_space<smem>>
    %88 = vector.broadcast %87 : f32 to vector<8x128xf32>
    %89 = arith.mulf %88, %86 : vector<8x128xf32>
    %90 = arith.addf %76, %89 : vector<8x128xf32>
    %c3_47 = arith.constant 3 : index
    %c2_48 = arith.constant 2 : index
    %91 = memref.load %arg1[%c3_47, %c2_48] : memref<8x17xf32, #tpu.memory_space<smem>>
    %92 = vector.broadcast %91 : f32 to vector<8x128xf32>
    %93 = arith.mulf %92, %86 : vector<8x128xf32>
    %94 = arith.addf %80, %93 : vector<8x128xf32>
    %cst_49 = arith.constant 2.000000e+00 : f32
    %95 = vector.broadcast %cst_49 : f32 to vector<8x128xf32>
    %96 = arith.subf %58, %95 : vector<8x128xf32>
    %cst_50 = arith.constant 0.000000e+00 : f32
    %cst_51 = arith.constant 1.000000e+00 : f32
    %97 = vector.broadcast %cst_50 : f32 to vector<8x128xf32>
    %98 = arith.maximumf %97, %96 : vector<8x128xf32>
    %99 = vector.broadcast %cst_51 : f32 to vector<8x128xf32>
    %100 = arith.minimumf %99, %98 : vector<8x128xf32>
    %c0_52 = arith.constant 0 : index
    %c3_53 = arith.constant 3 : index
    %101 = memref.load %arg1[%c0_52, %c3_53] : memref<8x17xf32, #tpu.memory_space<smem>>
    %102 = vector.broadcast %101 : f32 to vector<8x128xf32>
    %103 = arith.mulf %102, %100 : vector<8x128xf32>
    %104 = arith.addf %90, %103 : vector<8x128xf32>
    %c3_54 = arith.constant 3 : index
    %c3_55 = arith.constant 3 : index
    %105 = memref.load %arg1[%c3_54, %c3_55] : memref<8x17xf32, #tpu.memory_space<smem>>
    %106 = vector.broadcast %105 : f32 to vector<8x128xf32>
    %107 = arith.mulf %106, %100 : vector<8x128xf32>
    %108 = arith.addf %94, %107 : vector<8x128xf32>
    %cst_56 = arith.constant 3.000000e+00 : f32
    %109 = vector.broadcast %cst_56 : f32 to vector<8x128xf32>
    %110 = arith.subf %58, %109 : vector<8x128xf32>
    %cst_57 = arith.constant 0.000000e+00 : f32
    %cst_58 = arith.constant 1.000000e+00 : f32
    %111 = vector.broadcast %cst_57 : f32 to vector<8x128xf32>
    %112 = arith.maximumf %111, %110 : vector<8x128xf32>
    %113 = vector.broadcast %cst_58 : f32 to vector<8x128xf32>
    %114 = arith.minimumf %113, %112 : vector<8x128xf32>
    %c0_59 = arith.constant 0 : index
    %c4 = arith.constant 4 : index
    %115 = memref.load %arg1[%c0_59, %c4] : memref<8x17xf32, #tpu.memory_space<smem>>
    %116 = vector.broadcast %115 : f32 to vector<8x128xf32>
    %117 = arith.mulf %116, %114 : vector<8x128xf32>
    %118 = arith.addf %104, %117 : vector<8x128xf32>
    %c3_60 = arith.constant 3 : index
    %c4_61 = arith.constant 4 : index
    %119 = memref.load %arg1[%c3_60, %c4_61] : memref<8x17xf32, #tpu.memory_space<smem>>
    %120 = vector.broadcast %119 : f32 to vector<8x128xf32>
    %121 = arith.mulf %120, %114 : vector<8x128xf32>
    %122 = arith.addf %108, %121 : vector<8x128xf32>
    %cst_62 = arith.constant 4.000000e+00 : f32
    %123 = vector.broadcast %cst_62 : f32 to vector<8x128xf32>
    %124 = arith.subf %58, %123 : vector<8x128xf32>
    %cst_63 = arith.constant 0.000000e+00 : f32
    %cst_64 = arith.constant 1.000000e+00 : f32
    %125 = vector.broadcast %cst_63 : f32 to vector<8x128xf32>
    %126 = arith.maximumf %125, %124 : vector<8x128xf32>
    %127 = vector.broadcast %cst_64 : f32 to vector<8x128xf32>
    %128 = arith.minimumf %127, %126 : vector<8x128xf32>
    %c0_65 = arith.constant 0 : index
    %c5 = arith.constant 5 : index
    %129 = memref.load %arg1[%c0_65, %c5] : memref<8x17xf32, #tpu.memory_space<smem>>
    %130 = vector.broadcast %129 : f32 to vector<8x128xf32>
    %131 = arith.mulf %130, %128 : vector<8x128xf32>
    %132 = arith.addf %118, %131 : vector<8x128xf32>
    %c3_66 = arith.constant 3 : index
    %c5_67 = arith.constant 5 : index
    %133 = memref.load %arg1[%c3_66, %c5_67] : memref<8x17xf32, #tpu.memory_space<smem>>
    %134 = vector.broadcast %133 : f32 to vector<8x128xf32>
    %135 = arith.mulf %134, %128 : vector<8x128xf32>
    %136 = arith.addf %122, %135 : vector<8x128xf32>
    %cst_68 = arith.constant 5.000000e+00 : f32
    %137 = vector.broadcast %cst_68 : f32 to vector<8x128xf32>
    %138 = arith.subf %58, %137 : vector<8x128xf32>
    %cst_69 = arith.constant 0.000000e+00 : f32
    %cst_70 = arith.constant 1.000000e+00 : f32
    %139 = vector.broadcast %cst_69 : f32 to vector<8x128xf32>
    %140 = arith.maximumf %139, %138 : vector<8x128xf32>
    %141 = vector.broadcast %cst_70 : f32 to vector<8x128xf32>
    %142 = arith.minimumf %141, %140 : vector<8x128xf32>
    %c0_71 = arith.constant 0 : index
    %c6 = arith.constant 6 : index
    %143 = memref.load %arg1[%c0_71, %c6] : memref<8x17xf32, #tpu.memory_space<smem>>
    %144 = vector.broadcast %143 : f32 to vector<8x128xf32>
    %145 = arith.mulf %144, %142 : vector<8x128xf32>
    %146 = arith.addf %132, %145 : vector<8x128xf32>
    %c3_72 = arith.constant 3 : index
    %c6_73 = arith.constant 6 : index
    %147 = memref.load %arg1[%c3_72, %c6_73] : memref<8x17xf32, #tpu.memory_space<smem>>
    %148 = vector.broadcast %147 : f32 to vector<8x128xf32>
    %149 = arith.mulf %148, %142 : vector<8x128xf32>
    %150 = arith.addf %136, %149 : vector<8x128xf32>
    %cst_74 = arith.constant 6.000000e+00 : f32
    %151 = vector.broadcast %cst_74 : f32 to vector<8x128xf32>
    %152 = arith.subf %58, %151 : vector<8x128xf32>
    %cst_75 = arith.constant 0.000000e+00 : f32
    %cst_76 = arith.constant 1.000000e+00 : f32
    %153 = vector.broadcast %cst_75 : f32 to vector<8x128xf32>
    %154 = arith.maximumf %153, %152 : vector<8x128xf32>
    %155 = vector.broadcast %cst_76 : f32 to vector<8x128xf32>
    %156 = arith.minimumf %155, %154 : vector<8x128xf32>
    %c0_77 = arith.constant 0 : index
    %c7 = arith.constant 7 : index
    %157 = memref.load %arg1[%c0_77, %c7] : memref<8x17xf32, #tpu.memory_space<smem>>
    %158 = vector.broadcast %157 : f32 to vector<8x128xf32>
    %159 = arith.mulf %158, %156 : vector<8x128xf32>
    %160 = arith.addf %146, %159 : vector<8x128xf32>
    %c3_78 = arith.constant 3 : index
    %c7_79 = arith.constant 7 : index
    %161 = memref.load %arg1[%c3_78, %c7_79] : memref<8x17xf32, #tpu.memory_space<smem>>
    %162 = vector.broadcast %161 : f32 to vector<8x128xf32>
    %163 = arith.mulf %162, %156 : vector<8x128xf32>
    %164 = arith.addf %150, %163 : vector<8x128xf32>
    %cst_80 = arith.constant 7.000000e+00 : f32
    %165 = vector.broadcast %cst_80 : f32 to vector<8x128xf32>
    %166 = arith.subf %58, %165 : vector<8x128xf32>
    %cst_81 = arith.constant 0.000000e+00 : f32
    %cst_82 = arith.constant 1.000000e+00 : f32
    %167 = vector.broadcast %cst_81 : f32 to vector<8x128xf32>
    %168 = arith.maximumf %167, %166 : vector<8x128xf32>
    %169 = vector.broadcast %cst_82 : f32 to vector<8x128xf32>
    %170 = arith.minimumf %169, %168 : vector<8x128xf32>
    %c0_83 = arith.constant 0 : index
    %c8 = arith.constant 8 : index
    %171 = memref.load %arg1[%c0_83, %c8] : memref<8x17xf32, #tpu.memory_space<smem>>
    %172 = vector.broadcast %171 : f32 to vector<8x128xf32>
    %173 = arith.mulf %172, %170 : vector<8x128xf32>
    %174 = arith.addf %160, %173 : vector<8x128xf32>
    %c3_84 = arith.constant 3 : index
    %c8_85 = arith.constant 8 : index
    %175 = memref.load %arg1[%c3_84, %c8_85] : memref<8x17xf32, #tpu.memory_space<smem>>
    %176 = vector.broadcast %175 : f32 to vector<8x128xf32>
    %177 = arith.mulf %176, %170 : vector<8x128xf32>
    %178 = arith.addf %164, %177 : vector<8x128xf32>
    %cst_86 = arith.constant 8.000000e+00 : f32
    %179 = vector.broadcast %cst_86 : f32 to vector<8x128xf32>
    %180 = arith.subf %58, %179 : vector<8x128xf32>
    %cst_87 = arith.constant 0.000000e+00 : f32
    %cst_88 = arith.constant 1.000000e+00 : f32
    %181 = vector.broadcast %cst_87 : f32 to vector<8x128xf32>
    %182 = arith.maximumf %181, %180 : vector<8x128xf32>
    %183 = vector.broadcast %cst_88 : f32 to vector<8x128xf32>
    %184 = arith.minimumf %183, %182 : vector<8x128xf32>
    %c0_89 = arith.constant 0 : index
    %c9 = arith.constant 9 : index
    %185 = memref.load %arg1[%c0_89, %c9] : memref<8x17xf32, #tpu.memory_space<smem>>
    %186 = vector.broadcast %185 : f32 to vector<8x128xf32>
    %187 = arith.mulf %186, %184 : vector<8x128xf32>
    %188 = arith.addf %174, %187 : vector<8x128xf32>
    %c3_90 = arith.constant 3 : index
    %c9_91 = arith.constant 9 : index
    %189 = memref.load %arg1[%c3_90, %c9_91] : memref<8x17xf32, #tpu.memory_space<smem>>
    %190 = vector.broadcast %189 : f32 to vector<8x128xf32>
    %191 = arith.mulf %190, %184 : vector<8x128xf32>
    %192 = arith.addf %178, %191 : vector<8x128xf32>
    %cst_92 = arith.constant 9.000000e+00 : f32
    %193 = vector.broadcast %cst_92 : f32 to vector<8x128xf32>
    %194 = arith.subf %58, %193 : vector<8x128xf32>
    %cst_93 = arith.constant 0.000000e+00 : f32
    %cst_94 = arith.constant 1.000000e+00 : f32
    %195 = vector.broadcast %cst_93 : f32 to vector<8x128xf32>
    %196 = arith.maximumf %195, %194 : vector<8x128xf32>
    %197 = vector.broadcast %cst_94 : f32 to vector<8x128xf32>
    %198 = arith.minimumf %197, %196 : vector<8x128xf32>
    %c0_95 = arith.constant 0 : index
    %c10 = arith.constant 10 : index
    %199 = memref.load %arg1[%c0_95, %c10] : memref<8x17xf32, #tpu.memory_space<smem>>
    %200 = vector.broadcast %199 : f32 to vector<8x128xf32>
    %201 = arith.mulf %200, %198 : vector<8x128xf32>
    %202 = arith.addf %188, %201 : vector<8x128xf32>
    %c3_96 = arith.constant 3 : index
    %c10_97 = arith.constant 10 : index
    %203 = memref.load %arg1[%c3_96, %c10_97] : memref<8x17xf32, #tpu.memory_space<smem>>
    %204 = vector.broadcast %203 : f32 to vector<8x128xf32>
    %205 = arith.mulf %204, %198 : vector<8x128xf32>
    %206 = arith.addf %192, %205 : vector<8x128xf32>
    %cst_98 = arith.constant 1.000000e+01 : f32
    %207 = vector.broadcast %cst_98 : f32 to vector<8x128xf32>
    %208 = arith.subf %58, %207 : vector<8x128xf32>
    %cst_99 = arith.constant 0.000000e+00 : f32
    %cst_100 = arith.constant 1.000000e+00 : f32
    %209 = vector.broadcast %cst_99 : f32 to vector<8x128xf32>
    %210 = arith.maximumf %209, %208 : vector<8x128xf32>
    %211 = vector.broadcast %cst_100 : f32 to vector<8x128xf32>
    %212 = arith.minimumf %211, %210 : vector<8x128xf32>
    %c0_101 = arith.constant 0 : index
    %c11 = arith.constant 11 : index
    %213 = memref.load %arg1[%c0_101, %c11] : memref<8x17xf32, #tpu.memory_space<smem>>
    %214 = vector.broadcast %213 : f32 to vector<8x128xf32>
    %215 = arith.mulf %214, %212 : vector<8x128xf32>
    %216 = arith.addf %202, %215 : vector<8x128xf32>
    %c3_102 = arith.constant 3 : index
    %c11_103 = arith.constant 11 : index
    %217 = memref.load %arg1[%c3_102, %c11_103] : memref<8x17xf32, #tpu.memory_space<smem>>
    %218 = vector.broadcast %217 : f32 to vector<8x128xf32>
    %219 = arith.mulf %218, %212 : vector<8x128xf32>
    %220 = arith.addf %206, %219 : vector<8x128xf32>
    %cst_104 = arith.constant 1.100000e+01 : f32
    %221 = vector.broadcast %cst_104 : f32 to vector<8x128xf32>
    %222 = arith.subf %58, %221 : vector<8x128xf32>
    %cst_105 = arith.constant 0.000000e+00 : f32
    %cst_106 = arith.constant 1.000000e+00 : f32
    %223 = vector.broadcast %cst_105 : f32 to vector<8x128xf32>
    %224 = arith.maximumf %223, %222 : vector<8x128xf32>
    %225 = vector.broadcast %cst_106 : f32 to vector<8x128xf32>
    %226 = arith.minimumf %225, %224 : vector<8x128xf32>
    %c0_107 = arith.constant 0 : index
    %c12 = arith.constant 12 : index
    %227 = memref.load %arg1[%c0_107, %c12] : memref<8x17xf32, #tpu.memory_space<smem>>
    %228 = vector.broadcast %227 : f32 to vector<8x128xf32>
    %229 = arith.mulf %228, %226 : vector<8x128xf32>
    %230 = arith.addf %216, %229 : vector<8x128xf32>
    %c3_108 = arith.constant 3 : index
    %c12_109 = arith.constant 12 : index
    %231 = memref.load %arg1[%c3_108, %c12_109] : memref<8x17xf32, #tpu.memory_space<smem>>
    %232 = vector.broadcast %231 : f32 to vector<8x128xf32>
    %233 = arith.mulf %232, %226 : vector<8x128xf32>
    %234 = arith.addf %220, %233 : vector<8x128xf32>
    %cst_110 = arith.constant 1.200000e+01 : f32
    %235 = vector.broadcast %cst_110 : f32 to vector<8x128xf32>
    %236 = arith.subf %58, %235 : vector<8x128xf32>
    %cst_111 = arith.constant 0.000000e+00 : f32
    %cst_112 = arith.constant 1.000000e+00 : f32
    %237 = vector.broadcast %cst_111 : f32 to vector<8x128xf32>
    %238 = arith.maximumf %237, %236 : vector<8x128xf32>
    %239 = vector.broadcast %cst_112 : f32 to vector<8x128xf32>
    %240 = arith.minimumf %239, %238 : vector<8x128xf32>
    %c0_113 = arith.constant 0 : index
    %c13 = arith.constant 13 : index
    %241 = memref.load %arg1[%c0_113, %c13] : memref<8x17xf32, #tpu.memory_space<smem>>
    %242 = vector.broadcast %241 : f32 to vector<8x128xf32>
    %243 = arith.mulf %242, %240 : vector<8x128xf32>
    %244 = arith.addf %230, %243 : vector<8x128xf32>
    %c3_114 = arith.constant 3 : index
    %c13_115 = arith.constant 13 : index
    %245 = memref.load %arg1[%c3_114, %c13_115] : memref<8x17xf32, #tpu.memory_space<smem>>
    %246 = vector.broadcast %245 : f32 to vector<8x128xf32>
    %247 = arith.mulf %246, %240 : vector<8x128xf32>
    %248 = arith.addf %234, %247 : vector<8x128xf32>
    %cst_116 = arith.constant 1.300000e+01 : f32
    %249 = vector.broadcast %cst_116 : f32 to vector<8x128xf32>
    %250 = arith.subf %58, %249 : vector<8x128xf32>
    %cst_117 = arith.constant 0.000000e+00 : f32
    %cst_118 = arith.constant 1.000000e+00 : f32
    %251 = vector.broadcast %cst_117 : f32 to vector<8x128xf32>
    %252 = arith.maximumf %251, %250 : vector<8x128xf32>
    %253 = vector.broadcast %cst_118 : f32 to vector<8x128xf32>
    %254 = arith.minimumf %253, %252 : vector<8x128xf32>
    %c0_119 = arith.constant 0 : index
    %c14 = arith.constant 14 : index
    %255 = memref.load %arg1[%c0_119, %c14] : memref<8x17xf32, #tpu.memory_space<smem>>
    %256 = vector.broadcast %255 : f32 to vector<8x128xf32>
    %257 = arith.mulf %256, %254 : vector<8x128xf32>
    %258 = arith.addf %244, %257 : vector<8x128xf32>
    %c3_120 = arith.constant 3 : index
    %c14_121 = arith.constant 14 : index
    %259 = memref.load %arg1[%c3_120, %c14_121] : memref<8x17xf32, #tpu.memory_space<smem>>
    %260 = vector.broadcast %259 : f32 to vector<8x128xf32>
    %261 = arith.mulf %260, %254 : vector<8x128xf32>
    %262 = arith.addf %248, %261 : vector<8x128xf32>
    %cst_122 = arith.constant 1.400000e+01 : f32
    %263 = vector.broadcast %cst_122 : f32 to vector<8x128xf32>
    %264 = arith.subf %58, %263 : vector<8x128xf32>
    %cst_123 = arith.constant 0.000000e+00 : f32
    %cst_124 = arith.constant 1.000000e+00 : f32
    %265 = vector.broadcast %cst_123 : f32 to vector<8x128xf32>
    %266 = arith.maximumf %265, %264 : vector<8x128xf32>
    %267 = vector.broadcast %cst_124 : f32 to vector<8x128xf32>
    %268 = arith.minimumf %267, %266 : vector<8x128xf32>
    %c0_125 = arith.constant 0 : index
    %c15 = arith.constant 15 : index
    %269 = memref.load %arg1[%c0_125, %c15] : memref<8x17xf32, #tpu.memory_space<smem>>
    %270 = vector.broadcast %269 : f32 to vector<8x128xf32>
    %271 = arith.mulf %270, %268 : vector<8x128xf32>
    %272 = arith.addf %258, %271 : vector<8x128xf32>
    %c3_126 = arith.constant 3 : index
    %c15_127 = arith.constant 15 : index
    %273 = memref.load %arg1[%c3_126, %c15_127] : memref<8x17xf32, #tpu.memory_space<smem>>
    %274 = vector.broadcast %273 : f32 to vector<8x128xf32>
    %275 = arith.mulf %274, %268 : vector<8x128xf32>
    %276 = arith.addf %262, %275 : vector<8x128xf32>
    %cst_128 = arith.constant 1.500000e+01 : f32
    %277 = vector.broadcast %cst_128 : f32 to vector<8x128xf32>
    %278 = arith.subf %58, %277 : vector<8x128xf32>
    %cst_129 = arith.constant 0.000000e+00 : f32
    %cst_130 = arith.constant 1.000000e+00 : f32
    %279 = vector.broadcast %cst_129 : f32 to vector<8x128xf32>
    %280 = arith.maximumf %279, %278 : vector<8x128xf32>
    %281 = vector.broadcast %cst_130 : f32 to vector<8x128xf32>
    %282 = arith.minimumf %281, %280 : vector<8x128xf32>
    %c0_131 = arith.constant 0 : index
    %c16 = arith.constant 16 : index
    %283 = memref.load %arg1[%c0_131, %c16] : memref<8x17xf32, #tpu.memory_space<smem>>
    %284 = vector.broadcast %283 : f32 to vector<8x128xf32>
    %285 = arith.mulf %284, %282 : vector<8x128xf32>
    %286 = arith.addf %272, %285 : vector<8x128xf32>
    %c3_132 = arith.constant 3 : index
    %c16_133 = arith.constant 16 : index
    %287 = memref.load %arg1[%c3_132, %c16_133] : memref<8x17xf32, #tpu.memory_space<smem>>
    %288 = vector.broadcast %287 : f32 to vector<8x128xf32>
    %289 = arith.mulf %288, %282 : vector<8x128xf32>
    %290 = arith.addf %276, %289 : vector<8x128xf32>
    %cst_134 = arith.constant 1.600000e+01 : f32
    %291 = vector.broadcast %cst_134 : f32 to vector<8x128xf32>
    %292 = arith.mulf %291, %54 : vector<8x128xf32>
    %cst_135 = arith.constant 0.000000e+00 : f32
    %293 = vector.broadcast %cst_135 : f32 to vector<8x128xf32>
    %c1_136 = arith.constant 1 : index
    %c0_137 = arith.constant 0 : index
    %294 = memref.load %arg1[%c1_136, %c0_137] : memref<8x17xf32, #tpu.memory_space<smem>>
    %295 = vector.broadcast %294 : f32 to vector<8x128xf32>
    %296 = arith.addf %293, %295 : vector<8x128xf32>
    %cst_138 = arith.constant 0.000000e+00 : f32
    %297 = vector.broadcast %cst_138 : f32 to vector<8x128xf32>
    %c4_139 = arith.constant 4 : index
    %c0_140 = arith.constant 0 : index
    %298 = memref.load %arg1[%c4_139, %c0_140] : memref<8x17xf32, #tpu.memory_space<smem>>
    %299 = vector.broadcast %298 : f32 to vector<8x128xf32>
    %300 = arith.addf %297, %299 : vector<8x128xf32>
    %cst_141 = arith.constant 0.000000e+00 : f32
    %301 = vector.broadcast %cst_141 : f32 to vector<8x128xf32>
    %c6_142 = arith.constant 6 : index
    %c0_143 = arith.constant 0 : index
    %302 = memref.load %arg1[%c6_142, %c0_143] : memref<8x17xf32, #tpu.memory_space<smem>>
    %303 = vector.broadcast %302 : f32 to vector<8x128xf32>
    %304 = arith.addf %301, %303 : vector<8x128xf32>
    %cst_144 = arith.constant 0.000000e+00 : f32
    %305 = vector.broadcast %cst_144 : f32 to vector<8x128xf32>
    %306 = arith.subf %292, %305 : vector<8x128xf32>
    %cst_145 = arith.constant 0.000000e+00 : f32
    %cst_146 = arith.constant 1.000000e+00 : f32
    %307 = vector.broadcast %cst_145 : f32 to vector<8x128xf32>
    %308 = arith.maximumf %307, %306 : vector<8x128xf32>
    %309 = vector.broadcast %cst_146 : f32 to vector<8x128xf32>
    %310 = arith.minimumf %309, %308 : vector<8x128xf32>
    %c1_147 = arith.constant 1 : index
    %c1_148 = arith.constant 1 : index
    %311 = memref.load %arg1[%c1_147, %c1_148] : memref<8x17xf32, #tpu.memory_space<smem>>
    %312 = vector.broadcast %311 : f32 to vector<8x128xf32>
    %313 = arith.mulf %312, %310 : vector<8x128xf32>
    %314 = arith.addf %296, %313 : vector<8x128xf32>
    %c4_149 = arith.constant 4 : index
    %c1_150 = arith.constant 1 : index
    %315 = memref.load %arg1[%c4_149, %c1_150] : memref<8x17xf32, #tpu.memory_space<smem>>
    %316 = vector.broadcast %315 : f32 to vector<8x128xf32>
    %317 = arith.mulf %316, %310 : vector<8x128xf32>
    %318 = arith.addf %300, %317 : vector<8x128xf32>
    %c6_151 = arith.constant 6 : index
    %c1_152 = arith.constant 1 : index
    %319 = memref.load %arg1[%c6_151, %c1_152] : memref<8x17xf32, #tpu.memory_space<smem>>
    %320 = vector.broadcast %319 : f32 to vector<8x128xf32>
    %321 = arith.mulf %320, %310 : vector<8x128xf32>
    %322 = arith.addf %304, %321 : vector<8x128xf32>
    %cst_153 = arith.constant 1.000000e+00 : f32
    %323 = vector.broadcast %cst_153 : f32 to vector<8x128xf32>
    %324 = arith.subf %292, %323 : vector<8x128xf32>
    %cst_154 = arith.constant 0.000000e+00 : f32
    %cst_155 = arith.constant 1.000000e+00 : f32
    %325 = vector.broadcast %cst_154 : f32 to vector<8x128xf32>
    %326 = arith.maximumf %325, %324 : vector<8x128xf32>
    %327 = vector.broadcast %cst_155 : f32 to vector<8x128xf32>
    %328 = arith.minimumf %327, %326 : vector<8x128xf32>
    %c1_156 = arith.constant 1 : index
    %c2_157 = arith.constant 2 : index
    %329 = memref.load %arg1[%c1_156, %c2_157] : memref<8x17xf32, #tpu.memory_space<smem>>
    %330 = vector.broadcast %329 : f32 to vector<8x128xf32>
    %331 = arith.mulf %330, %328 : vector<8x128xf32>
    %332 = arith.addf %314, %331 : vector<8x128xf32>
    %c4_158 = arith.constant 4 : index
    %c2_159 = arith.constant 2 : index
    %333 = memref.load %arg1[%c4_158, %c2_159] : memref<8x17xf32, #tpu.memory_space<smem>>
    %334 = vector.broadcast %333 : f32 to vector<8x128xf32>
    %335 = arith.mulf %334, %328 : vector<8x128xf32>
    %336 = arith.addf %318, %335 : vector<8x128xf32>
    %c6_160 = arith.constant 6 : index
    %c2_161 = arith.constant 2 : index
    %337 = memref.load %arg1[%c6_160, %c2_161] : memref<8x17xf32, #tpu.memory_space<smem>>
    %338 = vector.broadcast %337 : f32 to vector<8x128xf32>
    %339 = arith.mulf %338, %328 : vector<8x128xf32>
    %340 = arith.addf %322, %339 : vector<8x128xf32>
    %cst_162 = arith.constant 2.000000e+00 : f32
    %341 = vector.broadcast %cst_162 : f32 to vector<8x128xf32>
    %342 = arith.subf %292, %341 : vector<8x128xf32>
    %cst_163 = arith.constant 0.000000e+00 : f32
    %cst_164 = arith.constant 1.000000e+00 : f32
    %343 = vector.broadcast %cst_163 : f32 to vector<8x128xf32>
    %344 = arith.maximumf %343, %342 : vector<8x128xf32>
    %345 = vector.broadcast %cst_164 : f32 to vector<8x128xf32>
    %346 = arith.minimumf %345, %344 : vector<8x128xf32>
    %c1_165 = arith.constant 1 : index
    %c3_166 = arith.constant 3 : index
    %347 = memref.load %arg1[%c1_165, %c3_166] : memref<8x17xf32, #tpu.memory_space<smem>>
    %348 = vector.broadcast %347 : f32 to vector<8x128xf32>
    %349 = arith.mulf %348, %346 : vector<8x128xf32>
    %350 = arith.addf %332, %349 : vector<8x128xf32>
    %c4_167 = arith.constant 4 : index
    %c3_168 = arith.constant 3 : index
    %351 = memref.load %arg1[%c4_167, %c3_168] : memref<8x17xf32, #tpu.memory_space<smem>>
    %352 = vector.broadcast %351 : f32 to vector<8x128xf32>
    %353 = arith.mulf %352, %346 : vector<8x128xf32>
    %354 = arith.addf %336, %353 : vector<8x128xf32>
    %c6_169 = arith.constant 6 : index
    %c3_170 = arith.constant 3 : index
    %355 = memref.load %arg1[%c6_169, %c3_170] : memref<8x17xf32, #tpu.memory_space<smem>>
    %356 = vector.broadcast %355 : f32 to vector<8x128xf32>
    %357 = arith.mulf %356, %346 : vector<8x128xf32>
    %358 = arith.addf %340, %357 : vector<8x128xf32>
    %cst_171 = arith.constant 3.000000e+00 : f32
    %359 = vector.broadcast %cst_171 : f32 to vector<8x128xf32>
    %360 = arith.subf %292, %359 : vector<8x128xf32>
    %cst_172 = arith.constant 0.000000e+00 : f32
    %cst_173 = arith.constant 1.000000e+00 : f32
    %361 = vector.broadcast %cst_172 : f32 to vector<8x128xf32>
    %362 = arith.maximumf %361, %360 : vector<8x128xf32>
    %363 = vector.broadcast %cst_173 : f32 to vector<8x128xf32>
    %364 = arith.minimumf %363, %362 : vector<8x128xf32>
    %c1_174 = arith.constant 1 : index
    %c4_175 = arith.constant 4 : index
    %365 = memref.load %arg1[%c1_174, %c4_175] : memref<8x17xf32, #tpu.memory_space<smem>>
    %366 = vector.broadcast %365 : f32 to vector<8x128xf32>
    %367 = arith.mulf %366, %364 : vector<8x128xf32>
    %368 = arith.addf %350, %367 : vector<8x128xf32>
    %c4_176 = arith.constant 4 : index
    %c4_177 = arith.constant 4 : index
    %369 = memref.load %arg1[%c4_176, %c4_177] : memref<8x17xf32, #tpu.memory_space<smem>>
    %370 = vector.broadcast %369 : f32 to vector<8x128xf32>
    %371 = arith.mulf %370, %364 : vector<8x128xf32>
    %372 = arith.addf %354, %371 : vector<8x128xf32>
    %c6_178 = arith.constant 6 : index
    %c4_179 = arith.constant 4 : index
    %373 = memref.load %arg1[%c6_178, %c4_179] : memref<8x17xf32, #tpu.memory_space<smem>>
    %374 = vector.broadcast %373 : f32 to vector<8x128xf32>
    %375 = arith.mulf %374, %364 : vector<8x128xf32>
    %376 = arith.addf %358, %375 : vector<8x128xf32>
    %cst_180 = arith.constant 4.000000e+00 : f32
    %377 = vector.broadcast %cst_180 : f32 to vector<8x128xf32>
    %378 = arith.subf %292, %377 : vector<8x128xf32>
    %cst_181 = arith.constant 0.000000e+00 : f32
    %cst_182 = arith.constant 1.000000e+00 : f32
    %379 = vector.broadcast %cst_181 : f32 to vector<8x128xf32>
    %380 = arith.maximumf %379, %378 : vector<8x128xf32>
    %381 = vector.broadcast %cst_182 : f32 to vector<8x128xf32>
    %382 = arith.minimumf %381, %380 : vector<8x128xf32>
    %c1_183 = arith.constant 1 : index
    %c5_184 = arith.constant 5 : index
    %383 = memref.load %arg1[%c1_183, %c5_184] : memref<8x17xf32, #tpu.memory_space<smem>>
    %384 = vector.broadcast %383 : f32 to vector<8x128xf32>
    %385 = arith.mulf %384, %382 : vector<8x128xf32>
    %386 = arith.addf %368, %385 : vector<8x128xf32>
    %c4_185 = arith.constant 4 : index
    %c5_186 = arith.constant 5 : index
    %387 = memref.load %arg1[%c4_185, %c5_186] : memref<8x17xf32, #tpu.memory_space<smem>>
    %388 = vector.broadcast %387 : f32 to vector<8x128xf32>
    %389 = arith.mulf %388, %382 : vector<8x128xf32>
    %390 = arith.addf %372, %389 : vector<8x128xf32>
    %c6_187 = arith.constant 6 : index
    %c5_188 = arith.constant 5 : index
    %391 = memref.load %arg1[%c6_187, %c5_188] : memref<8x17xf32, #tpu.memory_space<smem>>
    %392 = vector.broadcast %391 : f32 to vector<8x128xf32>
    %393 = arith.mulf %392, %382 : vector<8x128xf32>
    %394 = arith.addf %376, %393 : vector<8x128xf32>
    %cst_189 = arith.constant 5.000000e+00 : f32
    %395 = vector.broadcast %cst_189 : f32 to vector<8x128xf32>
    %396 = arith.subf %292, %395 : vector<8x128xf32>
    %cst_190 = arith.constant 0.000000e+00 : f32
    %cst_191 = arith.constant 1.000000e+00 : f32
    %397 = vector.broadcast %cst_190 : f32 to vector<8x128xf32>
    %398 = arith.maximumf %397, %396 : vector<8x128xf32>
    %399 = vector.broadcast %cst_191 : f32 to vector<8x128xf32>
    %400 = arith.minimumf %399, %398 : vector<8x128xf32>
    %c1_192 = arith.constant 1 : index
    %c6_193 = arith.constant 6 : index
    %401 = memref.load %arg1[%c1_192, %c6_193] : memref<8x17xf32, #tpu.memory_space<smem>>
    %402 = vector.broadcast %401 : f32 to vector<8x128xf32>
    %403 = arith.mulf %402, %400 : vector<8x128xf32>
    %404 = arith.addf %386, %403 : vector<8x128xf32>
    %c4_194 = arith.constant 4 : index
    %c6_195 = arith.constant 6 : index
    %405 = memref.load %arg1[%c4_194, %c6_195] : memref<8x17xf32, #tpu.memory_space<smem>>
    %406 = vector.broadcast %405 : f32 to vector<8x128xf32>
    %407 = arith.mulf %406, %400 : vector<8x128xf32>
    %408 = arith.addf %390, %407 : vector<8x128xf32>
    %c6_196 = arith.constant 6 : index
    %c6_197 = arith.constant 6 : index
    %409 = memref.load %arg1[%c6_196, %c6_197] : memref<8x17xf32, #tpu.memory_space<smem>>
    %410 = vector.broadcast %409 : f32 to vector<8x128xf32>
    %411 = arith.mulf %410, %400 : vector<8x128xf32>
    %412 = arith.addf %394, %411 : vector<8x128xf32>
    %cst_198 = arith.constant 6.000000e+00 : f32
    %413 = vector.broadcast %cst_198 : f32 to vector<8x128xf32>
    %414 = arith.subf %292, %413 : vector<8x128xf32>
    %cst_199 = arith.constant 0.000000e+00 : f32
    %cst_200 = arith.constant 1.000000e+00 : f32
    %415 = vector.broadcast %cst_199 : f32 to vector<8x128xf32>
    %416 = arith.maximumf %415, %414 : vector<8x128xf32>
    %417 = vector.broadcast %cst_200 : f32 to vector<8x128xf32>
    %418 = arith.minimumf %417, %416 : vector<8x128xf32>
    %c1_201 = arith.constant 1 : index
    %c7_202 = arith.constant 7 : index
    %419 = memref.load %arg1[%c1_201, %c7_202] : memref<8x17xf32, #tpu.memory_space<smem>>
    %420 = vector.broadcast %419 : f32 to vector<8x128xf32>
    %421 = arith.mulf %420, %418 : vector<8x128xf32>
    %422 = arith.addf %404, %421 : vector<8x128xf32>
    %c4_203 = arith.constant 4 : index
    %c7_204 = arith.constant 7 : index
    %423 = memref.load %arg1[%c4_203, %c7_204] : memref<8x17xf32, #tpu.memory_space<smem>>
    %424 = vector.broadcast %423 : f32 to vector<8x128xf32>
    %425 = arith.mulf %424, %418 : vector<8x128xf32>
    %426 = arith.addf %408, %425 : vector<8x128xf32>
    %c6_205 = arith.constant 6 : index
    %c7_206 = arith.constant 7 : index
    %427 = memref.load %arg1[%c6_205, %c7_206] : memref<8x17xf32, #tpu.memory_space<smem>>
    %428 = vector.broadcast %427 : f32 to vector<8x128xf32>
    %429 = arith.mulf %428, %418 : vector<8x128xf32>
    %430 = arith.addf %412, %429 : vector<8x128xf32>
    %cst_207 = arith.constant 7.000000e+00 : f32
    %431 = vector.broadcast %cst_207 : f32 to vector<8x128xf32>
    %432 = arith.subf %292, %431 : vector<8x128xf32>
    %cst_208 = arith.constant 0.000000e+00 : f32
    %cst_209 = arith.constant 1.000000e+00 : f32
    %433 = vector.broadcast %cst_208 : f32 to vector<8x128xf32>
    %434 = arith.maximumf %433, %432 : vector<8x128xf32>
    %435 = vector.broadcast %cst_209 : f32 to vector<8x128xf32>
    %436 = arith.minimumf %435, %434 : vector<8x128xf32>
    %c1_210 = arith.constant 1 : index
    %c8_211 = arith.constant 8 : index
    %437 = memref.load %arg1[%c1_210, %c8_211] : memref<8x17xf32, #tpu.memory_space<smem>>
    %438 = vector.broadcast %437 : f32 to vector<8x128xf32>
    %439 = arith.mulf %438, %436 : vector<8x128xf32>
    %440 = arith.addf %422, %439 : vector<8x128xf32>
    %c4_212 = arith.constant 4 : index
    %c8_213 = arith.constant 8 : index
    %441 = memref.load %arg1[%c4_212, %c8_213] : memref<8x17xf32, #tpu.memory_space<smem>>
    %442 = vector.broadcast %441 : f32 to vector<8x128xf32>
    %443 = arith.mulf %442, %436 : vector<8x128xf32>
    %444 = arith.addf %426, %443 : vector<8x128xf32>
    %c6_214 = arith.constant 6 : index
    %c8_215 = arith.constant 8 : index
    %445 = memref.load %arg1[%c6_214, %c8_215] : memref<8x17xf32, #tpu.memory_space<smem>>
    %446 = vector.broadcast %445 : f32 to vector<8x128xf32>
    %447 = arith.mulf %446, %436 : vector<8x128xf32>
    %448 = arith.addf %430, %447 : vector<8x128xf32>
    %cst_216 = arith.constant 8.000000e+00 : f32
    %449 = vector.broadcast %cst_216 : f32 to vector<8x128xf32>
    %450 = arith.subf %292, %449 : vector<8x128xf32>
    %cst_217 = arith.constant 0.000000e+00 : f32
    %cst_218 = arith.constant 1.000000e+00 : f32
    %451 = vector.broadcast %cst_217 : f32 to vector<8x128xf32>
    %452 = arith.maximumf %451, %450 : vector<8x128xf32>
    %453 = vector.broadcast %cst_218 : f32 to vector<8x128xf32>
    %454 = arith.minimumf %453, %452 : vector<8x128xf32>
    %c1_219 = arith.constant 1 : index
    %c9_220 = arith.constant 9 : index
    %455 = memref.load %arg1[%c1_219, %c9_220] : memref<8x17xf32, #tpu.memory_space<smem>>
    %456 = vector.broadcast %455 : f32 to vector<8x128xf32>
    %457 = arith.mulf %456, %454 : vector<8x128xf32>
    %458 = arith.addf %440, %457 : vector<8x128xf32>
    %c4_221 = arith.constant 4 : index
    %c9_222 = arith.constant 9 : index
    %459 = memref.load %arg1[%c4_221, %c9_222] : memref<8x17xf32, #tpu.memory_space<smem>>
    %460 = vector.broadcast %459 : f32 to vector<8x128xf32>
    %461 = arith.mulf %460, %454 : vector<8x128xf32>
    %462 = arith.addf %444, %461 : vector<8x128xf32>
    %c6_223 = arith.constant 6 : index
    %c9_224 = arith.constant 9 : index
    %463 = memref.load %arg1[%c6_223, %c9_224] : memref<8x17xf32, #tpu.memory_space<smem>>
    %464 = vector.broadcast %463 : f32 to vector<8x128xf32>
    %465 = arith.mulf %464, %454 : vector<8x128xf32>
    %466 = arith.addf %448, %465 : vector<8x128xf32>
    %cst_225 = arith.constant 9.000000e+00 : f32
    %467 = vector.broadcast %cst_225 : f32 to vector<8x128xf32>
    %468 = arith.subf %292, %467 : vector<8x128xf32>
    %cst_226 = arith.constant 0.000000e+00 : f32
    %cst_227 = arith.constant 1.000000e+00 : f32
    %469 = vector.broadcast %cst_226 : f32 to vector<8x128xf32>
    %470 = arith.maximumf %469, %468 : vector<8x128xf32>
    %471 = vector.broadcast %cst_227 : f32 to vector<8x128xf32>
    %472 = arith.minimumf %471, %470 : vector<8x128xf32>
    %c1_228 = arith.constant 1 : index
    %c10_229 = arith.constant 10 : index
    %473 = memref.load %arg1[%c1_228, %c10_229] : memref<8x17xf32, #tpu.memory_space<smem>>
    %474 = vector.broadcast %473 : f32 to vector<8x128xf32>
    %475 = arith.mulf %474, %472 : vector<8x128xf32>
    %476 = arith.addf %458, %475 : vector<8x128xf32>
    %c4_230 = arith.constant 4 : index
    %c10_231 = arith.constant 10 : index
    %477 = memref.load %arg1[%c4_230, %c10_231] : memref<8x17xf32, #tpu.memory_space<smem>>
    %478 = vector.broadcast %477 : f32 to vector<8x128xf32>
    %479 = arith.mulf %478, %472 : vector<8x128xf32>
    %480 = arith.addf %462, %479 : vector<8x128xf32>
    %c6_232 = arith.constant 6 : index
    %c10_233 = arith.constant 10 : index
    %481 = memref.load %arg1[%c6_232, %c10_233] : memref<8x17xf32, #tpu.memory_space<smem>>
    %482 = vector.broadcast %481 : f32 to vector<8x128xf32>
    %483 = arith.mulf %482, %472 : vector<8x128xf32>
    %484 = arith.addf %466, %483 : vector<8x128xf32>
    %cst_234 = arith.constant 1.000000e+01 : f32
    %485 = vector.broadcast %cst_234 : f32 to vector<8x128xf32>
    %486 = arith.subf %292, %485 : vector<8x128xf32>
    %cst_235 = arith.constant 0.000000e+00 : f32
    %cst_236 = arith.constant 1.000000e+00 : f32
    %487 = vector.broadcast %cst_235 : f32 to vector<8x128xf32>
    %488 = arith.maximumf %487, %486 : vector<8x128xf32>
    %489 = vector.broadcast %cst_236 : f32 to vector<8x128xf32>
    %490 = arith.minimumf %489, %488 : vector<8x128xf32>
    %c1_237 = arith.constant 1 : index
    %c11_238 = arith.constant 11 : index
    %491 = memref.load %arg1[%c1_237, %c11_238] : memref<8x17xf32, #tpu.memory_space<smem>>
    %492 = vector.broadcast %491 : f32 to vector<8x128xf32>
    %493 = arith.mulf %492, %490 : vector<8x128xf32>
    %494 = arith.addf %476, %493 : vector<8x128xf32>
    %c4_239 = arith.constant 4 : index
    %c11_240 = arith.constant 11 : index
    %495 = memref.load %arg1[%c4_239, %c11_240] : memref<8x17xf32, #tpu.memory_space<smem>>
    %496 = vector.broadcast %495 : f32 to vector<8x128xf32>
    %497 = arith.mulf %496, %490 : vector<8x128xf32>
    %498 = arith.addf %480, %497 : vector<8x128xf32>
    %c6_241 = arith.constant 6 : index
    %c11_242 = arith.constant 11 : index
    %499 = memref.load %arg1[%c6_241, %c11_242] : memref<8x17xf32, #tpu.memory_space<smem>>
    %500 = vector.broadcast %499 : f32 to vector<8x128xf32>
    %501 = arith.mulf %500, %490 : vector<8x128xf32>
    %502 = arith.addf %484, %501 : vector<8x128xf32>
    %cst_243 = arith.constant 1.100000e+01 : f32
    %503 = vector.broadcast %cst_243 : f32 to vector<8x128xf32>
    %504 = arith.subf %292, %503 : vector<8x128xf32>
    %cst_244 = arith.constant 0.000000e+00 : f32
    %cst_245 = arith.constant 1.000000e+00 : f32
    %505 = vector.broadcast %cst_244 : f32 to vector<8x128xf32>
    %506 = arith.maximumf %505, %504 : vector<8x128xf32>
    %507 = vector.broadcast %cst_245 : f32 to vector<8x128xf32>
    %508 = arith.minimumf %507, %506 : vector<8x128xf32>
    %c1_246 = arith.constant 1 : index
    %c12_247 = arith.constant 12 : index
    %509 = memref.load %arg1[%c1_246, %c12_247] : memref<8x17xf32, #tpu.memory_space<smem>>
    %510 = vector.broadcast %509 : f32 to vector<8x128xf32>
    %511 = arith.mulf %510, %508 : vector<8x128xf32>
    %512 = arith.addf %494, %511 : vector<8x128xf32>
    %c4_248 = arith.constant 4 : index
    %c12_249 = arith.constant 12 : index
    %513 = memref.load %arg1[%c4_248, %c12_249] : memref<8x17xf32, #tpu.memory_space<smem>>
    %514 = vector.broadcast %513 : f32 to vector<8x128xf32>
    %515 = arith.mulf %514, %508 : vector<8x128xf32>
    %516 = arith.addf %498, %515 : vector<8x128xf32>
    %c6_250 = arith.constant 6 : index
    %c12_251 = arith.constant 12 : index
    %517 = memref.load %arg1[%c6_250, %c12_251] : memref<8x17xf32, #tpu.memory_space<smem>>
    %518 = vector.broadcast %517 : f32 to vector<8x128xf32>
    %519 = arith.mulf %518, %508 : vector<8x128xf32>
    %520 = arith.addf %502, %519 : vector<8x128xf32>
    %cst_252 = arith.constant 1.200000e+01 : f32
    %521 = vector.broadcast %cst_252 : f32 to vector<8x128xf32>
    %522 = arith.subf %292, %521 : vector<8x128xf32>
    %cst_253 = arith.constant 0.000000e+00 : f32
    %cst_254 = arith.constant 1.000000e+00 : f32
    %523 = vector.broadcast %cst_253 : f32 to vector<8x128xf32>
    %524 = arith.maximumf %523, %522 : vector<8x128xf32>
    %525 = vector.broadcast %cst_254 : f32 to vector<8x128xf32>
    %526 = arith.minimumf %525, %524 : vector<8x128xf32>
    %c1_255 = arith.constant 1 : index
    %c13_256 = arith.constant 13 : index
    %527 = memref.load %arg1[%c1_255, %c13_256] : memref<8x17xf32, #tpu.memory_space<smem>>
    %528 = vector.broadcast %527 : f32 to vector<8x128xf32>
    %529 = arith.mulf %528, %526 : vector<8x128xf32>
    %530 = arith.addf %512, %529 : vector<8x128xf32>
    %c4_257 = arith.constant 4 : index
    %c13_258 = arith.constant 13 : index
    %531 = memref.load %arg1[%c4_257, %c13_258] : memref<8x17xf32, #tpu.memory_space<smem>>
    %532 = vector.broadcast %531 : f32 to vector<8x128xf32>
    %533 = arith.mulf %532, %526 : vector<8x128xf32>
    %534 = arith.addf %516, %533 : vector<8x128xf32>
    %c6_259 = arith.constant 6 : index
    %c13_260 = arith.constant 13 : index
    %535 = memref.load %arg1[%c6_259, %c13_260] : memref<8x17xf32, #tpu.memory_space<smem>>
    %536 = vector.broadcast %535 : f32 to vector<8x128xf32>
    %537 = arith.mulf %536, %526 : vector<8x128xf32>
    %538 = arith.addf %520, %537 : vector<8x128xf32>
    %cst_261 = arith.constant 1.300000e+01 : f32
    %539 = vector.broadcast %cst_261 : f32 to vector<8x128xf32>
    %540 = arith.subf %292, %539 : vector<8x128xf32>
    %cst_262 = arith.constant 0.000000e+00 : f32
    %cst_263 = arith.constant 1.000000e+00 : f32
    %541 = vector.broadcast %cst_262 : f32 to vector<8x128xf32>
    %542 = arith.maximumf %541, %540 : vector<8x128xf32>
    %543 = vector.broadcast %cst_263 : f32 to vector<8x128xf32>
    %544 = arith.minimumf %543, %542 : vector<8x128xf32>
    %c1_264 = arith.constant 1 : index
    %c14_265 = arith.constant 14 : index
    %545 = memref.load %arg1[%c1_264, %c14_265] : memref<8x17xf32, #tpu.memory_space<smem>>
    %546 = vector.broadcast %545 : f32 to vector<8x128xf32>
    %547 = arith.mulf %546, %544 : vector<8x128xf32>
    %548 = arith.addf %530, %547 : vector<8x128xf32>
    %c4_266 = arith.constant 4 : index
    %c14_267 = arith.constant 14 : index
    %549 = memref.load %arg1[%c4_266, %c14_267] : memref<8x17xf32, #tpu.memory_space<smem>>
    %550 = vector.broadcast %549 : f32 to vector<8x128xf32>
    %551 = arith.mulf %550, %544 : vector<8x128xf32>
    %552 = arith.addf %534, %551 : vector<8x128xf32>
    %c6_268 = arith.constant 6 : index
    %c14_269 = arith.constant 14 : index
    %553 = memref.load %arg1[%c6_268, %c14_269] : memref<8x17xf32, #tpu.memory_space<smem>>
    %554 = vector.broadcast %553 : f32 to vector<8x128xf32>
    %555 = arith.mulf %554, %544 : vector<8x128xf32>
    %556 = arith.addf %538, %555 : vector<8x128xf32>
    %cst_270 = arith.constant 1.400000e+01 : f32
    %557 = vector.broadcast %cst_270 : f32 to vector<8x128xf32>
    %558 = arith.subf %292, %557 : vector<8x128xf32>
    %cst_271 = arith.constant 0.000000e+00 : f32
    %cst_272 = arith.constant 1.000000e+00 : f32
    %559 = vector.broadcast %cst_271 : f32 to vector<8x128xf32>
    %560 = arith.maximumf %559, %558 : vector<8x128xf32>
    %561 = vector.broadcast %cst_272 : f32 to vector<8x128xf32>
    %562 = arith.minimumf %561, %560 : vector<8x128xf32>
    %c1_273 = arith.constant 1 : index
    %c15_274 = arith.constant 15 : index
    %563 = memref.load %arg1[%c1_273, %c15_274] : memref<8x17xf32, #tpu.memory_space<smem>>
    %564 = vector.broadcast %563 : f32 to vector<8x128xf32>
    %565 = arith.mulf %564, %562 : vector<8x128xf32>
    %566 = arith.addf %548, %565 : vector<8x128xf32>
    %c4_275 = arith.constant 4 : index
    %c15_276 = arith.constant 15 : index
    %567 = memref.load %arg1[%c4_275, %c15_276] : memref<8x17xf32, #tpu.memory_space<smem>>
    %568 = vector.broadcast %567 : f32 to vector<8x128xf32>
    %569 = arith.mulf %568, %562 : vector<8x128xf32>
    %570 = arith.addf %552, %569 : vector<8x128xf32>
    %c6_277 = arith.constant 6 : index
    %c15_278 = arith.constant 15 : index
    %571 = memref.load %arg1[%c6_277, %c15_278] : memref<8x17xf32, #tpu.memory_space<smem>>
    %572 = vector.broadcast %571 : f32 to vector<8x128xf32>
    %573 = arith.mulf %572, %562 : vector<8x128xf32>
    %574 = arith.addf %556, %573 : vector<8x128xf32>
    %cst_279 = arith.constant 1.500000e+01 : f32
    %575 = vector.broadcast %cst_279 : f32 to vector<8x128xf32>
    %576 = arith.subf %292, %575 : vector<8x128xf32>
    %cst_280 = arith.constant 0.000000e+00 : f32
    %cst_281 = arith.constant 1.000000e+00 : f32
    %577 = vector.broadcast %cst_280 : f32 to vector<8x128xf32>
    %578 = arith.maximumf %577, %576 : vector<8x128xf32>
    %579 = vector.broadcast %cst_281 : f32 to vector<8x128xf32>
    %580 = arith.minimumf %579, %578 : vector<8x128xf32>
    %c1_282 = arith.constant 1 : index
    %c16_283 = arith.constant 16 : index
    %581 = memref.load %arg1[%c1_282, %c16_283] : memref<8x17xf32, #tpu.memory_space<smem>>
    %582 = vector.broadcast %581 : f32 to vector<8x128xf32>
    %583 = arith.mulf %582, %580 : vector<8x128xf32>
    %584 = arith.addf %566, %583 : vector<8x128xf32>
    %c4_284 = arith.constant 4 : index
    %c16_285 = arith.constant 16 : index
    %585 = memref.load %arg1[%c4_284, %c16_285] : memref<8x17xf32, #tpu.memory_space<smem>>
    %586 = vector.broadcast %585 : f32 to vector<8x128xf32>
    %587 = arith.mulf %586, %580 : vector<8x128xf32>
    %588 = arith.addf %570, %587 : vector<8x128xf32>
    %c6_286 = arith.constant 6 : index
    %c16_287 = arith.constant 16 : index
    %589 = memref.load %arg1[%c6_286, %c16_287] : memref<8x17xf32, #tpu.memory_space<smem>>
    %590 = vector.broadcast %589 : f32 to vector<8x128xf32>
    %591 = arith.mulf %590, %580 : vector<8x128xf32>
    %592 = arith.addf %574, %591 : vector<8x128xf32>
    %593 = arith.mulf %286, %584 : vector<8x128xf32>
    %594 = arith.mulf %290, %588 : vector<8x128xf32>
    %cst_288 = arith.constant 5.000000e-01 : f32
    %595 = vector.broadcast %cst_288 : f32 to vector<8x128xf32>
    %596 = arith.subf %592, %595 : vector<8x128xf32>
    %597 = math.absf %596 : vector<8x128xf32>
    %cst_289 = arith.constant dense<0.000000e+00> : vector<128xf32>
    %598 = vector.multi_reduction <add>, %597, %cst_289 [0] : vector<8x128xf32> to vector<128xf32>
    %599 = vector.shape_cast %598 : vector<128xf32> to vector<1x128xf32>
    %cst_290 = arith.constant 1.600000e+01 : f32
    %600 = vector.broadcast %cst_290 : f32 to vector<1x128xf32>
    %601 = arith.mulf %600, %1 : vector<1x128xf32>
    %cst_291 = arith.constant 0.000000e+00 : f32
    %602 = vector.broadcast %cst_291 : f32 to vector<1x128xf32>
    %c5_292 = arith.constant 5 : index
    %c0_293 = arith.constant 0 : index
    %603 = memref.load %arg1[%c5_292, %c0_293] : memref<8x17xf32, #tpu.memory_space<smem>>
    %604 = vector.broadcast %603 : f32 to vector<1x128xf32>
    %605 = arith.addf %602, %604 : vector<1x128xf32>
    %cst_294 = arith.constant 0.000000e+00 : f32
    %606 = vector.broadcast %cst_294 : f32 to vector<1x128xf32>
    %607 = arith.subf %601, %606 : vector<1x128xf32>
    %cst_295 = arith.constant 0.000000e+00 : f32
    %cst_296 = arith.constant 1.000000e+00 : f32
    %608 = vector.broadcast %cst_295 : f32 to vector<1x128xf32>
    %609 = arith.maximumf %608, %607 : vector<1x128xf32>
    %610 = vector.broadcast %cst_296 : f32 to vector<1x128xf32>
    %611 = arith.minimumf %610, %609 : vector<1x128xf32>
    %c5_297 = arith.constant 5 : index
    %c1_298 = arith.constant 1 : index
    %612 = memref.load %arg1[%c5_297, %c1_298] : memref<8x17xf32, #tpu.memory_space<smem>>
    %613 = vector.broadcast %612 : f32 to vector<1x128xf32>
    %614 = arith.mulf %613, %611 : vector<1x128xf32>
    %615 = arith.addf %605, %614 : vector<1x128xf32>
    %cst_299 = arith.constant 1.000000e+00 : f32
    %616 = vector.broadcast %cst_299 : f32 to vector<1x128xf32>
    %617 = arith.subf %601, %616 : vector<1x128xf32>
    %cst_300 = arith.constant 0.000000e+00 : f32
    %cst_301 = arith.constant 1.000000e+00 : f32
    %618 = vector.broadcast %cst_300 : f32 to vector<1x128xf32>
    %619 = arith.maximumf %618, %617 : vector<1x128xf32>
    %620 = vector.broadcast %cst_301 : f32 to vector<1x128xf32>
    %621 = arith.minimumf %620, %619 : vector<1x128xf32>
    %c5_302 = arith.constant 5 : index
    %c2_303 = arith.constant 2 : index
    %622 = memref.load %arg1[%c5_302, %c2_303] : memref<8x17xf32, #tpu.memory_space<smem>>
    %623 = vector.broadcast %622 : f32 to vector<1x128xf32>
    %624 = arith.mulf %623, %621 : vector<1x128xf32>
    %625 = arith.addf %615, %624 : vector<1x128xf32>
    %cst_304 = arith.constant 2.000000e+00 : f32
    %626 = vector.broadcast %cst_304 : f32 to vector<1x128xf32>
    %627 = arith.subf %601, %626 : vector<1x128xf32>
    %cst_305 = arith.constant 0.000000e+00 : f32
    %cst_306 = arith.constant 1.000000e+00 : f32
    %628 = vector.broadcast %cst_305 : f32 to vector<1x128xf32>
    %629 = arith.maximumf %628, %627 : vector<1x128xf32>
    %630 = vector.broadcast %cst_306 : f32 to vector<1x128xf32>
    %631 = arith.minimumf %630, %629 : vector<1x128xf32>
    %c5_307 = arith.constant 5 : index
    %c3_308 = arith.constant 3 : index
    %632 = memref.load %arg1[%c5_307, %c3_308] : memref<8x17xf32, #tpu.memory_space<smem>>
    %633 = vector.broadcast %632 : f32 to vector<1x128xf32>
    %634 = arith.mulf %633, %631 : vector<1x128xf32>
    %635 = arith.addf %625, %634 : vector<1x128xf32>
    %cst_309 = arith.constant 3.000000e+00 : f32
    %636 = vector.broadcast %cst_309 : f32 to vector<1x128xf32>
    %637 = arith.subf %601, %636 : vector<1x128xf32>
    %cst_310 = arith.constant 0.000000e+00 : f32
    %cst_311 = arith.constant 1.000000e+00 : f32
    %638 = vector.broadcast %cst_310 : f32 to vector<1x128xf32>
    %639 = arith.maximumf %638, %637 : vector<1x128xf32>
    %640 = vector.broadcast %cst_311 : f32 to vector<1x128xf32>
    %641 = arith.minimumf %640, %639 : vector<1x128xf32>
    %c5_312 = arith.constant 5 : index
    %c4_313 = arith.constant 4 : index
    %642 = memref.load %arg1[%c5_312, %c4_313] : memref<8x17xf32, #tpu.memory_space<smem>>
    %643 = vector.broadcast %642 : f32 to vector<1x128xf32>
    %644 = arith.mulf %643, %641 : vector<1x128xf32>
    %645 = arith.addf %635, %644 : vector<1x128xf32>
    %cst_314 = arith.constant 4.000000e+00 : f32
    %646 = vector.broadcast %cst_314 : f32 to vector<1x128xf32>
    %647 = arith.subf %601, %646 : vector<1x128xf32>
    %cst_315 = arith.constant 0.000000e+00 : f32
    %cst_316 = arith.constant 1.000000e+00 : f32
    %648 = vector.broadcast %cst_315 : f32 to vector<1x128xf32>
    %649 = arith.maximumf %648, %647 : vector<1x128xf32>
    %650 = vector.broadcast %cst_316 : f32 to vector<1x128xf32>
    %651 = arith.minimumf %650, %649 : vector<1x128xf32>
    %c5_317 = arith.constant 5 : index
    %c5_318 = arith.constant 5 : index
    %652 = memref.load %arg1[%c5_317, %c5_318] : memref<8x17xf32, #tpu.memory_space<smem>>
    %653 = vector.broadcast %652 : f32 to vector<1x128xf32>
    %654 = arith.mulf %653, %651 : vector<1x128xf32>
    %655 = arith.addf %645, %654 : vector<1x128xf32>
    %cst_319 = arith.constant 5.000000e+00 : f32
    %656 = vector.broadcast %cst_319 : f32 to vector<1x128xf32>
    %657 = arith.subf %601, %656 : vector<1x128xf32>
    %cst_320 = arith.constant 0.000000e+00 : f32
    %cst_321 = arith.constant 1.000000e+00 : f32
    %658 = vector.broadcast %cst_320 : f32 to vector<1x128xf32>
    %659 = arith.maximumf %658, %657 : vector<1x128xf32>
    %660 = vector.broadcast %cst_321 : f32 to vector<1x128xf32>
    %661 = arith.minimumf %660, %659 : vector<1x128xf32>
    %c5_322 = arith.constant 5 : index
    %c6_323 = arith.constant 6 : index
    %662 = memref.load %arg1[%c5_322, %c6_323] : memref<8x17xf32, #tpu.memory_space<smem>>
    %663 = vector.broadcast %662 : f32 to vector<1x128xf32>
    %664 = arith.mulf %663, %661 : vector<1x128xf32>
    %665 = arith.addf %655, %664 : vector<1x128xf32>
    %cst_324 = arith.constant 6.000000e+00 : f32
    %666 = vector.broadcast %cst_324 : f32 to vector<1x128xf32>
    %667 = arith.subf %601, %666 : vector<1x128xf32>
    %cst_325 = arith.constant 0.000000e+00 : f32
    %cst_326 = arith.constant 1.000000e+00 : f32
    %668 = vector.broadcast %cst_325 : f32 to vector<1x128xf32>
    %669 = arith.maximumf %668, %667 : vector<1x128xf32>
    %670 = vector.broadcast %cst_326 : f32 to vector<1x128xf32>
    %671 = arith.minimumf %670, %669 : vector<1x128xf32>
    %c5_327 = arith.constant 5 : index
    %c7_328 = arith.constant 7 : index
    %672 = memref.load %arg1[%c5_327, %c7_328] : memref<8x17xf32, #tpu.memory_space<smem>>
    %673 = vector.broadcast %672 : f32 to vector<1x128xf32>
    %674 = arith.mulf %673, %671 : vector<1x128xf32>
    %675 = arith.addf %665, %674 : vector<1x128xf32>
    %cst_329 = arith.constant 7.000000e+00 : f32
    %676 = vector.broadcast %cst_329 : f32 to vector<1x128xf32>
    %677 = arith.subf %601, %676 : vector<1x128xf32>
    %cst_330 = arith.constant 0.000000e+00 : f32
    %cst_331 = arith.constant 1.000000e+00 : f32
    %678 = vector.broadcast %cst_330 : f32 to vector<1x128xf32>
    %679 = arith.maximumf %678, %677 : vector<1x128xf32>
    %680 = vector.broadcast %cst_331 : f32 to vector<1x128xf32>
    %681 = arith.minimumf %680, %679 : vector<1x128xf32>
    %c5_332 = arith.constant 5 : index
    %c8_333 = arith.constant 8 : index
    %682 = memref.load %arg1[%c5_332, %c8_333] : memref<8x17xf32, #tpu.memory_space<smem>>
    %683 = vector.broadcast %682 : f32 to vector<1x128xf32>
    %684 = arith.mulf %683, %681 : vector<1x128xf32>
    %685 = arith.addf %675, %684 : vector<1x128xf32>
    %cst_334 = arith.constant 8.000000e+00 : f32
    %686 = vector.broadcast %cst_334 : f32 to vector<1x128xf32>
    %687 = arith.subf %601, %686 : vector<1x128xf32>
    %cst_335 = arith.constant 0.000000e+00 : f32
    %cst_336 = arith.constant 1.000000e+00 : f32
    %688 = vector.broadcast %cst_335 : f32 to vector<1x128xf32>
    %689 = arith.maximumf %688, %687 : vector<1x128xf32>
    %690 = vector.broadcast %cst_336 : f32 to vector<1x128xf32>
    %691 = arith.minimumf %690, %689 : vector<1x128xf32>
    %c5_337 = arith.constant 5 : index
    %c9_338 = arith.constant 9 : index
    %692 = memref.load %arg1[%c5_337, %c9_338] : memref<8x17xf32, #tpu.memory_space<smem>>
    %693 = vector.broadcast %692 : f32 to vector<1x128xf32>
    %694 = arith.mulf %693, %691 : vector<1x128xf32>
    %695 = arith.addf %685, %694 : vector<1x128xf32>
    %cst_339 = arith.constant 9.000000e+00 : f32
    %696 = vector.broadcast %cst_339 : f32 to vector<1x128xf32>
    %697 = arith.subf %601, %696 : vector<1x128xf32>
    %cst_340 = arith.constant 0.000000e+00 : f32
    %cst_341 = arith.constant 1.000000e+00 : f32
    %698 = vector.broadcast %cst_340 : f32 to vector<1x128xf32>
    %699 = arith.maximumf %698, %697 : vector<1x128xf32>
    %700 = vector.broadcast %cst_341 : f32 to vector<1x128xf32>
    %701 = arith.minimumf %700, %699 : vector<1x128xf32>
    %c5_342 = arith.constant 5 : index
    %c10_343 = arith.constant 10 : index
    %702 = memref.load %arg1[%c5_342, %c10_343] : memref<8x17xf32, #tpu.memory_space<smem>>
    %703 = vector.broadcast %702 : f32 to vector<1x128xf32>
    %704 = arith.mulf %703, %701 : vector<1x128xf32>
    %705 = arith.addf %695, %704 : vector<1x128xf32>
    %cst_344 = arith.constant 1.000000e+01 : f32
    %706 = vector.broadcast %cst_344 : f32 to vector<1x128xf32>
    %707 = arith.subf %601, %706 : vector<1x128xf32>
    %cst_345 = arith.constant 0.000000e+00 : f32
    %cst_346 = arith.constant 1.000000e+00 : f32
    %708 = vector.broadcast %cst_345 : f32 to vector<1x128xf32>
    %709 = arith.maximumf %708, %707 : vector<1x128xf32>
    %710 = vector.broadcast %cst_346 : f32 to vector<1x128xf32>
    %711 = arith.minimumf %710, %709 : vector<1x128xf32>
    %c5_347 = arith.constant 5 : index
    %c11_348 = arith.constant 11 : index
    %712 = memref.load %arg1[%c5_347, %c11_348] : memref<8x17xf32, #tpu.memory_space<smem>>
    %713 = vector.broadcast %712 : f32 to vector<1x128xf32>
    %714 = arith.mulf %713, %711 : vector<1x128xf32>
    %715 = arith.addf %705, %714 : vector<1x128xf32>
    %cst_349 = arith.constant 1.100000e+01 : f32
    %716 = vector.broadcast %cst_349 : f32 to vector<1x128xf32>
    %717 = arith.subf %601, %716 : vector<1x128xf32>
    %cst_350 = arith.constant 0.000000e+00 : f32
    %cst_351 = arith.constant 1.000000e+00 : f32
    %718 = vector.broadcast %cst_350 : f32 to vector<1x128xf32>
    %719 = arith.maximumf %718, %717 : vector<1x128xf32>
    %720 = vector.broadcast %cst_351 : f32 to vector<1x128xf32>
    %721 = arith.minimumf %720, %719 : vector<1x128xf32>
    %c5_352 = arith.constant 5 : index
    %c12_353 = arith.constant 12 : index
    %722 = memref.load %arg1[%c5_352, %c12_353] : memref<8x17xf32, #tpu.memory_space<smem>>
    %723 = vector.broadcast %722 : f32 to vector<1x128xf32>
    %724 = arith.mulf %723, %721 : vector<1x128xf32>
    %725 = arith.addf %715, %724 : vector<1x128xf32>
    %cst_354 = arith.constant 1.200000e+01 : f32
    %726 = vector.broadcast %cst_354 : f32 to vector<1x128xf32>
    %727 = arith.subf %601, %726 : vector<1x128xf32>
    %cst_355 = arith.constant 0.000000e+00 : f32
    %cst_356 = arith.constant 1.000000e+00 : f32
    %728 = vector.broadcast %cst_355 : f32 to vector<1x128xf32>
    %729 = arith.maximumf %728, %727 : vector<1x128xf32>
    %730 = vector.broadcast %cst_356 : f32 to vector<1x128xf32>
    %731 = arith.minimumf %730, %729 : vector<1x128xf32>
    %c5_357 = arith.constant 5 : index
    %c13_358 = arith.constant 13 : index
    %732 = memref.load %arg1[%c5_357, %c13_358] : memref<8x17xf32, #tpu.memory_space<smem>>
    %733 = vector.broadcast %732 : f32 to vector<1x128xf32>
    %734 = arith.mulf %733, %731 : vector<1x128xf32>
    %735 = arith.addf %725, %734 : vector<1x128xf32>
    %cst_359 = arith.constant 1.300000e+01 : f32
    %736 = vector.broadcast %cst_359 : f32 to vector<1x128xf32>
    %737 = arith.subf %601, %736 : vector<1x128xf32>
    %cst_360 = arith.constant 0.000000e+00 : f32
    %cst_361 = arith.constant 1.000000e+00 : f32
    %738 = vector.broadcast %cst_360 : f32 to vector<1x128xf32>
    %739 = arith.maximumf %738, %737 : vector<1x128xf32>
    %740 = vector.broadcast %cst_361 : f32 to vector<1x128xf32>
    %741 = arith.minimumf %740, %739 : vector<1x128xf32>
    %c5_362 = arith.constant 5 : index
    %c14_363 = arith.constant 14 : index
    %742 = memref.load %arg1[%c5_362, %c14_363] : memref<8x17xf32, #tpu.memory_space<smem>>
    %743 = vector.broadcast %742 : f32 to vector<1x128xf32>
    %744 = arith.mulf %743, %741 : vector<1x128xf32>
    %745 = arith.addf %735, %744 : vector<1x128xf32>
    %cst_364 = arith.constant 1.400000e+01 : f32
    %746 = vector.broadcast %cst_364 : f32 to vector<1x128xf32>
    %747 = arith.subf %601, %746 : vector<1x128xf32>
    %cst_365 = arith.constant 0.000000e+00 : f32
    %cst_366 = arith.constant 1.000000e+00 : f32
    %748 = vector.broadcast %cst_365 : f32 to vector<1x128xf32>
    %749 = arith.maximumf %748, %747 : vector<1x128xf32>
    %750 = vector.broadcast %cst_366 : f32 to vector<1x128xf32>
    %751 = arith.minimumf %750, %749 : vector<1x128xf32>
    %c5_367 = arith.constant 5 : index
    %c15_368 = arith.constant 15 : index
    %752 = memref.load %arg1[%c5_367, %c15_368] : memref<8x17xf32, #tpu.memory_space<smem>>
    %753 = vector.broadcast %752 : f32 to vector<1x128xf32>
    %754 = arith.mulf %753, %751 : vector<1x128xf32>
    %755 = arith.addf %745, %754 : vector<1x128xf32>
    %cst_369 = arith.constant 1.500000e+01 : f32
    %756 = vector.broadcast %cst_369 : f32 to vector<1x128xf32>
    %757 = arith.subf %601, %756 : vector<1x128xf32>
    %cst_370 = arith.constant 0.000000e+00 : f32
    %cst_371 = arith.constant 1.000000e+00 : f32
    %758 = vector.broadcast %cst_370 : f32 to vector<1x128xf32>
    %759 = arith.maximumf %758, %757 : vector<1x128xf32>
    %760 = vector.broadcast %cst_371 : f32 to vector<1x128xf32>
    %761 = arith.minimumf %760, %759 : vector<1x128xf32>
    %c5_372 = arith.constant 5 : index
    %c16_373 = arith.constant 16 : index
    %762 = memref.load %arg1[%c5_372, %c16_373] : memref<8x17xf32, #tpu.memory_space<smem>>
    %763 = vector.broadcast %762 : f32 to vector<1x128xf32>
    %764 = arith.mulf %763, %761 : vector<1x128xf32>
    %765 = arith.addf %755, %764 : vector<1x128xf32>
    %cst_374 = arith.constant 5.000000e-01 : f32
    %766 = vector.broadcast %cst_374 : f32 to vector<1x128xf32>
    %767 = arith.subf %765, %766 : vector<1x128xf32>
    %768 = math.absf %767 : vector<1x128xf32>
    %769 = vector.broadcast %1 : vector<1x128xf32> to vector<8x128xf32>
    %770 = arith.subf %3, %769 : vector<8x128xf32>
    %771 = math.absf %770 : vector<8x128xf32>
    %cst_375 = arith.constant 1.000000e+00 : f32
    %772 = vector.broadcast %cst_375 : f32 to vector<8x128xf32>
    %773 = arith.subf %772, %771 : vector<8x128xf32>
    %cst_376 = arith.constant 1.600000e+01 : f32
    %774 = vector.broadcast %cst_376 : f32 to vector<8x128xf32>
    %775 = arith.mulf %774, %773 : vector<8x128xf32>
    %cst_377 = arith.constant 0.000000e+00 : f32
    %776 = vector.broadcast %cst_377 : f32 to vector<8x128xf32>
    %c2_378 = arith.constant 2 : index
    %c0_379 = arith.constant 0 : index
    %777 = memref.load %arg1[%c2_378, %c0_379] : memref<8x17xf32, #tpu.memory_space<smem>>
    %778 = vector.broadcast %777 : f32 to vector<8x128xf32>
    %779 = arith.addf %776, %778 : vector<8x128xf32>
    %cst_380 = arith.constant 0.000000e+00 : f32
    %780 = vector.broadcast %cst_380 : f32 to vector<8x128xf32>
    %781 = arith.subf %775, %780 : vector<8x128xf32>
    %cst_381 = arith.constant 0.000000e+00 : f32
    %cst_382 = arith.constant 1.000000e+00 : f32
    %782 = vector.broadcast %cst_381 : f32 to vector<8x128xf32>
    %783 = arith.maximumf %782, %781 : vector<8x128xf32>
    %784 = vector.broadcast %cst_382 : f32 to vector<8x128xf32>
    %785 = arith.minimumf %784, %783 : vector<8x128xf32>
    %c2_383 = arith.constant 2 : index
    %c1_384 = arith.constant 1 : index
    %786 = memref.load %arg1[%c2_383, %c1_384] : memref<8x17xf32, #tpu.memory_space<smem>>
    %787 = vector.broadcast %786 : f32 to vector<8x128xf32>
    %788 = arith.mulf %787, %785 : vector<8x128xf32>
    %789 = arith.addf %779, %788 : vector<8x128xf32>
    %cst_385 = arith.constant 1.000000e+00 : f32
    %790 = vector.broadcast %cst_385 : f32 to vector<8x128xf32>
    %791 = arith.subf %775, %790 : vector<8x128xf32>
    %cst_386 = arith.constant 0.000000e+00 : f32
    %cst_387 = arith.constant 1.000000e+00 : f32
    %792 = vector.broadcast %cst_386 : f32 to vector<8x128xf32>
    %793 = arith.maximumf %792, %791 : vector<8x128xf32>
    %794 = vector.broadcast %cst_387 : f32 to vector<8x128xf32>
    %795 = arith.minimumf %794, %793 : vector<8x128xf32>
    %c2_388 = arith.constant 2 : index
    %c2_389 = arith.constant 2 : index
    %796 = memref.load %arg1[%c2_388, %c2_389] : memref<8x17xf32, #tpu.memory_space<smem>>
    %797 = vector.broadcast %796 : f32 to vector<8x128xf32>
    %798 = arith.mulf %797, %795 : vector<8x128xf32>
    %799 = arith.addf %789, %798 : vector<8x128xf32>
    %cst_390 = arith.constant 2.000000e+00 : f32
    %800 = vector.broadcast %cst_390 : f32 to vector<8x128xf32>
    %801 = arith.subf %775, %800 : vector<8x128xf32>
    %cst_391 = arith.constant 0.000000e+00 : f32
    %cst_392 = arith.constant 1.000000e+00 : f32
    %802 = vector.broadcast %cst_391 : f32 to vector<8x128xf32>
    %803 = arith.maximumf %802, %801 : vector<8x128xf32>
    %804 = vector.broadcast %cst_392 : f32 to vector<8x128xf32>
    %805 = arith.minimumf %804, %803 : vector<8x128xf32>
    %c2_393 = arith.constant 2 : index
    %c3_394 = arith.constant 3 : index
    %806 = memref.load %arg1[%c2_393, %c3_394] : memref<8x17xf32, #tpu.memory_space<smem>>
    %807 = vector.broadcast %806 : f32 to vector<8x128xf32>
    %808 = arith.mulf %807, %805 : vector<8x128xf32>
    %809 = arith.addf %799, %808 : vector<8x128xf32>
    %cst_395 = arith.constant 3.000000e+00 : f32
    %810 = vector.broadcast %cst_395 : f32 to vector<8x128xf32>
    %811 = arith.subf %775, %810 : vector<8x128xf32>
    %cst_396 = arith.constant 0.000000e+00 : f32
    %cst_397 = arith.constant 1.000000e+00 : f32
    %812 = vector.broadcast %cst_396 : f32 to vector<8x128xf32>
    %813 = arith.maximumf %812, %811 : vector<8x128xf32>
    %814 = vector.broadcast %cst_397 : f32 to vector<8x128xf32>
    %815 = arith.minimumf %814, %813 : vector<8x128xf32>
    %c2_398 = arith.constant 2 : index
    %c4_399 = arith.constant 4 : index
    %816 = memref.load %arg1[%c2_398, %c4_399] : memref<8x17xf32, #tpu.memory_space<smem>>
    %817 = vector.broadcast %816 : f32 to vector<8x128xf32>
    %818 = arith.mulf %817, %815 : vector<8x128xf32>
    %819 = arith.addf %809, %818 : vector<8x128xf32>
    %cst_400 = arith.constant 4.000000e+00 : f32
    %820 = vector.broadcast %cst_400 : f32 to vector<8x128xf32>
    %821 = arith.subf %775, %820 : vector<8x128xf32>
    %cst_401 = arith.constant 0.000000e+00 : f32
    %cst_402 = arith.constant 1.000000e+00 : f32
    %822 = vector.broadcast %cst_401 : f32 to vector<8x128xf32>
    %823 = arith.maximumf %822, %821 : vector<8x128xf32>
    %824 = vector.broadcast %cst_402 : f32 to vector<8x128xf32>
    %825 = arith.minimumf %824, %823 : vector<8x128xf32>
    %c2_403 = arith.constant 2 : index
    %c5_404 = arith.constant 5 : index
    %826 = memref.load %arg1[%c2_403, %c5_404] : memref<8x17xf32, #tpu.memory_space<smem>>
    %827 = vector.broadcast %826 : f32 to vector<8x128xf32>
    %828 = arith.mulf %827, %825 : vector<8x128xf32>
    %829 = arith.addf %819, %828 : vector<8x128xf32>
    %cst_405 = arith.constant 5.000000e+00 : f32
    %830 = vector.broadcast %cst_405 : f32 to vector<8x128xf32>
    %831 = arith.subf %775, %830 : vector<8x128xf32>
    %cst_406 = arith.constant 0.000000e+00 : f32
    %cst_407 = arith.constant 1.000000e+00 : f32
    %832 = vector.broadcast %cst_406 : f32 to vector<8x128xf32>
    %833 = arith.maximumf %832, %831 : vector<8x128xf32>
    %834 = vector.broadcast %cst_407 : f32 to vector<8x128xf32>
    %835 = arith.minimumf %834, %833 : vector<8x128xf32>
    %c2_408 = arith.constant 2 : index
    %c6_409 = arith.constant 6 : index
    %836 = memref.load %arg1[%c2_408, %c6_409] : memref<8x17xf32, #tpu.memory_space<smem>>
    %837 = vector.broadcast %836 : f32 to vector<8x128xf32>
    %838 = arith.mulf %837, %835 : vector<8x128xf32>
    %839 = arith.addf %829, %838 : vector<8x128xf32>
    %cst_410 = arith.constant 6.000000e+00 : f32
    %840 = vector.broadcast %cst_410 : f32 to vector<8x128xf32>
    %841 = arith.subf %775, %840 : vector<8x128xf32>
    %cst_411 = arith.constant 0.000000e+00 : f32
    %cst_412 = arith.constant 1.000000e+00 : f32
    %842 = vector.broadcast %cst_411 : f32 to vector<8x128xf32>
    %843 = arith.maximumf %842, %841 : vector<8x128xf32>
    %844 = vector.broadcast %cst_412 : f32 to vector<8x128xf32>
    %845 = arith.minimumf %844, %843 : vector<8x128xf32>
    %c2_413 = arith.constant 2 : index
    %c7_414 = arith.constant 7 : index
    %846 = memref.load %arg1[%c2_413, %c7_414] : memref<8x17xf32, #tpu.memory_space<smem>>
    %847 = vector.broadcast %846 : f32 to vector<8x128xf32>
    %848 = arith.mulf %847, %845 : vector<8x128xf32>
    %849 = arith.addf %839, %848 : vector<8x128xf32>
    %cst_415 = arith.constant 7.000000e+00 : f32
    %850 = vector.broadcast %cst_415 : f32 to vector<8x128xf32>
    %851 = arith.subf %775, %850 : vector<8x128xf32>
    %cst_416 = arith.constant 0.000000e+00 : f32
    %cst_417 = arith.constant 1.000000e+00 : f32
    %852 = vector.broadcast %cst_416 : f32 to vector<8x128xf32>
    %853 = arith.maximumf %852, %851 : vector<8x128xf32>
    %854 = vector.broadcast %cst_417 : f32 to vector<8x128xf32>
    %855 = arith.minimumf %854, %853 : vector<8x128xf32>
    %c2_418 = arith.constant 2 : index
    %c8_419 = arith.constant 8 : index
    %856 = memref.load %arg1[%c2_418, %c8_419] : memref<8x17xf32, #tpu.memory_space<smem>>
    %857 = vector.broadcast %856 : f32 to vector<8x128xf32>
    %858 = arith.mulf %857, %855 : vector<8x128xf32>
    %859 = arith.addf %849, %858 : vector<8x128xf32>
    %cst_420 = arith.constant 8.000000e+00 : f32
    %860 = vector.broadcast %cst_420 : f32 to vector<8x128xf32>
    %861 = arith.subf %775, %860 : vector<8x128xf32>
    %cst_421 = arith.constant 0.000000e+00 : f32
    %cst_422 = arith.constant 1.000000e+00 : f32
    %862 = vector.broadcast %cst_421 : f32 to vector<8x128xf32>
    %863 = arith.maximumf %862, %861 : vector<8x128xf32>
    %864 = vector.broadcast %cst_422 : f32 to vector<8x128xf32>
    %865 = arith.minimumf %864, %863 : vector<8x128xf32>
    %c2_423 = arith.constant 2 : index
    %c9_424 = arith.constant 9 : index
    %866 = memref.load %arg1[%c2_423, %c9_424] : memref<8x17xf32, #tpu.memory_space<smem>>
    %867 = vector.broadcast %866 : f32 to vector<8x128xf32>
    %868 = arith.mulf %867, %865 : vector<8x128xf32>
    %869 = arith.addf %859, %868 : vector<8x128xf32>
    %cst_425 = arith.constant 9.000000e+00 : f32
    %870 = vector.broadcast %cst_425 : f32 to vector<8x128xf32>
    %871 = arith.subf %775, %870 : vector<8x128xf32>
    %cst_426 = arith.constant 0.000000e+00 : f32
    %cst_427 = arith.constant 1.000000e+00 : f32
    %872 = vector.broadcast %cst_426 : f32 to vector<8x128xf32>
    %873 = arith.maximumf %872, %871 : vector<8x128xf32>
    %874 = vector.broadcast %cst_427 : f32 to vector<8x128xf32>
    %875 = arith.minimumf %874, %873 : vector<8x128xf32>
    %c2_428 = arith.constant 2 : index
    %c10_429 = arith.constant 10 : index
    %876 = memref.load %arg1[%c2_428, %c10_429] : memref<8x17xf32, #tpu.memory_space<smem>>
    %877 = vector.broadcast %876 : f32 to vector<8x128xf32>
    %878 = arith.mulf %877, %875 : vector<8x128xf32>
    %879 = arith.addf %869, %878 : vector<8x128xf32>
    %cst_430 = arith.constant 1.000000e+01 : f32
    %880 = vector.broadcast %cst_430 : f32 to vector<8x128xf32>
    %881 = arith.subf %775, %880 : vector<8x128xf32>
    %cst_431 = arith.constant 0.000000e+00 : f32
    %cst_432 = arith.constant 1.000000e+00 : f32
    %882 = vector.broadcast %cst_431 : f32 to vector<8x128xf32>
    %883 = arith.maximumf %882, %881 : vector<8x128xf32>
    %884 = vector.broadcast %cst_432 : f32 to vector<8x128xf32>
    %885 = arith.minimumf %884, %883 : vector<8x128xf32>
    %c2_433 = arith.constant 2 : index
    %c11_434 = arith.constant 11 : index
    %886 = memref.load %arg1[%c2_433, %c11_434] : memref<8x17xf32, #tpu.memory_space<smem>>
    %887 = vector.broadcast %886 : f32 to vector<8x128xf32>
    %888 = arith.mulf %887, %885 : vector<8x128xf32>
    %889 = arith.addf %879, %888 : vector<8x128xf32>
    %cst_435 = arith.constant 1.100000e+01 : f32
    %890 = vector.broadcast %cst_435 : f32 to vector<8x128xf32>
    %891 = arith.subf %775, %890 : vector<8x128xf32>
    %cst_436 = arith.constant 0.000000e+00 : f32
    %cst_437 = arith.constant 1.000000e+00 : f32
    %892 = vector.broadcast %cst_436 : f32 to vector<8x128xf32>
    %893 = arith.maximumf %892, %891 : vector<8x128xf32>
    %894 = vector.broadcast %cst_437 : f32 to vector<8x128xf32>
    %895 = arith.minimumf %894, %893 : vector<8x128xf32>
    %c2_438 = arith.constant 2 : index
    %c12_439 = arith.constant 12 : index
    %896 = memref.load %arg1[%c2_438, %c12_439] : memref<8x17xf32, #tpu.memory_space<smem>>
    %897 = vector.broadcast %896 : f32 to vector<8x128xf32>
    %898 = arith.mulf %897, %895 : vector<8x128xf32>
    %899 = arith.addf %889, %898 : vector<8x128xf32>
    %cst_440 = arith.constant 1.200000e+01 : f32
    %900 = vector.broadcast %cst_440 : f32 to vector<8x128xf32>
    %901 = arith.subf %775, %900 : vector<8x128xf32>
    %cst_441 = arith.constant 0.000000e+00 : f32
    %cst_442 = arith.constant 1.000000e+00 : f32
    %902 = vector.broadcast %cst_441 : f32 to vector<8x128xf32>
    %903 = arith.maximumf %902, %901 : vector<8x128xf32>
    %904 = vector.broadcast %cst_442 : f32 to vector<8x128xf32>
    %905 = arith.minimumf %904, %903 : vector<8x128xf32>
    %c2_443 = arith.constant 2 : index
    %c13_444 = arith.constant 13 : index
    %906 = memref.load %arg1[%c2_443, %c13_444] : memref<8x17xf32, #tpu.memory_space<smem>>
    %907 = vector.broadcast %906 : f32 to vector<8x128xf32>
    %908 = arith.mulf %907, %905 : vector<8x128xf32>
    %909 = arith.addf %899, %908 : vector<8x128xf32>
    %cst_445 = arith.constant 1.300000e+01 : f32
    %910 = vector.broadcast %cst_445 : f32 to vector<8x128xf32>
    %911 = arith.subf %775, %910 : vector<8x128xf32>
    %cst_446 = arith.constant 0.000000e+00 : f32
    %cst_447 = arith.constant 1.000000e+00 : f32
    %912 = vector.broadcast %cst_446 : f32 to vector<8x128xf32>
    %913 = arith.maximumf %912, %911 : vector<8x128xf32>
    %914 = vector.broadcast %cst_447 : f32 to vector<8x128xf32>
    %915 = arith.minimumf %914, %913 : vector<8x128xf32>
    %c2_448 = arith.constant 2 : index
    %c14_449 = arith.constant 14 : index
    %916 = memref.load %arg1[%c2_448, %c14_449] : memref<8x17xf32, #tpu.memory_space<smem>>
    %917 = vector.broadcast %916 : f32 to vector<8x128xf32>
    %918 = arith.mulf %917, %915 : vector<8x128xf32>
    %919 = arith.addf %909, %918 : vector<8x128xf32>
    %cst_450 = arith.constant 1.400000e+01 : f32
    %920 = vector.broadcast %cst_450 : f32 to vector<8x128xf32>
    %921 = arith.subf %775, %920 : vector<8x128xf32>
    %cst_451 = arith.constant 0.000000e+00 : f32
    %cst_452 = arith.constant 1.000000e+00 : f32
    %922 = vector.broadcast %cst_451 : f32 to vector<8x128xf32>
    %923 = arith.maximumf %922, %921 : vector<8x128xf32>
    %924 = vector.broadcast %cst_452 : f32 to vector<8x128xf32>
    %925 = arith.minimumf %924, %923 : vector<8x128xf32>
    %c2_453 = arith.constant 2 : index
    %c15_454 = arith.constant 15 : index
    %926 = memref.load %arg1[%c2_453, %c15_454] : memref<8x17xf32, #tpu.memory_space<smem>>
    %927 = vector.broadcast %926 : f32 to vector<8x128xf32>
    %928 = arith.mulf %927, %925 : vector<8x128xf32>
    %929 = arith.addf %919, %928 : vector<8x128xf32>
    %cst_455 = arith.constant 1.500000e+01 : f32
    %930 = vector.broadcast %cst_455 : f32 to vector<8x128xf32>
    %931 = arith.subf %775, %930 : vector<8x128xf32>
    %cst_456 = arith.constant 0.000000e+00 : f32
    %cst_457 = arith.constant 1.000000e+00 : f32
    %932 = vector.broadcast %cst_456 : f32 to vector<8x128xf32>
    %933 = arith.maximumf %932, %931 : vector<8x128xf32>
    %934 = vector.broadcast %cst_457 : f32 to vector<8x128xf32>
    %935 = arith.minimumf %934, %933 : vector<8x128xf32>
    %c2_458 = arith.constant 2 : index
    %c16_459 = arith.constant 16 : index
    %936 = memref.load %arg1[%c2_458, %c16_459] : memref<8x17xf32, #tpu.memory_space<smem>>
    %937 = vector.broadcast %936 : f32 to vector<8x128xf32>
    %938 = arith.mulf %937, %935 : vector<8x128xf32>
    %939 = arith.addf %929, %938 : vector<8x128xf32>
    %940 = vector.extract_strided_slice %594 {offsets = [0, 0], sizes = [1, 128], strides = [1, 1]} : vector<8x128xf32> to vector<1x128xf32>
    %c0_460 = arith.constant 0 : index
    %c0_461 = arith.constant 0 : index
    %c0_462 = arith.constant 0 : index
    %941 = vector.load %arg6[%c0_460, %c0_461, %c0_462] : memref<8x128x128xf32, #tpu.memory_space<vmem>>, vector<1x128x128xf32>
    %942 = vector.shape_cast %941 : vector<1x128x128xf32> to vector<128x128xf32>
    %cst_463 = arith.constant dense<0.000000e+00> : vector<8x128xf32>
    %943 = tpu.matmul %594, %942, %cst_463 {dimension_numbers = #tpu.dot_dimension_numbers<[1], [0], [0], [1], [0, 0, 1, 1], [], []>} : vector<8x128xf32>, vector<128x128xf32>, vector<8x128xf32> -> vector<8x128xf32>
    %944 = vector.broadcast %940 : vector<1x128xf32> to vector<8x128xf32>
    %945 = arith.subf %943, %944 : vector<8x128xf32>
    %946 = math.absf %945 : vector<8x128xf32>
    %cst_464 = arith.constant 1.000000e+00 : f32
    %947 = vector.broadcast %cst_464 : f32 to vector<8x128xf32>
    %948 = arith.subf %947, %946 : vector<8x128xf32>
    %cst_465 = arith.constant 1.600000e+01 : f32
    %949 = vector.broadcast %cst_465 : f32 to vector<8x128xf32>
    %950 = arith.mulf %949, %948 : vector<8x128xf32>
    %cst_466 = arith.constant 0.000000e+00 : f32
    %951 = vector.broadcast %cst_466 : f32 to vector<8x128xf32>
    %c2_467 = arith.constant 2 : index
    %c0_468 = arith.constant 0 : index
    %952 = memref.load %arg1[%c2_467, %c0_468] : memref<8x17xf32, #tpu.memory_space<smem>>
    %953 = vector.broadcast %952 : f32 to vector<8x128xf32>
    %954 = arith.addf %951, %953 : vector<8x128xf32>
    %cst_469 = arith.constant 0.000000e+00 : f32
    %955 = vector.broadcast %cst_469 : f32 to vector<8x128xf32>
    %956 = arith.subf %950, %955 : vector<8x128xf32>
    %cst_470 = arith.constant 0.000000e+00 : f32
    %cst_471 = arith.constant 1.000000e+00 : f32
    %957 = vector.broadcast %cst_470 : f32 to vector<8x128xf32>
    %958 = arith.maximumf %957, %956 : vector<8x128xf32>
    %959 = vector.broadcast %cst_471 : f32 to vector<8x128xf32>
    %960 = arith.minimumf %959, %958 : vector<8x128xf32>
    %c2_472 = arith.constant 2 : index
    %c1_473 = arith.constant 1 : index
    %961 = memref.load %arg1[%c2_472, %c1_473] : memref<8x17xf32, #tpu.memory_space<smem>>
    %962 = vector.broadcast %961 : f32 to vector<8x128xf32>
    %963 = arith.mulf %962, %960 : vector<8x128xf32>
    %964 = arith.addf %954, %963 : vector<8x128xf32>
    %cst_474 = arith.constant 1.000000e+00 : f32
    %965 = vector.broadcast %cst_474 : f32 to vector<8x128xf32>
    %966 = arith.subf %950, %965 : vector<8x128xf32>
    %cst_475 = arith.constant 0.000000e+00 : f32
    %cst_476 = arith.constant 1.000000e+00 : f32
    %967 = vector.broadcast %cst_475 : f32 to vector<8x128xf32>
    %968 = arith.maximumf %967, %966 : vector<8x128xf32>
    %969 = vector.broadcast %cst_476 : f32 to vector<8x128xf32>
    %970 = arith.minimumf %969, %968 : vector<8x128xf32>
    %c2_477 = arith.constant 2 : index
    %c2_478 = arith.constant 2 : index
    %971 = memref.load %arg1[%c2_477, %c2_478] : memref<8x17xf32, #tpu.memory_space<smem>>
    %972 = vector.broadcast %971 : f32 to vector<8x128xf32>
    %973 = arith.mulf %972, %970 : vector<8x128xf32>
    %974 = arith.addf %964, %973 : vector<8x128xf32>
    %cst_479 = arith.constant 2.000000e+00 : f32
    %975 = vector.broadcast %cst_479 : f32 to vector<8x128xf32>
    %976 = arith.subf %950, %975 : vector<8x128xf32>
    %cst_480 = arith.constant 0.000000e+00 : f32
    %cst_481 = arith.constant 1.000000e+00 : f32
    %977 = vector.broadcast %cst_480 : f32 to vector<8x128xf32>
    %978 = arith.maximumf %977, %976 : vector<8x128xf32>
    %979 = vector.broadcast %cst_481 : f32 to vector<8x128xf32>
    %980 = arith.minimumf %979, %978 : vector<8x128xf32>
    %c2_482 = arith.constant 2 : index
    %c3_483 = arith.constant 3 : index
    %981 = memref.load %arg1[%c2_482, %c3_483] : memref<8x17xf32, #tpu.memory_space<smem>>
    %982 = vector.broadcast %981 : f32 to vector<8x128xf32>
    %983 = arith.mulf %982, %980 : vector<8x128xf32>
    %984 = arith.addf %974, %983 : vector<8x128xf32>
    %cst_484 = arith.constant 3.000000e+00 : f32
    %985 = vector.broadcast %cst_484 : f32 to vector<8x128xf32>
    %986 = arith.subf %950, %985 : vector<8x128xf32>
    %cst_485 = arith.constant 0.000000e+00 : f32
    %cst_486 = arith.constant 1.000000e+00 : f32
    %987 = vector.broadcast %cst_485 : f32 to vector<8x128xf32>
    %988 = arith.maximumf %987, %986 : vector<8x128xf32>
    %989 = vector.broadcast %cst_486 : f32 to vector<8x128xf32>
    %990 = arith.minimumf %989, %988 : vector<8x128xf32>
    %c2_487 = arith.constant 2 : index
    %c4_488 = arith.constant 4 : index
    %991 = memref.load %arg1[%c2_487, %c4_488] : memref<8x17xf32, #tpu.memory_space<smem>>
    %992 = vector.broadcast %991 : f32 to vector<8x128xf32>
    %993 = arith.mulf %992, %990 : vector<8x128xf32>
    %994 = arith.addf %984, %993 : vector<8x128xf32>
    %cst_489 = arith.constant 4.000000e+00 : f32
    %995 = vector.broadcast %cst_489 : f32 to vector<8x128xf32>
    %996 = arith.subf %950, %995 : vector<8x128xf32>
    %cst_490 = arith.constant 0.000000e+00 : f32
    %cst_491 = arith.constant 1.000000e+00 : f32
    %997 = vector.broadcast %cst_490 : f32 to vector<8x128xf32>
    %998 = arith.maximumf %997, %996 : vector<8x128xf32>
    %999 = vector.broadcast %cst_491 : f32 to vector<8x128xf32>
    %1000 = arith.minimumf %999, %998 : vector<8x128xf32>
    %c2_492 = arith.constant 2 : index
    %c5_493 = arith.constant 5 : index
    %1001 = memref.load %arg1[%c2_492, %c5_493] : memref<8x17xf32, #tpu.memory_space<smem>>
    %1002 = vector.broadcast %1001 : f32 to vector<8x128xf32>
    %1003 = arith.mulf %1002, %1000 : vector<8x128xf32>
    %1004 = arith.addf %994, %1003 : vector<8x128xf32>
    %cst_494 = arith.constant 5.000000e+00 : f32
    %1005 = vector.broadcast %cst_494 : f32 to vector<8x128xf32>
    %1006 = arith.subf %950, %1005 : vector<8x128xf32>
    %cst_495 = arith.constant 0.000000e+00 : f32
    %cst_496 = arith.constant 1.000000e+00 : f32
    %1007 = vector.broadcast %cst_495 : f32 to vector<8x128xf32>
    %1008 = arith.maximumf %1007, %1006 : vector<8x128xf32>
    %1009 = vector.broadcast %cst_496 : f32 to vector<8x128xf32>
    %1010 = arith.minimumf %1009, %1008 : vector<8x128xf32>
    %c2_497 = arith.constant 2 : index
    %c6_498 = arith.constant 6 : index
    %1011 = memref.load %arg1[%c2_497, %c6_498] : memref<8x17xf32, #tpu.memory_space<smem>>
    %1012 = vector.broadcast %1011 : f32 to vector<8x128xf32>
    %1013 = arith.mulf %1012, %1010 : vector<8x128xf32>
    %1014 = arith.addf %1004, %1013 : vector<8x128xf32>
    %cst_499 = arith.constant 6.000000e+00 : f32
    %1015 = vector.broadcast %cst_499 : f32 to vector<8x128xf32>
    %1016 = arith.subf %950, %1015 : vector<8x128xf32>
    %cst_500 = arith.constant 0.000000e+00 : f32
    %cst_501 = arith.constant 1.000000e+00 : f32
    %1017 = vector.broadcast %cst_500 : f32 to vector<8x128xf32>
    %1018 = arith.maximumf %1017, %1016 : vector<8x128xf32>
    %1019 = vector.broadcast %cst_501 : f32 to vector<8x128xf32>
    %1020 = arith.minimumf %1019, %1018 : vector<8x128xf32>
    %c2_502 = arith.constant 2 : index
    %c7_503 = arith.constant 7 : index
    %1021 = memref.load %arg1[%c2_502, %c7_503] : memref<8x17xf32, #tpu.memory_space<smem>>
    %1022 = vector.broadcast %1021 : f32 to vector<8x128xf32>
    %1023 = arith.mulf %1022, %1020 : vector<8x128xf32>
    %1024 = arith.addf %1014, %1023 : vector<8x128xf32>
    %cst_504 = arith.constant 7.000000e+00 : f32
    %1025 = vector.broadcast %cst_504 : f32 to vector<8x128xf32>
    %1026 = arith.subf %950, %1025 : vector<8x128xf32>
    %cst_505 = arith.constant 0.000000e+00 : f32
    %cst_506 = arith.constant 1.000000e+00 : f32
    %1027 = vector.broadcast %cst_505 : f32 to vector<8x128xf32>
    %1028 = arith.maximumf %1027, %1026 : vector<8x128xf32>
    %1029 = vector.broadcast %cst_506 : f32 to vector<8x128xf32>
    %1030 = arith.minimumf %1029, %1028 : vector<8x128xf32>
    %c2_507 = arith.constant 2 : index
    %c8_508 = arith.constant 8 : index
    %1031 = memref.load %arg1[%c2_507, %c8_508] : memref<8x17xf32, #tpu.memory_space<smem>>
    %1032 = vector.broadcast %1031 : f32 to vector<8x128xf32>
    %1033 = arith.mulf %1032, %1030 : vector<8x128xf32>
    %1034 = arith.addf %1024, %1033 : vector<8x128xf32>
    %cst_509 = arith.constant 8.000000e+00 : f32
    %1035 = vector.broadcast %cst_509 : f32 to vector<8x128xf32>
    %1036 = arith.subf %950, %1035 : vector<8x128xf32>
    %cst_510 = arith.constant 0.000000e+00 : f32
    %cst_511 = arith.constant 1.000000e+00 : f32
    %1037 = vector.broadcast %cst_510 : f32 to vector<8x128xf32>
    %1038 = arith.maximumf %1037, %1036 : vector<8x128xf32>
    %1039 = vector.broadcast %cst_511 : f32 to vector<8x128xf32>
    %1040 = arith.minimumf %1039, %1038 : vector<8x128xf32>
    %c2_512 = arith.constant 2 : index
    %c9_513 = arith.constant 9 : index
    %1041 = memref.load %arg1[%c2_512, %c9_513] : memref<8x17xf32, #tpu.memory_space<smem>>
    %1042 = vector.broadcast %1041 : f32 to vector<8x128xf32>
    %1043 = arith.mulf %1042, %1040 : vector<8x128xf32>
    %1044 = arith.addf %1034, %1043 : vector<8x128xf32>
    %cst_514 = arith.constant 9.000000e+00 : f32
    %1045 = vector.broadcast %cst_514 : f32 to vector<8x128xf32>
    %1046 = arith.subf %950, %1045 : vector<8x128xf32>
    %cst_515 = arith.constant 0.000000e+00 : f32
    %cst_516 = arith.constant 1.000000e+00 : f32
    %1047 = vector.broadcast %cst_515 : f32 to vector<8x128xf32>
    %1048 = arith.maximumf %1047, %1046 : vector<8x128xf32>
    %1049 = vector.broadcast %cst_516 : f32 to vector<8x128xf32>
    %1050 = arith.minimumf %1049, %1048 : vector<8x128xf32>
    %c2_517 = arith.constant 2 : index
    %c10_518 = arith.constant 10 : index
    %1051 = memref.load %arg1[%c2_517, %c10_518] : memref<8x17xf32, #tpu.memory_space<smem>>
    %1052 = vector.broadcast %1051 : f32 to vector<8x128xf32>
    %1053 = arith.mulf %1052, %1050 : vector<8x128xf32>
    %1054 = arith.addf %1044, %1053 : vector<8x128xf32>
    %cst_519 = arith.constant 1.000000e+01 : f32
    %1055 = vector.broadcast %cst_519 : f32 to vector<8x128xf32>
    %1056 = arith.subf %950, %1055 : vector<8x128xf32>
    %cst_520 = arith.constant 0.000000e+00 : f32
    %cst_521 = arith.constant 1.000000e+00 : f32
    %1057 = vector.broadcast %cst_520 : f32 to vector<8x128xf32>
    %1058 = arith.maximumf %1057, %1056 : vector<8x128xf32>
    %1059 = vector.broadcast %cst_521 : f32 to vector<8x128xf32>
    %1060 = arith.minimumf %1059, %1058 : vector<8x128xf32>
    %c2_522 = arith.constant 2 : index
    %c11_523 = arith.constant 11 : index
    %1061 = memref.load %arg1[%c2_522, %c11_523] : memref<8x17xf32, #tpu.memory_space<smem>>
    %1062 = vector.broadcast %1061 : f32 to vector<8x128xf32>
    %1063 = arith.mulf %1062, %1060 : vector<8x128xf32>
    %1064 = arith.addf %1054, %1063 : vector<8x128xf32>
    %cst_524 = arith.constant 1.100000e+01 : f32
    %1065 = vector.broadcast %cst_524 : f32 to vector<8x128xf32>
    %1066 = arith.subf %950, %1065 : vector<8x128xf32>
    %cst_525 = arith.constant 0.000000e+00 : f32
    %cst_526 = arith.constant 1.000000e+00 : f32
    %1067 = vector.broadcast %cst_525 : f32 to vector<8x128xf32>
    %1068 = arith.maximumf %1067, %1066 : vector<8x128xf32>
    %1069 = vector.broadcast %cst_526 : f32 to vector<8x128xf32>
    %1070 = arith.minimumf %1069, %1068 : vector<8x128xf32>
    %c2_527 = arith.constant 2 : index
    %c12_528 = arith.constant 12 : index
    %1071 = memref.load %arg1[%c2_527, %c12_528] : memref<8x17xf32, #tpu.memory_space<smem>>
    %1072 = vector.broadcast %1071 : f32 to vector<8x128xf32>
    %1073 = arith.mulf %1072, %1070 : vector<8x128xf32>
    %1074 = arith.addf %1064, %1073 : vector<8x128xf32>
    %cst_529 = arith.constant 1.200000e+01 : f32
    %1075 = vector.broadcast %cst_529 : f32 to vector<8x128xf32>
    %1076 = arith.subf %950, %1075 : vector<8x128xf32>
    %cst_530 = arith.constant 0.000000e+00 : f32
    %cst_531 = arith.constant 1.000000e+00 : f32
    %1077 = vector.broadcast %cst_530 : f32 to vector<8x128xf32>
    %1078 = arith.maximumf %1077, %1076 : vector<8x128xf32>
    %1079 = vector.broadcast %cst_531 : f32 to vector<8x128xf32>
    %1080 = arith.minimumf %1079, %1078 : vector<8x128xf32>
    %c2_532 = arith.constant 2 : index
    %c13_533 = arith.constant 13 : index
    %1081 = memref.load %arg1[%c2_532, %c13_533] : memref<8x17xf32, #tpu.memory_space<smem>>
    %1082 = vector.broadcast %1081 : f32 to vector<8x128xf32>
    %1083 = arith.mulf %1082, %1080 : vector<8x128xf32>
    %1084 = arith.addf %1074, %1083 : vector<8x128xf32>
    %cst_534 = arith.constant 1.300000e+01 : f32
    %1085 = vector.broadcast %cst_534 : f32 to vector<8x128xf32>
    %1086 = arith.subf %950, %1085 : vector<8x128xf32>
    %cst_535 = arith.constant 0.000000e+00 : f32
    %cst_536 = arith.constant 1.000000e+00 : f32
    %1087 = vector.broadcast %cst_535 : f32 to vector<8x128xf32>
    %1088 = arith.maximumf %1087, %1086 : vector<8x128xf32>
    %1089 = vector.broadcast %cst_536 : f32 to vector<8x128xf32>
    %1090 = arith.minimumf %1089, %1088 : vector<8x128xf32>
    %c2_537 = arith.constant 2 : index
    %c14_538 = arith.constant 14 : index
    %1091 = memref.load %arg1[%c2_537, %c14_538] : memref<8x17xf32, #tpu.memory_space<smem>>
    %1092 = vector.broadcast %1091 : f32 to vector<8x128xf32>
    %1093 = arith.mulf %1092, %1090 : vector<8x128xf32>
    %1094 = arith.addf %1084, %1093 : vector<8x128xf32>
    %cst_539 = arith.constant 1.400000e+01 : f32
    %1095 = vector.broadcast %cst_539 : f32 to vector<8x128xf32>
    %1096 = arith.subf %950, %1095 : vector<8x128xf32>
    %cst_540 = arith.constant 0.000000e+00 : f32
    %cst_541 = arith.constant 1.000000e+00 : f32
    %1097 = vector.broadcast %cst_540 : f32 to vector<8x128xf32>
    %1098 = arith.maximumf %1097, %1096 : vector<8x128xf32>
    %1099 = vector.broadcast %cst_541 : f32 to vector<8x128xf32>
    %1100 = arith.minimumf %1099, %1098 : vector<8x128xf32>
    %c2_542 = arith.constant 2 : index
    %c15_543 = arith.constant 15 : index
    %1101 = memref.load %arg1[%c2_542, %c15_543] : memref<8x17xf32, #tpu.memory_space<smem>>
    %1102 = vector.broadcast %1101 : f32 to vector<8x128xf32>
    %1103 = arith.mulf %1102, %1100 : vector<8x128xf32>
    %1104 = arith.addf %1094, %1103 : vector<8x128xf32>
    %cst_544 = arith.constant 1.500000e+01 : f32
    %1105 = vector.broadcast %cst_544 : f32 to vector<8x128xf32>
    %1106 = arith.subf %950, %1105 : vector<8x128xf32>
    %cst_545 = arith.constant 0.000000e+00 : f32
    %cst_546 = arith.constant 1.000000e+00 : f32
    %1107 = vector.broadcast %cst_545 : f32 to vector<8x128xf32>
    %1108 = arith.maximumf %1107, %1106 : vector<8x128xf32>
    %1109 = vector.broadcast %cst_546 : f32 to vector<8x128xf32>
    %1110 = arith.minimumf %1109, %1108 : vector<8x128xf32>
    %c2_547 = arith.constant 2 : index
    %c16_548 = arith.constant 16 : index
    %1111 = memref.load %arg1[%c2_547, %c16_548] : memref<8x17xf32, #tpu.memory_space<smem>>
    %1112 = vector.broadcast %1111 : f32 to vector<8x128xf32>
    %1113 = arith.mulf %1112, %1110 : vector<8x128xf32>
    %1114 = arith.addf %1104, %1113 : vector<8x128xf32>
    %1115 = arith.mulf %939, %1114 : vector<8x128xf32>
    %1116 = vector.extract_strided_slice %594 {offsets = [1, 0], sizes = [1, 128], strides = [1, 1]} : vector<8x128xf32> to vector<1x128xf32>
    %c1_549 = arith.constant 1 : index
    %c0_550 = arith.constant 0 : index
    %c0_551 = arith.constant 0 : index
    %1117 = vector.load %arg6[%c1_549, %c0_550, %c0_551] : memref<8x128x128xf32, #tpu.memory_space<vmem>>, vector<1x128x128xf32>
    %1118 = vector.shape_cast %1117 : vector<1x128x128xf32> to vector<128x128xf32>
    %cst_552 = arith.constant dense<0.000000e+00> : vector<8x128xf32>
    %1119 = tpu.matmul %594, %1118, %cst_552 {dimension_numbers = #tpu.dot_dimension_numbers<[1], [0], [0], [1], [0, 0, 1, 1], [], []>} : vector<8x128xf32>, vector<128x128xf32>, vector<8x128xf32> -> vector<8x128xf32>
    %1120 = vector.broadcast %1116 : vector<1x128xf32> to vector<8x128xf32>
    %1121 = arith.subf %1119, %1120 : vector<8x128xf32>
    %1122 = math.absf %1121 : vector<8x128xf32>
    %cst_553 = arith.constant 1.000000e+00 : f32
    %1123 = vector.broadcast %cst_553 : f32 to vector<8x128xf32>
    %1124 = arith.subf %1123, %1122 : vector<8x128xf32>
    %cst_554 = arith.constant 1.600000e+01 : f32
    %1125 = vector.broadcast %cst_554 : f32 to vector<8x128xf32>
    %1126 = arith.mulf %1125, %1124 : vector<8x128xf32>
    %cst_555 = arith.constant 0.000000e+00 : f32
    %1127 = vector.broadcast %cst_555 : f32 to vector<8x128xf32>
    %c2_556 = arith.constant 2 : index
    %c0_557 = arith.constant 0 : index
    %1128 = memref.load %arg1[%c2_556, %c0_557] : memref<8x17xf32, #tpu.memory_space<smem>>
    %1129 = vector.broadcast %1128 : f32 to vector<8x128xf32>
    %1130 = arith.addf %1127, %1129 : vector<8x128xf32>
    %cst_558 = arith.constant 0.000000e+00 : f32
    %1131 = vector.broadcast %cst_558 : f32 to vector<8x128xf32>
    %1132 = arith.subf %1126, %1131 : vector<8x128xf32>
    %cst_559 = arith.constant 0.000000e+00 : f32
    %cst_560 = arith.constant 1.000000e+00 : f32
    %1133 = vector.broadcast %cst_559 : f32 to vector<8x128xf32>
    %1134 = arith.maximumf %1133, %1132 : vector<8x128xf32>
    %1135 = vector.broadcast %cst_560 : f32 to vector<8x128xf32>
    %1136 = arith.minimumf %1135, %1134 : vector<8x128xf32>
    %c2_561 = arith.constant 2 : index
    %c1_562 = arith.constant 1 : index
    %1137 = memref.load %arg1[%c2_561, %c1_562] : memref<8x17xf32, #tpu.memory_space<smem>>
    %1138 = vector.broadcast %1137 : f32 to vector<8x128xf32>
    %1139 = arith.mulf %1138, %1136 : vector<8x128xf32>
    %1140 = arith.addf %1130, %1139 : vector<8x128xf32>
    %cst_563 = arith.constant 1.000000e+00 : f32
    %1141 = vector.broadcast %cst_563 : f32 to vector<8x128xf32>
    %1142 = arith.subf %1126, %1141 : vector<8x128xf32>
    %cst_564 = arith.constant 0.000000e+00 : f32
    %cst_565 = arith.constant 1.000000e+00 : f32
    %1143 = vector.broadcast %cst_564 : f32 to vector<8x128xf32>
    %1144 = arith.maximumf %1143, %1142 : vector<8x128xf32>
    %1145 = vector.broadcast %cst_565 : f32 to vector<8x128xf32>
    %1146 = arith.minimumf %1145, %1144 : vector<8x128xf32>
    %c2_566 = arith.constant 2 : index
    %c2_567 = arith.constant 2 : index
    %1147 = memref.load %arg1[%c2_566, %c2_567] : memref<8x17xf32, #tpu.memory_space<smem>>
    %1148 = vector.broadcast %1147 : f32 to vector<8x128xf32>
    %1149 = arith.mulf %1148, %1146 : vector<8x128xf32>
    %1150 = arith.addf %1140, %1149 : vector<8x128xf32>
    %cst_568 = arith.constant 2.000000e+00 : f32
    %1151 = vector.broadcast %cst_568 : f32 to vector<8x128xf32>
    %1152 = arith.subf %1126, %1151 : vector<8x128xf32>
    %cst_569 = arith.constant 0.000000e+00 : f32
    %cst_570 = arith.constant 1.000000e+00 : f32
    %1153 = vector.broadcast %cst_569 : f32 to vector<8x128xf32>
    %1154 = arith.maximumf %1153, %1152 : vector<8x128xf32>
    %1155 = vector.broadcast %cst_570 : f32 to vector<8x128xf32>
    %1156 = arith.minimumf %1155, %1154 : vector<8x128xf32>
    %c2_571 = arith.constant 2 : index
    %c3_572 = arith.constant 3 : index
    %1157 = memref.load %arg1[%c2_571, %c3_572] : memref<8x17xf32, #tpu.memory_space<smem>>
    %1158 = vector.broadcast %1157 : f32 to vector<8x128xf32>
    %1159 = arith.mulf %1158, %1156 : vector<8x128xf32>
    %1160 = arith.addf %1150, %1159 : vector<8x128xf32>
    %cst_573 = arith.constant 3.000000e+00 : f32
    %1161 = vector.broadcast %cst_573 : f32 to vector<8x128xf32>
    %1162 = arith.subf %1126, %1161 : vector<8x128xf32>
    %cst_574 = arith.constant 0.000000e+00 : f32
    %cst_575 = arith.constant 1.000000e+00 : f32
    %1163 = vector.broadcast %cst_574 : f32 to vector<8x128xf32>
    %1164 = arith.maximumf %1163, %1162 : vector<8x128xf32>
    %1165 = vector.broadcast %cst_575 : f32 to vector<8x128xf32>
    %1166 = arith.minimumf %1165, %1164 : vector<8x128xf32>
    %c2_576 = arith.constant 2 : index
    %c4_577 = arith.constant 4 : index
    %1167 = memref.load %arg1[%c2_576, %c4_577] : memref<8x17xf32, #tpu.memory_space<smem>>
    %1168 = vector.broadcast %1167 : f32 to vector<8x128xf32>
    %1169 = arith.mulf %1168, %1166 : vector<8x128xf32>
    %1170 = arith.addf %1160, %1169 : vector<8x128xf32>
    %cst_578 = arith.constant 4.000000e+00 : f32
    %1171 = vector.broadcast %cst_578 : f32 to vector<8x128xf32>
    %1172 = arith.subf %1126, %1171 : vector<8x128xf32>
    %cst_579 = arith.constant 0.000000e+00 : f32
    %cst_580 = arith.constant 1.000000e+00 : f32
    %1173 = vector.broadcast %cst_579 : f32 to vector<8x128xf32>
    %1174 = arith.maximumf %1173, %1172 : vector<8x128xf32>
    %1175 = vector.broadcast %cst_580 : f32 to vector<8x128xf32>
    %1176 = arith.minimumf %1175, %1174 : vector<8x128xf32>
    %c2_581 = arith.constant 2 : index
    %c5_582 = arith.constant 5 : index
    %1177 = memref.load %arg1[%c2_581, %c5_582] : memref<8x17xf32, #tpu.memory_space<smem>>
    %1178 = vector.broadcast %1177 : f32 to vector<8x128xf32>
    %1179 = arith.mulf %1178, %1176 : vector<8x128xf32>
    %1180 = arith.addf %1170, %1179 : vector<8x128xf32>
    %cst_583 = arith.constant 5.000000e+00 : f32
    %1181 = vector.broadcast %cst_583 : f32 to vector<8x128xf32>
    %1182 = arith.subf %1126, %1181 : vector<8x128xf32>
    %cst_584 = arith.constant 0.000000e+00 : f32
    %cst_585 = arith.constant 1.000000e+00 : f32
    %1183 = vector.broadcast %cst_584 : f32 to vector<8x128xf32>
    %1184 = arith.maximumf %1183, %1182 : vector<8x128xf32>
    %1185 = vector.broadcast %cst_585 : f32 to vector<8x128xf32>
    %1186 = arith.minimumf %1185, %1184 : vector<8x128xf32>
    %c2_586 = arith.constant 2 : index
    %c6_587 = arith.constant 6 : index
    %1187 = memref.load %arg1[%c2_586, %c6_587] : memref<8x17xf32, #tpu.memory_space<smem>>
    %1188 = vector.broadcast %1187 : f32 to vector<8x128xf32>
    %1189 = arith.mulf %1188, %1186 : vector<8x128xf32>
    %1190 = arith.addf %1180, %1189 : vector<8x128xf32>
    %cst_588 = arith.constant 6.000000e+00 : f32
    %1191 = vector.broadcast %cst_588 : f32 to vector<8x128xf32>
    %1192 = arith.subf %1126, %1191 : vector<8x128xf32>
    %cst_589 = arith.constant 0.000000e+00 : f32
    %cst_590 = arith.constant 1.000000e+00 : f32
    %1193 = vector.broadcast %cst_589 : f32 to vector<8x128xf32>
    %1194 = arith.maximumf %1193, %1192 : vector<8x128xf32>
    %1195 = vector.broadcast %cst_590 : f32 to vector<8x128xf32>
    %1196 = arith.minimumf %1195, %1194 : vector<8x128xf32>
    %c2_591 = arith.constant 2 : index
    %c7_592 = arith.constant 7 : index
    %1197 = memref.load %arg1[%c2_591, %c7_592] : memref<8x17xf32, #tpu.memory_space<smem>>
    %1198 = vector.broadcast %1197 : f32 to vector<8x128xf32>
    %1199 = arith.mulf %1198, %1196 : vector<8x128xf32>
    %1200 = arith.addf %1190, %1199 : vector<8x128xf32>
    %cst_593 = arith.constant 7.000000e+00 : f32
    %1201 = vector.broadcast %cst_593 : f32 to vector<8x128xf32>
    %1202 = arith.subf %1126, %1201 : vector<8x128xf32>
    %cst_594 = arith.constant 0.000000e+00 : f32
    %cst_595 = arith.constant 1.000000e+00 : f32
    %1203 = vector.broadcast %cst_594 : f32 to vector<8x128xf32>
    %1204 = arith.maximumf %1203, %1202 : vector<8x128xf32>
    %1205 = vector.broadcast %cst_595 : f32 to vector<8x128xf32>
    %1206 = arith.minimumf %1205, %1204 : vector<8x128xf32>
    %c2_596 = arith.constant 2 : index
    %c8_597 = arith.constant 8 : index
    %1207 = memref.load %arg1[%c2_596, %c8_597] : memref<8x17xf32, #tpu.memory_space<smem>>
    %1208 = vector.broadcast %1207 : f32 to vector<8x128xf32>
    %1209 = arith.mulf %1208, %1206 : vector<8x128xf32>
    %1210 = arith.addf %1200, %1209 : vector<8x128xf32>
    %cst_598 = arith.constant 8.000000e+00 : f32
    %1211 = vector.broadcast %cst_598 : f32 to vector<8x128xf32>
    %1212 = arith.subf %1126, %1211 : vector<8x128xf32>
    %cst_599 = arith.constant 0.000000e+00 : f32
    %cst_600 = arith.constant 1.000000e+00 : f32
    %1213 = vector.broadcast %cst_599 : f32 to vector<8x128xf32>
    %1214 = arith.maximumf %1213, %1212 : vector<8x128xf32>
    %1215 = vector.broadcast %cst_600 : f32 to vector<8x128xf32>
    %1216 = arith.minimumf %1215, %1214 : vector<8x128xf32>
    %c2_601 = arith.constant 2 : index
    %c9_602 = arith.constant 9 : index
    %1217 = memref.load %arg1[%c2_601, %c9_602] : memref<8x17xf32, #tpu.memory_space<smem>>
    %1218 = vector.broadcast %1217 : f32 to vector<8x128xf32>
    %1219 = arith.mulf %1218, %1216 : vector<8x128xf32>
    %1220 = arith.addf %1210, %1219 : vector<8x128xf32>
    %cst_603 = arith.constant 9.000000e+00 : f32
    %1221 = vector.broadcast %cst_603 : f32 to vector<8x128xf32>
    %1222 = arith.subf %1126, %1221 : vector<8x128xf32>
    %cst_604 = arith.constant 0.000000e+00 : f32
    %cst_605 = arith.constant 1.000000e+00 : f32
    %1223 = vector.broadcast %cst_604 : f32 to vector<8x128xf32>
    %1224 = arith.maximumf %1223, %1222 : vector<8x128xf32>
    %1225 = vector.broadcast %cst_605 : f32 to vector<8x128xf32>
    %1226 = arith.minimumf %1225, %1224 : vector<8x128xf32>
    %c2_606 = arith.constant 2 : index
    %c10_607 = arith.constant 10 : index
    %1227 = memref.load %arg1[%c2_606, %c10_607] : memref<8x17xf32, #tpu.memory_space<smem>>
    %1228 = vector.broadcast %1227 : f32 to vector<8x128xf32>
    %1229 = arith.mulf %1228, %1226 : vector<8x128xf32>
    %1230 = arith.addf %1220, %1229 : vector<8x128xf32>
    %cst_608 = arith.constant 1.000000e+01 : f32
    %1231 = vector.broadcast %cst_608 : f32 to vector<8x128xf32>
    %1232 = arith.subf %1126, %1231 : vector<8x128xf32>
    %cst_609 = arith.constant 0.000000e+00 : f32
    %cst_610 = arith.constant 1.000000e+00 : f32
    %1233 = vector.broadcast %cst_609 : f32 to vector<8x128xf32>
    %1234 = arith.maximumf %1233, %1232 : vector<8x128xf32>
    %1235 = vector.broadcast %cst_610 : f32 to vector<8x128xf32>
    %1236 = arith.minimumf %1235, %1234 : vector<8x128xf32>
    %c2_611 = arith.constant 2 : index
    %c11_612 = arith.constant 11 : index
    %1237 = memref.load %arg1[%c2_611, %c11_612] : memref<8x17xf32, #tpu.memory_space<smem>>
    %1238 = vector.broadcast %1237 : f32 to vector<8x128xf32>
    %1239 = arith.mulf %1238, %1236 : vector<8x128xf32>
    %1240 = arith.addf %1230, %1239 : vector<8x128xf32>
    %cst_613 = arith.constant 1.100000e+01 : f32
    %1241 = vector.broadcast %cst_613 : f32 to vector<8x128xf32>
    %1242 = arith.subf %1126, %1241 : vector<8x128xf32>
    %cst_614 = arith.constant 0.000000e+00 : f32
    %cst_615 = arith.constant 1.000000e+00 : f32
    %1243 = vector.broadcast %cst_614 : f32 to vector<8x128xf32>
    %1244 = arith.maximumf %1243, %1242 : vector<8x128xf32>
    %1245 = vector.broadcast %cst_615 : f32 to vector<8x128xf32>
    %1246 = arith.minimumf %1245, %1244 : vector<8x128xf32>
    %c2_616 = arith.constant 2 : index
    %c12_617 = arith.constant 12 : index
    %1247 = memref.load %arg1[%c2_616, %c12_617] : memref<8x17xf32, #tpu.memory_space<smem>>
    %1248 = vector.broadcast %1247 : f32 to vector<8x128xf32>
    %1249 = arith.mulf %1248, %1246 : vector<8x128xf32>
    %1250 = arith.addf %1240, %1249 : vector<8x128xf32>
    %cst_618 = arith.constant 1.200000e+01 : f32
    %1251 = vector.broadcast %cst_618 : f32 to vector<8x128xf32>
    %1252 = arith.subf %1126, %1251 : vector<8x128xf32>
    %cst_619 = arith.constant 0.000000e+00 : f32
    %cst_620 = arith.constant 1.000000e+00 : f32
    %1253 = vector.broadcast %cst_619 : f32 to vector<8x128xf32>
    %1254 = arith.maximumf %1253, %1252 : vector<8x128xf32>
    %1255 = vector.broadcast %cst_620 : f32 to vector<8x128xf32>
    %1256 = arith.minimumf %1255, %1254 : vector<8x128xf32>
    %c2_621 = arith.constant 2 : index
    %c13_622 = arith.constant 13 : index
    %1257 = memref.load %arg1[%c2_621, %c13_622] : memref<8x17xf32, #tpu.memory_space<smem>>
    %1258 = vector.broadcast %1257 : f32 to vector<8x128xf32>
    %1259 = arith.mulf %1258, %1256 : vector<8x128xf32>
    %1260 = arith.addf %1250, %1259 : vector<8x128xf32>
    %cst_623 = arith.constant 1.300000e+01 : f32
    %1261 = vector.broadcast %cst_623 : f32 to vector<8x128xf32>
    %1262 = arith.subf %1126, %1261 : vector<8x128xf32>
    %cst_624 = arith.constant 0.000000e+00 : f32
    %cst_625 = arith.constant 1.000000e+00 : f32
    %1263 = vector.broadcast %cst_624 : f32 to vector<8x128xf32>
    %1264 = arith.maximumf %1263, %1262 : vector<8x128xf32>
    %1265 = vector.broadcast %cst_625 : f32 to vector<8x128xf32>
    %1266 = arith.minimumf %1265, %1264 : vector<8x128xf32>
    %c2_626 = arith.constant 2 : index
    %c14_627 = arith.constant 14 : index
    %1267 = memref.load %arg1[%c2_626, %c14_627] : memref<8x17xf32, #tpu.memory_space<smem>>
    %1268 = vector.broadcast %1267 : f32 to vector<8x128xf32>
    %1269 = arith.mulf %1268, %1266 : vector<8x128xf32>
    %1270 = arith.addf %1260, %1269 : vector<8x128xf32>
    %cst_628 = arith.constant 1.400000e+01 : f32
    %1271 = vector.broadcast %cst_628 : f32 to vector<8x128xf32>
    %1272 = arith.subf %1126, %1271 : vector<8x128xf32>
    %cst_629 = arith.constant 0.000000e+00 : f32
    %cst_630 = arith.constant 1.000000e+00 : f32
    %1273 = vector.broadcast %cst_629 : f32 to vector<8x128xf32>
    %1274 = arith.maximumf %1273, %1272 : vector<8x128xf32>
    %1275 = vector.broadcast %cst_630 : f32 to vector<8x128xf32>
    %1276 = arith.minimumf %1275, %1274 : vector<8x128xf32>
    %c2_631 = arith.constant 2 : index
    %c15_632 = arith.constant 15 : index
    %1277 = memref.load %arg1[%c2_631, %c15_632] : memref<8x17xf32, #tpu.memory_space<smem>>
    %1278 = vector.broadcast %1277 : f32 to vector<8x128xf32>
    %1279 = arith.mulf %1278, %1276 : vector<8x128xf32>
    %1280 = arith.addf %1270, %1279 : vector<8x128xf32>
    %cst_633 = arith.constant 1.500000e+01 : f32
    %1281 = vector.broadcast %cst_633 : f32 to vector<8x128xf32>
    %1282 = arith.subf %1126, %1281 : vector<8x128xf32>
    %cst_634 = arith.constant 0.000000e+00 : f32
    %cst_635 = arith.constant 1.000000e+00 : f32
    %1283 = vector.broadcast %cst_634 : f32 to vector<8x128xf32>
    %1284 = arith.maximumf %1283, %1282 : vector<8x128xf32>
    %1285 = vector.broadcast %cst_635 : f32 to vector<8x128xf32>
    %1286 = arith.minimumf %1285, %1284 : vector<8x128xf32>
    %c2_636 = arith.constant 2 : index
    %c16_637 = arith.constant 16 : index
    %1287 = memref.load %arg1[%c2_636, %c16_637] : memref<8x17xf32, #tpu.memory_space<smem>>
    %1288 = vector.broadcast %1287 : f32 to vector<8x128xf32>
    %1289 = arith.mulf %1288, %1286 : vector<8x128xf32>
    %1290 = arith.addf %1280, %1289 : vector<8x128xf32>
    %1291 = arith.mulf %1115, %1290 : vector<8x128xf32>
    %1292 = vector.extract_strided_slice %594 {offsets = [2, 0], sizes = [1, 128], strides = [1, 1]} : vector<8x128xf32> to vector<1x128xf32>
    %c2_638 = arith.constant 2 : index
    %c0_639 = arith.constant 0 : index
    %c0_640 = arith.constant 0 : index
    %1293 = vector.load %arg6[%c2_638, %c0_639, %c0_640] : memref<8x128x128xf32, #tpu.memory_space<vmem>>, vector<1x128x128xf32>
    %1294 = vector.shape_cast %1293 : vector<1x128x128xf32> to vector<128x128xf32>
    %cst_641 = arith.constant dense<0.000000e+00> : vector<8x128xf32>
    %1295 = tpu.matmul %594, %1294, %cst_641 {dimension_numbers = #tpu.dot_dimension_numbers<[1], [0], [0], [1], [0, 0, 1, 1], [], []>} : vector<8x128xf32>, vector<128x128xf32>, vector<8x128xf32> -> vector<8x128xf32>
    %1296 = vector.broadcast %1292 : vector<1x128xf32> to vector<8x128xf32>
    %1297 = arith.subf %1295, %1296 : vector<8x128xf32>
    %1298 = math.absf %1297 : vector<8x128xf32>
    %cst_642 = arith.constant 1.000000e+00 : f32
    %1299 = vector.broadcast %cst_642 : f32 to vector<8x128xf32>
    %1300 = arith.subf %1299, %1298 : vector<8x128xf32>
    %cst_643 = arith.constant 1.600000e+01 : f32
    %1301 = vector.broadcast %cst_643 : f32 to vector<8x128xf32>
    %1302 = arith.mulf %1301, %1300 : vector<8x128xf32>
    %cst_644 = arith.constant 0.000000e+00 : f32
    %1303 = vector.broadcast %cst_644 : f32 to vector<8x128xf32>
    %c2_645 = arith.constant 2 : index
    %c0_646 = arith.constant 0 : index
    %1304 = memref.load %arg1[%c2_645, %c0_646] : memref<8x17xf32, #tpu.memory_space<smem>>
    %1305 = vector.broadcast %1304 : f32 to vector<8x128xf32>
    %1306 = arith.addf %1303, %1305 : vector<8x128xf32>
    %cst_647 = arith.constant 0.000000e+00 : f32
    %1307 = vector.broadcast %cst_647 : f32 to vector<8x128xf32>
    %1308 = arith.subf %1302, %1307 : vector<8x128xf32>
    %cst_648 = arith.constant 0.000000e+00 : f32
    %cst_649 = arith.constant 1.000000e+00 : f32
    %1309 = vector.broadcast %cst_648 : f32 to vector<8x128xf32>
    %1310 = arith.maximumf %1309, %1308 : vector<8x128xf32>
    %1311 = vector.broadcast %cst_649 : f32 to vector<8x128xf32>
    %1312 = arith.minimumf %1311, %1310 : vector<8x128xf32>
    %c2_650 = arith.constant 2 : index
    %c1_651 = arith.constant 1 : index
    %1313 = memref.load %arg1[%c2_650, %c1_651] : memref<8x17xf32, #tpu.memory_space<smem>>
    %1314 = vector.broadcast %1313 : f32 to vector<8x128xf32>
    %1315 = arith.mulf %1314, %1312 : vector<8x128xf32>
    %1316 = arith.addf %1306, %1315 : vector<8x128xf32>
    %cst_652 = arith.constant 1.000000e+00 : f32
    %1317 = vector.broadcast %cst_652 : f32 to vector<8x128xf32>
    %1318 = arith.subf %1302, %1317 : vector<8x128xf32>
    %cst_653 = arith.constant 0.000000e+00 : f32
    %cst_654 = arith.constant 1.000000e+00 : f32
    %1319 = vector.broadcast %cst_653 : f32 to vector<8x128xf32>
    %1320 = arith.maximumf %1319, %1318 : vector<8x128xf32>
    %1321 = vector.broadcast %cst_654 : f32 to vector<8x128xf32>
    %1322 = arith.minimumf %1321, %1320 : vector<8x128xf32>
    %c2_655 = arith.constant 2 : index
    %c2_656 = arith.constant 2 : index
    %1323 = memref.load %arg1[%c2_655, %c2_656] : memref<8x17xf32, #tpu.memory_space<smem>>
    %1324 = vector.broadcast %1323 : f32 to vector<8x128xf32>
    %1325 = arith.mulf %1324, %1322 : vector<8x128xf32>
    %1326 = arith.addf %1316, %1325 : vector<8x128xf32>
    %cst_657 = arith.constant 2.000000e+00 : f32
    %1327 = vector.broadcast %cst_657 : f32 to vector<8x128xf32>
    %1328 = arith.subf %1302, %1327 : vector<8x128xf32>
    %cst_658 = arith.constant 0.000000e+00 : f32
    %cst_659 = arith.constant 1.000000e+00 : f32
    %1329 = vector.broadcast %cst_658 : f32 to vector<8x128xf32>
    %1330 = arith.maximumf %1329, %1328 : vector<8x128xf32>
    %1331 = vector.broadcast %cst_659 : f32 to vector<8x128xf32>
    %1332 = arith.minimumf %1331, %1330 : vector<8x128xf32>
    %c2_660 = arith.constant 2 : index
    %c3_661 = arith.constant 3 : index
    %1333 = memref.load %arg1[%c2_660, %c3_661] : memref<8x17xf32, #tpu.memory_space<smem>>
    %1334 = vector.broadcast %1333 : f32 to vector<8x128xf32>
    %1335 = arith.mulf %1334, %1332 : vector<8x128xf32>
    %1336 = arith.addf %1326, %1335 : vector<8x128xf32>
    %cst_662 = arith.constant 3.000000e+00 : f32
    %1337 = vector.broadcast %cst_662 : f32 to vector<8x128xf32>
    %1338 = arith.subf %1302, %1337 : vector<8x128xf32>
    %cst_663 = arith.constant 0.000000e+00 : f32
    %cst_664 = arith.constant 1.000000e+00 : f32
    %1339 = vector.broadcast %cst_663 : f32 to vector<8x128xf32>
    %1340 = arith.maximumf %1339, %1338 : vector<8x128xf32>
    %1341 = vector.broadcast %cst_664 : f32 to vector<8x128xf32>
    %1342 = arith.minimumf %1341, %1340 : vector<8x128xf32>
    %c2_665 = arith.constant 2 : index
    %c4_666 = arith.constant 4 : index
    %1343 = memref.load %arg1[%c2_665, %c4_666] : memref<8x17xf32, #tpu.memory_space<smem>>
    %1344 = vector.broadcast %1343 : f32 to vector<8x128xf32>
    %1345 = arith.mulf %1344, %1342 : vector<8x128xf32>
    %1346 = arith.addf %1336, %1345 : vector<8x128xf32>
    %cst_667 = arith.constant 4.000000e+00 : f32
    %1347 = vector.broadcast %cst_667 : f32 to vector<8x128xf32>
    %1348 = arith.subf %1302, %1347 : vector<8x128xf32>
    %cst_668 = arith.constant 0.000000e+00 : f32
    %cst_669 = arith.constant 1.000000e+00 : f32
    %1349 = vector.broadcast %cst_668 : f32 to vector<8x128xf32>
    %1350 = arith.maximumf %1349, %1348 : vector<8x128xf32>
    %1351 = vector.broadcast %cst_669 : f32 to vector<8x128xf32>
    %1352 = arith.minimumf %1351, %1350 : vector<8x128xf32>
    %c2_670 = arith.constant 2 : index
    %c5_671 = arith.constant 5 : index
    %1353 = memref.load %arg1[%c2_670, %c5_671] : memref<8x17xf32, #tpu.memory_space<smem>>
    %1354 = vector.broadcast %1353 : f32 to vector<8x128xf32>
    %1355 = arith.mulf %1354, %1352 : vector<8x128xf32>
    %1356 = arith.addf %1346, %1355 : vector<8x128xf32>
    %cst_672 = arith.constant 5.000000e+00 : f32
    %1357 = vector.broadcast %cst_672 : f32 to vector<8x128xf32>
    %1358 = arith.subf %1302, %1357 : vector<8x128xf32>
    %cst_673 = arith.constant 0.000000e+00 : f32
    %cst_674 = arith.constant 1.000000e+00 : f32
    %1359 = vector.broadcast %cst_673 : f32 to vector<8x128xf32>
    %1360 = arith.maximumf %1359, %1358 : vector<8x128xf32>
    %1361 = vector.broadcast %cst_674 : f32 to vector<8x128xf32>
    %1362 = arith.minimumf %1361, %1360 : vector<8x128xf32>
    %c2_675 = arith.constant 2 : index
    %c6_676 = arith.constant 6 : index
    %1363 = memref.load %arg1[%c2_675, %c6_676] : memref<8x17xf32, #tpu.memory_space<smem>>
    %1364 = vector.broadcast %1363 : f32 to vector<8x128xf32>
    %1365 = arith.mulf %1364, %1362 : vector<8x128xf32>
    %1366 = arith.addf %1356, %1365 : vector<8x128xf32>
    %cst_677 = arith.constant 6.000000e+00 : f32
    %1367 = vector.broadcast %cst_677 : f32 to vector<8x128xf32>
    %1368 = arith.subf %1302, %1367 : vector<8x128xf32>
    %cst_678 = arith.constant 0.000000e+00 : f32
    %cst_679 = arith.constant 1.000000e+00 : f32
    %1369 = vector.broadcast %cst_678 : f32 to vector<8x128xf32>
    %1370 = arith.maximumf %1369, %1368 : vector<8x128xf32>
    %1371 = vector.broadcast %cst_679 : f32 to vector<8x128xf32>
    %1372 = arith.minimumf %1371, %1370 : vector<8x128xf32>
    %c2_680 = arith.constant 2 : index
    %c7_681 = arith.constant 7 : index
    %1373 = memref.load %arg1[%c2_680, %c7_681] : memref<8x17xf32, #tpu.memory_space<smem>>
    %1374 = vector.broadcast %1373 : f32 to vector<8x128xf32>
    %1375 = arith.mulf %1374, %1372 : vector<8x128xf32>
    %1376 = arith.addf %1366, %1375 : vector<8x128xf32>
    %cst_682 = arith.constant 7.000000e+00 : f32
    %1377 = vector.broadcast %cst_682 : f32 to vector<8x128xf32>
    %1378 = arith.subf %1302, %1377 : vector<8x128xf32>
    %cst_683 = arith.constant 0.000000e+00 : f32
    %cst_684 = arith.constant 1.000000e+00 : f32
    %1379 = vector.broadcast %cst_683 : f32 to vector<8x128xf32>
    %1380 = arith.maximumf %1379, %1378 : vector<8x128xf32>
    %1381 = vector.broadcast %cst_684 : f32 to vector<8x128xf32>
    %1382 = arith.minimumf %1381, %1380 : vector<8x128xf32>
    %c2_685 = arith.constant 2 : index
    %c8_686 = arith.constant 8 : index
    %1383 = memref.load %arg1[%c2_685, %c8_686] : memref<8x17xf32, #tpu.memory_space<smem>>
    %1384 = vector.broadcast %1383 : f32 to vector<8x128xf32>
    %1385 = arith.mulf %1384, %1382 : vector<8x128xf32>
    %1386 = arith.addf %1376, %1385 : vector<8x128xf32>
    %cst_687 = arith.constant 8.000000e+00 : f32
    %1387 = vector.broadcast %cst_687 : f32 to vector<8x128xf32>
    %1388 = arith.subf %1302, %1387 : vector<8x128xf32>
    %cst_688 = arith.constant 0.000000e+00 : f32
    %cst_689 = arith.constant 1.000000e+00 : f32
    %1389 = vector.broadcast %cst_688 : f32 to vector<8x128xf32>
    %1390 = arith.maximumf %1389, %1388 : vector<8x128xf32>
    %1391 = vector.broadcast %cst_689 : f32 to vector<8x128xf32>
    %1392 = arith.minimumf %1391, %1390 : vector<8x128xf32>
    %c2_690 = arith.constant 2 : index
    %c9_691 = arith.constant 9 : index
    %1393 = memref.load %arg1[%c2_690, %c9_691] : memref<8x17xf32, #tpu.memory_space<smem>>
    %1394 = vector.broadcast %1393 : f32 to vector<8x128xf32>
    %1395 = arith.mulf %1394, %1392 : vector<8x128xf32>
    %1396 = arith.addf %1386, %1395 : vector<8x128xf32>
    %cst_692 = arith.constant 9.000000e+00 : f32
    %1397 = vector.broadcast %cst_692 : f32 to vector<8x128xf32>
    %1398 = arith.subf %1302, %1397 : vector<8x128xf32>
    %cst_693 = arith.constant 0.000000e+00 : f32
    %cst_694 = arith.constant 1.000000e+00 : f32
    %1399 = vector.broadcast %cst_693 : f32 to vector<8x128xf32>
    %1400 = arith.maximumf %1399, %1398 : vector<8x128xf32>
    %1401 = vector.broadcast %cst_694 : f32 to vector<8x128xf32>
    %1402 = arith.minimumf %1401, %1400 : vector<8x128xf32>
    %c2_695 = arith.constant 2 : index
    %c10_696 = arith.constant 10 : index
    %1403 = memref.load %arg1[%c2_695, %c10_696] : memref<8x17xf32, #tpu.memory_space<smem>>
    %1404 = vector.broadcast %1403 : f32 to vector<8x128xf32>
    %1405 = arith.mulf %1404, %1402 : vector<8x128xf32>
    %1406 = arith.addf %1396, %1405 : vector<8x128xf32>
    %cst_697 = arith.constant 1.000000e+01 : f32
    %1407 = vector.broadcast %cst_697 : f32 to vector<8x128xf32>
    %1408 = arith.subf %1302, %1407 : vector<8x128xf32>
    %cst_698 = arith.constant 0.000000e+00 : f32
    %cst_699 = arith.constant 1.000000e+00 : f32
    %1409 = vector.broadcast %cst_698 : f32 to vector<8x128xf32>
    %1410 = arith.maximumf %1409, %1408 : vector<8x128xf32>
    %1411 = vector.broadcast %cst_699 : f32 to vector<8x128xf32>
    %1412 = arith.minimumf %1411, %1410 : vector<8x128xf32>
    %c2_700 = arith.constant 2 : index
    %c11_701 = arith.constant 11 : index
    %1413 = memref.load %arg1[%c2_700, %c11_701] : memref<8x17xf32, #tpu.memory_space<smem>>
    %1414 = vector.broadcast %1413 : f32 to vector<8x128xf32>
    %1415 = arith.mulf %1414, %1412 : vector<8x128xf32>
    %1416 = arith.addf %1406, %1415 : vector<8x128xf32>
    %cst_702 = arith.constant 1.100000e+01 : f32
    %1417 = vector.broadcast %cst_702 : f32 to vector<8x128xf32>
    %1418 = arith.subf %1302, %1417 : vector<8x128xf32>
    %cst_703 = arith.constant 0.000000e+00 : f32
    %cst_704 = arith.constant 1.000000e+00 : f32
    %1419 = vector.broadcast %cst_703 : f32 to vector<8x128xf32>
    %1420 = arith.maximumf %1419, %1418 : vector<8x128xf32>
    %1421 = vector.broadcast %cst_704 : f32 to vector<8x128xf32>
    %1422 = arith.minimumf %1421, %1420 : vector<8x128xf32>
    %c2_705 = arith.constant 2 : index
    %c12_706 = arith.constant 12 : index
    %1423 = memref.load %arg1[%c2_705, %c12_706] : memref<8x17xf32, #tpu.memory_space<smem>>
    %1424 = vector.broadcast %1423 : f32 to vector<8x128xf32>
    %1425 = arith.mulf %1424, %1422 : vector<8x128xf32>
    %1426 = arith.addf %1416, %1425 : vector<8x128xf32>
    %cst_707 = arith.constant 1.200000e+01 : f32
    %1427 = vector.broadcast %cst_707 : f32 to vector<8x128xf32>
    %1428 = arith.subf %1302, %1427 : vector<8x128xf32>
    %cst_708 = arith.constant 0.000000e+00 : f32
    %cst_709 = arith.constant 1.000000e+00 : f32
    %1429 = vector.broadcast %cst_708 : f32 to vector<8x128xf32>
    %1430 = arith.maximumf %1429, %1428 : vector<8x128xf32>
    %1431 = vector.broadcast %cst_709 : f32 to vector<8x128xf32>
    %1432 = arith.minimumf %1431, %1430 : vector<8x128xf32>
    %c2_710 = arith.constant 2 : index
    %c13_711 = arith.constant 13 : index
    %1433 = memref.load %arg1[%c2_710, %c13_711] : memref<8x17xf32, #tpu.memory_space<smem>>
    %1434 = vector.broadcast %1433 : f32 to vector<8x128xf32>
    %1435 = arith.mulf %1434, %1432 : vector<8x128xf32>
    %1436 = arith.addf %1426, %1435 : vector<8x128xf32>
    %cst_712 = arith.constant 1.300000e+01 : f32
    %1437 = vector.broadcast %cst_712 : f32 to vector<8x128xf32>
    %1438 = arith.subf %1302, %1437 : vector<8x128xf32>
    %cst_713 = arith.constant 0.000000e+00 : f32
    %cst_714 = arith.constant 1.000000e+00 : f32
    %1439 = vector.broadcast %cst_713 : f32 to vector<8x128xf32>
    %1440 = arith.maximumf %1439, %1438 : vector<8x128xf32>
    %1441 = vector.broadcast %cst_714 : f32 to vector<8x128xf32>
    %1442 = arith.minimumf %1441, %1440 : vector<8x128xf32>
    %c2_715 = arith.constant 2 : index
    %c14_716 = arith.constant 14 : index
    %1443 = memref.load %arg1[%c2_715, %c14_716] : memref<8x17xf32, #tpu.memory_space<smem>>
    %1444 = vector.broadcast %1443 : f32 to vector<8x128xf32>
    %1445 = arith.mulf %1444, %1442 : vector<8x128xf32>
    %1446 = arith.addf %1436, %1445 : vector<8x128xf32>
    %cst_717 = arith.constant 1.400000e+01 : f32
    %1447 = vector.broadcast %cst_717 : f32 to vector<8x128xf32>
    %1448 = arith.subf %1302, %1447 : vector<8x128xf32>
    %cst_718 = arith.constant 0.000000e+00 : f32
    %cst_719 = arith.constant 1.000000e+00 : f32
    %1449 = vector.broadcast %cst_718 : f32 to vector<8x128xf32>
    %1450 = arith.maximumf %1449, %1448 : vector<8x128xf32>
    %1451 = vector.broadcast %cst_719 : f32 to vector<8x128xf32>
    %1452 = arith.minimumf %1451, %1450 : vector<8x128xf32>
    %c2_720 = arith.constant 2 : index
    %c15_721 = arith.constant 15 : index
    %1453 = memref.load %arg1[%c2_720, %c15_721] : memref<8x17xf32, #tpu.memory_space<smem>>
    %1454 = vector.broadcast %1453 : f32 to vector<8x128xf32>
    %1455 = arith.mulf %1454, %1452 : vector<8x128xf32>
    %1456 = arith.addf %1446, %1455 : vector<8x128xf32>
    %cst_722 = arith.constant 1.500000e+01 : f32
    %1457 = vector.broadcast %cst_722 : f32 to vector<8x128xf32>
    %1458 = arith.subf %1302, %1457 : vector<8x128xf32>
    %cst_723 = arith.constant 0.000000e+00 : f32
    %cst_724 = arith.constant 1.000000e+00 : f32
    %1459 = vector.broadcast %cst_723 : f32 to vector<8x128xf32>
    %1460 = arith.maximumf %1459, %1458 : vector<8x128xf32>
    %1461 = vector.broadcast %cst_724 : f32 to vector<8x128xf32>
    %1462 = arith.minimumf %1461, %1460 : vector<8x128xf32>
    %c2_725 = arith.constant 2 : index
    %c16_726 = arith.constant 16 : index
    %1463 = memref.load %arg1[%c2_725, %c16_726] : memref<8x17xf32, #tpu.memory_space<smem>>
    %1464 = vector.broadcast %1463 : f32 to vector<8x128xf32>
    %1465 = arith.mulf %1464, %1462 : vector<8x128xf32>
    %1466 = arith.addf %1456, %1465 : vector<8x128xf32>
    %1467 = arith.mulf %1291, %1466 : vector<8x128xf32>
    %1468 = vector.extract_strided_slice %594 {offsets = [3, 0], sizes = [1, 128], strides = [1, 1]} : vector<8x128xf32> to vector<1x128xf32>
    %c3_727 = arith.constant 3 : index
    %c0_728 = arith.constant 0 : index
    %c0_729 = arith.constant 0 : index
    %1469 = vector.load %arg6[%c3_727, %c0_728, %c0_729] : memref<8x128x128xf32, #tpu.memory_space<vmem>>, vector<1x128x128xf32>
    %1470 = vector.shape_cast %1469 : vector<1x128x128xf32> to vector<128x128xf32>
    %cst_730 = arith.constant dense<0.000000e+00> : vector<8x128xf32>
    %1471 = tpu.matmul %594, %1470, %cst_730 {dimension_numbers = #tpu.dot_dimension_numbers<[1], [0], [0], [1], [0, 0, 1, 1], [], []>} : vector<8x128xf32>, vector<128x128xf32>, vector<8x128xf32> -> vector<8x128xf32>
    %1472 = vector.broadcast %1468 : vector<1x128xf32> to vector<8x128xf32>
    %1473 = arith.subf %1471, %1472 : vector<8x128xf32>
    %1474 = math.absf %1473 : vector<8x128xf32>
    %cst_731 = arith.constant 1.000000e+00 : f32
    %1475 = vector.broadcast %cst_731 : f32 to vector<8x128xf32>
    %1476 = arith.subf %1475, %1474 : vector<8x128xf32>
    %cst_732 = arith.constant 1.600000e+01 : f32
    %1477 = vector.broadcast %cst_732 : f32 to vector<8x128xf32>
    %1478 = arith.mulf %1477, %1476 : vector<8x128xf32>
    %cst_733 = arith.constant 0.000000e+00 : f32
    %1479 = vector.broadcast %cst_733 : f32 to vector<8x128xf32>
    %c2_734 = arith.constant 2 : index
    %c0_735 = arith.constant 0 : index
    %1480 = memref.load %arg1[%c2_734, %c0_735] : memref<8x17xf32, #tpu.memory_space<smem>>
    %1481 = vector.broadcast %1480 : f32 to vector<8x128xf32>
    %1482 = arith.addf %1479, %1481 : vector<8x128xf32>
    %cst_736 = arith.constant 0.000000e+00 : f32
    %1483 = vector.broadcast %cst_736 : f32 to vector<8x128xf32>
    %1484 = arith.subf %1478, %1483 : vector<8x128xf32>
    %cst_737 = arith.constant 0.000000e+00 : f32
    %cst_738 = arith.constant 1.000000e+00 : f32
    %1485 = vector.broadcast %cst_737 : f32 to vector<8x128xf32>
    %1486 = arith.maximumf %1485, %1484 : vector<8x128xf32>
    %1487 = vector.broadcast %cst_738 : f32 to vector<8x128xf32>
    %1488 = arith.minimumf %1487, %1486 : vector<8x128xf32>
    %c2_739 = arith.constant 2 : index
    %c1_740 = arith.constant 1 : index
    %1489 = memref.load %arg1[%c2_739, %c1_740] : memref<8x17xf32, #tpu.memory_space<smem>>
    %1490 = vector.broadcast %1489 : f32 to vector<8x128xf32>
    %1491 = arith.mulf %1490, %1488 : vector<8x128xf32>
    %1492 = arith.addf %1482, %1491 : vector<8x128xf32>
    %cst_741 = arith.constant 1.000000e+00 : f32
    %1493 = vector.broadcast %cst_741 : f32 to vector<8x128xf32>
    %1494 = arith.subf %1478, %1493 : vector<8x128xf32>
    %cst_742 = arith.constant 0.000000e+00 : f32
    %cst_743 = arith.constant 1.000000e+00 : f32
    %1495 = vector.broadcast %cst_742 : f32 to vector<8x128xf32>
    %1496 = arith.maximumf %1495, %1494 : vector<8x128xf32>
    %1497 = vector.broadcast %cst_743 : f32 to vector<8x128xf32>
    %1498 = arith.minimumf %1497, %1496 : vector<8x128xf32>
    %c2_744 = arith.constant 2 : index
    %c2_745 = arith.constant 2 : index
    %1499 = memref.load %arg1[%c2_744, %c2_745] : memref<8x17xf32, #tpu.memory_space<smem>>
    %1500 = vector.broadcast %1499 : f32 to vector<8x128xf32>
    %1501 = arith.mulf %1500, %1498 : vector<8x128xf32>
    %1502 = arith.addf %1492, %1501 : vector<8x128xf32>
    %cst_746 = arith.constant 2.000000e+00 : f32
    %1503 = vector.broadcast %cst_746 : f32 to vector<8x128xf32>
    %1504 = arith.subf %1478, %1503 : vector<8x128xf32>
    %cst_747 = arith.constant 0.000000e+00 : f32
    %cst_748 = arith.constant 1.000000e+00 : f32
    %1505 = vector.broadcast %cst_747 : f32 to vector<8x128xf32>
    %1506 = arith.maximumf %1505, %1504 : vector<8x128xf32>
    %1507 = vector.broadcast %cst_748 : f32 to vector<8x128xf32>
    %1508 = arith.minimumf %1507, %1506 : vector<8x128xf32>
    %c2_749 = arith.constant 2 : index
    %c3_750 = arith.constant 3 : index
    %1509 = memref.load %arg1[%c2_749, %c3_750] : memref<8x17xf32, #tpu.memory_space<smem>>
    %1510 = vector.broadcast %1509 : f32 to vector<8x128xf32>
    %1511 = arith.mulf %1510, %1508 : vector<8x128xf32>
    %1512 = arith.addf %1502, %1511 : vector<8x128xf32>
    %cst_751 = arith.constant 3.000000e+00 : f32
    %1513 = vector.broadcast %cst_751 : f32 to vector<8x128xf32>
    %1514 = arith.subf %1478, %1513 : vector<8x128xf32>
    %cst_752 = arith.constant 0.000000e+00 : f32
    %cst_753 = arith.constant 1.000000e+00 : f32
    %1515 = vector.broadcast %cst_752 : f32 to vector<8x128xf32>
    %1516 = arith.maximumf %1515, %1514 : vector<8x128xf32>
    %1517 = vector.broadcast %cst_753 : f32 to vector<8x128xf32>
    %1518 = arith.minimumf %1517, %1516 : vector<8x128xf32>
    %c2_754 = arith.constant 2 : index
    %c4_755 = arith.constant 4 : index
    %1519 = memref.load %arg1[%c2_754, %c4_755] : memref<8x17xf32, #tpu.memory_space<smem>>
    %1520 = vector.broadcast %1519 : f32 to vector<8x128xf32>
    %1521 = arith.mulf %1520, %1518 : vector<8x128xf32>
    %1522 = arith.addf %1512, %1521 : vector<8x128xf32>
    %cst_756 = arith.constant 4.000000e+00 : f32
    %1523 = vector.broadcast %cst_756 : f32 to vector<8x128xf32>
    %1524 = arith.subf %1478, %1523 : vector<8x128xf32>
    %cst_757 = arith.constant 0.000000e+00 : f32
    %cst_758 = arith.constant 1.000000e+00 : f32
    %1525 = vector.broadcast %cst_757 : f32 to vector<8x128xf32>
    %1526 = arith.maximumf %1525, %1524 : vector<8x128xf32>
    %1527 = vector.broadcast %cst_758 : f32 to vector<8x128xf32>
    %1528 = arith.minimumf %1527, %1526 : vector<8x128xf32>
    %c2_759 = arith.constant 2 : index
    %c5_760 = arith.constant 5 : index
    %1529 = memref.load %arg1[%c2_759, %c5_760] : memref<8x17xf32, #tpu.memory_space<smem>>
    %1530 = vector.broadcast %1529 : f32 to vector<8x128xf32>
    %1531 = arith.mulf %1530, %1528 : vector<8x128xf32>
    %1532 = arith.addf %1522, %1531 : vector<8x128xf32>
    %cst_761 = arith.constant 5.000000e+00 : f32
    %1533 = vector.broadcast %cst_761 : f32 to vector<8x128xf32>
    %1534 = arith.subf %1478, %1533 : vector<8x128xf32>
    %cst_762 = arith.constant 0.000000e+00 : f32
    %cst_763 = arith.constant 1.000000e+00 : f32
    %1535 = vector.broadcast %cst_762 : f32 to vector<8x128xf32>
    %1536 = arith.maximumf %1535, %1534 : vector<8x128xf32>
    %1537 = vector.broadcast %cst_763 : f32 to vector<8x128xf32>
    %1538 = arith.minimumf %1537, %1536 : vector<8x128xf32>
    %c2_764 = arith.constant 2 : index
    %c6_765 = arith.constant 6 : index
    %1539 = memref.load %arg1[%c2_764, %c6_765] : memref<8x17xf32, #tpu.memory_space<smem>>
    %1540 = vector.broadcast %1539 : f32 to vector<8x128xf32>
    %1541 = arith.mulf %1540, %1538 : vector<8x128xf32>
    %1542 = arith.addf %1532, %1541 : vector<8x128xf32>
    %cst_766 = arith.constant 6.000000e+00 : f32
    %1543 = vector.broadcast %cst_766 : f32 to vector<8x128xf32>
    %1544 = arith.subf %1478, %1543 : vector<8x128xf32>
    %cst_767 = arith.constant 0.000000e+00 : f32
    %cst_768 = arith.constant 1.000000e+00 : f32
    %1545 = vector.broadcast %cst_767 : f32 to vector<8x128xf32>
    %1546 = arith.maximumf %1545, %1544 : vector<8x128xf32>
    %1547 = vector.broadcast %cst_768 : f32 to vector<8x128xf32>
    %1548 = arith.minimumf %1547, %1546 : vector<8x128xf32>
    %c2_769 = arith.constant 2 : index
    %c7_770 = arith.constant 7 : index
    %1549 = memref.load %arg1[%c2_769, %c7_770] : memref<8x17xf32, #tpu.memory_space<smem>>
    %1550 = vector.broadcast %1549 : f32 to vector<8x128xf32>
    %1551 = arith.mulf %1550, %1548 : vector<8x128xf32>
    %1552 = arith.addf %1542, %1551 : vector<8x128xf32>
    %cst_771 = arith.constant 7.000000e+00 : f32
    %1553 = vector.broadcast %cst_771 : f32 to vector<8x128xf32>
    %1554 = arith.subf %1478, %1553 : vector<8x128xf32>
    %cst_772 = arith.constant 0.000000e+00 : f32
    %cst_773 = arith.constant 1.000000e+00 : f32
    %1555 = vector.broadcast %cst_772 : f32 to vector<8x128xf32>
    %1556 = arith.maximumf %1555, %1554 : vector<8x128xf32>
    %1557 = vector.broadcast %cst_773 : f32 to vector<8x128xf32>
    %1558 = arith.minimumf %1557, %1556 : vector<8x128xf32>
    %c2_774 = arith.constant 2 : index
    %c8_775 = arith.constant 8 : index
    %1559 = memref.load %arg1[%c2_774, %c8_775] : memref<8x17xf32, #tpu.memory_space<smem>>
    %1560 = vector.broadcast %1559 : f32 to vector<8x128xf32>
    %1561 = arith.mulf %1560, %1558 : vector<8x128xf32>
    %1562 = arith.addf %1552, %1561 : vector<8x128xf32>
    %cst_776 = arith.constant 8.000000e+00 : f32
    %1563 = vector.broadcast %cst_776 : f32 to vector<8x128xf32>
    %1564 = arith.subf %1478, %1563 : vector<8x128xf32>
    %cst_777 = arith.constant 0.000000e+00 : f32
    %cst_778 = arith.constant 1.000000e+00 : f32
    %1565 = vector.broadcast %cst_777 : f32 to vector<8x128xf32>
    %1566 = arith.maximumf %1565, %1564 : vector<8x128xf32>
    %1567 = vector.broadcast %cst_778 : f32 to vector<8x128xf32>
    %1568 = arith.minimumf %1567, %1566 : vector<8x128xf32>
    %c2_779 = arith.constant 2 : index
    %c9_780 = arith.constant 9 : index
    %1569 = memref.load %arg1[%c2_779, %c9_780] : memref<8x17xf32, #tpu.memory_space<smem>>
    %1570 = vector.broadcast %1569 : f32 to vector<8x128xf32>
    %1571 = arith.mulf %1570, %1568 : vector<8x128xf32>
    %1572 = arith.addf %1562, %1571 : vector<8x128xf32>
    %cst_781 = arith.constant 9.000000e+00 : f32
    %1573 = vector.broadcast %cst_781 : f32 to vector<8x128xf32>
    %1574 = arith.subf %1478, %1573 : vector<8x128xf32>
    %cst_782 = arith.constant 0.000000e+00 : f32
    %cst_783 = arith.constant 1.000000e+00 : f32
    %1575 = vector.broadcast %cst_782 : f32 to vector<8x128xf32>
    %1576 = arith.maximumf %1575, %1574 : vector<8x128xf32>
    %1577 = vector.broadcast %cst_783 : f32 to vector<8x128xf32>
    %1578 = arith.minimumf %1577, %1576 : vector<8x128xf32>
    %c2_784 = arith.constant 2 : index
    %c10_785 = arith.constant 10 : index
    %1579 = memref.load %arg1[%c2_784, %c10_785] : memref<8x17xf32, #tpu.memory_space<smem>>
    %1580 = vector.broadcast %1579 : f32 to vector<8x128xf32>
    %1581 = arith.mulf %1580, %1578 : vector<8x128xf32>
    %1582 = arith.addf %1572, %1581 : vector<8x128xf32>
    %cst_786 = arith.constant 1.000000e+01 : f32
    %1583 = vector.broadcast %cst_786 : f32 to vector<8x128xf32>
    %1584 = arith.subf %1478, %1583 : vector<8x128xf32>
    %cst_787 = arith.constant 0.000000e+00 : f32
    %cst_788 = arith.constant 1.000000e+00 : f32
    %1585 = vector.broadcast %cst_787 : f32 to vector<8x128xf32>
    %1586 = arith.maximumf %1585, %1584 : vector<8x128xf32>
    %1587 = vector.broadcast %cst_788 : f32 to vector<8x128xf32>
    %1588 = arith.minimumf %1587, %1586 : vector<8x128xf32>
    %c2_789 = arith.constant 2 : index
    %c11_790 = arith.constant 11 : index
    %1589 = memref.load %arg1[%c2_789, %c11_790] : memref<8x17xf32, #tpu.memory_space<smem>>
    %1590 = vector.broadcast %1589 : f32 to vector<8x128xf32>
    %1591 = arith.mulf %1590, %1588 : vector<8x128xf32>
    %1592 = arith.addf %1582, %1591 : vector<8x128xf32>
    %cst_791 = arith.constant 1.100000e+01 : f32
    %1593 = vector.broadcast %cst_791 : f32 to vector<8x128xf32>
    %1594 = arith.subf %1478, %1593 : vector<8x128xf32>
    %cst_792 = arith.constant 0.000000e+00 : f32
    %cst_793 = arith.constant 1.000000e+00 : f32
    %1595 = vector.broadcast %cst_792 : f32 to vector<8x128xf32>
    %1596 = arith.maximumf %1595, %1594 : vector<8x128xf32>
    %1597 = vector.broadcast %cst_793 : f32 to vector<8x128xf32>
    %1598 = arith.minimumf %1597, %1596 : vector<8x128xf32>
    %c2_794 = arith.constant 2 : index
    %c12_795 = arith.constant 12 : index
    %1599 = memref.load %arg1[%c2_794, %c12_795] : memref<8x17xf32, #tpu.memory_space<smem>>
    %1600 = vector.broadcast %1599 : f32 to vector<8x128xf32>
    %1601 = arith.mulf %1600, %1598 : vector<8x128xf32>
    %1602 = arith.addf %1592, %1601 : vector<8x128xf32>
    %cst_796 = arith.constant 1.200000e+01 : f32
    %1603 = vector.broadcast %cst_796 : f32 to vector<8x128xf32>
    %1604 = arith.subf %1478, %1603 : vector<8x128xf32>
    %cst_797 = arith.constant 0.000000e+00 : f32
    %cst_798 = arith.constant 1.000000e+00 : f32
    %1605 = vector.broadcast %cst_797 : f32 to vector<8x128xf32>
    %1606 = arith.maximumf %1605, %1604 : vector<8x128xf32>
    %1607 = vector.broadcast %cst_798 : f32 to vector<8x128xf32>
    %1608 = arith.minimumf %1607, %1606 : vector<8x128xf32>
    %c2_799 = arith.constant 2 : index
    %c13_800 = arith.constant 13 : index
    %1609 = memref.load %arg1[%c2_799, %c13_800] : memref<8x17xf32, #tpu.memory_space<smem>>
    %1610 = vector.broadcast %1609 : f32 to vector<8x128xf32>
    %1611 = arith.mulf %1610, %1608 : vector<8x128xf32>
    %1612 = arith.addf %1602, %1611 : vector<8x128xf32>
    %cst_801 = arith.constant 1.300000e+01 : f32
    %1613 = vector.broadcast %cst_801 : f32 to vector<8x128xf32>
    %1614 = arith.subf %1478, %1613 : vector<8x128xf32>
    %cst_802 = arith.constant 0.000000e+00 : f32
    %cst_803 = arith.constant 1.000000e+00 : f32
    %1615 = vector.broadcast %cst_802 : f32 to vector<8x128xf32>
    %1616 = arith.maximumf %1615, %1614 : vector<8x128xf32>
    %1617 = vector.broadcast %cst_803 : f32 to vector<8x128xf32>
    %1618 = arith.minimumf %1617, %1616 : vector<8x128xf32>
    %c2_804 = arith.constant 2 : index
    %c14_805 = arith.constant 14 : index
    %1619 = memref.load %arg1[%c2_804, %c14_805] : memref<8x17xf32, #tpu.memory_space<smem>>
    %1620 = vector.broadcast %1619 : f32 to vector<8x128xf32>
    %1621 = arith.mulf %1620, %1618 : vector<8x128xf32>
    %1622 = arith.addf %1612, %1621 : vector<8x128xf32>
    %cst_806 = arith.constant 1.400000e+01 : f32
    %1623 = vector.broadcast %cst_806 : f32 to vector<8x128xf32>
    %1624 = arith.subf %1478, %1623 : vector<8x128xf32>
    %cst_807 = arith.constant 0.000000e+00 : f32
    %cst_808 = arith.constant 1.000000e+00 : f32
    %1625 = vector.broadcast %cst_807 : f32 to vector<8x128xf32>
    %1626 = arith.maximumf %1625, %1624 : vector<8x128xf32>
    %1627 = vector.broadcast %cst_808 : f32 to vector<8x128xf32>
    %1628 = arith.minimumf %1627, %1626 : vector<8x128xf32>
    %c2_809 = arith.constant 2 : index
    %c15_810 = arith.constant 15 : index
    %1629 = memref.load %arg1[%c2_809, %c15_810] : memref<8x17xf32, #tpu.memory_space<smem>>
    %1630 = vector.broadcast %1629 : f32 to vector<8x128xf32>
    %1631 = arith.mulf %1630, %1628 : vector<8x128xf32>
    %1632 = arith.addf %1622, %1631 : vector<8x128xf32>
    %cst_811 = arith.constant 1.500000e+01 : f32
    %1633 = vector.broadcast %cst_811 : f32 to vector<8x128xf32>
    %1634 = arith.subf %1478, %1633 : vector<8x128xf32>
    %cst_812 = arith.constant 0.000000e+00 : f32
    %cst_813 = arith.constant 1.000000e+00 : f32
    %1635 = vector.broadcast %cst_812 : f32 to vector<8x128xf32>
    %1636 = arith.maximumf %1635, %1634 : vector<8x128xf32>
    %1637 = vector.broadcast %cst_813 : f32 to vector<8x128xf32>
    %1638 = arith.minimumf %1637, %1636 : vector<8x128xf32>
    %c2_814 = arith.constant 2 : index
    %c16_815 = arith.constant 16 : index
    %1639 = memref.load %arg1[%c2_814, %c16_815] : memref<8x17xf32, #tpu.memory_space<smem>>
    %1640 = vector.broadcast %1639 : f32 to vector<8x128xf32>
    %1641 = arith.mulf %1640, %1638 : vector<8x128xf32>
    %1642 = arith.addf %1632, %1641 : vector<8x128xf32>
    %1643 = arith.mulf %1467, %1642 : vector<8x128xf32>
    %1644 = vector.extract_strided_slice %594 {offsets = [4, 0], sizes = [1, 128], strides = [1, 1]} : vector<8x128xf32> to vector<1x128xf32>
    %c4_816 = arith.constant 4 : index
    %c0_817 = arith.constant 0 : index
    %c0_818 = arith.constant 0 : index
    %1645 = vector.load %arg6[%c4_816, %c0_817, %c0_818] : memref<8x128x128xf32, #tpu.memory_space<vmem>>, vector<1x128x128xf32>
    %1646 = vector.shape_cast %1645 : vector<1x128x128xf32> to vector<128x128xf32>
    %cst_819 = arith.constant dense<0.000000e+00> : vector<8x128xf32>
    %1647 = tpu.matmul %594, %1646, %cst_819 {dimension_numbers = #tpu.dot_dimension_numbers<[1], [0], [0], [1], [0, 0, 1, 1], [], []>} : vector<8x128xf32>, vector<128x128xf32>, vector<8x128xf32> -> vector<8x128xf32>
    %1648 = vector.broadcast %1644 : vector<1x128xf32> to vector<8x128xf32>
    %1649 = arith.subf %1647, %1648 : vector<8x128xf32>
    %1650 = math.absf %1649 : vector<8x128xf32>
    %cst_820 = arith.constant 1.000000e+00 : f32
    %1651 = vector.broadcast %cst_820 : f32 to vector<8x128xf32>
    %1652 = arith.subf %1651, %1650 : vector<8x128xf32>
    %cst_821 = arith.constant 1.600000e+01 : f32
    %1653 = vector.broadcast %cst_821 : f32 to vector<8x128xf32>
    %1654 = arith.mulf %1653, %1652 : vector<8x128xf32>
    %cst_822 = arith.constant 0.000000e+00 : f32
    %1655 = vector.broadcast %cst_822 : f32 to vector<8x128xf32>
    %c2_823 = arith.constant 2 : index
    %c0_824 = arith.constant 0 : index
    %1656 = memref.load %arg1[%c2_823, %c0_824] : memref<8x17xf32, #tpu.memory_space<smem>>
    %1657 = vector.broadcast %1656 : f32 to vector<8x128xf32>
    %1658 = arith.addf %1655, %1657 : vector<8x128xf32>
    %cst_825 = arith.constant 0.000000e+00 : f32
    %1659 = vector.broadcast %cst_825 : f32 to vector<8x128xf32>
    %1660 = arith.subf %1654, %1659 : vector<8x128xf32>
    %cst_826 = arith.constant 0.000000e+00 : f32
    %cst_827 = arith.constant 1.000000e+00 : f32
    %1661 = vector.broadcast %cst_826 : f32 to vector<8x128xf32>
    %1662 = arith.maximumf %1661, %1660 : vector<8x128xf32>
    %1663 = vector.broadcast %cst_827 : f32 to vector<8x128xf32>
    %1664 = arith.minimumf %1663, %1662 : vector<8x128xf32>
    %c2_828 = arith.constant 2 : index
    %c1_829 = arith.constant 1 : index
    %1665 = memref.load %arg1[%c2_828, %c1_829] : memref<8x17xf32, #tpu.memory_space<smem>>
    %1666 = vector.broadcast %1665 : f32 to vector<8x128xf32>
    %1667 = arith.mulf %1666, %1664 : vector<8x128xf32>
    %1668 = arith.addf %1658, %1667 : vector<8x128xf32>
    %cst_830 = arith.constant 1.000000e+00 : f32
    %1669 = vector.broadcast %cst_830 : f32 to vector<8x128xf32>
    %1670 = arith.subf %1654, %1669 : vector<8x128xf32>
    %cst_831 = arith.constant 0.000000e+00 : f32
    %cst_832 = arith.constant 1.000000e+00 : f32
    %1671 = vector.broadcast %cst_831 : f32 to vector<8x128xf32>
    %1672 = arith.maximumf %1671, %1670 : vector<8x128xf32>
    %1673 = vector.broadcast %cst_832 : f32 to vector<8x128xf32>
    %1674 = arith.minimumf %1673, %1672 : vector<8x128xf32>
    %c2_833 = arith.constant 2 : index
    %c2_834 = arith.constant 2 : index
    %1675 = memref.load %arg1[%c2_833, %c2_834] : memref<8x17xf32, #tpu.memory_space<smem>>
    %1676 = vector.broadcast %1675 : f32 to vector<8x128xf32>
    %1677 = arith.mulf %1676, %1674 : vector<8x128xf32>
    %1678 = arith.addf %1668, %1677 : vector<8x128xf32>
    %cst_835 = arith.constant 2.000000e+00 : f32
    %1679 = vector.broadcast %cst_835 : f32 to vector<8x128xf32>
    %1680 = arith.subf %1654, %1679 : vector<8x128xf32>
    %cst_836 = arith.constant 0.000000e+00 : f32
    %cst_837 = arith.constant 1.000000e+00 : f32
    %1681 = vector.broadcast %cst_836 : f32 to vector<8x128xf32>
    %1682 = arith.maximumf %1681, %1680 : vector<8x128xf32>
    %1683 = vector.broadcast %cst_837 : f32 to vector<8x128xf32>
    %1684 = arith.minimumf %1683, %1682 : vector<8x128xf32>
    %c2_838 = arith.constant 2 : index
    %c3_839 = arith.constant 3 : index
    %1685 = memref.load %arg1[%c2_838, %c3_839] : memref<8x17xf32, #tpu.memory_space<smem>>
    %1686 = vector.broadcast %1685 : f32 to vector<8x128xf32>
    %1687 = arith.mulf %1686, %1684 : vector<8x128xf32>
    %1688 = arith.addf %1678, %1687 : vector<8x128xf32>
    %cst_840 = arith.constant 3.000000e+00 : f32
    %1689 = vector.broadcast %cst_840 : f32 to vector<8x128xf32>
    %1690 = arith.subf %1654, %1689 : vector<8x128xf32>
    %cst_841 = arith.constant 0.000000e+00 : f32
    %cst_842 = arith.constant 1.000000e+00 : f32
    %1691 = vector.broadcast %cst_841 : f32 to vector<8x128xf32>
    %1692 = arith.maximumf %1691, %1690 : vector<8x128xf32>
    %1693 = vector.broadcast %cst_842 : f32 to vector<8x128xf32>
    %1694 = arith.minimumf %1693, %1692 : vector<8x128xf32>
    %c2_843 = arith.constant 2 : index
    %c4_844 = arith.constant 4 : index
    %1695 = memref.load %arg1[%c2_843, %c4_844] : memref<8x17xf32, #tpu.memory_space<smem>>
    %1696 = vector.broadcast %1695 : f32 to vector<8x128xf32>
    %1697 = arith.mulf %1696, %1694 : vector<8x128xf32>
    %1698 = arith.addf %1688, %1697 : vector<8x128xf32>
    %cst_845 = arith.constant 4.000000e+00 : f32
    %1699 = vector.broadcast %cst_845 : f32 to vector<8x128xf32>
    %1700 = arith.subf %1654, %1699 : vector<8x128xf32>
    %cst_846 = arith.constant 0.000000e+00 : f32
    %cst_847 = arith.constant 1.000000e+00 : f32
    %1701 = vector.broadcast %cst_846 : f32 to vector<8x128xf32>
    %1702 = arith.maximumf %1701, %1700 : vector<8x128xf32>
    %1703 = vector.broadcast %cst_847 : f32 to vector<8x128xf32>
    %1704 = arith.minimumf %1703, %1702 : vector<8x128xf32>
    %c2_848 = arith.constant 2 : index
    %c5_849 = arith.constant 5 : index
    %1705 = memref.load %arg1[%c2_848, %c5_849] : memref<8x17xf32, #tpu.memory_space<smem>>
    %1706 = vector.broadcast %1705 : f32 to vector<8x128xf32>
    %1707 = arith.mulf %1706, %1704 : vector<8x128xf32>
    %1708 = arith.addf %1698, %1707 : vector<8x128xf32>
    %cst_850 = arith.constant 5.000000e+00 : f32
    %1709 = vector.broadcast %cst_850 : f32 to vector<8x128xf32>
    %1710 = arith.subf %1654, %1709 : vector<8x128xf32>
    %cst_851 = arith.constant 0.000000e+00 : f32
    %cst_852 = arith.constant 1.000000e+00 : f32
    %1711 = vector.broadcast %cst_851 : f32 to vector<8x128xf32>
    %1712 = arith.maximumf %1711, %1710 : vector<8x128xf32>
    %1713 = vector.broadcast %cst_852 : f32 to vector<8x128xf32>
    %1714 = arith.minimumf %1713, %1712 : vector<8x128xf32>
    %c2_853 = arith.constant 2 : index
    %c6_854 = arith.constant 6 : index
    %1715 = memref.load %arg1[%c2_853, %c6_854] : memref<8x17xf32, #tpu.memory_space<smem>>
    %1716 = vector.broadcast %1715 : f32 to vector<8x128xf32>
    %1717 = arith.mulf %1716, %1714 : vector<8x128xf32>
    %1718 = arith.addf %1708, %1717 : vector<8x128xf32>
    %cst_855 = arith.constant 6.000000e+00 : f32
    %1719 = vector.broadcast %cst_855 : f32 to vector<8x128xf32>
    %1720 = arith.subf %1654, %1719 : vector<8x128xf32>
    %cst_856 = arith.constant 0.000000e+00 : f32
    %cst_857 = arith.constant 1.000000e+00 : f32
    %1721 = vector.broadcast %cst_856 : f32 to vector<8x128xf32>
    %1722 = arith.maximumf %1721, %1720 : vector<8x128xf32>
    %1723 = vector.broadcast %cst_857 : f32 to vector<8x128xf32>
    %1724 = arith.minimumf %1723, %1722 : vector<8x128xf32>
    %c2_858 = arith.constant 2 : index
    %c7_859 = arith.constant 7 : index
    %1725 = memref.load %arg1[%c2_858, %c7_859] : memref<8x17xf32, #tpu.memory_space<smem>>
    %1726 = vector.broadcast %1725 : f32 to vector<8x128xf32>
    %1727 = arith.mulf %1726, %1724 : vector<8x128xf32>
    %1728 = arith.addf %1718, %1727 : vector<8x128xf32>
    %cst_860 = arith.constant 7.000000e+00 : f32
    %1729 = vector.broadcast %cst_860 : f32 to vector<8x128xf32>
    %1730 = arith.subf %1654, %1729 : vector<8x128xf32>
    %cst_861 = arith.constant 0.000000e+00 : f32
    %cst_862 = arith.constant 1.000000e+00 : f32
    %1731 = vector.broadcast %cst_861 : f32 to vector<8x128xf32>
    %1732 = arith.maximumf %1731, %1730 : vector<8x128xf32>
    %1733 = vector.broadcast %cst_862 : f32 to vector<8x128xf32>
    %1734 = arith.minimumf %1733, %1732 : vector<8x128xf32>
    %c2_863 = arith.constant 2 : index
    %c8_864 = arith.constant 8 : index
    %1735 = memref.load %arg1[%c2_863, %c8_864] : memref<8x17xf32, #tpu.memory_space<smem>>
    %1736 = vector.broadcast %1735 : f32 to vector<8x128xf32>
    %1737 = arith.mulf %1736, %1734 : vector<8x128xf32>
    %1738 = arith.addf %1728, %1737 : vector<8x128xf32>
    %cst_865 = arith.constant 8.000000e+00 : f32
    %1739 = vector.broadcast %cst_865 : f32 to vector<8x128xf32>
    %1740 = arith.subf %1654, %1739 : vector<8x128xf32>
    %cst_866 = arith.constant 0.000000e+00 : f32
    %cst_867 = arith.constant 1.000000e+00 : f32
    %1741 = vector.broadcast %cst_866 : f32 to vector<8x128xf32>
    %1742 = arith.maximumf %1741, %1740 : vector<8x128xf32>
    %1743 = vector.broadcast %cst_867 : f32 to vector<8x128xf32>
    %1744 = arith.minimumf %1743, %1742 : vector<8x128xf32>
    %c2_868 = arith.constant 2 : index
    %c9_869 = arith.constant 9 : index
    %1745 = memref.load %arg1[%c2_868, %c9_869] : memref<8x17xf32, #tpu.memory_space<smem>>
    %1746 = vector.broadcast %1745 : f32 to vector<8x128xf32>
    %1747 = arith.mulf %1746, %1744 : vector<8x128xf32>
    %1748 = arith.addf %1738, %1747 : vector<8x128xf32>
    %cst_870 = arith.constant 9.000000e+00 : f32
    %1749 = vector.broadcast %cst_870 : f32 to vector<8x128xf32>
    %1750 = arith.subf %1654, %1749 : vector<8x128xf32>
    %cst_871 = arith.constant 0.000000e+00 : f32
    %cst_872 = arith.constant 1.000000e+00 : f32
    %1751 = vector.broadcast %cst_871 : f32 to vector<8x128xf32>
    %1752 = arith.maximumf %1751, %1750 : vector<8x128xf32>
    %1753 = vector.broadcast %cst_872 : f32 to vector<8x128xf32>
    %1754 = arith.minimumf %1753, %1752 : vector<8x128xf32>
    %c2_873 = arith.constant 2 : index
    %c10_874 = arith.constant 10 : index
    %1755 = memref.load %arg1[%c2_873, %c10_874] : memref<8x17xf32, #tpu.memory_space<smem>>
    %1756 = vector.broadcast %1755 : f32 to vector<8x128xf32>
    %1757 = arith.mulf %1756, %1754 : vector<8x128xf32>
    %1758 = arith.addf %1748, %1757 : vector<8x128xf32>
    %cst_875 = arith.constant 1.000000e+01 : f32
    %1759 = vector.broadcast %cst_875 : f32 to vector<8x128xf32>
    %1760 = arith.subf %1654, %1759 : vector<8x128xf32>
    %cst_876 = arith.constant 0.000000e+00 : f32
    %cst_877 = arith.constant 1.000000e+00 : f32
    %1761 = vector.broadcast %cst_876 : f32 to vector<8x128xf32>
    %1762 = arith.maximumf %1761, %1760 : vector<8x128xf32>
    %1763 = vector.broadcast %cst_877 : f32 to vector<8x128xf32>
    %1764 = arith.minimumf %1763, %1762 : vector<8x128xf32>
    %c2_878 = arith.constant 2 : index
    %c11_879 = arith.constant 11 : index
    %1765 = memref.load %arg1[%c2_878, %c11_879] : memref<8x17xf32, #tpu.memory_space<smem>>
    %1766 = vector.broadcast %1765 : f32 to vector<8x128xf32>
    %1767 = arith.mulf %1766, %1764 : vector<8x128xf32>
    %1768 = arith.addf %1758, %1767 : vector<8x128xf32>
    %cst_880 = arith.constant 1.100000e+01 : f32
    %1769 = vector.broadcast %cst_880 : f32 to vector<8x128xf32>
    %1770 = arith.subf %1654, %1769 : vector<8x128xf32>
    %cst_881 = arith.constant 0.000000e+00 : f32
    %cst_882 = arith.constant 1.000000e+00 : f32
    %1771 = vector.broadcast %cst_881 : f32 to vector<8x128xf32>
    %1772 = arith.maximumf %1771, %1770 : vector<8x128xf32>
    %1773 = vector.broadcast %cst_882 : f32 to vector<8x128xf32>
    %1774 = arith.minimumf %1773, %1772 : vector<8x128xf32>
    %c2_883 = arith.constant 2 : index
    %c12_884 = arith.constant 12 : index
    %1775 = memref.load %arg1[%c2_883, %c12_884] : memref<8x17xf32, #tpu.memory_space<smem>>
    %1776 = vector.broadcast %1775 : f32 to vector<8x128xf32>
    %1777 = arith.mulf %1776, %1774 : vector<8x128xf32>
    %1778 = arith.addf %1768, %1777 : vector<8x128xf32>
    %cst_885 = arith.constant 1.200000e+01 : f32
    %1779 = vector.broadcast %cst_885 : f32 to vector<8x128xf32>
    %1780 = arith.subf %1654, %1779 : vector<8x128xf32>
    %cst_886 = arith.constant 0.000000e+00 : f32
    %cst_887 = arith.constant 1.000000e+00 : f32
    %1781 = vector.broadcast %cst_886 : f32 to vector<8x128xf32>
    %1782 = arith.maximumf %1781, %1780 : vector<8x128xf32>
    %1783 = vector.broadcast %cst_887 : f32 to vector<8x128xf32>
    %1784 = arith.minimumf %1783, %1782 : vector<8x128xf32>
    %c2_888 = arith.constant 2 : index
    %c13_889 = arith.constant 13 : index
    %1785 = memref.load %arg1[%c2_888, %c13_889] : memref<8x17xf32, #tpu.memory_space<smem>>
    %1786 = vector.broadcast %1785 : f32 to vector<8x128xf32>
    %1787 = arith.mulf %1786, %1784 : vector<8x128xf32>
    %1788 = arith.addf %1778, %1787 : vector<8x128xf32>
    %cst_890 = arith.constant 1.300000e+01 : f32
    %1789 = vector.broadcast %cst_890 : f32 to vector<8x128xf32>
    %1790 = arith.subf %1654, %1789 : vector<8x128xf32>
    %cst_891 = arith.constant 0.000000e+00 : f32
    %cst_892 = arith.constant 1.000000e+00 : f32
    %1791 = vector.broadcast %cst_891 : f32 to vector<8x128xf32>
    %1792 = arith.maximumf %1791, %1790 : vector<8x128xf32>
    %1793 = vector.broadcast %cst_892 : f32 to vector<8x128xf32>
    %1794 = arith.minimumf %1793, %1792 : vector<8x128xf32>
    %c2_893 = arith.constant 2 : index
    %c14_894 = arith.constant 14 : index
    %1795 = memref.load %arg1[%c2_893, %c14_894] : memref<8x17xf32, #tpu.memory_space<smem>>
    %1796 = vector.broadcast %1795 : f32 to vector<8x128xf32>
    %1797 = arith.mulf %1796, %1794 : vector<8x128xf32>
    %1798 = arith.addf %1788, %1797 : vector<8x128xf32>
    %cst_895 = arith.constant 1.400000e+01 : f32
    %1799 = vector.broadcast %cst_895 : f32 to vector<8x128xf32>
    %1800 = arith.subf %1654, %1799 : vector<8x128xf32>
    %cst_896 = arith.constant 0.000000e+00 : f32
    %cst_897 = arith.constant 1.000000e+00 : f32
    %1801 = vector.broadcast %cst_896 : f32 to vector<8x128xf32>
    %1802 = arith.maximumf %1801, %1800 : vector<8x128xf32>
    %1803 = vector.broadcast %cst_897 : f32 to vector<8x128xf32>
    %1804 = arith.minimumf %1803, %1802 : vector<8x128xf32>
    %c2_898 = arith.constant 2 : index
    %c15_899 = arith.constant 15 : index
    %1805 = memref.load %arg1[%c2_898, %c15_899] : memref<8x17xf32, #tpu.memory_space<smem>>
    %1806 = vector.broadcast %1805 : f32 to vector<8x128xf32>
    %1807 = arith.mulf %1806, %1804 : vector<8x128xf32>
    %1808 = arith.addf %1798, %1807 : vector<8x128xf32>
    %cst_900 = arith.constant 1.500000e+01 : f32
    %1809 = vector.broadcast %cst_900 : f32 to vector<8x128xf32>
    %1810 = arith.subf %1654, %1809 : vector<8x128xf32>
    %cst_901 = arith.constant 0.000000e+00 : f32
    %cst_902 = arith.constant 1.000000e+00 : f32
    %1811 = vector.broadcast %cst_901 : f32 to vector<8x128xf32>
    %1812 = arith.maximumf %1811, %1810 : vector<8x128xf32>
    %1813 = vector.broadcast %cst_902 : f32 to vector<8x128xf32>
    %1814 = arith.minimumf %1813, %1812 : vector<8x128xf32>
    %c2_903 = arith.constant 2 : index
    %c16_904 = arith.constant 16 : index
    %1815 = memref.load %arg1[%c2_903, %c16_904] : memref<8x17xf32, #tpu.memory_space<smem>>
    %1816 = vector.broadcast %1815 : f32 to vector<8x128xf32>
    %1817 = arith.mulf %1816, %1814 : vector<8x128xf32>
    %1818 = arith.addf %1808, %1817 : vector<8x128xf32>
    %1819 = arith.mulf %1643, %1818 : vector<8x128xf32>
    %1820 = vector.extract_strided_slice %594 {offsets = [5, 0], sizes = [1, 128], strides = [1, 1]} : vector<8x128xf32> to vector<1x128xf32>
    %c5_905 = arith.constant 5 : index
    %c0_906 = arith.constant 0 : index
    %c0_907 = arith.constant 0 : index
    %1821 = vector.load %arg6[%c5_905, %c0_906, %c0_907] : memref<8x128x128xf32, #tpu.memory_space<vmem>>, vector<1x128x128xf32>
    %1822 = vector.shape_cast %1821 : vector<1x128x128xf32> to vector<128x128xf32>
    %cst_908 = arith.constant dense<0.000000e+00> : vector<8x128xf32>
    %1823 = tpu.matmul %594, %1822, %cst_908 {dimension_numbers = #tpu.dot_dimension_numbers<[1], [0], [0], [1], [0, 0, 1, 1], [], []>} : vector<8x128xf32>, vector<128x128xf32>, vector<8x128xf32> -> vector<8x128xf32>
    %1824 = vector.broadcast %1820 : vector<1x128xf32> to vector<8x128xf32>
    %1825 = arith.subf %1823, %1824 : vector<8x128xf32>
    %1826 = math.absf %1825 : vector<8x128xf32>
    %cst_909 = arith.constant 1.000000e+00 : f32
    %1827 = vector.broadcast %cst_909 : f32 to vector<8x128xf32>
    %1828 = arith.subf %1827, %1826 : vector<8x128xf32>
    %cst_910 = arith.constant 1.600000e+01 : f32
    %1829 = vector.broadcast %cst_910 : f32 to vector<8x128xf32>
    %1830 = arith.mulf %1829, %1828 : vector<8x128xf32>
    %cst_911 = arith.constant 0.000000e+00 : f32
    %1831 = vector.broadcast %cst_911 : f32 to vector<8x128xf32>
    %c2_912 = arith.constant 2 : index
    %c0_913 = arith.constant 0 : index
    %1832 = memref.load %arg1[%c2_912, %c0_913] : memref<8x17xf32, #tpu.memory_space<smem>>
    %1833 = vector.broadcast %1832 : f32 to vector<8x128xf32>
    %1834 = arith.addf %1831, %1833 : vector<8x128xf32>
    %cst_914 = arith.constant 0.000000e+00 : f32
    %1835 = vector.broadcast %cst_914 : f32 to vector<8x128xf32>
    %1836 = arith.subf %1830, %1835 : vector<8x128xf32>
    %cst_915 = arith.constant 0.000000e+00 : f32
    %cst_916 = arith.constant 1.000000e+00 : f32
    %1837 = vector.broadcast %cst_915 : f32 to vector<8x128xf32>
    %1838 = arith.maximumf %1837, %1836 : vector<8x128xf32>
    %1839 = vector.broadcast %cst_916 : f32 to vector<8x128xf32>
    %1840 = arith.minimumf %1839, %1838 : vector<8x128xf32>
    %c2_917 = arith.constant 2 : index
    %c1_918 = arith.constant 1 : index
    %1841 = memref.load %arg1[%c2_917, %c1_918] : memref<8x17xf32, #tpu.memory_space<smem>>
    %1842 = vector.broadcast %1841 : f32 to vector<8x128xf32>
    %1843 = arith.mulf %1842, %1840 : vector<8x128xf32>
    %1844 = arith.addf %1834, %1843 : vector<8x128xf32>
    %cst_919 = arith.constant 1.000000e+00 : f32
    %1845 = vector.broadcast %cst_919 : f32 to vector<8x128xf32>
    %1846 = arith.subf %1830, %1845 : vector<8x128xf32>
    %cst_920 = arith.constant 0.000000e+00 : f32
    %cst_921 = arith.constant 1.000000e+00 : f32
    %1847 = vector.broadcast %cst_920 : f32 to vector<8x128xf32>
    %1848 = arith.maximumf %1847, %1846 : vector<8x128xf32>
    %1849 = vector.broadcast %cst_921 : f32 to vector<8x128xf32>
    %1850 = arith.minimumf %1849, %1848 : vector<8x128xf32>
    %c2_922 = arith.constant 2 : index
    %c2_923 = arith.constant 2 : index
    %1851 = memref.load %arg1[%c2_922, %c2_923] : memref<8x17xf32, #tpu.memory_space<smem>>
    %1852 = vector.broadcast %1851 : f32 to vector<8x128xf32>
    %1853 = arith.mulf %1852, %1850 : vector<8x128xf32>
    %1854 = arith.addf %1844, %1853 : vector<8x128xf32>
    %cst_924 = arith.constant 2.000000e+00 : f32
    %1855 = vector.broadcast %cst_924 : f32 to vector<8x128xf32>
    %1856 = arith.subf %1830, %1855 : vector<8x128xf32>
    %cst_925 = arith.constant 0.000000e+00 : f32
    %cst_926 = arith.constant 1.000000e+00 : f32
    %1857 = vector.broadcast %cst_925 : f32 to vector<8x128xf32>
    %1858 = arith.maximumf %1857, %1856 : vector<8x128xf32>
    %1859 = vector.broadcast %cst_926 : f32 to vector<8x128xf32>
    %1860 = arith.minimumf %1859, %1858 : vector<8x128xf32>
    %c2_927 = arith.constant 2 : index
    %c3_928 = arith.constant 3 : index
    %1861 = memref.load %arg1[%c2_927, %c3_928] : memref<8x17xf32, #tpu.memory_space<smem>>
    %1862 = vector.broadcast %1861 : f32 to vector<8x128xf32>
    %1863 = arith.mulf %1862, %1860 : vector<8x128xf32>
    %1864 = arith.addf %1854, %1863 : vector<8x128xf32>
    %cst_929 = arith.constant 3.000000e+00 : f32
    %1865 = vector.broadcast %cst_929 : f32 to vector<8x128xf32>
    %1866 = arith.subf %1830, %1865 : vector<8x128xf32>
    %cst_930 = arith.constant 0.000000e+00 : f32
    %cst_931 = arith.constant 1.000000e+00 : f32
    %1867 = vector.broadcast %cst_930 : f32 to vector<8x128xf32>
    %1868 = arith.maximumf %1867, %1866 : vector<8x128xf32>
    %1869 = vector.broadcast %cst_931 : f32 to vector<8x128xf32>
    %1870 = arith.minimumf %1869, %1868 : vector<8x128xf32>
    %c2_932 = arith.constant 2 : index
    %c4_933 = arith.constant 4 : index
    %1871 = memref.load %arg1[%c2_932, %c4_933] : memref<8x17xf32, #tpu.memory_space<smem>>
    %1872 = vector.broadcast %1871 : f32 to vector<8x128xf32>
    %1873 = arith.mulf %1872, %1870 : vector<8x128xf32>
    %1874 = arith.addf %1864, %1873 : vector<8x128xf32>
    %cst_934 = arith.constant 4.000000e+00 : f32
    %1875 = vector.broadcast %cst_934 : f32 to vector<8x128xf32>
    %1876 = arith.subf %1830, %1875 : vector<8x128xf32>
    %cst_935 = arith.constant 0.000000e+00 : f32
    %cst_936 = arith.constant 1.000000e+00 : f32
    %1877 = vector.broadcast %cst_935 : f32 to vector<8x128xf32>
    %1878 = arith.maximumf %1877, %1876 : vector<8x128xf32>
    %1879 = vector.broadcast %cst_936 : f32 to vector<8x128xf32>
    %1880 = arith.minimumf %1879, %1878 : vector<8x128xf32>
    %c2_937 = arith.constant 2 : index
    %c5_938 = arith.constant 5 : index
    %1881 = memref.load %arg1[%c2_937, %c5_938] : memref<8x17xf32, #tpu.memory_space<smem>>
    %1882 = vector.broadcast %1881 : f32 to vector<8x128xf32>
    %1883 = arith.mulf %1882, %1880 : vector<8x128xf32>
    %1884 = arith.addf %1874, %1883 : vector<8x128xf32>
    %cst_939 = arith.constant 5.000000e+00 : f32
    %1885 = vector.broadcast %cst_939 : f32 to vector<8x128xf32>
    %1886 = arith.subf %1830, %1885 : vector<8x128xf32>
    %cst_940 = arith.constant 0.000000e+00 : f32
    %cst_941 = arith.constant 1.000000e+00 : f32
    %1887 = vector.broadcast %cst_940 : f32 to vector<8x128xf32>
    %1888 = arith.maximumf %1887, %1886 : vector<8x128xf32>
    %1889 = vector.broadcast %cst_941 : f32 to vector<8x128xf32>
    %1890 = arith.minimumf %1889, %1888 : vector<8x128xf32>
    %c2_942 = arith.constant 2 : index
    %c6_943 = arith.constant 6 : index
    %1891 = memref.load %arg1[%c2_942, %c6_943] : memref<8x17xf32, #tpu.memory_space<smem>>
    %1892 = vector.broadcast %1891 : f32 to vector<8x128xf32>
    %1893 = arith.mulf %1892, %1890 : vector<8x128xf32>
    %1894 = arith.addf %1884, %1893 : vector<8x128xf32>
    %cst_944 = arith.constant 6.000000e+00 : f32
    %1895 = vector.broadcast %cst_944 : f32 to vector<8x128xf32>
    %1896 = arith.subf %1830, %1895 : vector<8x128xf32>
    %cst_945 = arith.constant 0.000000e+00 : f32
    %cst_946 = arith.constant 1.000000e+00 : f32
    %1897 = vector.broadcast %cst_945 : f32 to vector<8x128xf32>
    %1898 = arith.maximumf %1897, %1896 : vector<8x128xf32>
    %1899 = vector.broadcast %cst_946 : f32 to vector<8x128xf32>
    %1900 = arith.minimumf %1899, %1898 : vector<8x128xf32>
    %c2_947 = arith.constant 2 : index
    %c7_948 = arith.constant 7 : index
    %1901 = memref.load %arg1[%c2_947, %c7_948] : memref<8x17xf32, #tpu.memory_space<smem>>
    %1902 = vector.broadcast %1901 : f32 to vector<8x128xf32>
    %1903 = arith.mulf %1902, %1900 : vector<8x128xf32>
    %1904 = arith.addf %1894, %1903 : vector<8x128xf32>
    %cst_949 = arith.constant 7.000000e+00 : f32
    %1905 = vector.broadcast %cst_949 : f32 to vector<8x128xf32>
    %1906 = arith.subf %1830, %1905 : vector<8x128xf32>
    %cst_950 = arith.constant 0.000000e+00 : f32
    %cst_951 = arith.constant 1.000000e+00 : f32
    %1907 = vector.broadcast %cst_950 : f32 to vector<8x128xf32>
    %1908 = arith.maximumf %1907, %1906 : vector<8x128xf32>
    %1909 = vector.broadcast %cst_951 : f32 to vector<8x128xf32>
    %1910 = arith.minimumf %1909, %1908 : vector<8x128xf32>
    %c2_952 = arith.constant 2 : index
    %c8_953 = arith.constant 8 : index
    %1911 = memref.load %arg1[%c2_952, %c8_953] : memref<8x17xf32, #tpu.memory_space<smem>>
    %1912 = vector.broadcast %1911 : f32 to vector<8x128xf32>
    %1913 = arith.mulf %1912, %1910 : vector<8x128xf32>
    %1914 = arith.addf %1904, %1913 : vector<8x128xf32>
    %cst_954 = arith.constant 8.000000e+00 : f32
    %1915 = vector.broadcast %cst_954 : f32 to vector<8x128xf32>
    %1916 = arith.subf %1830, %1915 : vector<8x128xf32>
    %cst_955 = arith.constant 0.000000e+00 : f32
    %cst_956 = arith.constant 1.000000e+00 : f32
    %1917 = vector.broadcast %cst_955 : f32 to vector<8x128xf32>
    %1918 = arith.maximumf %1917, %1916 : vector<8x128xf32>
    %1919 = vector.broadcast %cst_956 : f32 to vector<8x128xf32>
    %1920 = arith.minimumf %1919, %1918 : vector<8x128xf32>
    %c2_957 = arith.constant 2 : index
    %c9_958 = arith.constant 9 : index
    %1921 = memref.load %arg1[%c2_957, %c9_958] : memref<8x17xf32, #tpu.memory_space<smem>>
    %1922 = vector.broadcast %1921 : f32 to vector<8x128xf32>
    %1923 = arith.mulf %1922, %1920 : vector<8x128xf32>
    %1924 = arith.addf %1914, %1923 : vector<8x128xf32>
    %cst_959 = arith.constant 9.000000e+00 : f32
    %1925 = vector.broadcast %cst_959 : f32 to vector<8x128xf32>
    %1926 = arith.subf %1830, %1925 : vector<8x128xf32>
    %cst_960 = arith.constant 0.000000e+00 : f32
    %cst_961 = arith.constant 1.000000e+00 : f32
    %1927 = vector.broadcast %cst_960 : f32 to vector<8x128xf32>
    %1928 = arith.maximumf %1927, %1926 : vector<8x128xf32>
    %1929 = vector.broadcast %cst_961 : f32 to vector<8x128xf32>
    %1930 = arith.minimumf %1929, %1928 : vector<8x128xf32>
    %c2_962 = arith.constant 2 : index
    %c10_963 = arith.constant 10 : index
    %1931 = memref.load %arg1[%c2_962, %c10_963] : memref<8x17xf32, #tpu.memory_space<smem>>
    %1932 = vector.broadcast %1931 : f32 to vector<8x128xf32>
    %1933 = arith.mulf %1932, %1930 : vector<8x128xf32>
    %1934 = arith.addf %1924, %1933 : vector<8x128xf32>
    %cst_964 = arith.constant 1.000000e+01 : f32
    %1935 = vector.broadcast %cst_964 : f32 to vector<8x128xf32>
    %1936 = arith.subf %1830, %1935 : vector<8x128xf32>
    %cst_965 = arith.constant 0.000000e+00 : f32
    %cst_966 = arith.constant 1.000000e+00 : f32
    %1937 = vector.broadcast %cst_965 : f32 to vector<8x128xf32>
    %1938 = arith.maximumf %1937, %1936 : vector<8x128xf32>
    %1939 = vector.broadcast %cst_966 : f32 to vector<8x128xf32>
    %1940 = arith.minimumf %1939, %1938 : vector<8x128xf32>
    %c2_967 = arith.constant 2 : index
    %c11_968 = arith.constant 11 : index
    %1941 = memref.load %arg1[%c2_967, %c11_968] : memref<8x17xf32, #tpu.memory_space<smem>>
    %1942 = vector.broadcast %1941 : f32 to vector<8x128xf32>
    %1943 = arith.mulf %1942, %1940 : vector<8x128xf32>
    %1944 = arith.addf %1934, %1943 : vector<8x128xf32>
    %cst_969 = arith.constant 1.100000e+01 : f32
    %1945 = vector.broadcast %cst_969 : f32 to vector<8x128xf32>
    %1946 = arith.subf %1830, %1945 : vector<8x128xf32>
    %cst_970 = arith.constant 0.000000e+00 : f32
    %cst_971 = arith.constant 1.000000e+00 : f32
    %1947 = vector.broadcast %cst_970 : f32 to vector<8x128xf32>
    %1948 = arith.maximumf %1947, %1946 : vector<8x128xf32>
    %1949 = vector.broadcast %cst_971 : f32 to vector<8x128xf32>
    %1950 = arith.minimumf %1949, %1948 : vector<8x128xf32>
    %c2_972 = arith.constant 2 : index
    %c12_973 = arith.constant 12 : index
    %1951 = memref.load %arg1[%c2_972, %c12_973] : memref<8x17xf32, #tpu.memory_space<smem>>
    %1952 = vector.broadcast %1951 : f32 to vector<8x128xf32>
    %1953 = arith.mulf %1952, %1950 : vector<8x128xf32>
    %1954 = arith.addf %1944, %1953 : vector<8x128xf32>
    %cst_974 = arith.constant 1.200000e+01 : f32
    %1955 = vector.broadcast %cst_974 : f32 to vector<8x128xf32>
    %1956 = arith.subf %1830, %1955 : vector<8x128xf32>
    %cst_975 = arith.constant 0.000000e+00 : f32
    %cst_976 = arith.constant 1.000000e+00 : f32
    %1957 = vector.broadcast %cst_975 : f32 to vector<8x128xf32>
    %1958 = arith.maximumf %1957, %1956 : vector<8x128xf32>
    %1959 = vector.broadcast %cst_976 : f32 to vector<8x128xf32>
    %1960 = arith.minimumf %1959, %1958 : vector<8x128xf32>
    %c2_977 = arith.constant 2 : index
    %c13_978 = arith.constant 13 : index
    %1961 = memref.load %arg1[%c2_977, %c13_978] : memref<8x17xf32, #tpu.memory_space<smem>>
    %1962 = vector.broadcast %1961 : f32 to vector<8x128xf32>
    %1963 = arith.mulf %1962, %1960 : vector<8x128xf32>
    %1964 = arith.addf %1954, %1963 : vector<8x128xf32>
    %cst_979 = arith.constant 1.300000e+01 : f32
    %1965 = vector.broadcast %cst_979 : f32 to vector<8x128xf32>
    %1966 = arith.subf %1830, %1965 : vector<8x128xf32>
    %cst_980 = arith.constant 0.000000e+00 : f32
    %cst_981 = arith.constant 1.000000e+00 : f32
    %1967 = vector.broadcast %cst_980 : f32 to vector<8x128xf32>
    %1968 = arith.maximumf %1967, %1966 : vector<8x128xf32>
    %1969 = vector.broadcast %cst_981 : f32 to vector<8x128xf32>
    %1970 = arith.minimumf %1969, %1968 : vector<8x128xf32>
    %c2_982 = arith.constant 2 : index
    %c14_983 = arith.constant 14 : index
    %1971 = memref.load %arg1[%c2_982, %c14_983] : memref<8x17xf32, #tpu.memory_space<smem>>
    %1972 = vector.broadcast %1971 : f32 to vector<8x128xf32>
    %1973 = arith.mulf %1972, %1970 : vector<8x128xf32>
    %1974 = arith.addf %1964, %1973 : vector<8x128xf32>
    %cst_984 = arith.constant 1.400000e+01 : f32
    %1975 = vector.broadcast %cst_984 : f32 to vector<8x128xf32>
    %1976 = arith.subf %1830, %1975 : vector<8x128xf32>
    %cst_985 = arith.constant 0.000000e+00 : f32
    %cst_986 = arith.constant 1.000000e+00 : f32
    %1977 = vector.broadcast %cst_985 : f32 to vector<8x128xf32>
    %1978 = arith.maximumf %1977, %1976 : vector<8x128xf32>
    %1979 = vector.broadcast %cst_986 : f32 to vector<8x128xf32>
    %1980 = arith.minimumf %1979, %1978 : vector<8x128xf32>
    %c2_987 = arith.constant 2 : index
    %c15_988 = arith.constant 15 : index
    %1981 = memref.load %arg1[%c2_987, %c15_988] : memref<8x17xf32, #tpu.memory_space<smem>>
    %1982 = vector.broadcast %1981 : f32 to vector<8x128xf32>
    %1983 = arith.mulf %1982, %1980 : vector<8x128xf32>
    %1984 = arith.addf %1974, %1983 : vector<8x128xf32>
    %cst_989 = arith.constant 1.500000e+01 : f32
    %1985 = vector.broadcast %cst_989 : f32 to vector<8x128xf32>
    %1986 = arith.subf %1830, %1985 : vector<8x128xf32>
    %cst_990 = arith.constant 0.000000e+00 : f32
    %cst_991 = arith.constant 1.000000e+00 : f32
    %1987 = vector.broadcast %cst_990 : f32 to vector<8x128xf32>
    %1988 = arith.maximumf %1987, %1986 : vector<8x128xf32>
    %1989 = vector.broadcast %cst_991 : f32 to vector<8x128xf32>
    %1990 = arith.minimumf %1989, %1988 : vector<8x128xf32>
    %c2_992 = arith.constant 2 : index
    %c16_993 = arith.constant 16 : index
    %1991 = memref.load %arg1[%c2_992, %c16_993] : memref<8x17xf32, #tpu.memory_space<smem>>
    %1992 = vector.broadcast %1991 : f32 to vector<8x128xf32>
    %1993 = arith.mulf %1992, %1990 : vector<8x128xf32>
    %1994 = arith.addf %1984, %1993 : vector<8x128xf32>
    %1995 = arith.mulf %1819, %1994 : vector<8x128xf32>
    %1996 = vector.extract_strided_slice %594 {offsets = [6, 0], sizes = [1, 128], strides = [1, 1]} : vector<8x128xf32> to vector<1x128xf32>
    %c6_994 = arith.constant 6 : index
    %c0_995 = arith.constant 0 : index
    %c0_996 = arith.constant 0 : index
    %1997 = vector.load %arg6[%c6_994, %c0_995, %c0_996] : memref<8x128x128xf32, #tpu.memory_space<vmem>>, vector<1x128x128xf32>
    %1998 = vector.shape_cast %1997 : vector<1x128x128xf32> to vector<128x128xf32>
    %cst_997 = arith.constant dense<0.000000e+00> : vector<8x128xf32>
    %1999 = tpu.matmul %594, %1998, %cst_997 {dimension_numbers = #tpu.dot_dimension_numbers<[1], [0], [0], [1], [0, 0, 1, 1], [], []>} : vector<8x128xf32>, vector<128x128xf32>, vector<8x128xf32> -> vector<8x128xf32>
    %2000 = vector.broadcast %1996 : vector<1x128xf32> to vector<8x128xf32>
    %2001 = arith.subf %1999, %2000 : vector<8x128xf32>
    %2002 = math.absf %2001 : vector<8x128xf32>
    %cst_998 = arith.constant 1.000000e+00 : f32
    %2003 = vector.broadcast %cst_998 : f32 to vector<8x128xf32>
    %2004 = arith.subf %2003, %2002 : vector<8x128xf32>
    %cst_999 = arith.constant 1.600000e+01 : f32
    %2005 = vector.broadcast %cst_999 : f32 to vector<8x128xf32>
    %2006 = arith.mulf %2005, %2004 : vector<8x128xf32>
    %cst_1000 = arith.constant 0.000000e+00 : f32
    %2007 = vector.broadcast %cst_1000 : f32 to vector<8x128xf32>
    %c2_1001 = arith.constant 2 : index
    %c0_1002 = arith.constant 0 : index
    %2008 = memref.load %arg1[%c2_1001, %c0_1002] : memref<8x17xf32, #tpu.memory_space<smem>>
    %2009 = vector.broadcast %2008 : f32 to vector<8x128xf32>
    %2010 = arith.addf %2007, %2009 : vector<8x128xf32>
    %cst_1003 = arith.constant 0.000000e+00 : f32
    %2011 = vector.broadcast %cst_1003 : f32 to vector<8x128xf32>
    %2012 = arith.subf %2006, %2011 : vector<8x128xf32>
    %cst_1004 = arith.constant 0.000000e+00 : f32
    %cst_1005 = arith.constant 1.000000e+00 : f32
    %2013 = vector.broadcast %cst_1004 : f32 to vector<8x128xf32>
    %2014 = arith.maximumf %2013, %2012 : vector<8x128xf32>
    %2015 = vector.broadcast %cst_1005 : f32 to vector<8x128xf32>
    %2016 = arith.minimumf %2015, %2014 : vector<8x128xf32>
    %c2_1006 = arith.constant 2 : index
    %c1_1007 = arith.constant 1 : index
    %2017 = memref.load %arg1[%c2_1006, %c1_1007] : memref<8x17xf32, #tpu.memory_space<smem>>
    %2018 = vector.broadcast %2017 : f32 to vector<8x128xf32>
    %2019 = arith.mulf %2018, %2016 : vector<8x128xf32>
    %2020 = arith.addf %2010, %2019 : vector<8x128xf32>
    %cst_1008 = arith.constant 1.000000e+00 : f32
    %2021 = vector.broadcast %cst_1008 : f32 to vector<8x128xf32>
    %2022 = arith.subf %2006, %2021 : vector<8x128xf32>
    %cst_1009 = arith.constant 0.000000e+00 : f32
    %cst_1010 = arith.constant 1.000000e+00 : f32
    %2023 = vector.broadcast %cst_1009 : f32 to vector<8x128xf32>
    %2024 = arith.maximumf %2023, %2022 : vector<8x128xf32>
    %2025 = vector.broadcast %cst_1010 : f32 to vector<8x128xf32>
    %2026 = arith.minimumf %2025, %2024 : vector<8x128xf32>
    %c2_1011 = arith.constant 2 : index
    %c2_1012 = arith.constant 2 : index
    %2027 = memref.load %arg1[%c2_1011, %c2_1012] : memref<8x17xf32, #tpu.memory_space<smem>>
    %2028 = vector.broadcast %2027 : f32 to vector<8x128xf32>
    %2029 = arith.mulf %2028, %2026 : vector<8x128xf32>
    %2030 = arith.addf %2020, %2029 : vector<8x128xf32>
    %cst_1013 = arith.constant 2.000000e+00 : f32
    %2031 = vector.broadcast %cst_1013 : f32 to vector<8x128xf32>
    %2032 = arith.subf %2006, %2031 : vector<8x128xf32>
    %cst_1014 = arith.constant 0.000000e+00 : f32
    %cst_1015 = arith.constant 1.000000e+00 : f32
    %2033 = vector.broadcast %cst_1014 : f32 to vector<8x128xf32>
    %2034 = arith.maximumf %2033, %2032 : vector<8x128xf32>
    %2035 = vector.broadcast %cst_1015 : f32 to vector<8x128xf32>
    %2036 = arith.minimumf %2035, %2034 : vector<8x128xf32>
    %c2_1016 = arith.constant 2 : index
    %c3_1017 = arith.constant 3 : index
    %2037 = memref.load %arg1[%c2_1016, %c3_1017] : memref<8x17xf32, #tpu.memory_space<smem>>
    %2038 = vector.broadcast %2037 : f32 to vector<8x128xf32>
    %2039 = arith.mulf %2038, %2036 : vector<8x128xf32>
    %2040 = arith.addf %2030, %2039 : vector<8x128xf32>
    %cst_1018 = arith.constant 3.000000e+00 : f32
    %2041 = vector.broadcast %cst_1018 : f32 to vector<8x128xf32>
    %2042 = arith.subf %2006, %2041 : vector<8x128xf32>
    %cst_1019 = arith.constant 0.000000e+00 : f32
    %cst_1020 = arith.constant 1.000000e+00 : f32
    %2043 = vector.broadcast %cst_1019 : f32 to vector<8x128xf32>
    %2044 = arith.maximumf %2043, %2042 : vector<8x128xf32>
    %2045 = vector.broadcast %cst_1020 : f32 to vector<8x128xf32>
    %2046 = arith.minimumf %2045, %2044 : vector<8x128xf32>
    %c2_1021 = arith.constant 2 : index
    %c4_1022 = arith.constant 4 : index
    %2047 = memref.load %arg1[%c2_1021, %c4_1022] : memref<8x17xf32, #tpu.memory_space<smem>>
    %2048 = vector.broadcast %2047 : f32 to vector<8x128xf32>
    %2049 = arith.mulf %2048, %2046 : vector<8x128xf32>
    %2050 = arith.addf %2040, %2049 : vector<8x128xf32>
    %cst_1023 = arith.constant 4.000000e+00 : f32
    %2051 = vector.broadcast %cst_1023 : f32 to vector<8x128xf32>
    %2052 = arith.subf %2006, %2051 : vector<8x128xf32>
    %cst_1024 = arith.constant 0.000000e+00 : f32
    %cst_1025 = arith.constant 1.000000e+00 : f32
    %2053 = vector.broadcast %cst_1024 : f32 to vector<8x128xf32>
    %2054 = arith.maximumf %2053, %2052 : vector<8x128xf32>
    %2055 = vector.broadcast %cst_1025 : f32 to vector<8x128xf32>
    %2056 = arith.minimumf %2055, %2054 : vector<8x128xf32>
    %c2_1026 = arith.constant 2 : index
    %c5_1027 = arith.constant 5 : index
    %2057 = memref.load %arg1[%c2_1026, %c5_1027] : memref<8x17xf32, #tpu.memory_space<smem>>
    %2058 = vector.broadcast %2057 : f32 to vector<8x128xf32>
    %2059 = arith.mulf %2058, %2056 : vector<8x128xf32>
    %2060 = arith.addf %2050, %2059 : vector<8x128xf32>
    %cst_1028 = arith.constant 5.000000e+00 : f32
    %2061 = vector.broadcast %cst_1028 : f32 to vector<8x128xf32>
    %2062 = arith.subf %2006, %2061 : vector<8x128xf32>
    %cst_1029 = arith.constant 0.000000e+00 : f32
    %cst_1030 = arith.constant 1.000000e+00 : f32
    %2063 = vector.broadcast %cst_1029 : f32 to vector<8x128xf32>
    %2064 = arith.maximumf %2063, %2062 : vector<8x128xf32>
    %2065 = vector.broadcast %cst_1030 : f32 to vector<8x128xf32>
    %2066 = arith.minimumf %2065, %2064 : vector<8x128xf32>
    %c2_1031 = arith.constant 2 : index
    %c6_1032 = arith.constant 6 : index
    %2067 = memref.load %arg1[%c2_1031, %c6_1032] : memref<8x17xf32, #tpu.memory_space<smem>>
    %2068 = vector.broadcast %2067 : f32 to vector<8x128xf32>
    %2069 = arith.mulf %2068, %2066 : vector<8x128xf32>
    %2070 = arith.addf %2060, %2069 : vector<8x128xf32>
    %cst_1033 = arith.constant 6.000000e+00 : f32
    %2071 = vector.broadcast %cst_1033 : f32 to vector<8x128xf32>
    %2072 = arith.subf %2006, %2071 : vector<8x128xf32>
    %cst_1034 = arith.constant 0.000000e+00 : f32
    %cst_1035 = arith.constant 1.000000e+00 : f32
    %2073 = vector.broadcast %cst_1034 : f32 to vector<8x128xf32>
    %2074 = arith.maximumf %2073, %2072 : vector<8x128xf32>
    %2075 = vector.broadcast %cst_1035 : f32 to vector<8x128xf32>
    %2076 = arith.minimumf %2075, %2074 : vector<8x128xf32>
    %c2_1036 = arith.constant 2 : index
    %c7_1037 = arith.constant 7 : index
    %2077 = memref.load %arg1[%c2_1036, %c7_1037] : memref<8x17xf32, #tpu.memory_space<smem>>
    %2078 = vector.broadcast %2077 : f32 to vector<8x128xf32>
    %2079 = arith.mulf %2078, %2076 : vector<8x128xf32>
    %2080 = arith.addf %2070, %2079 : vector<8x128xf32>
    %cst_1038 = arith.constant 7.000000e+00 : f32
    %2081 = vector.broadcast %cst_1038 : f32 to vector<8x128xf32>
    %2082 = arith.subf %2006, %2081 : vector<8x128xf32>
    %cst_1039 = arith.constant 0.000000e+00 : f32
    %cst_1040 = arith.constant 1.000000e+00 : f32
    %2083 = vector.broadcast %cst_1039 : f32 to vector<8x128xf32>
    %2084 = arith.maximumf %2083, %2082 : vector<8x128xf32>
    %2085 = vector.broadcast %cst_1040 : f32 to vector<8x128xf32>
    %2086 = arith.minimumf %2085, %2084 : vector<8x128xf32>
    %c2_1041 = arith.constant 2 : index
    %c8_1042 = arith.constant 8 : index
    %2087 = memref.load %arg1[%c2_1041, %c8_1042] : memref<8x17xf32, #tpu.memory_space<smem>>
    %2088 = vector.broadcast %2087 : f32 to vector<8x128xf32>
    %2089 = arith.mulf %2088, %2086 : vector<8x128xf32>
    %2090 = arith.addf %2080, %2089 : vector<8x128xf32>
    %cst_1043 = arith.constant 8.000000e+00 : f32
    %2091 = vector.broadcast %cst_1043 : f32 to vector<8x128xf32>
    %2092 = arith.subf %2006, %2091 : vector<8x128xf32>
    %cst_1044 = arith.constant 0.000000e+00 : f32
    %cst_1045 = arith.constant 1.000000e+00 : f32
    %2093 = vector.broadcast %cst_1044 : f32 to vector<8x128xf32>
    %2094 = arith.maximumf %2093, %2092 : vector<8x128xf32>
    %2095 = vector.broadcast %cst_1045 : f32 to vector<8x128xf32>
    %2096 = arith.minimumf %2095, %2094 : vector<8x128xf32>
    %c2_1046 = arith.constant 2 : index
    %c9_1047 = arith.constant 9 : index
    %2097 = memref.load %arg1[%c2_1046, %c9_1047] : memref<8x17xf32, #tpu.memory_space<smem>>
    %2098 = vector.broadcast %2097 : f32 to vector<8x128xf32>
    %2099 = arith.mulf %2098, %2096 : vector<8x128xf32>
    %2100 = arith.addf %2090, %2099 : vector<8x128xf32>
    %cst_1048 = arith.constant 9.000000e+00 : f32
    %2101 = vector.broadcast %cst_1048 : f32 to vector<8x128xf32>
    %2102 = arith.subf %2006, %2101 : vector<8x128xf32>
    %cst_1049 = arith.constant 0.000000e+00 : f32
    %cst_1050 = arith.constant 1.000000e+00 : f32
    %2103 = vector.broadcast %cst_1049 : f32 to vector<8x128xf32>
    %2104 = arith.maximumf %2103, %2102 : vector<8x128xf32>
    %2105 = vector.broadcast %cst_1050 : f32 to vector<8x128xf32>
    %2106 = arith.minimumf %2105, %2104 : vector<8x128xf32>
    %c2_1051 = arith.constant 2 : index
    %c10_1052 = arith.constant 10 : index
    %2107 = memref.load %arg1[%c2_1051, %c10_1052] : memref<8x17xf32, #tpu.memory_space<smem>>
    %2108 = vector.broadcast %2107 : f32 to vector<8x128xf32>
    %2109 = arith.mulf %2108, %2106 : vector<8x128xf32>
    %2110 = arith.addf %2100, %2109 : vector<8x128xf32>
    %cst_1053 = arith.constant 1.000000e+01 : f32
    %2111 = vector.broadcast %cst_1053 : f32 to vector<8x128xf32>
    %2112 = arith.subf %2006, %2111 : vector<8x128xf32>
    %cst_1054 = arith.constant 0.000000e+00 : f32
    %cst_1055 = arith.constant 1.000000e+00 : f32
    %2113 = vector.broadcast %cst_1054 : f32 to vector<8x128xf32>
    %2114 = arith.maximumf %2113, %2112 : vector<8x128xf32>
    %2115 = vector.broadcast %cst_1055 : f32 to vector<8x128xf32>
    %2116 = arith.minimumf %2115, %2114 : vector<8x128xf32>
    %c2_1056 = arith.constant 2 : index
    %c11_1057 = arith.constant 11 : index
    %2117 = memref.load %arg1[%c2_1056, %c11_1057] : memref<8x17xf32, #tpu.memory_space<smem>>
    %2118 = vector.broadcast %2117 : f32 to vector<8x128xf32>
    %2119 = arith.mulf %2118, %2116 : vector<8x128xf32>
    %2120 = arith.addf %2110, %2119 : vector<8x128xf32>
    %cst_1058 = arith.constant 1.100000e+01 : f32
    %2121 = vector.broadcast %cst_1058 : f32 to vector<8x128xf32>
    %2122 = arith.subf %2006, %2121 : vector<8x128xf32>
    %cst_1059 = arith.constant 0.000000e+00 : f32
    %cst_1060 = arith.constant 1.000000e+00 : f32
    %2123 = vector.broadcast %cst_1059 : f32 to vector<8x128xf32>
    %2124 = arith.maximumf %2123, %2122 : vector<8x128xf32>
    %2125 = vector.broadcast %cst_1060 : f32 to vector<8x128xf32>
    %2126 = arith.minimumf %2125, %2124 : vector<8x128xf32>
    %c2_1061 = arith.constant 2 : index
    %c12_1062 = arith.constant 12 : index
    %2127 = memref.load %arg1[%c2_1061, %c12_1062] : memref<8x17xf32, #tpu.memory_space<smem>>
    %2128 = vector.broadcast %2127 : f32 to vector<8x128xf32>
    %2129 = arith.mulf %2128, %2126 : vector<8x128xf32>
    %2130 = arith.addf %2120, %2129 : vector<8x128xf32>
    %cst_1063 = arith.constant 1.200000e+01 : f32
    %2131 = vector.broadcast %cst_1063 : f32 to vector<8x128xf32>
    %2132 = arith.subf %2006, %2131 : vector<8x128xf32>
    %cst_1064 = arith.constant 0.000000e+00 : f32
    %cst_1065 = arith.constant 1.000000e+00 : f32
    %2133 = vector.broadcast %cst_1064 : f32 to vector<8x128xf32>
    %2134 = arith.maximumf %2133, %2132 : vector<8x128xf32>
    %2135 = vector.broadcast %cst_1065 : f32 to vector<8x128xf32>
    %2136 = arith.minimumf %2135, %2134 : vector<8x128xf32>
    %c2_1066 = arith.constant 2 : index
    %c13_1067 = arith.constant 13 : index
    %2137 = memref.load %arg1[%c2_1066, %c13_1067] : memref<8x17xf32, #tpu.memory_space<smem>>
    %2138 = vector.broadcast %2137 : f32 to vector<8x128xf32>
    %2139 = arith.mulf %2138, %2136 : vector<8x128xf32>
    %2140 = arith.addf %2130, %2139 : vector<8x128xf32>
    %cst_1068 = arith.constant 1.300000e+01 : f32
    %2141 = vector.broadcast %cst_1068 : f32 to vector<8x128xf32>
    %2142 = arith.subf %2006, %2141 : vector<8x128xf32>
    %cst_1069 = arith.constant 0.000000e+00 : f32
    %cst_1070 = arith.constant 1.000000e+00 : f32
    %2143 = vector.broadcast %cst_1069 : f32 to vector<8x128xf32>
    %2144 = arith.maximumf %2143, %2142 : vector<8x128xf32>
    %2145 = vector.broadcast %cst_1070 : f32 to vector<8x128xf32>
    %2146 = arith.minimumf %2145, %2144 : vector<8x128xf32>
    %c2_1071 = arith.constant 2 : index
    %c14_1072 = arith.constant 14 : index
    %2147 = memref.load %arg1[%c2_1071, %c14_1072] : memref<8x17xf32, #tpu.memory_space<smem>>
    %2148 = vector.broadcast %2147 : f32 to vector<8x128xf32>
    %2149 = arith.mulf %2148, %2146 : vector<8x128xf32>
    %2150 = arith.addf %2140, %2149 : vector<8x128xf32>
    %cst_1073 = arith.constant 1.400000e+01 : f32
    %2151 = vector.broadcast %cst_1073 : f32 to vector<8x128xf32>
    %2152 = arith.subf %2006, %2151 : vector<8x128xf32>
    %cst_1074 = arith.constant 0.000000e+00 : f32
    %cst_1075 = arith.constant 1.000000e+00 : f32
    %2153 = vector.broadcast %cst_1074 : f32 to vector<8x128xf32>
    %2154 = arith.maximumf %2153, %2152 : vector<8x128xf32>
    %2155 = vector.broadcast %cst_1075 : f32 to vector<8x128xf32>
    %2156 = arith.minimumf %2155, %2154 : vector<8x128xf32>
    %c2_1076 = arith.constant 2 : index
    %c15_1077 = arith.constant 15 : index
    %2157 = memref.load %arg1[%c2_1076, %c15_1077] : memref<8x17xf32, #tpu.memory_space<smem>>
    %2158 = vector.broadcast %2157 : f32 to vector<8x128xf32>
    %2159 = arith.mulf %2158, %2156 : vector<8x128xf32>
    %2160 = arith.addf %2150, %2159 : vector<8x128xf32>
    %cst_1078 = arith.constant 1.500000e+01 : f32
    %2161 = vector.broadcast %cst_1078 : f32 to vector<8x128xf32>
    %2162 = arith.subf %2006, %2161 : vector<8x128xf32>
    %cst_1079 = arith.constant 0.000000e+00 : f32
    %cst_1080 = arith.constant 1.000000e+00 : f32
    %2163 = vector.broadcast %cst_1079 : f32 to vector<8x128xf32>
    %2164 = arith.maximumf %2163, %2162 : vector<8x128xf32>
    %2165 = vector.broadcast %cst_1080 : f32 to vector<8x128xf32>
    %2166 = arith.minimumf %2165, %2164 : vector<8x128xf32>
    %c2_1081 = arith.constant 2 : index
    %c16_1082 = arith.constant 16 : index
    %2167 = memref.load %arg1[%c2_1081, %c16_1082] : memref<8x17xf32, #tpu.memory_space<smem>>
    %2168 = vector.broadcast %2167 : f32 to vector<8x128xf32>
    %2169 = arith.mulf %2168, %2166 : vector<8x128xf32>
    %2170 = arith.addf %2160, %2169 : vector<8x128xf32>
    %2171 = arith.mulf %1995, %2170 : vector<8x128xf32>
    %2172 = vector.extract_strided_slice %594 {offsets = [7, 0], sizes = [1, 128], strides = [1, 1]} : vector<8x128xf32> to vector<1x128xf32>
    %c7_1083 = arith.constant 7 : index
    %c0_1084 = arith.constant 0 : index
    %c0_1085 = arith.constant 0 : index
    %2173 = vector.load %arg6[%c7_1083, %c0_1084, %c0_1085] : memref<8x128x128xf32, #tpu.memory_space<vmem>>, vector<1x128x128xf32>
    %2174 = vector.shape_cast %2173 : vector<1x128x128xf32> to vector<128x128xf32>
    %cst_1086 = arith.constant dense<0.000000e+00> : vector<8x128xf32>
    %2175 = tpu.matmul %594, %2174, %cst_1086 {dimension_numbers = #tpu.dot_dimension_numbers<[1], [0], [0], [1], [0, 0, 1, 1], [], []>} : vector<8x128xf32>, vector<128x128xf32>, vector<8x128xf32> -> vector<8x128xf32>
    %2176 = vector.broadcast %2172 : vector<1x128xf32> to vector<8x128xf32>
    %2177 = arith.subf %2175, %2176 : vector<8x128xf32>
    %2178 = math.absf %2177 : vector<8x128xf32>
    %cst_1087 = arith.constant 1.000000e+00 : f32
    %2179 = vector.broadcast %cst_1087 : f32 to vector<8x128xf32>
    %2180 = arith.subf %2179, %2178 : vector<8x128xf32>
    %cst_1088 = arith.constant 1.600000e+01 : f32
    %2181 = vector.broadcast %cst_1088 : f32 to vector<8x128xf32>
    %2182 = arith.mulf %2181, %2180 : vector<8x128xf32>
    %cst_1089 = arith.constant 0.000000e+00 : f32
    %2183 = vector.broadcast %cst_1089 : f32 to vector<8x128xf32>
    %c2_1090 = arith.constant 2 : index
    %c0_1091 = arith.constant 0 : index
    %2184 = memref.load %arg1[%c2_1090, %c0_1091] : memref<8x17xf32, #tpu.memory_space<smem>>
    %2185 = vector.broadcast %2184 : f32 to vector<8x128xf32>
    %2186 = arith.addf %2183, %2185 : vector<8x128xf32>
    %cst_1092 = arith.constant 0.000000e+00 : f32
    %2187 = vector.broadcast %cst_1092 : f32 to vector<8x128xf32>
    %2188 = arith.subf %2182, %2187 : vector<8x128xf32>
    %cst_1093 = arith.constant 0.000000e+00 : f32
    %cst_1094 = arith.constant 1.000000e+00 : f32
    %2189 = vector.broadcast %cst_1093 : f32 to vector<8x128xf32>
    %2190 = arith.maximumf %2189, %2188 : vector<8x128xf32>
    %2191 = vector.broadcast %cst_1094 : f32 to vector<8x128xf32>
    %2192 = arith.minimumf %2191, %2190 : vector<8x128xf32>
    %c2_1095 = arith.constant 2 : index
    %c1_1096 = arith.constant 1 : index
    %2193 = memref.load %arg1[%c2_1095, %c1_1096] : memref<8x17xf32, #tpu.memory_space<smem>>
    %2194 = vector.broadcast %2193 : f32 to vector<8x128xf32>
    %2195 = arith.mulf %2194, %2192 : vector<8x128xf32>
    %2196 = arith.addf %2186, %2195 : vector<8x128xf32>
    %cst_1097 = arith.constant 1.000000e+00 : f32
    %2197 = vector.broadcast %cst_1097 : f32 to vector<8x128xf32>
    %2198 = arith.subf %2182, %2197 : vector<8x128xf32>
    %cst_1098 = arith.constant 0.000000e+00 : f32
    %cst_1099 = arith.constant 1.000000e+00 : f32
    %2199 = vector.broadcast %cst_1098 : f32 to vector<8x128xf32>
    %2200 = arith.maximumf %2199, %2198 : vector<8x128xf32>
    %2201 = vector.broadcast %cst_1099 : f32 to vector<8x128xf32>
    %2202 = arith.minimumf %2201, %2200 : vector<8x128xf32>
    %c2_1100 = arith.constant 2 : index
    %c2_1101 = arith.constant 2 : index
    %2203 = memref.load %arg1[%c2_1100, %c2_1101] : memref<8x17xf32, #tpu.memory_space<smem>>
    %2204 = vector.broadcast %2203 : f32 to vector<8x128xf32>
    %2205 = arith.mulf %2204, %2202 : vector<8x128xf32>
    %2206 = arith.addf %2196, %2205 : vector<8x128xf32>
    %cst_1102 = arith.constant 2.000000e+00 : f32
    %2207 = vector.broadcast %cst_1102 : f32 to vector<8x128xf32>
    %2208 = arith.subf %2182, %2207 : vector<8x128xf32>
    %cst_1103 = arith.constant 0.000000e+00 : f32
    %cst_1104 = arith.constant 1.000000e+00 : f32
    %2209 = vector.broadcast %cst_1103 : f32 to vector<8x128xf32>
    %2210 = arith.maximumf %2209, %2208 : vector<8x128xf32>
    %2211 = vector.broadcast %cst_1104 : f32 to vector<8x128xf32>
    %2212 = arith.minimumf %2211, %2210 : vector<8x128xf32>
    %c2_1105 = arith.constant 2 : index
    %c3_1106 = arith.constant 3 : index
    %2213 = memref.load %arg1[%c2_1105, %c3_1106] : memref<8x17xf32, #tpu.memory_space<smem>>
    %2214 = vector.broadcast %2213 : f32 to vector<8x128xf32>
    %2215 = arith.mulf %2214, %2212 : vector<8x128xf32>
    %2216 = arith.addf %2206, %2215 : vector<8x128xf32>
    %cst_1107 = arith.constant 3.000000e+00 : f32
    %2217 = vector.broadcast %cst_1107 : f32 to vector<8x128xf32>
    %2218 = arith.subf %2182, %2217 : vector<8x128xf32>
    %cst_1108 = arith.constant 0.000000e+00 : f32
    %cst_1109 = arith.constant 1.000000e+00 : f32
    %2219 = vector.broadcast %cst_1108 : f32 to vector<8x128xf32>
    %2220 = arith.maximumf %2219, %2218 : vector<8x128xf32>
    %2221 = vector.broadcast %cst_1109 : f32 to vector<8x128xf32>
    %2222 = arith.minimumf %2221, %2220 : vector<8x128xf32>
    %c2_1110 = arith.constant 2 : index
    %c4_1111 = arith.constant 4 : index
    %2223 = memref.load %arg1[%c2_1110, %c4_1111] : memref<8x17xf32, #tpu.memory_space<smem>>
    %2224 = vector.broadcast %2223 : f32 to vector<8x128xf32>
    %2225 = arith.mulf %2224, %2222 : vector<8x128xf32>
    %2226 = arith.addf %2216, %2225 : vector<8x128xf32>
    %cst_1112 = arith.constant 4.000000e+00 : f32
    %2227 = vector.broadcast %cst_1112 : f32 to vector<8x128xf32>
    %2228 = arith.subf %2182, %2227 : vector<8x128xf32>
    %cst_1113 = arith.constant 0.000000e+00 : f32
    %cst_1114 = arith.constant 1.000000e+00 : f32
    %2229 = vector.broadcast %cst_1113 : f32 to vector<8x128xf32>
    %2230 = arith.maximumf %2229, %2228 : vector<8x128xf32>
    %2231 = vector.broadcast %cst_1114 : f32 to vector<8x128xf32>
    %2232 = arith.minimumf %2231, %2230 : vector<8x128xf32>
    %c2_1115 = arith.constant 2 : index
    %c5_1116 = arith.constant 5 : index
    %2233 = memref.load %arg1[%c2_1115, %c5_1116] : memref<8x17xf32, #tpu.memory_space<smem>>
    %2234 = vector.broadcast %2233 : f32 to vector<8x128xf32>
    %2235 = arith.mulf %2234, %2232 : vector<8x128xf32>
    %2236 = arith.addf %2226, %2235 : vector<8x128xf32>
    %cst_1117 = arith.constant 5.000000e+00 : f32
    %2237 = vector.broadcast %cst_1117 : f32 to vector<8x128xf32>
    %2238 = arith.subf %2182, %2237 : vector<8x128xf32>
    %cst_1118 = arith.constant 0.000000e+00 : f32
    %cst_1119 = arith.constant 1.000000e+00 : f32
    %2239 = vector.broadcast %cst_1118 : f32 to vector<8x128xf32>
    %2240 = arith.maximumf %2239, %2238 : vector<8x128xf32>
    %2241 = vector.broadcast %cst_1119 : f32 to vector<8x128xf32>
    %2242 = arith.minimumf %2241, %2240 : vector<8x128xf32>
    %c2_1120 = arith.constant 2 : index
    %c6_1121 = arith.constant 6 : index
    %2243 = memref.load %arg1[%c2_1120, %c6_1121] : memref<8x17xf32, #tpu.memory_space<smem>>
    %2244 = vector.broadcast %2243 : f32 to vector<8x128xf32>
    %2245 = arith.mulf %2244, %2242 : vector<8x128xf32>
    %2246 = arith.addf %2236, %2245 : vector<8x128xf32>
    %cst_1122 = arith.constant 6.000000e+00 : f32
    %2247 = vector.broadcast %cst_1122 : f32 to vector<8x128xf32>
    %2248 = arith.subf %2182, %2247 : vector<8x128xf32>
    %cst_1123 = arith.constant 0.000000e+00 : f32
    %cst_1124 = arith.constant 1.000000e+00 : f32
    %2249 = vector.broadcast %cst_1123 : f32 to vector<8x128xf32>
    %2250 = arith.maximumf %2249, %2248 : vector<8x128xf32>
    %2251 = vector.broadcast %cst_1124 : f32 to vector<8x128xf32>
    %2252 = arith.minimumf %2251, %2250 : vector<8x128xf32>
    %c2_1125 = arith.constant 2 : index
    %c7_1126 = arith.constant 7 : index
    %2253 = memref.load %arg1[%c2_1125, %c7_1126] : memref<8x17xf32, #tpu.memory_space<smem>>
    %2254 = vector.broadcast %2253 : f32 to vector<8x128xf32>
    %2255 = arith.mulf %2254, %2252 : vector<8x128xf32>
    %2256 = arith.addf %2246, %2255 : vector<8x128xf32>
    %cst_1127 = arith.constant 7.000000e+00 : f32
    %2257 = vector.broadcast %cst_1127 : f32 to vector<8x128xf32>
    %2258 = arith.subf %2182, %2257 : vector<8x128xf32>
    %cst_1128 = arith.constant 0.000000e+00 : f32
    %cst_1129 = arith.constant 1.000000e+00 : f32
    %2259 = vector.broadcast %cst_1128 : f32 to vector<8x128xf32>
    %2260 = arith.maximumf %2259, %2258 : vector<8x128xf32>
    %2261 = vector.broadcast %cst_1129 : f32 to vector<8x128xf32>
    %2262 = arith.minimumf %2261, %2260 : vector<8x128xf32>
    %c2_1130 = arith.constant 2 : index
    %c8_1131 = arith.constant 8 : index
    %2263 = memref.load %arg1[%c2_1130, %c8_1131] : memref<8x17xf32, #tpu.memory_space<smem>>
    %2264 = vector.broadcast %2263 : f32 to vector<8x128xf32>
    %2265 = arith.mulf %2264, %2262 : vector<8x128xf32>
    %2266 = arith.addf %2256, %2265 : vector<8x128xf32>
    %cst_1132 = arith.constant 8.000000e+00 : f32
    %2267 = vector.broadcast %cst_1132 : f32 to vector<8x128xf32>
    %2268 = arith.subf %2182, %2267 : vector<8x128xf32>
    %cst_1133 = arith.constant 0.000000e+00 : f32
    %cst_1134 = arith.constant 1.000000e+00 : f32
    %2269 = vector.broadcast %cst_1133 : f32 to vector<8x128xf32>
    %2270 = arith.maximumf %2269, %2268 : vector<8x128xf32>
    %2271 = vector.broadcast %cst_1134 : f32 to vector<8x128xf32>
    %2272 = arith.minimumf %2271, %2270 : vector<8x128xf32>
    %c2_1135 = arith.constant 2 : index
    %c9_1136 = arith.constant 9 : index
    %2273 = memref.load %arg1[%c2_1135, %c9_1136] : memref<8x17xf32, #tpu.memory_space<smem>>
    %2274 = vector.broadcast %2273 : f32 to vector<8x128xf32>
    %2275 = arith.mulf %2274, %2272 : vector<8x128xf32>
    %2276 = arith.addf %2266, %2275 : vector<8x128xf32>
    %cst_1137 = arith.constant 9.000000e+00 : f32
    %2277 = vector.broadcast %cst_1137 : f32 to vector<8x128xf32>
    %2278 = arith.subf %2182, %2277 : vector<8x128xf32>
    %cst_1138 = arith.constant 0.000000e+00 : f32
    %cst_1139 = arith.constant 1.000000e+00 : f32
    %2279 = vector.broadcast %cst_1138 : f32 to vector<8x128xf32>
    %2280 = arith.maximumf %2279, %2278 : vector<8x128xf32>
    %2281 = vector.broadcast %cst_1139 : f32 to vector<8x128xf32>
    %2282 = arith.minimumf %2281, %2280 : vector<8x128xf32>
    %c2_1140 = arith.constant 2 : index
    %c10_1141 = arith.constant 10 : index
    %2283 = memref.load %arg1[%c2_1140, %c10_1141] : memref<8x17xf32, #tpu.memory_space<smem>>
    %2284 = vector.broadcast %2283 : f32 to vector<8x128xf32>
    %2285 = arith.mulf %2284, %2282 : vector<8x128xf32>
    %2286 = arith.addf %2276, %2285 : vector<8x128xf32>
    %cst_1142 = arith.constant 1.000000e+01 : f32
    %2287 = vector.broadcast %cst_1142 : f32 to vector<8x128xf32>
    %2288 = arith.subf %2182, %2287 : vector<8x128xf32>
    %cst_1143 = arith.constant 0.000000e+00 : f32
    %cst_1144 = arith.constant 1.000000e+00 : f32
    %2289 = vector.broadcast %cst_1143 : f32 to vector<8x128xf32>
    %2290 = arith.maximumf %2289, %2288 : vector<8x128xf32>
    %2291 = vector.broadcast %cst_1144 : f32 to vector<8x128xf32>
    %2292 = arith.minimumf %2291, %2290 : vector<8x128xf32>
    %c2_1145 = arith.constant 2 : index
    %c11_1146 = arith.constant 11 : index
    %2293 = memref.load %arg1[%c2_1145, %c11_1146] : memref<8x17xf32, #tpu.memory_space<smem>>
    %2294 = vector.broadcast %2293 : f32 to vector<8x128xf32>
    %2295 = arith.mulf %2294, %2292 : vector<8x128xf32>
    %2296 = arith.addf %2286, %2295 : vector<8x128xf32>
    %cst_1147 = arith.constant 1.100000e+01 : f32
    %2297 = vector.broadcast %cst_1147 : f32 to vector<8x128xf32>
    %2298 = arith.subf %2182, %2297 : vector<8x128xf32>
    %cst_1148 = arith.constant 0.000000e+00 : f32
    %cst_1149 = arith.constant 1.000000e+00 : f32
    %2299 = vector.broadcast %cst_1148 : f32 to vector<8x128xf32>
    %2300 = arith.maximumf %2299, %2298 : vector<8x128xf32>
    %2301 = vector.broadcast %cst_1149 : f32 to vector<8x128xf32>
    %2302 = arith.minimumf %2301, %2300 : vector<8x128xf32>
    %c2_1150 = arith.constant 2 : index
    %c12_1151 = arith.constant 12 : index
    %2303 = memref.load %arg1[%c2_1150, %c12_1151] : memref<8x17xf32, #tpu.memory_space<smem>>
    %2304 = vector.broadcast %2303 : f32 to vector<8x128xf32>
    %2305 = arith.mulf %2304, %2302 : vector<8x128xf32>
    %2306 = arith.addf %2296, %2305 : vector<8x128xf32>
    %cst_1152 = arith.constant 1.200000e+01 : f32
    %2307 = vector.broadcast %cst_1152 : f32 to vector<8x128xf32>
    %2308 = arith.subf %2182, %2307 : vector<8x128xf32>
    %cst_1153 = arith.constant 0.000000e+00 : f32
    %cst_1154 = arith.constant 1.000000e+00 : f32
    %2309 = vector.broadcast %cst_1153 : f32 to vector<8x128xf32>
    %2310 = arith.maximumf %2309, %2308 : vector<8x128xf32>
    %2311 = vector.broadcast %cst_1154 : f32 to vector<8x128xf32>
    %2312 = arith.minimumf %2311, %2310 : vector<8x128xf32>
    %c2_1155 = arith.constant 2 : index
    %c13_1156 = arith.constant 13 : index
    %2313 = memref.load %arg1[%c2_1155, %c13_1156] : memref<8x17xf32, #tpu.memory_space<smem>>
    %2314 = vector.broadcast %2313 : f32 to vector<8x128xf32>
    %2315 = arith.mulf %2314, %2312 : vector<8x128xf32>
    %2316 = arith.addf %2306, %2315 : vector<8x128xf32>
    %cst_1157 = arith.constant 1.300000e+01 : f32
    %2317 = vector.broadcast %cst_1157 : f32 to vector<8x128xf32>
    %2318 = arith.subf %2182, %2317 : vector<8x128xf32>
    %cst_1158 = arith.constant 0.000000e+00 : f32
    %cst_1159 = arith.constant 1.000000e+00 : f32
    %2319 = vector.broadcast %cst_1158 : f32 to vector<8x128xf32>
    %2320 = arith.maximumf %2319, %2318 : vector<8x128xf32>
    %2321 = vector.broadcast %cst_1159 : f32 to vector<8x128xf32>
    %2322 = arith.minimumf %2321, %2320 : vector<8x128xf32>
    %c2_1160 = arith.constant 2 : index
    %c14_1161 = arith.constant 14 : index
    %2323 = memref.load %arg1[%c2_1160, %c14_1161] : memref<8x17xf32, #tpu.memory_space<smem>>
    %2324 = vector.broadcast %2323 : f32 to vector<8x128xf32>
    %2325 = arith.mulf %2324, %2322 : vector<8x128xf32>
    %2326 = arith.addf %2316, %2325 : vector<8x128xf32>
    %cst_1162 = arith.constant 1.400000e+01 : f32
    %2327 = vector.broadcast %cst_1162 : f32 to vector<8x128xf32>
    %2328 = arith.subf %2182, %2327 : vector<8x128xf32>
    %cst_1163 = arith.constant 0.000000e+00 : f32
    %cst_1164 = arith.constant 1.000000e+00 : f32
    %2329 = vector.broadcast %cst_1163 : f32 to vector<8x128xf32>
    %2330 = arith.maximumf %2329, %2328 : vector<8x128xf32>
    %2331 = vector.broadcast %cst_1164 : f32 to vector<8x128xf32>
    %2332 = arith.minimumf %2331, %2330 : vector<8x128xf32>
    %c2_1165 = arith.constant 2 : index
    %c15_1166 = arith.constant 15 : index
    %2333 = memref.load %arg1[%c2_1165, %c15_1166] : memref<8x17xf32, #tpu.memory_space<smem>>
    %2334 = vector.broadcast %2333 : f32 to vector<8x128xf32>
    %2335 = arith.mulf %2334, %2332 : vector<8x128xf32>
    %2336 = arith.addf %2326, %2335 : vector<8x128xf32>
    %cst_1167 = arith.constant 1.500000e+01 : f32
    %2337 = vector.broadcast %cst_1167 : f32 to vector<8x128xf32>
    %2338 = arith.subf %2182, %2337 : vector<8x128xf32>
    %cst_1168 = arith.constant 0.000000e+00 : f32
    %cst_1169 = arith.constant 1.000000e+00 : f32
    %2339 = vector.broadcast %cst_1168 : f32 to vector<8x128xf32>
    %2340 = arith.maximumf %2339, %2338 : vector<8x128xf32>
    %2341 = vector.broadcast %cst_1169 : f32 to vector<8x128xf32>
    %2342 = arith.minimumf %2341, %2340 : vector<8x128xf32>
    %c2_1170 = arith.constant 2 : index
    %c16_1171 = arith.constant 16 : index
    %2343 = memref.load %arg1[%c2_1170, %c16_1171] : memref<8x17xf32, #tpu.memory_space<smem>>
    %2344 = vector.broadcast %2343 : f32 to vector<8x128xf32>
    %2345 = arith.mulf %2344, %2342 : vector<8x128xf32>
    %2346 = arith.addf %2336, %2345 : vector<8x128xf32>
    %2347 = arith.mulf %2171, %2346 : vector<8x128xf32>
    %cst_1172 = arith.constant dense<0.000000e+00> : vector<128xf32>
    %2348 = vector.multi_reduction <add>, %2347, %cst_1172 [0] : vector<8x128xf32> to vector<128xf32>
    %2349 = vector.shape_cast %2348 : vector<128xf32> to vector<1x128xf32>
    %c0_1173 = arith.constant 0 : index
    %c0_1174 = arith.constant 0 : index
    %2350 = vector.load %arg7[%c0_1173, %c0_1174] : memref<128x128xf32, #tpu.memory_space<vmem>>, vector<128x128xf32>
    %cst_1175 = arith.constant dense<0.000000e+00> : vector<8x128xf32>
    %2351 = tpu.matmul %2347, %2350, %cst_1175 {dimension_numbers = #tpu.dot_dimension_numbers<[1], [0], [0], [1], [0, 0, 1, 1], [], []>} : vector<8x128xf32>, vector<128x128xf32>, vector<8x128xf32> -> vector<8x128xf32>
    %2352 = vector.broadcast %2349 : vector<1x128xf32> to vector<8x128xf32>
    %2353 = arith.mulf %2351, %2352 : vector<8x128xf32>
    %2354 = arith.divf %593, %2353 : vector<8x128xf32>
    %2355 = arith.mulf %1, %1 : vector<1x128xf32>
    %cst_1176 = arith.constant 1.600000e+01 : f32
    %2356 = vector.broadcast %cst_1176 : f32 to vector<1x128xf32>
    %2357 = arith.mulf %2356, %2355 : vector<1x128xf32>
    %cst_1177 = arith.constant 0.000000e+00 : f32
    %2358 = vector.broadcast %cst_1177 : f32 to vector<1x128xf32>
    %c0_1178 = arith.constant 0 : index
    %c0_1179 = arith.constant 0 : index
    %2359 = memref.load %arg1[%c0_1178, %c0_1179] : memref<8x17xf32, #tpu.memory_space<smem>>
    %2360 = vector.broadcast %2359 : f32 to vector<1x128xf32>
    %2361 = arith.addf %2358, %2360 : vector<1x128xf32>
    %cst_1180 = arith.constant 0.000000e+00 : f32
    %2362 = vector.broadcast %cst_1180 : f32 to vector<1x128xf32>
    %2363 = arith.subf %2357, %2362 : vector<1x128xf32>
    %cst_1181 = arith.constant 0.000000e+00 : f32
    %cst_1182 = arith.constant 1.000000e+00 : f32
    %2364 = vector.broadcast %cst_1181 : f32 to vector<1x128xf32>
    %2365 = arith.maximumf %2364, %2363 : vector<1x128xf32>
    %2366 = vector.broadcast %cst_1182 : f32 to vector<1x128xf32>
    %2367 = arith.minimumf %2366, %2365 : vector<1x128xf32>
    %c0_1183 = arith.constant 0 : index
    %c1_1184 = arith.constant 1 : index
    %2368 = memref.load %arg1[%c0_1183, %c1_1184] : memref<8x17xf32, #tpu.memory_space<smem>>
    %2369 = vector.broadcast %2368 : f32 to vector<1x128xf32>
    %2370 = arith.mulf %2369, %2367 : vector<1x128xf32>
    %2371 = arith.addf %2361, %2370 : vector<1x128xf32>
    %cst_1185 = arith.constant 1.000000e+00 : f32
    %2372 = vector.broadcast %cst_1185 : f32 to vector<1x128xf32>
    %2373 = arith.subf %2357, %2372 : vector<1x128xf32>
    %cst_1186 = arith.constant 0.000000e+00 : f32
    %cst_1187 = arith.constant 1.000000e+00 : f32
    %2374 = vector.broadcast %cst_1186 : f32 to vector<1x128xf32>
    %2375 = arith.maximumf %2374, %2373 : vector<1x128xf32>
    %2376 = vector.broadcast %cst_1187 : f32 to vector<1x128xf32>
    %2377 = arith.minimumf %2376, %2375 : vector<1x128xf32>
    %c0_1188 = arith.constant 0 : index
    %c2_1189 = arith.constant 2 : index
    %2378 = memref.load %arg1[%c0_1188, %c2_1189] : memref<8x17xf32, #tpu.memory_space<smem>>
    %2379 = vector.broadcast %2378 : f32 to vector<1x128xf32>
    %2380 = arith.mulf %2379, %2377 : vector<1x128xf32>
    %2381 = arith.addf %2371, %2380 : vector<1x128xf32>
    %cst_1190 = arith.constant 2.000000e+00 : f32
    %2382 = vector.broadcast %cst_1190 : f32 to vector<1x128xf32>
    %2383 = arith.subf %2357, %2382 : vector<1x128xf32>
    %cst_1191 = arith.constant 0.000000e+00 : f32
    %cst_1192 = arith.constant 1.000000e+00 : f32
    %2384 = vector.broadcast %cst_1191 : f32 to vector<1x128xf32>
    %2385 = arith.maximumf %2384, %2383 : vector<1x128xf32>
    %2386 = vector.broadcast %cst_1192 : f32 to vector<1x128xf32>
    %2387 = arith.minimumf %2386, %2385 : vector<1x128xf32>
    %c0_1193 = arith.constant 0 : index
    %c3_1194 = arith.constant 3 : index
    %2388 = memref.load %arg1[%c0_1193, %c3_1194] : memref<8x17xf32, #tpu.memory_space<smem>>
    %2389 = vector.broadcast %2388 : f32 to vector<1x128xf32>
    %2390 = arith.mulf %2389, %2387 : vector<1x128xf32>
    %2391 = arith.addf %2381, %2390 : vector<1x128xf32>
    %cst_1195 = arith.constant 3.000000e+00 : f32
    %2392 = vector.broadcast %cst_1195 : f32 to vector<1x128xf32>
    %2393 = arith.subf %2357, %2392 : vector<1x128xf32>
    %cst_1196 = arith.constant 0.000000e+00 : f32
    %cst_1197 = arith.constant 1.000000e+00 : f32
    %2394 = vector.broadcast %cst_1196 : f32 to vector<1x128xf32>
    %2395 = arith.maximumf %2394, %2393 : vector<1x128xf32>
    %2396 = vector.broadcast %cst_1197 : f32 to vector<1x128xf32>
    %2397 = arith.minimumf %2396, %2395 : vector<1x128xf32>
    %c0_1198 = arith.constant 0 : index
    %c4_1199 = arith.constant 4 : index
    %2398 = memref.load %arg1[%c0_1198, %c4_1199] : memref<8x17xf32, #tpu.memory_space<smem>>
    %2399 = vector.broadcast %2398 : f32 to vector<1x128xf32>
    %2400 = arith.mulf %2399, %2397 : vector<1x128xf32>
    %2401 = arith.addf %2391, %2400 : vector<1x128xf32>
    %cst_1200 = arith.constant 4.000000e+00 : f32
    %2402 = vector.broadcast %cst_1200 : f32 to vector<1x128xf32>
    %2403 = arith.subf %2357, %2402 : vector<1x128xf32>
    %cst_1201 = arith.constant 0.000000e+00 : f32
    %cst_1202 = arith.constant 1.000000e+00 : f32
    %2404 = vector.broadcast %cst_1201 : f32 to vector<1x128xf32>
    %2405 = arith.maximumf %2404, %2403 : vector<1x128xf32>
    %2406 = vector.broadcast %cst_1202 : f32 to vector<1x128xf32>
    %2407 = arith.minimumf %2406, %2405 : vector<1x128xf32>
    %c0_1203 = arith.constant 0 : index
    %c5_1204 = arith.constant 5 : index
    %2408 = memref.load %arg1[%c0_1203, %c5_1204] : memref<8x17xf32, #tpu.memory_space<smem>>
    %2409 = vector.broadcast %2408 : f32 to vector<1x128xf32>
    %2410 = arith.mulf %2409, %2407 : vector<1x128xf32>
    %2411 = arith.addf %2401, %2410 : vector<1x128xf32>
    %cst_1205 = arith.constant 5.000000e+00 : f32
    %2412 = vector.broadcast %cst_1205 : f32 to vector<1x128xf32>
    %2413 = arith.subf %2357, %2412 : vector<1x128xf32>
    %cst_1206 = arith.constant 0.000000e+00 : f32
    %cst_1207 = arith.constant 1.000000e+00 : f32
    %2414 = vector.broadcast %cst_1206 : f32 to vector<1x128xf32>
    %2415 = arith.maximumf %2414, %2413 : vector<1x128xf32>
    %2416 = vector.broadcast %cst_1207 : f32 to vector<1x128xf32>
    %2417 = arith.minimumf %2416, %2415 : vector<1x128xf32>
    %c0_1208 = arith.constant 0 : index
    %c6_1209 = arith.constant 6 : index
    %2418 = memref.load %arg1[%c0_1208, %c6_1209] : memref<8x17xf32, #tpu.memory_space<smem>>
    %2419 = vector.broadcast %2418 : f32 to vector<1x128xf32>
    %2420 = arith.mulf %2419, %2417 : vector<1x128xf32>
    %2421 = arith.addf %2411, %2420 : vector<1x128xf32>
    %cst_1210 = arith.constant 6.000000e+00 : f32
    %2422 = vector.broadcast %cst_1210 : f32 to vector<1x128xf32>
    %2423 = arith.subf %2357, %2422 : vector<1x128xf32>
    %cst_1211 = arith.constant 0.000000e+00 : f32
    %cst_1212 = arith.constant 1.000000e+00 : f32
    %2424 = vector.broadcast %cst_1211 : f32 to vector<1x128xf32>
    %2425 = arith.maximumf %2424, %2423 : vector<1x128xf32>
    %2426 = vector.broadcast %cst_1212 : f32 to vector<1x128xf32>
    %2427 = arith.minimumf %2426, %2425 : vector<1x128xf32>
    %c0_1213 = arith.constant 0 : index
    %c7_1214 = arith.constant 7 : index
    %2428 = memref.load %arg1[%c0_1213, %c7_1214] : memref<8x17xf32, #tpu.memory_space<smem>>
    %2429 = vector.broadcast %2428 : f32 to vector<1x128xf32>
    %2430 = arith.mulf %2429, %2427 : vector<1x128xf32>
    %2431 = arith.addf %2421, %2430 : vector<1x128xf32>
    %cst_1215 = arith.constant 7.000000e+00 : f32
    %2432 = vector.broadcast %cst_1215 : f32 to vector<1x128xf32>
    %2433 = arith.subf %2357, %2432 : vector<1x128xf32>
    %cst_1216 = arith.constant 0.000000e+00 : f32
    %cst_1217 = arith.constant 1.000000e+00 : f32
    %2434 = vector.broadcast %cst_1216 : f32 to vector<1x128xf32>
    %2435 = arith.maximumf %2434, %2433 : vector<1x128xf32>
    %2436 = vector.broadcast %cst_1217 : f32 to vector<1x128xf32>
    %2437 = arith.minimumf %2436, %2435 : vector<1x128xf32>
    %c0_1218 = arith.constant 0 : index
    %c8_1219 = arith.constant 8 : index
    %2438 = memref.load %arg1[%c0_1218, %c8_1219] : memref<8x17xf32, #tpu.memory_space<smem>>
    %2439 = vector.broadcast %2438 : f32 to vector<1x128xf32>
    %2440 = arith.mulf %2439, %2437 : vector<1x128xf32>
    %2441 = arith.addf %2431, %2440 : vector<1x128xf32>
    %cst_1220 = arith.constant 8.000000e+00 : f32
    %2442 = vector.broadcast %cst_1220 : f32 to vector<1x128xf32>
    %2443 = arith.subf %2357, %2442 : vector<1x128xf32>
    %cst_1221 = arith.constant 0.000000e+00 : f32
    %cst_1222 = arith.constant 1.000000e+00 : f32
    %2444 = vector.broadcast %cst_1221 : f32 to vector<1x128xf32>
    %2445 = arith.maximumf %2444, %2443 : vector<1x128xf32>
    %2446 = vector.broadcast %cst_1222 : f32 to vector<1x128xf32>
    %2447 = arith.minimumf %2446, %2445 : vector<1x128xf32>
    %c0_1223 = arith.constant 0 : index
    %c9_1224 = arith.constant 9 : index
    %2448 = memref.load %arg1[%c0_1223, %c9_1224] : memref<8x17xf32, #tpu.memory_space<smem>>
    %2449 = vector.broadcast %2448 : f32 to vector<1x128xf32>
    %2450 = arith.mulf %2449, %2447 : vector<1x128xf32>
    %2451 = arith.addf %2441, %2450 : vector<1x128xf32>
    %cst_1225 = arith.constant 9.000000e+00 : f32
    %2452 = vector.broadcast %cst_1225 : f32 to vector<1x128xf32>
    %2453 = arith.subf %2357, %2452 : vector<1x128xf32>
    %cst_1226 = arith.constant 0.000000e+00 : f32
    %cst_1227 = arith.constant 1.000000e+00 : f32
    %2454 = vector.broadcast %cst_1226 : f32 to vector<1x128xf32>
    %2455 = arith.maximumf %2454, %2453 : vector<1x128xf32>
    %2456 = vector.broadcast %cst_1227 : f32 to vector<1x128xf32>
    %2457 = arith.minimumf %2456, %2455 : vector<1x128xf32>
    %c0_1228 = arith.constant 0 : index
    %c10_1229 = arith.constant 10 : index
    %2458 = memref.load %arg1[%c0_1228, %c10_1229] : memref<8x17xf32, #tpu.memory_space<smem>>
    %2459 = vector.broadcast %2458 : f32 to vector<1x128xf32>
    %2460 = arith.mulf %2459, %2457 : vector<1x128xf32>
    %2461 = arith.addf %2451, %2460 : vector<1x128xf32>
    %cst_1230 = arith.constant 1.000000e+01 : f32
    %2462 = vector.broadcast %cst_1230 : f32 to vector<1x128xf32>
    %2463 = arith.subf %2357, %2462 : vector<1x128xf32>
    %cst_1231 = arith.constant 0.000000e+00 : f32
    %cst_1232 = arith.constant 1.000000e+00 : f32
    %2464 = vector.broadcast %cst_1231 : f32 to vector<1x128xf32>
    %2465 = arith.maximumf %2464, %2463 : vector<1x128xf32>
    %2466 = vector.broadcast %cst_1232 : f32 to vector<1x128xf32>
    %2467 = arith.minimumf %2466, %2465 : vector<1x128xf32>
    %c0_1233 = arith.constant 0 : index
    %c11_1234 = arith.constant 11 : index
    %2468 = memref.load %arg1[%c0_1233, %c11_1234] : memref<8x17xf32, #tpu.memory_space<smem>>
    %2469 = vector.broadcast %2468 : f32 to vector<1x128xf32>
    %2470 = arith.mulf %2469, %2467 : vector<1x128xf32>
    %2471 = arith.addf %2461, %2470 : vector<1x128xf32>
    %cst_1235 = arith.constant 1.100000e+01 : f32
    %2472 = vector.broadcast %cst_1235 : f32 to vector<1x128xf32>
    %2473 = arith.subf %2357, %2472 : vector<1x128xf32>
    %cst_1236 = arith.constant 0.000000e+00 : f32
    %cst_1237 = arith.constant 1.000000e+00 : f32
    %2474 = vector.broadcast %cst_1236 : f32 to vector<1x128xf32>
    %2475 = arith.maximumf %2474, %2473 : vector<1x128xf32>
    %2476 = vector.broadcast %cst_1237 : f32 to vector<1x128xf32>
    %2477 = arith.minimumf %2476, %2475 : vector<1x128xf32>
    %c0_1238 = arith.constant 0 : index
    %c12_1239 = arith.constant 12 : index
    %2478 = memref.load %arg1[%c0_1238, %c12_1239] : memref<8x17xf32, #tpu.memory_space<smem>>
    %2479 = vector.broadcast %2478 : f32 to vector<1x128xf32>
    %2480 = arith.mulf %2479, %2477 : vector<1x128xf32>
    %2481 = arith.addf %2471, %2480 : vector<1x128xf32>
    %cst_1240 = arith.constant 1.200000e+01 : f32
    %2482 = vector.broadcast %cst_1240 : f32 to vector<1x128xf32>
    %2483 = arith.subf %2357, %2482 : vector<1x128xf32>
    %cst_1241 = arith.constant 0.000000e+00 : f32
    %cst_1242 = arith.constant 1.000000e+00 : f32
    %2484 = vector.broadcast %cst_1241 : f32 to vector<1x128xf32>
    %2485 = arith.maximumf %2484, %2483 : vector<1x128xf32>
    %2486 = vector.broadcast %cst_1242 : f32 to vector<1x128xf32>
    %2487 = arith.minimumf %2486, %2485 : vector<1x128xf32>
    %c0_1243 = arith.constant 0 : index
    %c13_1244 = arith.constant 13 : index
    %2488 = memref.load %arg1[%c0_1243, %c13_1244] : memref<8x17xf32, #tpu.memory_space<smem>>
    %2489 = vector.broadcast %2488 : f32 to vector<1x128xf32>
    %2490 = arith.mulf %2489, %2487 : vector<1x128xf32>
    %2491 = arith.addf %2481, %2490 : vector<1x128xf32>
    %cst_1245 = arith.constant 1.300000e+01 : f32
    %2492 = vector.broadcast %cst_1245 : f32 to vector<1x128xf32>
    %2493 = arith.subf %2357, %2492 : vector<1x128xf32>
    %cst_1246 = arith.constant 0.000000e+00 : f32
    %cst_1247 = arith.constant 1.000000e+00 : f32
    %2494 = vector.broadcast %cst_1246 : f32 to vector<1x128xf32>
    %2495 = arith.maximumf %2494, %2493 : vector<1x128xf32>
    %2496 = vector.broadcast %cst_1247 : f32 to vector<1x128xf32>
    %2497 = arith.minimumf %2496, %2495 : vector<1x128xf32>
    %c0_1248 = arith.constant 0 : index
    %c14_1249 = arith.constant 14 : index
    %2498 = memref.load %arg1[%c0_1248, %c14_1249] : memref<8x17xf32, #tpu.memory_space<smem>>
    %2499 = vector.broadcast %2498 : f32 to vector<1x128xf32>
    %2500 = arith.mulf %2499, %2497 : vector<1x128xf32>
    %2501 = arith.addf %2491, %2500 : vector<1x128xf32>
    %cst_1250 = arith.constant 1.400000e+01 : f32
    %2502 = vector.broadcast %cst_1250 : f32 to vector<1x128xf32>
    %2503 = arith.subf %2357, %2502 : vector<1x128xf32>
    %cst_1251 = arith.constant 0.000000e+00 : f32
    %cst_1252 = arith.constant 1.000000e+00 : f32
    %2504 = vector.broadcast %cst_1251 : f32 to vector<1x128xf32>
    %2505 = arith.maximumf %2504, %2503 : vector<1x128xf32>
    %2506 = vector.broadcast %cst_1252 : f32 to vector<1x128xf32>
    %2507 = arith.minimumf %2506, %2505 : vector<1x128xf32>
    %c0_1253 = arith.constant 0 : index
    %c15_1254 = arith.constant 15 : index
    %2508 = memref.load %arg1[%c0_1253, %c15_1254] : memref<8x17xf32, #tpu.memory_space<smem>>
    %2509 = vector.broadcast %2508 : f32 to vector<1x128xf32>
    %2510 = arith.mulf %2509, %2507 : vector<1x128xf32>
    %2511 = arith.addf %2501, %2510 : vector<1x128xf32>
    %cst_1255 = arith.constant 1.500000e+01 : f32
    %2512 = vector.broadcast %cst_1255 : f32 to vector<1x128xf32>
    %2513 = arith.subf %2357, %2512 : vector<1x128xf32>
    %cst_1256 = arith.constant 0.000000e+00 : f32
    %cst_1257 = arith.constant 1.000000e+00 : f32
    %2514 = vector.broadcast %cst_1256 : f32 to vector<1x128xf32>
    %2515 = arith.maximumf %2514, %2513 : vector<1x128xf32>
    %2516 = vector.broadcast %cst_1257 : f32 to vector<1x128xf32>
    %2517 = arith.minimumf %2516, %2515 : vector<1x128xf32>
    %c0_1258 = arith.constant 0 : index
    %c16_1259 = arith.constant 16 : index
    %2518 = memref.load %arg1[%c0_1258, %c16_1259] : memref<8x17xf32, #tpu.memory_space<smem>>
    %2519 = vector.broadcast %2518 : f32 to vector<1x128xf32>
    %2520 = arith.mulf %2519, %2517 : vector<1x128xf32>
    %2521 = arith.addf %2511, %2520 : vector<1x128xf32>
    %2522 = arith.divf %2521, %2349 : vector<1x128xf32>
    %cst_1260 = arith.constant dense<0.000000e+00> : vector<128xf32>
    %2523 = vector.multi_reduction <add>, %2354, %cst_1260 [0] : vector<8x128xf32> to vector<128xf32>
    %2524 = vector.shape_cast %2523 : vector<128xf32> to vector<1x128xf32>
    %2525 = arith.addf %2524, %2522 : vector<1x128xf32>
    %c0_1261 = arith.constant 0 : index
    %c0_1262 = arith.constant 0 : index
    %2526 = vector.load %arg8[%c0_1261, %c0_1262] : memref<128x16xf32, #tpu.memory_space<vmem>>, vector<128x16xf32>
    %cst_1263 = arith.constant dense<0.000000e+00> : vector<1x16xf32>
    %2527 = tpu.matmul %2525, %2526, %cst_1263 {dimension_numbers = #tpu.dot_dimension_numbers<[1], [0], [0], [1], [0, 0, 1, 1], [], []>} : vector<1x128xf32>, vector<128x16xf32>, vector<1x16xf32> -> vector<1x16xf32>
    %cst_1264 = arith.constant 9.99999968E-21 : f32
    %2528 = vector.broadcast %cst_1264 : f32 to vector<1x16xf32>
    %2529 = arith.addf %2527, %2528 : vector<1x16xf32>
    %2530 = math.sqrt %2529 : vector<1x16xf32>
    %cst_1265 = arith.constant 8.000000e+00 : f32
    %2531 = vector.broadcast %cst_1265 : f32 to vector<1x128xf32>
    %2532 = arith.divf %768, %2531 : vector<1x128xf32>
    %cst_1266 = arith.constant 6.400000e+01 : f32
    %2533 = vector.broadcast %cst_1266 : f32 to vector<1x128xf32>
    %2534 = arith.divf %599, %2533 : vector<1x128xf32>
    %2535 = arith.addf %2532, %2534 : vector<1x128xf32>
    %c0_1267 = arith.constant 0 : index
    %c0_1268 = arith.constant 0 : index
    %2536 = vector.load %arg8[%c0_1267, %c0_1268] : memref<128x16xf32, #tpu.memory_space<vmem>>, vector<128x16xf32>
    %cst_1269 = arith.constant dense<0.000000e+00> : vector<1x16xf32>
    %2537 = tpu.matmul %2535, %2536, %cst_1269 {dimension_numbers = #tpu.dot_dimension_numbers<[1], [0], [0], [1], [0, 0, 1, 1], [], []>} : vector<1x128xf32>, vector<128x16xf32>, vector<1x16xf32> -> vector<1x16xf32>
    %cst_1270 = arith.constant 1.600000e+01 : f32
    %2538 = vector.broadcast %cst_1270 : f32 to vector<1x16xf32>
    %2539 = arith.mulf %2538, %2537 : vector<1x16xf32>
    %cst_1271 = arith.constant 0.000000e+00 : f32
    %2540 = vector.broadcast %cst_1271 : f32 to vector<1x16xf32>
    %c7_1272 = arith.constant 7 : index
    %c0_1273 = arith.constant 0 : index
    %2541 = memref.load %arg1[%c7_1272, %c0_1273] : memref<8x17xf32, #tpu.memory_space<smem>>
    %2542 = vector.broadcast %2541 : f32 to vector<1x16xf32>
    %2543 = arith.addf %2540, %2542 : vector<1x16xf32>
    %cst_1274 = arith.constant 0.000000e+00 : f32
    %2544 = vector.broadcast %cst_1274 : f32 to vector<1x16xf32>
    %2545 = arith.subf %2539, %2544 : vector<1x16xf32>
    %cst_1275 = arith.constant 0.000000e+00 : f32
    %cst_1276 = arith.constant 1.000000e+00 : f32
    %2546 = vector.broadcast %cst_1275 : f32 to vector<1x16xf32>
    %2547 = arith.maximumf %2546, %2545 : vector<1x16xf32>
    %2548 = vector.broadcast %cst_1276 : f32 to vector<1x16xf32>
    %2549 = arith.minimumf %2548, %2547 : vector<1x16xf32>
    %c7_1277 = arith.constant 7 : index
    %c1_1278 = arith.constant 1 : index
    %2550 = memref.load %arg1[%c7_1277, %c1_1278] : memref<8x17xf32, #tpu.memory_space<smem>>
    %2551 = vector.broadcast %2550 : f32 to vector<1x16xf32>
    %2552 = arith.mulf %2551, %2549 : vector<1x16xf32>
    %2553 = arith.addf %2543, %2552 : vector<1x16xf32>
    %cst_1279 = arith.constant 1.000000e+00 : f32
    %2554 = vector.broadcast %cst_1279 : f32 to vector<1x16xf32>
    %2555 = arith.subf %2539, %2554 : vector<1x16xf32>
    %cst_1280 = arith.constant 0.000000e+00 : f32
    %cst_1281 = arith.constant 1.000000e+00 : f32
    %2556 = vector.broadcast %cst_1280 : f32 to vector<1x16xf32>
    %2557 = arith.maximumf %2556, %2555 : vector<1x16xf32>
    %2558 = vector.broadcast %cst_1281 : f32 to vector<1x16xf32>
    %2559 = arith.minimumf %2558, %2557 : vector<1x16xf32>
    %c7_1282 = arith.constant 7 : index
    %c2_1283 = arith.constant 2 : index
    %2560 = memref.load %arg1[%c7_1282, %c2_1283] : memref<8x17xf32, #tpu.memory_space<smem>>
    %2561 = vector.broadcast %2560 : f32 to vector<1x16xf32>
    %2562 = arith.mulf %2561, %2559 : vector<1x16xf32>
    %2563 = arith.addf %2553, %2562 : vector<1x16xf32>
    %cst_1284 = arith.constant 2.000000e+00 : f32
    %2564 = vector.broadcast %cst_1284 : f32 to vector<1x16xf32>
    %2565 = arith.subf %2539, %2564 : vector<1x16xf32>
    %cst_1285 = arith.constant 0.000000e+00 : f32
    %cst_1286 = arith.constant 1.000000e+00 : f32
    %2566 = vector.broadcast %cst_1285 : f32 to vector<1x16xf32>
    %2567 = arith.maximumf %2566, %2565 : vector<1x16xf32>
    %2568 = vector.broadcast %cst_1286 : f32 to vector<1x16xf32>
    %2569 = arith.minimumf %2568, %2567 : vector<1x16xf32>
    %c7_1287 = arith.constant 7 : index
    %c3_1288 = arith.constant 3 : index
    %2570 = memref.load %arg1[%c7_1287, %c3_1288] : memref<8x17xf32, #tpu.memory_space<smem>>
    %2571 = vector.broadcast %2570 : f32 to vector<1x16xf32>
    %2572 = arith.mulf %2571, %2569 : vector<1x16xf32>
    %2573 = arith.addf %2563, %2572 : vector<1x16xf32>
    %cst_1289 = arith.constant 3.000000e+00 : f32
    %2574 = vector.broadcast %cst_1289 : f32 to vector<1x16xf32>
    %2575 = arith.subf %2539, %2574 : vector<1x16xf32>
    %cst_1290 = arith.constant 0.000000e+00 : f32
    %cst_1291 = arith.constant 1.000000e+00 : f32
    %2576 = vector.broadcast %cst_1290 : f32 to vector<1x16xf32>
    %2577 = arith.maximumf %2576, %2575 : vector<1x16xf32>
    %2578 = vector.broadcast %cst_1291 : f32 to vector<1x16xf32>
    %2579 = arith.minimumf %2578, %2577 : vector<1x16xf32>
    %c7_1292 = arith.constant 7 : index
    %c4_1293 = arith.constant 4 : index
    %2580 = memref.load %arg1[%c7_1292, %c4_1293] : memref<8x17xf32, #tpu.memory_space<smem>>
    %2581 = vector.broadcast %2580 : f32 to vector<1x16xf32>
    %2582 = arith.mulf %2581, %2579 : vector<1x16xf32>
    %2583 = arith.addf %2573, %2582 : vector<1x16xf32>
    %cst_1294 = arith.constant 4.000000e+00 : f32
    %2584 = vector.broadcast %cst_1294 : f32 to vector<1x16xf32>
    %2585 = arith.subf %2539, %2584 : vector<1x16xf32>
    %cst_1295 = arith.constant 0.000000e+00 : f32
    %cst_1296 = arith.constant 1.000000e+00 : f32
    %2586 = vector.broadcast %cst_1295 : f32 to vector<1x16xf32>
    %2587 = arith.maximumf %2586, %2585 : vector<1x16xf32>
    %2588 = vector.broadcast %cst_1296 : f32 to vector<1x16xf32>
    %2589 = arith.minimumf %2588, %2587 : vector<1x16xf32>
    %c7_1297 = arith.constant 7 : index
    %c5_1298 = arith.constant 5 : index
    %2590 = memref.load %arg1[%c7_1297, %c5_1298] : memref<8x17xf32, #tpu.memory_space<smem>>
    %2591 = vector.broadcast %2590 : f32 to vector<1x16xf32>
    %2592 = arith.mulf %2591, %2589 : vector<1x16xf32>
    %2593 = arith.addf %2583, %2592 : vector<1x16xf32>
    %cst_1299 = arith.constant 5.000000e+00 : f32
    %2594 = vector.broadcast %cst_1299 : f32 to vector<1x16xf32>
    %2595 = arith.subf %2539, %2594 : vector<1x16xf32>
    %cst_1300 = arith.constant 0.000000e+00 : f32
    %cst_1301 = arith.constant 1.000000e+00 : f32
    %2596 = vector.broadcast %cst_1300 : f32 to vector<1x16xf32>
    %2597 = arith.maximumf %2596, %2595 : vector<1x16xf32>
    %2598 = vector.broadcast %cst_1301 : f32 to vector<1x16xf32>
    %2599 = arith.minimumf %2598, %2597 : vector<1x16xf32>
    %c7_1302 = arith.constant 7 : index
    %c6_1303 = arith.constant 6 : index
    %2600 = memref.load %arg1[%c7_1302, %c6_1303] : memref<8x17xf32, #tpu.memory_space<smem>>
    %2601 = vector.broadcast %2600 : f32 to vector<1x16xf32>
    %2602 = arith.mulf %2601, %2599 : vector<1x16xf32>
    %2603 = arith.addf %2593, %2602 : vector<1x16xf32>
    %cst_1304 = arith.constant 6.000000e+00 : f32
    %2604 = vector.broadcast %cst_1304 : f32 to vector<1x16xf32>
    %2605 = arith.subf %2539, %2604 : vector<1x16xf32>
    %cst_1305 = arith.constant 0.000000e+00 : f32
    %cst_1306 = arith.constant 1.000000e+00 : f32
    %2606 = vector.broadcast %cst_1305 : f32 to vector<1x16xf32>
    %2607 = arith.maximumf %2606, %2605 : vector<1x16xf32>
    %2608 = vector.broadcast %cst_1306 : f32 to vector<1x16xf32>
    %2609 = arith.minimumf %2608, %2607 : vector<1x16xf32>
    %c7_1307 = arith.constant 7 : index
    %c7_1308 = arith.constant 7 : index
    %2610 = memref.load %arg1[%c7_1307, %c7_1308] : memref<8x17xf32, #tpu.memory_space<smem>>
    %2611 = vector.broadcast %2610 : f32 to vector<1x16xf32>
    %2612 = arith.mulf %2611, %2609 : vector<1x16xf32>
    %2613 = arith.addf %2603, %2612 : vector<1x16xf32>
    %cst_1309 = arith.constant 7.000000e+00 : f32
    %2614 = vector.broadcast %cst_1309 : f32 to vector<1x16xf32>
    %2615 = arith.subf %2539, %2614 : vector<1x16xf32>
    %cst_1310 = arith.constant 0.000000e+00 : f32
    %cst_1311 = arith.constant 1.000000e+00 : f32
    %2616 = vector.broadcast %cst_1310 : f32 to vector<1x16xf32>
    %2617 = arith.maximumf %2616, %2615 : vector<1x16xf32>
    %2618 = vector.broadcast %cst_1311 : f32 to vector<1x16xf32>
    %2619 = arith.minimumf %2618, %2617 : vector<1x16xf32>
    %c7_1312 = arith.constant 7 : index
    %c8_1313 = arith.constant 8 : index
    %2620 = memref.load %arg1[%c7_1312, %c8_1313] : memref<8x17xf32, #tpu.memory_space<smem>>
    %2621 = vector.broadcast %2620 : f32 to vector<1x16xf32>
    %2622 = arith.mulf %2621, %2619 : vector<1x16xf32>
    %2623 = arith.addf %2613, %2622 : vector<1x16xf32>
    %cst_1314 = arith.constant 8.000000e+00 : f32
    %2624 = vector.broadcast %cst_1314 : f32 to vector<1x16xf32>
    %2625 = arith.subf %2539, %2624 : vector<1x16xf32>
    %cst_1315 = arith.constant 0.000000e+00 : f32
    %cst_1316 = arith.constant 1.000000e+00 : f32
    %2626 = vector.broadcast %cst_1315 : f32 to vector<1x16xf32>
    %2627 = arith.maximumf %2626, %2625 : vector<1x16xf32>
    %2628 = vector.broadcast %cst_1316 : f32 to vector<1x16xf32>
    %2629 = arith.minimumf %2628, %2627 : vector<1x16xf32>
    %c7_1317 = arith.constant 7 : index
    %c9_1318 = arith.constant 9 : index
    %2630 = memref.load %arg1[%c7_1317, %c9_1318] : memref<8x17xf32, #tpu.memory_space<smem>>
    %2631 = vector.broadcast %2630 : f32 to vector<1x16xf32>
    %2632 = arith.mulf %2631, %2629 : vector<1x16xf32>
    %2633 = arith.addf %2623, %2632 : vector<1x16xf32>
    %cst_1319 = arith.constant 9.000000e+00 : f32
    %2634 = vector.broadcast %cst_1319 : f32 to vector<1x16xf32>
    %2635 = arith.subf %2539, %2634 : vector<1x16xf32>
    %cst_1320 = arith.constant 0.000000e+00 : f32
    %cst_1321 = arith.constant 1.000000e+00 : f32
    %2636 = vector.broadcast %cst_1320 : f32 to vector<1x16xf32>
    %2637 = arith.maximumf %2636, %2635 : vector<1x16xf32>
    %2638 = vector.broadcast %cst_1321 : f32 to vector<1x16xf32>
    %2639 = arith.minimumf %2638, %2637 : vector<1x16xf32>
    %c7_1322 = arith.constant 7 : index
    %c10_1323 = arith.constant 10 : index
    %2640 = memref.load %arg1[%c7_1322, %c10_1323] : memref<8x17xf32, #tpu.memory_space<smem>>
    %2641 = vector.broadcast %2640 : f32 to vector<1x16xf32>
    %2642 = arith.mulf %2641, %2639 : vector<1x16xf32>
    %2643 = arith.addf %2633, %2642 : vector<1x16xf32>
    %cst_1324 = arith.constant 1.000000e+01 : f32
    %2644 = vector.broadcast %cst_1324 : f32 to vector<1x16xf32>
    %2645 = arith.subf %2539, %2644 : vector<1x16xf32>
    %cst_1325 = arith.constant 0.000000e+00 : f32
    %cst_1326 = arith.constant 1.000000e+00 : f32
    %2646 = vector.broadcast %cst_1325 : f32 to vector<1x16xf32>
    %2647 = arith.maximumf %2646, %2645 : vector<1x16xf32>
    %2648 = vector.broadcast %cst_1326 : f32 to vector<1x16xf32>
    %2649 = arith.minimumf %2648, %2647 : vector<1x16xf32>
    %c7_1327 = arith.constant 7 : index
    %c11_1328 = arith.constant 11 : index
    %2650 = memref.load %arg1[%c7_1327, %c11_1328] : memref<8x17xf32, #tpu.memory_space<smem>>
    %2651 = vector.broadcast %2650 : f32 to vector<1x16xf32>
    %2652 = arith.mulf %2651, %2649 : vector<1x16xf32>
    %2653 = arith.addf %2643, %2652 : vector<1x16xf32>
    %cst_1329 = arith.constant 1.100000e+01 : f32
    %2654 = vector.broadcast %cst_1329 : f32 to vector<1x16xf32>
    %2655 = arith.subf %2539, %2654 : vector<1x16xf32>
    %cst_1330 = arith.constant 0.000000e+00 : f32
    %cst_1331 = arith.constant 1.000000e+00 : f32
    %2656 = vector.broadcast %cst_1330 : f32 to vector<1x16xf32>
    %2657 = arith.maximumf %2656, %2655 : vector<1x16xf32>
    %2658 = vector.broadcast %cst_1331 : f32 to vector<1x16xf32>
    %2659 = arith.minimumf %2658, %2657 : vector<1x16xf32>
    %c7_1332 = arith.constant 7 : index
    %c12_1333 = arith.constant 12 : index
    %2660 = memref.load %arg1[%c7_1332, %c12_1333] : memref<8x17xf32, #tpu.memory_space<smem>>
    %2661 = vector.broadcast %2660 : f32 to vector<1x16xf32>
    %2662 = arith.mulf %2661, %2659 : vector<1x16xf32>
    %2663 = arith.addf %2653, %2662 : vector<1x16xf32>
    %cst_1334 = arith.constant 1.200000e+01 : f32
    %2664 = vector.broadcast %cst_1334 : f32 to vector<1x16xf32>
    %2665 = arith.subf %2539, %2664 : vector<1x16xf32>
    %cst_1335 = arith.constant 0.000000e+00 : f32
    %cst_1336 = arith.constant 1.000000e+00 : f32
    %2666 = vector.broadcast %cst_1335 : f32 to vector<1x16xf32>
    %2667 = arith.maximumf %2666, %2665 : vector<1x16xf32>
    %2668 = vector.broadcast %cst_1336 : f32 to vector<1x16xf32>
    %2669 = arith.minimumf %2668, %2667 : vector<1x16xf32>
    %c7_1337 = arith.constant 7 : index
    %c13_1338 = arith.constant 13 : index
    %2670 = memref.load %arg1[%c7_1337, %c13_1338] : memref<8x17xf32, #tpu.memory_space<smem>>
    %2671 = vector.broadcast %2670 : f32 to vector<1x16xf32>
    %2672 = arith.mulf %2671, %2669 : vector<1x16xf32>
    %2673 = arith.addf %2663, %2672 : vector<1x16xf32>
    %cst_1339 = arith.constant 1.300000e+01 : f32
    %2674 = vector.broadcast %cst_1339 : f32 to vector<1x16xf32>
    %2675 = arith.subf %2539, %2674 : vector<1x16xf32>
    %cst_1340 = arith.constant 0.000000e+00 : f32
    %cst_1341 = arith.constant 1.000000e+00 : f32
    %2676 = vector.broadcast %cst_1340 : f32 to vector<1x16xf32>
    %2677 = arith.maximumf %2676, %2675 : vector<1x16xf32>
    %2678 = vector.broadcast %cst_1341 : f32 to vector<1x16xf32>
    %2679 = arith.minimumf %2678, %2677 : vector<1x16xf32>
    %c7_1342 = arith.constant 7 : index
    %c14_1343 = arith.constant 14 : index
    %2680 = memref.load %arg1[%c7_1342, %c14_1343] : memref<8x17xf32, #tpu.memory_space<smem>>
    %2681 = vector.broadcast %2680 : f32 to vector<1x16xf32>
    %2682 = arith.mulf %2681, %2679 : vector<1x16xf32>
    %2683 = arith.addf %2673, %2682 : vector<1x16xf32>
    %cst_1344 = arith.constant 1.400000e+01 : f32
    %2684 = vector.broadcast %cst_1344 : f32 to vector<1x16xf32>
    %2685 = arith.subf %2539, %2684 : vector<1x16xf32>
    %cst_1345 = arith.constant 0.000000e+00 : f32
    %cst_1346 = arith.constant 1.000000e+00 : f32
    %2686 = vector.broadcast %cst_1345 : f32 to vector<1x16xf32>
    %2687 = arith.maximumf %2686, %2685 : vector<1x16xf32>
    %2688 = vector.broadcast %cst_1346 : f32 to vector<1x16xf32>
    %2689 = arith.minimumf %2688, %2687 : vector<1x16xf32>
    %c7_1347 = arith.constant 7 : index
    %c15_1348 = arith.constant 15 : index
    %2690 = memref.load %arg1[%c7_1347, %c15_1348] : memref<8x17xf32, #tpu.memory_space<smem>>
    %2691 = vector.broadcast %2690 : f32 to vector<1x16xf32>
    %2692 = arith.mulf %2691, %2689 : vector<1x16xf32>
    %2693 = arith.addf %2683, %2692 : vector<1x16xf32>
    %cst_1349 = arith.constant 1.500000e+01 : f32
    %2694 = vector.broadcast %cst_1349 : f32 to vector<1x16xf32>
    %2695 = arith.subf %2539, %2694 : vector<1x16xf32>
    %cst_1350 = arith.constant 0.000000e+00 : f32
    %cst_1351 = arith.constant 1.000000e+00 : f32
    %2696 = vector.broadcast %cst_1350 : f32 to vector<1x16xf32>
    %2697 = arith.maximumf %2696, %2695 : vector<1x16xf32>
    %2698 = vector.broadcast %cst_1351 : f32 to vector<1x16xf32>
    %2699 = arith.minimumf %2698, %2697 : vector<1x16xf32>
    %c7_1352 = arith.constant 7 : index
    %c16_1353 = arith.constant 16 : index
    %2700 = memref.load %arg1[%c7_1352, %c16_1353] : memref<8x17xf32, #tpu.memory_space<smem>>
    %2701 = vector.broadcast %2700 : f32 to vector<1x16xf32>
    %2702 = arith.mulf %2701, %2699 : vector<1x16xf32>
    %2703 = arith.addf %2693, %2702 : vector<1x16xf32>
    %cst_1354 = arith.constant 0.000000e+00 : f32
    %cst_1355 = arith.constant 8.000000e+00 : f32
    %2704 = vector.broadcast %cst_1354 : f32 to vector<1x16xf32>
    %2705 = arith.maximumf %2704, %2530 : vector<1x16xf32>
    %2706 = vector.broadcast %cst_1355 : f32 to vector<1x16xf32>
    %2707 = arith.minimumf %2706, %2705 : vector<1x16xf32>
    %2708 = math.floor %2707 : vector<1x16xf32>
    %2709 = arith.subf %2707, %2708 : vector<1x16xf32>
    %2710 = arith.fptosi %2708 : vector<1x16xf32> to vector<1x16xi32>
    %c1_i32 = arith.constant 1 : i32
    %2711 = vector.broadcast %c1_i32 : i32 to vector<1x16xi32>
    %2712 = arith.addi %2710, %2711 : vector<1x16xi32>
    %c8_i32 = arith.constant 8 : i32
    %2713 = vector.broadcast %c8_i32 : i32 to vector<1x16xi32>
    %2714 = arith.minsi %2712, %2713 : vector<1x16xi32>
    %2715 = tpu.iota {dimensions = array<i32: 0>} : vector<9x16xi32>
    %cst_1356 = arith.constant 1.000000e+00 : f32
    %2716 = vector.broadcast %cst_1356 : f32 to vector<1x16xf32>
    %2717 = arith.subf %2716, %2709 : vector<1x16xf32>
    %2718 = vector.broadcast %2710 : vector<1x16xi32> to vector<9x16xi32>
    %2719 = arith.cmpi eq, %2715, %2718 : vector<9x16xi32>
    %2720 = arith.extui %2719 : vector<9x16xi1> to vector<9x16xi32>
    %2721 = arith.sitofp %2720 : vector<9x16xi32> to vector<9x16xf32>
    %2722 = vector.broadcast %2717 : vector<1x16xf32> to vector<9x16xf32>
    %2723 = arith.mulf %2722, %2721 : vector<9x16xf32>
    %2724 = vector.broadcast %2714 : vector<1x16xi32> to vector<9x16xi32>
    %2725 = arith.cmpi eq, %2715, %2724 : vector<9x16xi32>
    %2726 = arith.extui %2725 : vector<9x16xi1> to vector<9x16xi32>
    %2727 = arith.sitofp %2726 : vector<9x16xi32> to vector<9x16xf32>
    %2728 = vector.broadcast %2709 : vector<1x16xf32> to vector<9x16xf32>
    %2729 = arith.mulf %2728, %2727 : vector<9x16xf32>
    %2730 = arith.addf %2723, %2729 : vector<9x16xf32>
    %2731 = vector.broadcast %2703 : vector<1x16xf32> to vector<9x16xf32>
    %2732 = arith.mulf %2730, %2731 : vector<9x16xf32>
    %c0_1357 = arith.constant 0 : index
    %c0_1358 = arith.constant 0 : index
    %c0_1359 = arith.constant 0 : index
    %2733 = vector.load %arg9[%c0_1357, %c0_1358, %c0_1359] : memref<1x9x16xf32, #tpu.memory_space<vmem>>, vector<1x9x16xf32>
    %2734 = vector.shape_cast %2733 : vector<1x9x16xf32> to vector<9x16xf32>
    %2735 = vector.shape_cast %2732 : vector<9x16xf32> to vector<1x9x16xf32>
    tpu.vector_store %arg9[%c0_1357, %c0_1358, %c0_1359], %2735 {strides = array<i32>} : memref<1x9x16xf32, #tpu.memory_space<vmem>>, vector<1x9x16xf32>,
    return
  }
  func.func @transform_0(%arg0: i32) -> (i32, i32) {
    %c0_i32 = arith.constant 0 : i32
    %c0_i32_0 = arith.constant 0 : i32
    %c0_i32_1 = arith.constant 0 : i32
    return %c0_i32, %c0_i32_0 : i32, i32
  }
  func.func @transform_1(%arg0: i32) -> (i32, i32, i32) {
    %c0_i32 = arith.constant 0 : i32
    %c0_i32_0 = arith.constant 0 : i32
    %c0_i32_1 = arith.constant 0 : i32
    return %arg0, %c0_i32, %c0_i32_0 : i32, i32, i32
  }
  func.func @transform_2(%arg0: i32) -> (i32, i32, i32) {
    %c0_i32 = arith.constant 0 : i32
    %c0_i32_0 = arith.constant 0 : i32
    %c0_i32_1 = arith.constant 0 : i32
    return %arg0, %c0_i32, %c0_i32_0 : i32, i32, i32
  }
  func.func @transform_3(%arg0: i32) -> (i32, i32, i32) {
    %c0_i32 = arith.constant 0 : i32
    %c0_i32_0 = arith.constant 0 : i32
    %c0_i32_1 = arith.constant 0 : i32
    return %arg0, %c0_i32, %c0_i32_0 : i32, i32, i32
  }
  func.func @transform_4(%arg0: i32) -> (i32, i32, i32, i32) {
    %c0_i32 = arith.constant 0 : i32
    %c0_i32_0 = arith.constant 0 : i32
    %c0_i32_1 = arith.constant 0 : i32
    %c0_i32_2 = arith.constant 0 : i32
    return %arg0, %c0_i32, %c0_i32_0, %c0_i32_1 : i32, i32, i32, i32
  }
  func.func @transform_5(%arg0: i32) -> (i32, i32, i32) {
    %c0_i32 = arith.constant 0 : i32
    %c0_i32_0 = arith.constant 0 : i32
    %c0_i32_1 = arith.constant 0 : i32
    %c0_i32_2 = arith.constant 0 : i32
    return %c0_i32, %c0_i32_0, %c0_i32_1 : i32, i32, i32
  }
  func.func @transform_6(%arg0: i32) -> (i32, i32) {
    %c0_i32 = arith.constant 0 : i32
    %c0_i32_0 = arith.constant 0 : i32
    %c0_i32_1 = arith.constant 0 : i32
    return %c0_i32, %c0_i32_0 : i32, i32
  }
  func.func @transform_7(%arg0: i32) -> (i32, i32) {
    %c0_i32 = arith.constant 0 : i32
    %c0_i32_0 = arith.constant 0 : i32
    %c0_i32_1 = arith.constant 0 : i32
    return %c0_i32, %c0_i32_0 : i32, i32
  }
  func.func @transform_8(%arg0: i32) -> (i32, i32, i32) {
    %c0_i32 = arith.constant 0 : i32
    %c0_i32_0 = arith.constant 0 : i32
    %c0_i32_1 = arith.constant 0 : i32
    return %arg0, %c0_i32, %c0_i32_0 : i32, i32, i32
  }
}

</mosaic_0001>

<bundles_post_ra>
// kernel: net_forward.1
= control target key start
LH: loop header
LB: loop body
LE: loop exit
PB: predicated region body
PF: predicated region fallthrough
CT: control target
= control target key end

     0   :  { %13 = vsyncpa [#allocation3], 0  ;;  %s2660_s30 = smov [#allocation2]   ;;  %s4390_s0 = inlined_call_operand.vmem [shape: f32[8,17], index: 0, kind: input, shape index: {}]   ;;  %s4391_s1 = inlined_call_operand.vmem [shape: f32[1,1,128], index: 1, kind: input, shape index: {}]   ;;  %s4392_s2 = inlined_call_operand.vmem [shape: f32[1,8,128], index: 2, kind: input, shape index: {}]   ;;  %s4393_s3 = inlined_call_operand.vmem [shape: f32[1,4,128], index: 3, kind: input, shape index: {}]   ;;  %s4394_s4 = inlined_call_operand.vmem [shape: f32[1,4,8,128], index: 4, kind: input, shape index: {}]   ;;  %s4395_s5 = inlined_call_operand.vmem [shape: f32[8,128,128], index: 5, kind: input, shape index: {}]   ;;  %s4396_s6 = inlined_call_operand.vmem [shape: f32[128,128], index: 6, kind: input, shape index: {}]   ;;  %s4397_s7 = inlined_call_operand.vmem [shape: f32[128,16], index: 7, kind: input, shape index: {}]   ;;  %s4398_s8 = inlined_call_operand.vmem [shape: f32[1,9,16], index: 8, kind: output, shape index: {}]  }
   0x1   :  { %s19_s29 = sshll.u32 %s4390_s0, 4  ;;  %s20_s29 = int_to_ptr.vmem [resolvable:$true] %s19_s29 }
   0x2   :  { %22 = dma.vmem_to_smem %s20_s29, 128, %s2660_s30, [#allocation3]  }
   0x3   :  { %2658 = dma.done.wait [#allocation3], 128  }
   0x4   :  { %2659 = vsyncadd [#allocation3], 4294967168 }
   0x5   :  { %41 = sfence }
   0x6   :  { %v794_v0 = vld [vmem:[%s4395_s5 + $0x78] sm:$0xff]  ;;  %v793_v4 = vld [vmem:[%s4395_s5 + $0x70] sm:$0xff]  ;;  %v792_v8 = vld [vmem:[%s4395_s5 + $0x68] sm:$0xff]  ;;  %s2985_s28 = sld [smem:[#allocation2 + $0x180]] }
   0x7   :  { %v2374_v1 = vld [vmem:[%s4395_s5 + $0xf8] sm:$0xff]  ;;  %795 = vmatpush.msra.mxu0 %v794_v0  ;;  %v2373_v5 = vld [vmem:[%s4395_s5 + $0xf0] sm:$0xff]  ;;  %v2372_v9 = vld [vmem:[%s4395_s5 + $0xe8] sm:$0xff]  ;;  %s2998_s12 = sld [smem:[#allocation2 + $0x181]] }
   0x8   :  { %v2405_v2 = vld [vmem:[%s4395_s5 + $0x178] sm:$0xff]  ;;  %917 = vmatpush.msra.mxu1 %v2374_v1  ;;  %v2404_v6 = vld [vmem:[%s4395_s5 + $0x170] sm:$0xff]  ;;  %v2403_v10 = vld [vmem:[%s4395_s5 + $0x168] sm:$0xff]  ;;  %s3011_s17 = sld [smem:[#allocation2 + $0x182]] }
   0x9   :  { %v2436_v3 = vld [vmem:[%s4395_s5 + $0x1f8] sm:$0xff]  ;;  %1039 = vmatpush.msra.mxu2 %v2405_v2  ;;  %v2435_v7 = vld [vmem:[%s4395_s5 + $0x1f0] sm:$0xff]  ;;  %796 = vmatpush.msra.mxu0 %v793_v4  ;;  %v2434_v11 = vld [vmem:[%s4395_s5 + $0x1e8] sm:$0xff]  ;;  %s3027_s25 = sld [smem:[#allocation2 + $0x183]] }
   0xa   :  { %1161 = vmatpush.msra.mxu3 %v2436_v3  ;;  %918 = vmatpush.msra.mxu1 %v2373_v5  ;;  %v791_v12 = vld [vmem:[%s4395_s5 + $0x60] sm:$0xff]  ;;  %v790_v16 = vld [vmem:[%s4395_s5 + $0x58] sm:$0xff]  ;;  %v789_v20 = vld [vmem:[%s4395_s5 + $0x50] sm:$0xff]  ;;  %s3049_s16 = sld [smem:[#allocation2 + $0x184]] }
   0xb   :  { %1040 = vmatpush.msra.mxu2 %v2404_v6  ;;  %v2371_v13 = vld [vmem:[%s4395_s5 + $0xe0] sm:$0xff]  ;;  %797 = vmatpush.msra.mxu0 %v792_v8  ;;  %v2370_v17 = vld [vmem:[%s4395_s5 + $0xd8] sm:$0xff]  ;;  %v2369_v21 = vld [vmem:[%s4395_s5 + $0xd0] sm:$0xff]  ;;  %s3119_s18 = sld [smem:[#allocation2 + $0x187]] }
   0xc   :  { %1162 = vmatpush.msra.mxu3 %v2435_v7  ;;  %919 = vmatpush.msra.mxu1 %v2372_v9  ;;  %v2402_v14 = vld [vmem:[%s4395_s5 + $0x160] sm:$0xff]  ;;  %v2401_v18 = vld [vmem:[%s4395_s5 + $0x158] sm:$0xff]  ;;  %v2400_v22 = vld [vmem:[%s4395_s5 + $0x150] sm:$0xff]  ;;  %s3130_s19 = sld [smem:[#allocation2 + $0x189]] }
   0xd   :  { %v2433_v15 = vld [vmem:[%s4395_s5 + $0x1e0] sm:$0xff]  ;;  %1041 = vmatpush.msra.mxu2 %v2403_v10  ;;  %798 = vmatpush.msra.mxu0 %v791_v12  ;;  %v2432_v19 = vld [vmem:[%s4395_s5 + $0x1d8] sm:$0xff]  ;;  %v2431_v23 = vld [vmem:[%s4395_s5 + $0x1d0] sm:$0xff]  ;;  %s3133_s20 = sld [smem:[#allocation2 + $0x18a]] }
   0xe   :  { %1163 = vmatpush.msra.mxu3 %v2434_v11  ;;  %920 = vmatpush.msra.mxu1 %v2371_v13  ;;  %v788_v24 = vld [vmem:[%s4395_s5 + $0x48] sm:$0xff]  ;;  %v787_v28 = vld [vmem:[%s4395_s5 + $0x40] sm:$0xff]  ;;  %v786_v32 = vld [vmem:[%s4395_s5 + $0x38] sm:$0xff]  ;;  %s3137_s21 = sld [smem:[#allocation2 + $0x18b]] }
   0xf   :  { %1042 = vmatpush.msra.mxu2 %v2402_v14  ;;  %799 = vmatpush.msra.mxu0 %v790_v16  ;;  %v2368_v25 = vld [vmem:[%s4395_s5 + $0xc8] sm:$0xff]  ;;  %v2367_v29 = vld [vmem:[%s4395_s5 + $0xc0] sm:$0xff]  ;;  %v2366_v33 = vld [vmem:[%s4395_s5 + $0xb8] sm:$0xff]  ;;  %s3140_s22 = sld [smem:[#allocation2 + $0x18c]] }
  0x10   :  { %1164 = vmatpush.msra.mxu3 %v2433_v15  ;;  %921 = vmatpush.msra.mxu1 %v2370_v17  ;;  %v2399_v26 = vld [vmem:[%s4395_s5 + $0x148] sm:$0xff]  ;;  %v2398_v30 = vld [vmem:[%s4395_s5 + $0x140] sm:$0xff]  ;;  %v2397_v34 = vld [vmem:[%s4395_s5 + $0x138] sm:$0xff]  ;;  %s3146_s23 = sld [smem:[#allocation2 + $0x18d]] }
  0x11   :  { %1043 = vmatpush.msra.mxu2 %v2401_v18  ;;  %800 = vmatpush.msra.mxu0 %v789_v20  ;;  %v2430_v27 = vld [vmem:[%s4395_s5 + $0x1c8] sm:$0xff]  ;;  %v2429_v31 = vld [vmem:[%s4395_s5 + $0x1c0] sm:$0xff]  ;;  %v2428_v35 = vld [vmem:[%s4395_s5 + $0x1b8] sm:$0xff]  ;;  %s3149_s24 = sld [smem:[#allocation2 + $0x18e]] }
  0x12   :  { %1165 = vmatpush.msra.mxu3 %v2432_v19  ;;  %922 = vmatpush.msra.mxu1 %v2369_v21  ;;  %v785_v36 = vld [vmem:[%s4395_s5 + $0x30] sm:$0xff]  ;;  %v784_v40 = vld [vmem:[%s4395_s5 + $0x28] sm:$0xff]  ;;  %v783_v44 = vld [vmem:[%s4395_s5 + $0x20] sm:$0xff]  ;;  %s3159_s26 = sld [smem:[#allocation2 + $0x201]] }
  0x13   :  { %1044 = vmatpush.msra.mxu2 %v2400_v22  ;;  %801 = vmatpush.msra.mxu0 %v788_v24  ;;  %v2365_v37 = vld [vmem:[%s4395_s5 + $0xb0] sm:$0xff]  ;;  %v2364_v41 = vld [vmem:[%s4395_s5 + $0xa8] sm:$0xff]  ;;  %v2363_v45 = vld [vmem:[%s4395_s5 + $0xa0] sm:$0xff]  ;;  %s3171_s27 = sld [smem:[#allocation2 + $0x202]] }
  0x14   :  { %1166 = vmatpush.msra.mxu3 %v2431_v23  ;;  %923 = vmatpush.msra.mxu1 %v2368_v25  ;;  %v2396_v38 = vld [vmem:[%s4395_s5 + $0x130] sm:$0xff]  ;;  %v2395_v42 = vld [vmem:[%s4395_s5 + $0x128] sm:$0xff]  ;;  %v2394_v46 = vld [vmem:[%s4395_s5 + $0x120] sm:$0xff]  ;;  %s3193_s29 = sld [smem:[#allocation2 + $0x205]] }
  0x15   :  { %1045 = vmatpush.msra.mxu2 %v2399_v26  ;;  %802 = vmatpush.msra.mxu0 %v787_v28  ;;  %v2427_v39 = vld [vmem:[%s4395_s5 + $0x1b0] sm:$0xff]  ;;  %v2426_v43 = vld [vmem:[%s4395_s5 + $0x1a8] sm:$0xff]  ;;  %v2425_v47 = vld [vmem:[%s4395_s5 + $0x1a0] sm:$0xff]  ;;  %s3200_s30 = sld [smem:[#allocation2 + $0x206]] }
  0x16   :  { %1167 = vmatpush.msra.mxu3 %v2430_v27  ;;  %924 = vmatpush.msra.mxu1 %v2367_v29  ;;  %v782_v48 = vld [vmem:[%s4395_s5 + $0x18] sm:$0xff]  ;;  %v781_v52 = vld [vmem:[%s4395_s5 + $0x10] sm:$0xff]  ;;  %v780_v56 = vld [vmem:[%s4395_s5 + $0x8] sm:$0xff]  ;;  %s3214_s9 = sld [smem:[#allocation2 + $0x207]] }
  0x17   :  { %1046 = vmatpush.msra.mxu2 %v2398_v30  ;;  %803 = vmatpush.msra.mxu0 %v786_v32  ;;  %v2362_v49 = vld [vmem:[%s4395_s5 + $0x98] sm:$0xff]  ;;  %v2361_v53 = vld [vmem:[%s4395_s5 + $0x90] sm:$0xff]  ;;  %v2360_v57 = vld [vmem:[%s4395_s5 + $0x88] sm:$0xff]  ;;  %s3236_s10 = sld [smem:[#allocation2 + $0x209]] }
  0x18   :  { %1168 = vmatpush.msra.mxu3 %v2429_v31  ;;  %925 = vmatpush.msra.mxu1 %v2366_v33  ;;  %v2393_v50 = vld [vmem:[%s4395_s5 + $0x118] sm:$0xff]  ;;  %v2392_v54 = vld [vmem:[%s4395_s5 + $0x110] sm:$0xff]  ;;  %v2391_v58 = vld [vmem:[%s4395_s5 + $0x108] sm:$0xff]  ;;  %s3238_s11 = sld [smem:[#allocation2 + $0x18f]] }
  0x19   :  { %1047 = vmatpush.msra.mxu2 %v2397_v34  ;;  %804 = vmatpush.msra.mxu0 %v785_v36  ;;  %v2424_v51 = vld [vmem:[%s4395_s5 + $0x198] sm:$0xff]  ;;  %v2423_v55 = vld [vmem:[%s4395_s5 + $0x190] sm:$0xff]  ;;  %v2422_v59 = vld [vmem:[%s4395_s5 + $0x188] sm:$0xff]  ;;  %s3249_s13 = sld [smem:[#allocation2 + $0x20a]] }
  0x1a   :  { %1169 = vmatpush.msra.mxu3 %v2428_v35  ;;  %926 = vmatpush.msra.mxu1 %v2365_v37  ;;  %v779_v60 = vld [vmem:[%s4395_s5] sm:$0xff]  ;;  %v2467_v0 = vld [vmem:[%s4395_s5 + $0x278] sm:$0xff]  ;;  %v2466_v4 = vld [vmem:[%s4395_s5 + $0x270] sm:$0xff]  ;;  %s3299_s14 = sld [smem:[#allocation2 + $0x20c]] }
  0x1b   :  { %1048 = vmatpush.msra.mxu2 %v2396_v38  ;;  %805 = vmatpush.msra.mxu0 %v784_v40  ;;  %v2359_v61 = vld [vmem:[%s4395_s5 + $0x80] sm:$0xff]  ;;  %v2498_v1 = vld [vmem:[%s4395_s5 + $0x2f8] sm:$0xff]  ;;  %v2497_v5 = vld [vmem:[%s4395_s5 + $0x2f0] sm:$0xff]  ;;  %s4020_s0 = sld [smem:[#allocation2 + $0xa]] }
  0x1c   :  { %1170 = vmatpush.msra.mxu3 %v2427_v39  ;;  %927 = vmatpush.msra.mxu1 %v2364_v41  ;;  %v2390_v62 = vld [vmem:[%s4395_s5 + $0x100] sm:$0xff]  ;;  %v2529_v2 = vld [vmem:[%s4395_s5 + $0x378] sm:$0xff]  ;;  %v2528_v6 = vld [vmem:[%s4395_s5 + $0x370] sm:$0xff]  ;;  %s4022_s15 = sld [smem:[#allocation2 + $0x305]] }
  0x1d   :  { %1049 = vmatpush.msra.mxu2 %v2395_v42  ;;  %806 = vmatpush.msra.mxu0 %v783_v44  ;;  %v2421_v63 = vld [vmem:[%s4395_s5 + $0x180] sm:$0xff]  ;;  %v2560_v3 = vld [vmem:[%s4395_s5 + $0x3f8] sm:$0xff]  ;;  %v2559_v7 = vld [vmem:[%s4395_s5 + $0x3f0] sm:$0xff] }
  0x1e   :  { %1171 = vmatpush.msra.mxu3 %v2426_v43  ;;  %928 = vmatpush.msra.mxu1 %v2363_v45  ;;  %v2465_v8 = vld [vmem:[%s4395_s5 + $0x268] sm:$0xff]  ;;  %v2464_v12 = vld [vmem:[%s4395_s5 + $0x260] sm:$0xff]  ;;  %v2463_v16 = vld [vmem:[%s4395_s5 + $0x258] sm:$0xff] }
  0x1f   :  { %1050 = vmatpush.msra.mxu2 %v2394_v46  ;;  %807 = vmatpush.msra.mxu0 %v782_v48  ;;  %v2496_v9 = vld [vmem:[%s4395_s5 + $0x2e8] sm:$0xff]  ;;  %v2495_v13 = vld [vmem:[%s4395_s5 + $0x2e0] sm:$0xff]  ;;  %v2494_v17 = vld [vmem:[%s4395_s5 + $0x2d8] sm:$0xff] }
  0x20   :  { %1172 = vmatpush.msra.mxu3 %v2425_v47  ;;  %929 = vmatpush.msra.mxu1 %v2362_v49  ;;  %v2527_v10 = vld [vmem:[%s4395_s5 + $0x368] sm:$0xff]  ;;  %v2526_v14 = vld [vmem:[%s4395_s5 + $0x360] sm:$0xff]  ;;  %v2525_v18 = vld [vmem:[%s4395_s5 + $0x358] sm:$0xff] }
  0x21   :  { %1051 = vmatpush.msra.mxu2 %v2393_v50  ;;  %808 = vmatpush.msra.mxu0 %v781_v52  ;;  %v2558_v11 = vld [vmem:[%s4395_s5 + $0x3e8] sm:$0xff]  ;;  %v2557_v15 = vld [vmem:[%s4395_s5 + $0x3e0] sm:$0xff]  ;;  %v2556_v19 = vld [vmem:[%s4395_s5 + $0x3d8] sm:$0xff] }
  0x22   :  { %1173 = vmatpush.msra.mxu3 %v2424_v51  ;;  %930 = vmatpush.msra.mxu1 %v2361_v53  ;;  %v44_v20 = vld [vmem:[%s4393_s3] sm:$0xf]  ;;  %v2161_v22 = vld [vmem:[%s4394_s4 + $0x8] sm:$0xff]  ;;  %v2162_v23 = vld [vmem:[%s4394_s4 + $0x10] sm:$0xff]  ;;  %s3154_s3 = sld [smem:[#allocation2 + $0x200]] }
  0x23   :  { %1052 = vmatpush.msra.mxu2 %v2392_v54  ;;  %809 = vmatpush.msra.mxu0 %v780_v56  ;;  %v45_v21 = vld [vmem:[%s4394_s4] sm:$0xff]  ;;  %v2163_v24 = vld [vmem:[%s4394_s4 + $0x18] sm:$0xff]  ;;  %v53_v25 = vrot.slane %v44_v20, 6  ;;  %v66_v26 = vperm.slane %v44_v20, 2  ;;  %v68_v27 = vperm.slane %v44_v20, 0  ;;  %v72_v28 = vperm.slane %v44_v20, 3 }
  0x24   :  { %1174 = vmatpush.msra.mxu3 %v2423_v55  ;;  %931 = vmatpush.msra.mxu1 %v2360_v57  ;;  %v2462_v29 = vld [vmem:[%s4395_s5 + $0x250] sm:$0xff]  ;;  %v61_v31 = vsub.f32 %v2162_v23, %v45_v21  ;;  %v63_v32 = vsub.f32 %v2163_v24, %v2161_v22  ;;  %v74_v33 = vperm.slane %v44_v20, 1  ;;  %v2996_v36 = vld [vmem:[%s4392_s2] sm:$0xff]  ;;  %v2461_v40 = vld [vmem:[%s4395_s5 + $0x248] sm:$0xff]  ;;  %s3176_s4 = sld [smem:[#allocation2 + $0x203]] }
  0x25   :  { %1053 = vmatpush.msra.mxu2 %v2391_v58  ;;  %810 = vmatpush.msra.mxu0 %v779_v60  ;;  %v2493_v30 = vld [vmem:[%s4395_s5 + $0x2d0] sm:$0xff]  ;;  %v55_v37 = vsub.f32 %v44_v20, %v53_v25  ;;  %v67_v38 = vmin.f32 %v2162_v23, %v66_v26  ;;  %v69_v39 = vmax.f32 %v45_v21, %v68_v27  ;;  %v2492_v41 = vld [vmem:[%s4395_s5 + $0x2c8] sm:$0xff]  ;;  %v3009_v44 = vld [vmem:[%s4391_s1] ss:$0 sm:$0xff]  ;;  %v128_v23 = vstv %s3011_s17  ;;  %s3099_s17 = sld [smem:[#allocation2 + $0x185]] }
  0x26   :  { %1175 = vmatpush.msra.mxu3 %v2422_v59  ;;  %932 = vmatpush.msra.mxu1 %v2359_v61  ;;  %v2524_v34 = vld [vmem:[%s4395_s5 + $0x350] sm:$0xff]  ;;  %v73_v42 = vmin.f32 %v2163_v24, %v72_v28  ;;  %v75_v43 = vmax.f32 %v2161_v22, %v74_v33  ;;  %v2523_v45 = vld [vmem:[%s4395_s5 + $0x348] sm:$0xff]  ;;  %v62_v48 = vmax.f32 %v61_v31, 0.0  ;;  %v64_v49 = vmax.f32 %v63_v32, 0.0  ;;  %v2460_v51 = vld [vmem:[%s4395_s5 + $0x240] sm:$0xff]  ;;  %s4028_s2 = sld [smem:[#allocation2 + $0x306]] }
  0x27   :  { %1054 = vmatpush.msra.mxu2 %v2390_v62  ;;  %1283 = vmatpush.msrb.mxu0 %v2467_v0  ;;  %v2555_v35 = vld [vmem:[%s4395_s5 + $0x3d0] sm:$0xff]  ;;  %v2554_v46 = vld [vmem:[%s4395_s5 + $0x3c8] sm:$0xff]  ;;  %v56_v47 = vmax.f32 %v55_v37, 0.0  ;;  %v70_v50 = vsub.f32 %v67_v38, %v69_v39  ;;  %v2491_v52 = vld [vmem:[%s4395_s5 + $0x2c0] sm:$0xff]  ;;  %v102_v54 = vmul.f32 %v3009_v44, %v2996_v36  ;;  %v139_v31 = vstv %s3027_s25  ;;  %s2181_s25 = sld [smem:[#allocation2 + $0x186]] }
  0x28   :  { %1176 = vmatpush.msra.mxu3 %v2421_v63  ;;  %1405 = vmatpush.msrb.mxu1 %v2498_v1  ;;  %v76_v53 = vsub.f32 %v73_v42, %v75_v43  ;;  %v2522_v55 = vld [vmem:[%s4395_s5 + $0x340] sm:$0xff]  ;;  %v2459_v59 = vld [vmem:[%s4395_s5 + $0x238] sm:$0xff]  ;;  %v2519_v20 = vld [vmem:[%s4395_s5 + $0x328] sm:$0xff] }
  0x29   :  { %1527 = vmatpush.msrb.mxu2 %v2529_v2  ;;  %1284 = vmatpush.msrb.mxu0 %v2466_v4  ;;  %v2553_v56 = vld [vmem:[%s4395_s5 + $0x3c0] sm:$0xff]  ;;  %v58_v57 = vrot.slane %v56_v47, 1  ;;  %v71_v58 = vmax.f32 %v70_v50, 0.0  ;;  %v2490_v60 = vld [vmem:[%s4395_s5 + $0x2b8] sm:$0xff]  ;;  %v3041_v62 = vmul.f32 16.0, %v102_v54  ;;  %v65_v2 = vmul.f32 %v64_v49, %v62_v48  ;;  %v2489_v4 = vld [vmem:[%s4395_s5 + $0x2b0] sm:$0xff] }
  0x2a   :  { %1649 = vmatpush.msrb.mxu3 %v2560_v3  ;;  %1406 = vmatpush.msrb.mxu1 %v2497_v5  ;;  %v77_v61 = vmax.f32 %v76_v53, 0.0  ;;  %v2521_v63 = vld [vmem:[%s4395_s5 + $0x338] sm:$0xff]  ;;  %v2458_v3 = vld [vmem:[%s4395_s5 + $0x230] sm:$0xff]  ;;  %v2550_v21 = vld [vmem:[%s4395_s5 + $0x3a8] sm:$0xff] }
  0x2b   :  { %1528 = vmatpush.msrb.mxu2 %v2528_v6  ;;  %1285 = vmatpush.msrb.mxu0 %v2465_v8  ;;  %v2552_v0 = vld [vmem:[%s4395_s5 + $0x3b8] sm:$0xff]  ;;  %v60_v1 = vmul.f32 %v58_v57, %v56_v47  ;;  %v110_v5 = vmax.f32 %v3041_v62, 0.0  ;;  %v2167_v6 = vadd.f32 -1.0, %v3041_v62  ;;  %v2520_v8 = vld [vmem:[%s4395_s5 + $0x330] sm:$0xff]  ;;  %v2176_v25 = vadd.f32 -4.0, %v3041_v62  ;;  %v2456_v26 = vld [vmem:[%s4395_s5 + $0x220] sm:$0xff] }
  0x2c   :  { %1650 = vmatpush.msrb.mxu3 %v2559_v7  ;;  %1407 = vmatpush.msrb.mxu1 %v2496_v9  ;;  %v2170_v7 = vadd.f32 -2.0, %v3041_v62  ;;  %v2551_v9 = vld [vmem:[%s4395_s5 + $0x3b0] sm:$0xff]  ;;  %v2487_v27 = vld [vmem:[%s4395_s5 + $0x2a0] sm:$0xff]  ;;  %v2179_v38 = vadd.f32 -5.0, %v3041_v62  ;;  %v2185_v57 = vadd.f32 -7.0, %v3041_v62 }
  0x2d   :  { %1529 = vmatpush.msrb.mxu2 %v2527_v10  ;;  %1286 = vmatpush.msrb.mxu0 %v2464_v12  ;;  %v3066_v10 = vmul.f32 %v77_v61, %v71_v58  ;;  %v117_v12 = vstv %s2998_s12  ;;  %v2518_v32 = vld [vmem:[%s4395_s5 + $0x320] sm:$0xff]  ;;  %v154_v42 = vmax.f32 %v2176_v25, 0.0  ;;  %v205_v25 = vstv %s3130_s19  ;;  %s3179_s12 = sld [smem:[#allocation2 + $0x204]] }
  0x2e   :  { %1651 = vmatpush.msrb.mxu3 %v2558_v11  ;;  %1408 = vmatpush.msrb.mxu1 %v2495_v13  ;;  %v79_v11 = vperm.slane %v60_v1, 2  ;;  %v2173_v13 = vadd.f32 -3.0, %v3041_v62  ;;  %v2549_v33 = vld [vmem:[%s4395_s5 + $0x3a0] sm:$0xff]  ;;  %v165_v50 = vmax.f32 %v2179_v38, 0.0  ;;  %v227_v38 = vstv %s3137_s21  ;;  %s3274_s21 = sld [smem:[#allocation2 + $0x20b]] }
  0x2f   :  { %1530 = vmatpush.msrb.mxu2 %v2526_v14  ;;  %1287 = vmatpush.msrb.mxu0 %v2463_v16  ;;  %v2457_v14 = vld [vmem:[%s4395_s5 + $0x228] sm:$0xff]  ;;  %v108_v16 = vstv %s2985_s28  ;;  %v3116_v49 = vmin.f32 %v154_v42, 1.0  ;;  %v249_v42 = vstv %s3146_s23  ;;  %s3226_s28 = sld [smem:[#allocation2 + $0x208]] }
  0x30   :  { %1652 = vmatpush.msrb.mxu3 %v2557_v15  ;;  %1409 = vmatpush.msrb.mxu1 %v2494_v17  ;;  %v2488_v15 = vld [vmem:[%s4395_s5 + $0x2a8] sm:$0xff]  ;;  %v3077_v17 = vmin.f32 %v110_v5, 1.0  ;;  %v80_v22 = vadd.f32 %v79_v11, %v65_v2  ;;  %v143_v24 = vmax.f32 %v2173_v13, 0.0  ;;  %v187_v5 = vmax.f32 %v2185_v57, 0.0  ;;  %s4038_s23 = sld [smem:[#allocation2 + $0x281]] }
  0x31   :  { %1531 = vmatpush.msrb.mxu2 %v2525_v18  ;;  %1288 = vmatpush.msrb.mxu0 %v2462_v29  ;;  %v121_v18 = vmax.f32 %v2167_v6, 0.0  ;;  %4439 = vst [vmem:[#allocation9_spill] sm:$0xff] %v3116_v49  ;;  %v2194_v6 = vadd.f32 -10.0, %v3041_v62  ;;  %s4066_s19 = sld [smem:[#allocation2 + $0x309]] }
  0x32   :  { %1653 = vmatpush.msrb.mxu3 %v2556_v19  ;;  %1410 = vmatpush.msrb.mxu1 %v2493_v30  ;;  %4435 = vst [vmem:[#allocation5_spill] sm:$0xff] %v3077_v17  ;;  %v132_v19 = vmax.f32 %v2170_v7, 0.0  ;;  %v118_v28 = vmul.f32 %v117_v12, %v3077_v17 }
  0x33   :  { %1532 = vmatpush.msrb.mxu2 %v2524_v34  ;;  %1289 = vmatpush.msrb.mxu0 %v2461_v40  ;;  %v3094_v29 = vmin.f32 %v121_v18, 1.0  ;;  %v81_v34 = vsub.f32 %v80_v22, %v3066_v10 }
  0x34   :  { %1654 = vmatpush.msrb.mxu3 %v2555_v35  ;;  %1411 = vmatpush.msrb.mxu1 %v2492_v41  ;;  %v3096_v30 = vmin.f32 %v132_v19, 1.0  ;;  %v119_v35 = vadd.f32 %v118_v28, %v108_v16  ;;  %v3111_v41 = vmin.f32 %v143_v24, 1.0  ;;  %v3152_v19 = vmin.f32 %v187_v5, 1.0 }
  0x35   :  { %1533 = vmatpush.msrb.mxu2 %v2523_v45  ;;  %1290 = vmatpush.msrb.mxu0 %v2460_v51  ;;  %4436 = vst [vmem:[#allocation6_spill] sm:$0xff] %v3094_v29  ;;  %v129_v37 = vmul.f32 %v128_v23, %v3094_v29  ;;  %v82_v39 = vadd.f32 1e-12, %v81_v34  ;;  %v150_v45 = vstv %s3049_s16  ;;  %v161_v51 = vstv %s3099_s17  ;;  %s3125_s16 = sld [smem:[#allocation2 + $0x188]] }
  0x36   :  { %1655 = vmatpush.msrb.mxu3 %v2554_v46  ;;  %1412 = vmatpush.msrb.mxu1 %v2491_v52  ;;  %4437 = vst [vmem:[#allocation7_spill] sm:$0xff] %v3096_v30  ;;  %v140_v40 = vmul.f32 %v139_v31, %v3096_v30  ;;  %v2182_v46 = vadd.f32 -6.0, %v3041_v62  ;;  %v151_v48 = vmul.f32 %v150_v45, %v3111_v41  ;;  %v216_v28 = vstv %s3133_s20  ;;  %s2327_s17 = sld [smem:[#allocation2 + $0x108]] }
  0x37   :  { %1534 = vmatpush.msrb.mxu2 %v2522_v55  ;;  %1291 = vmatpush.msrb.mxu0 %v2459_v59  ;;  %4438 = vst [vmem:[#allocation8_spill] sm:$0xff] %v3111_v41  ;;  %v130_v43 = vadd.f32 %v129_v37, %v119_v35  ;;  %2634 = vrcp.f32 %v82_v39  ;;  %v162_v55 = vmul.f32 %v161_v51, %v3116_v49  ;;  %v172_v59 = vstv %s2181_s25  ;;  %s4034_s25 = sld [smem:[#allocation2 + $0x307]] }
  0x38   :  { %1656 = vmatpush.msrb.mxu3 %v2553_v56  ;;  %1413 = vmatpush.msrb.mxu1 %v2490_v60  ;;  %v176_v52 = vmax.f32 %v2182_v46, 0.0  ;;  %v3122_v56 = vmin.f32 %v165_v50, 1.0  ;;  %v94_v60 = vand.u32 2147483648, %v82_v39  ;;  %vm88_vm0 = vweird.f32 %v82_v39  ;;  %4444 = vst [vmem:[#allocation12_spill] sm:$0xff] %v3152_v19  ;;  %s4073_s20 = sld [smem:[#allocation2 + $0x283]] }
  0x39   :  { %1535 = vmatpush.msrb.mxu2 %v2521_v63  ;;  %1292 = vmatpush.msrb.mxu0 %v2458_v3  ;;  %v141_v47 = vadd.f32 %v140_v40, %v130_v43  ;;  %v2188_v63 = vadd.f32 -8.0, %v3041_v62  ;;  %v92_v2 = vand.u32 2147483647, %v82_v39  ;;  %v238_v40 = vstv %s3140_s22  ;;  %s3323_s22 = sld [smem:[#allocation2 + $0x20d]] }
  0x3a   :  { %1657 = vmatpush.msrb.mxu3 %v2552_v0  ;;  %1414 = vmatpush.msrb.mxu1 %v2489_v4  ;;  %4440 = vst [vmem:[#allocation10_spill] sm:$0xff] %v3122_v56  ;;  %v3127_v61 = vmin.f32 %v176_v52, 1.0  ;;  %v2191_v0 = vadd.f32 -9.0, %v3041_v62  ;;  %v173_v4 = vmul.f32 %v172_v59, %v3122_v56  ;;  %v95_v11 = vor.u32 1.1754944e-38, %v94_v60 }
  0x3b   :  { %1536 = vmatpush.msrb.mxu2 %v2520_v8  ;;  %1293 = vmatpush.msrb.mxu0 %v2457_v14  ;;  %v152_v54 = vadd.f32 %v151_v48, %v141_v47  ;;  %v183_v8 = vstv %s3119_s18  ;;  %v198_v12 = vmax.f32 %v2188_v63, 0.0  ;;  %vm93_vm3 = vcmp.eq.f32.partialorder %v92_v2, 8.507059e+37  ;;  %s4052_s18 = sld [smem:[#allocation2 + $0x280]] }
  0x3c   :  { %1658 = vmatpush.msrb.mxu3 %v2551_v9  ;;  %1415 = vmatpush.msrb.mxu1 %v2488_v15  ;;  %4441 = vst [vmem:[#allocation11_spill] sm:$0xff] %v3127_v61  ;;  %v209_v13 = vmax.f32 %v2191_v0, 0.0  ;;  %v2197_v15 = vadd.f32 -11.0, %v3041_v62  ;;  %v184_v18 = vmul.f32 %v183_v8, %v3127_v61  ;;  %v194_v22 = vstv %s3125_s16  ;;  %s4058_s16 = sld [smem:[#allocation2 + $0x282]] }
  0x3d   :  { %1537 = vmatpush.msrb.mxu2 %v2519_v20  ;;  %1294 = vmatpush.msrb.mxu0 %v2456_v26  ;;  %v2635_v53 = vpop.eup %2634  ;;  %v163_v3 = vadd.f32 %v162_v55, %v152_v54  ;;  %v220_v20 = vmax.f32 %v2194_v6, 0.0  ;;  %v3161_v24 = vmin.f32 %v198_v12, 1.0  ;;  %v195_v34 = vmul.f32 %v194_v22, %v3152_v19 }
  0x3e   :  { %1659 = vmatpush.msrb.mxu3 %v2550_v21  ;;  %1416 = vmatpush.msrb.mxu1 %v2487_v27  ;;  %v84_v58 = vmul.f32 %v2635_v53, %v82_v39  ;;  %vm89_vm1 = vweird.f32 %v2635_v53  ;;  %v3164_v26 = vmin.f32 %v209_v13, 1.0  ;;  %v231_v31 = vmax.f32 %v2197_v15, 0.0 }
  0x3f   :  { %1538 = vmatpush.msrb.mxu2 %v2518_v32  ;;  %vm3142_vm2 = vmor %vm88_vm0, %vm89_vm1  ;;  %v174_v16 = vadd.f32 %v173_v4, %v163_v3  ;;  %4445 = vst [vmem:[#allocation13_spill] sm:$0xff] %v3161_v24  ;;  %v3169_v32 = vadd.f32 -12.0, %v3041_v62  ;;  %v3174_v35 = vmin.f32 %v220_v20, 1.0  ;;  %v3189_v46 = vadd.f32 -13.0, %v3041_v62 }
  0x40   :  { %1660 = vmatpush.msrb.mxu3 %v2549_v33  ;;  %v85_v1 = vsub.f32 1.0, %v84_v58  ;;  %4446 = vst [vmem:[#allocation14_spill] sm:$0xff] %v3164_v26  ;;  %v217_v39 = vmul.f32 %v216_v28, %v3164_v26  ;;  %v3185_v43 = vmin.f32 %v231_v31, 1.0  ;;  %v260_v51 = vstv %s3149_s24  ;;  %s2313_s24 = sld [smem:[#allocation2 + $0x101]] }
  0x41   :  { %v185_v33 = vadd.f32 %v184_v18, %v174_v16  ;;  %4447 = vst [vmem:[#allocation15_spill] sm:$0xff] %v3174_v35  ;;  %v242_v45 = vmax.f32 %v3169_v32, 0.0  ;;  %v3196_v50 = vmul.f32 %v227_v38, %v3174_v35  ;;  %v290_v52 = vstv %s3154_s3  ;;  %v1763_v35 = vld [vmem:[%s4396_s6 + $0x18] sm:$0xff]  ;;  %s4084_s3 = sld [smem:[#allocation2 + $0x284]] }
  0x42   :  { %v86_v7 = vmul.f32 %v2635_v53, %v85_v1  ;;  %4448 = vst [vmem:[#allocation16_spill] sm:$0xff] %v3185_v43  ;;  %v302_v54 = vstv %s3159_s26  ;;  %v317_v2 = vstv %s3171_s27  ;;  %v332_v4 = vstv %s3176_s4  ;;  %s2315_s27 = sld [smem:[#allocation2 + $0x102]] }
  0x43   :  { %v196_v48 = vadd.f32 %v195_v34, %v185_v33  ;;  %v347_v12 = vstv %s3179_s12  ;;  %v377_v28 = vstv %s3200_s30  ;;  %v3243_v38 = vmul.f32 %v238_v40, %v3185_v43  ;;  %s2317_s4 = sld [smem:[#allocation2 + $0x103]] }
  0x44   :  { %v87_v14 = vadd.f32 %v2635_v53, %v86_v7  ;;  %s2319_s12 = sld [smem:[#allocation2 + $0x104]] }
  0x45   :  { %s2323_s30 = sld [smem:[#allocation2 + $0x106]] }
  0x46   :  { %v91_v21 = vsel %vm3142_vm2, %v2635_v53, %v87_v14  ;;  %s4098_s26 = sld [smem:[#allocation2 + $0x285]] }
  0x47   :  { %v96_v23 = vsel %vm93_vm3, %v95_v11, %v91_v21 }
  0x48   :  { %v97_v27 = vmul.f32 %v96_v23, %v3066_v10  ;;  %v206_v10 = vmul.f32 %v205_v25, %v3161_v24  ;;  %v362_v25 = vstv %s3193_s29  ;;  %s2321_s29 = sld [smem:[#allocation2 + $0x105]] }
  0x4a   :  { %v98_v37 = vsub.f32 1.0, %v97_v27  ;;  %v207_v13 = vadd.f32 %v206_v10, %v196_v48  ;;  %v3245_v10 = vmin.f32 %v242_v45, 1.0 }
  0x4c   :  { %v3191_v47 = vmul.f32 16.0, %v98_v37  ;;  %v218_v37 = vadd.f32 %v217_v39, %v207_v13  ;;  %4449 = vst [vmem:[#allocation17_spill] sm:$0xff] %v3245_v10 }
  0x4e   :  { %v295_v53 = vmax.f32 %v3191_v47, 0.0  ;;  %v2218_v55 = vadd.f32 -1.0, %v3191_v47  ;;  %v2222_v57 = vadd.f32 -2.0, %v3191_v47  ;;  %v2226_v58 = vadd.f32 -3.0, %v3191_v47 }
  0x4f   :  { %v2230_v59 = vadd.f32 -4.0, %v3191_v47  ;;  %v2234_v60 = vadd.f32 -5.0, %v3191_v47  ;;  %v2238_v63 = vadd.f32 -6.0, %v3191_v47  ;;  %v2242_v22 = vadd.f32 -7.0, %v3191_v47 }
  0x50   :  { %v3210_v0 = vmin.f32 %v295_v53, 1.0  ;;  %v310_v1 = vmax.f32 %v2218_v55, 0.0  ;;  %v325_v3 = vmax.f32 %v2222_v57, 0.0  ;;  %v340_v5 = vmax.f32 %v2226_v58, 0.0  ;;  %v2486_v53 = vld [vmem:[%s4395_s5 + $0x298] sm:$0xff]  ;;  %v2454_v58 = vld [vmem:[%s4395_s5 + $0x210] sm:$0xff] }
  0x51   :  { %v355_v6 = vmax.f32 %v2230_v59, 0.0  ;;  %v370_v7 = vmax.f32 %v2234_v60, 0.0  ;;  %v385_v16 = vmax.f32 %v2238_v63, 0.0  ;;  %v400_v32 = vmax.f32 %v2242_v22, 0.0  ;;  %1417 = vmatpush.msrb.mxu1 %v2486_v53  ;;  %v2517_v55 = vld [vmem:[%s4395_s5 + $0x318] sm:$0xff]  ;;  %v2546_v22 = vld [vmem:[%s4395_s5 + $0x388] sm:$0xff] }
  0x52   :  { %v303_v8 = vmul.f32 %v302_v54, %v3210_v0  ;;  %v3217_v9 = vmin.f32 %v310_v1, 1.0  ;;  %v3219_v11 = vmin.f32 %v325_v3, 1.0  ;;  %v3222_v14 = vmin.f32 %v340_v5, 1.0  ;;  %v2548_v57 = vld [vmem:[%s4395_s5 + $0x398] sm:$0xff]  ;;  %1539 = vmatpush.msrb.mxu2 %v2517_v55  ;;  %v2516_v3 = vld [vmem:[%s4395_s5 + $0x310] sm:$0xff]  ;;  %v2545_v53 = vld [vmem:[%s4395_s5 + $0x380] sm:$0xff] }
  0x53   :  { %v3224_v15 = vmin.f32 %v355_v6, 1.0  ;;  %v3233_v27 = vmin.f32 %v370_v7, 1.0  ;;  %v2246_v33 = vadd.f32 -8.0, %v3191_v47  ;;  %v2250_v34 = vadd.f32 -9.0, %v3191_v47  ;;  %1661 = vmatpush.msrb.mxu3 %v2548_v57  ;;  %v2547_v7 = vld [vmem:[%s4395_s5 + $0x390] sm:$0xff] }
  0x54   :  { %v304_v18 = vadd.f32 %v303_v8, %v290_v52  ;;  %v318_v20 = vmul.f32 %v317_v2, %v3217_v9  ;;  %v333_v21 = vmul.f32 %v332_v4, %v3219_v11  ;;  %v348_v23 = vmul.f32 %v347_v12, %v3222_v14  ;;  %v2455_v52 = vld [vmem:[%s4395_s5 + $0x218] sm:$0xff]  ;;  %v2485_v2 = vld [vmem:[%s4395_s5 + $0x290] sm:$0xff]  ;;  %v2453_v8 = vld [vmem:[%s4395_s5 + $0x208] sm:$0xff]  ;;  %1540 = vmatpush.msrb.mxu2 %v2516_v3 }
  0x55   :  { %v3247_v48 = vmin.f32 %v385_v16, 1.0  ;;  %v363_v39 = vmul.f32 %v362_v25, %v3224_v15  ;;  %v415_v40 = vmax.f32 %v2246_v33, 0.0  ;;  %v3259_v45 = vadd.f32 -10.0, %v3191_v47  ;;  %1295 = vmatpush.msrb.mxu0 %v2455_v52  ;;  %1418 = vmatpush.msrb.mxu1 %v2485_v2  ;;  %v2484_v12 = vld [vmem:[%s4395_s5 + $0x288] sm:$0xff] }
  0x56   :  { %v319_v31 = vadd.f32 %v318_v20, %v304_v18  ;;  %v253_v59 = vmax.f32 %v3189_v46, 0.0  ;;  %v2206_v60 = vadd.f32 -14.0, %v3041_v62  ;;  %v378_v63 = vmul.f32 %v377_v28, %v3233_v27  ;;  %1662 = vmatpush.msrb.mxu3 %v2547_v7  ;;  %v2452_v28 = vld [vmem:[%s4395_s5 + $0x200] sm:$0xff] }
  0x57   :  { %4450 = vst [vmem:[#allocation18_spill] sm:$0xff] %v3247_v48  ;;  %v392_v1 = vstv %s3214_s9  ;;  %v3282_v4 = vmin.f32 %v400_v32, 1.0  ;;  %v430_v5 = vmax.f32 %v2250_v34, 0.0  ;;  %v2258_v6 = vadd.f32 -11.0, %v3191_v47  ;;  %1296 = vmatpush.msrb.mxu0 %v2454_v58  ;;  %1419 = vmatpush.msrb.mxu1 %v2484_v12  ;;  %v2514_v32 = vld [vmem:[%s4395_s5 + $0x300] sm:$0xff]  ;;  %s2325_s9 = sld [smem:[#allocation2 + $0x107]] }
  0x58   :  { %v334_v54 = vadd.f32 %v333_v21, %v319_v31  ;;  %v229_v13 = vadd.f32 %v3196_v50, %v218_v37  ;;  %v250_v16 = vmul.f32 %v249_v42, %v3245_v10  ;;  %v407_v18 = vstv %s3226_s28  ;;  %v2515_v21 = vld [vmem:[%s4395_s5 + $0x308] sm:$0xff]  ;;  %v2483_v31 = vld [vmem:[%s4395_s5 + $0x280] sm:$0xff]  ;;  %1663 = vmatpush.msrb.mxu3 %v2546_v22  ;;  %s3338_s5 = sld [smem:[#allocation2 + $0x190]] }
  0x59   :  { %4451 = vst [vmem:[#allocation19_spill] sm:$0xff] %v3282_v4  ;;  %v2262_v20 = vadd.f32 -12.0, %v3191_v47  ;;  %v3309_v42 = vmin.f32 %v415_v40, 1.0  ;;  %v445_v25 = vmax.f32 %v3259_v45, 0.0  ;;  %1297 = vmatpush.msrb.mxu0 %v2453_v8  ;;  %v264_v33 = vmax.f32 %v2206_v60, 0.0  ;;  %1541 = vmatpush.msrb.mxu2 %v2515_v21  ;;  %s2329_s28 = sld [smem:[#allocation2 + $0x109]] }
  0x5a   :  { %v349_v46 = vadd.f32 %v348_v23, %v334_v54  ;;  %v393_v23 = vmul.f32 %v392_v1, %v3247_v48  ;;  %v2209_v34 = vadd.f32 -15.0, %v3041_v62  ;;  %v422_v37 = vstv %s3236_s10  ;;  %s3336_s10 = sld [smem:[#allocation2 + $0x20e]]  ;;  %1420 = vmatpush.msrb.mxu1 %v2483_v31  ;;  %1664 = vmatpush.msrb.mxu3 %v2545_v53 }
  0x5b   :  { %4452 = vst [vmem:[#allocation20_spill] sm:$0xff] %v3309_v42  ;;  %v2266_v52 = vadd.f32 -13.0, %v3191_v47  ;;  %v3330_v40 = vmin.f32 %v430_v5, 1.0  ;;  %v460_v45 = vmax.f32 %v2258_v6, 0.0  ;;  %1298 = vmatpush.msrb.mxu0 %v2452_v28  ;;  %v240_v62 = vadd.f32 %v3243_v38, %v229_v13  ;;  %1542 = vmatpush.msrb.mxu2 %v2514_v32 }
  0x5c   :  { %v364_v50 = vadd.f32 %v363_v39, %v349_v46  ;;  %v408_v39 = vmul.f32 %v407_v18, %v3282_v4  ;;  %v3333_v55 = vmin.f32 %v253_v59, 1.0  ;;  %v437_v57 = vstv %s3249_s13  ;;  %s3348_s13 = sld [smem:[#allocation2 + $0x20f]] }
  0x5d   :  { %4453 = vst [vmem:[#allocation21_spill] sm:$0xff] %v3330_v40  ;;  %v475_v58 = vmax.f32 %v2262_v20, 0.0  ;;  %v3341_v1 = vmin.f32 %v445_v25, 1.0  ;;  %v2270_v2 = vadd.f32 -14.0, %v3191_v47  ;;  %v3344_v38 = vmin.f32 %v264_v33, 1.0 }
  0x5e   :  { %v379_v54 = vadd.f32 %v378_v63, %v364_v50  ;;  %4454 = vst [vmem:[#allocation22_spill] sm:$0xff] %v3333_v55  ;;  %v423_v63 = vmul.f32 %v422_v37, %v3309_v42  ;;  %v271_v59 = vstv %s3238_s11  ;;  %v452_v3 = vstv %s3274_s21  ;;  %s2276_s11 = sld [smem:[#allocation2 + $0x210]] }
  0x5f   :  { %4455 = vst [vmem:[#allocation23_spill] sm:$0xff] %v3341_v1  ;;  %v490_v46 = vmax.f32 %v2266_v52, 0.0  ;;  %v438_v6 = vmul.f32 %v437_v57, %v3330_v40  ;;  %v3351_v7 = vmin.f32 %v460_v45, 1.0  ;;  %v2274_v8 = vadd.f32 -15.0, %v3191_v47  ;;  %s2312_s21 = sld [smem:[#allocation2 + $0x100]] }
  0x60   :  { %v394_v60 = vadd.f32 %v393_v23, %v379_v54  ;;  %4456 = vst [vmem:[#allocation24_spill] sm:$0xff] %v3344_v38  ;;  %v251_v12 = vadd.f32 %v250_v16, %v240_v62  ;;  %v261_v13 = vmul.f32 %v260_v51, %v3333_v55  ;;  %v275_v18 = vmax.f32 %v2209_v34, 0.0 }
  0x61   :  { %4457 = vst [vmem:[#allocation25_spill] sm:$0xff] %v3351_v7  ;;  %v467_v20 = vstv %s3299_s14  ;;  %v453_v22 = vmul.f32 %v452_v3, %v3341_v1  ;;  %v3359_v50 = vmin.f32 %v475_v58, 1.0  ;;  %v505_v23 = vmax.f32 %v2270_v2, 0.0  ;;  %s3489_s14 = sld [smem:[#allocation2 + $0x110]] }
  0x62   :  { %v409_v5 = vadd.f32 %v408_v39, %v394_v60  ;;  %v482_v25 = vstv %s3323_s22  ;;  %v468_v47 = vmul.f32 %v467_v20, %v3351_v7  ;;  %v3363_v16 = vmin.f32 %v490_v46, 1.0  ;;  %s2331_s22 = sld [smem:[#allocation2 + $0x10a]] }
  0x63   :  { %4458 = vst [vmem:[#allocation26_spill] sm:$0xff] %v3359_v50  ;;  %v520_v31 = vmax.f32 %v2274_v8, 0.0  ;;  %v272_v51 = vmul.f32 %v271_v59, %v3344_v38  ;;  %v3366_v32 = vmin.f32 %v275_v18, 1.0  ;;  %v497_v33 = vstv %s3336_s10  ;;  %s3971_s10 = sld [smem:[#allocation2 + $0x1]] }
  0x64   :  { %v424_v21 = vadd.f32 %v423_v63, %v409_v5  ;;  %4459 = vst [vmem:[#allocation27_spill] sm:$0xff] %v3363_v16  ;;  %v262_v34 = vadd.f32 %v261_v13, %v251_v12  ;;  %v483_v52 = vmul.f32 %v482_v25, %v3359_v50  ;;  %v3370_v53 = vmin.f32 %v505_v23, 1.0 }
  0x65   :  { %4460 = vst [vmem:[#allocation28_spill] sm:$0xff] %v3366_v32  ;;  %v282_v54 = vstv %s3338_s5  ;;  %v512_v39 = vstv %s3348_s13  ;;  %v498_v62 = vmul.f32 %v497_v33, %v3363_v16  ;;  %v3375_v57 = vmin.f32 %v520_v31, 1.0  ;;  %s3454_s13 = sld [smem:[#allocation2 + $0x10b]] }
  0x66   :  { %v439_v28 = vadd.f32 %v438_v6, %v424_v21  ;;  %4461 = vst [vmem:[#allocation29_spill] sm:$0xff] %v3370_v53  ;;  %v527_v58 = vstv %s2276_s11  ;;  %v273_v60 = vadd.f32 %v272_v51, %v262_v34  ;;  %v283_v63 = vmul.f32 %v282_v54, %v3366_v32  ;;  %s3459_s11 = sld [smem:[#allocation2 + $0x10c]] }
  0x67   :  { %4462 = vst [vmem:[#allocation30_spill] sm:$0xff] %v3375_v57  ;;  %v513_v59 = vmul.f32 %v512_v39, %v3370_v53  ;;  %v528_v46 = vmul.f32 %v527_v58, %v3375_v57  ;;  %v661_v13 = vsub.f32 %v2996_v36, %v3009_v44  ;;  %v3397_v31 = vstv %s2313_s24  ;;  %s3973_s5 = sld [smem:[#allocation2]] }
  0x68   :  { %v454_v37 = vadd.f32 %v453_v22, %v439_v28  ;;  %v284_v5 = vadd.f32 %v283_v63, %v273_v60  ;;  %v3400_v51 = vstv %s2312_s21  ;;  %v3402_v33 = vstv %s2315_s27  ;;  %s3465_s27 = sld [smem:[#allocation2 + $0x10d]] }
  0x69   :  { %v662_v18 = vand.u32 2147483647, %v661_v13  ;;  %s3990_s24 = sld [smem:[#allocation2 + $0x5]] }
  0x6a   :  { %v469_v45 = vadd.f32 %v468_v47, %v454_v37  ;;  %s3992_s21 = sld [smem:[#allocation2 + $0x6]] }
  0x6b   :  { %v663_v20 = vsub.f32 1.0, %v662_v18 }
  0x6c   :  { %v484_v2 = vadd.f32 %v483_v52, %v469_v45 }
  0x6d   :  { %v3392_v21 = vmul.f32 16.0, %v663_v20  ;;  %v3416_v20 = vstv %s2321_s29  ;;  %s3472_s29 = sld [smem:[#allocation2 + $0x10e]] }
  0x6e   :  { %v499_v3 = vadd.f32 %v498_v62, %v484_v2  ;;  %v3408_v62 = vstv %s2317_s4  ;;  %s2217_s4 = sld [smem:[#allocation2 + $0x301]] }
  0x6f   :  { %v668_v22 = vmax.f32 %v3392_v21, 0.0  ;;  %v2314_v23 = vadd.f32 -1.0, %v3392_v21  ;;  %v2316_v47 = vadd.f32 -2.0, %v3392_v21  ;;  %v2318_v37 = vadd.f32 -3.0, %v3392_v21 }
  0x70   :  { %v514_v6 = vadd.f32 %v513_v59, %v499_v3  ;;  %v2320_v39 = vadd.f32 -4.0, %v3392_v21  ;;  %v2322_v2 = vadd.f32 -5.0, %v3392_v21 }
  0x71   :  { %v669_v25 = vmin.f32 %v668_v22, 1.0  ;;  %v675_v28 = vmax.f32 %v2314_v23, 0.0  ;;  %v682_v34 = vmax.f32 %v2316_v47, 0.0  ;;  %v689_v58 = vmax.f32 %v2318_v37, 0.0  ;;  %v1775_v22 = vld [vmem:[%s4396_s6 + $0x78] sm:$0xff]  ;;  %v1774_v23 = vld [vmem:[%s4396_s6 + $0x70] sm:$0xff] }
  0x72   :  { %v529_v8 = vadd.f32 %v528_v46, %v514_v6  ;;  %v696_v63 = vmax.f32 %v2320_v39, 0.0  ;;  %v3412_v46 = vstv %s2319_s12  ;;  %v703_v6 = vmax.f32 %v2322_v2, 0.0  ;;  %s4001_s12 = sld [smem:[#allocation2 + $0x300]] }
  0x73   :  { %v672_v36 = vmul.f32 %v3397_v31, %v669_v25  ;;  %v676_v44 = vmin.f32 %v675_v28, 1.0  ;;  %v683_v45 = vmin.f32 %v682_v34, 1.0  ;;  %v690_v3 = vmin.f32 %v689_v58, 1.0 }
  0x74   :  { %v3380_v12 = vmul.f32 %v529_v8, %v284_v5  ;;  %v697_v5 = vmin.f32 %v696_v63, 1.0  ;;  %v2324_v8 = vadd.f32 -6.0, %v3392_v21  ;;  %v704_v28 = vmin.f32 %v703_v6, 1.0  ;;  %v1772_v63 = vld [vmem:[%s4396_s6 + $0x60] sm:$0xff] }
  0x75   :  { %v673_v52 = vadd.f32 %v672_v36, %v3400_v51  ;;  %v679_v54 = vmul.f32 %v3402_v33, %v676_v44  ;;  %v686_v59 = vmul.f32 %v3408_v62, %v683_v45  ;;  %v693_v18 = vmul.f32 %v3412_v46, %v690_v3 }
  0x76   :  { %811 = vmatmul.f32.vlgmr.msra.gmra.mxu0 %v3380_v12  ;;  %933 = vmatmul.f32.vlgmr.msra.gmra.mxu1 %v3380_v12  ;;  %v700_v25 = vmul.f32 %v3416_v20, %v697_v5  ;;  %v710_v47 = vmax.f32 %v2324_v8, 0.0  ;;  %v2326_v36 = vadd.f32 -7.0, %v3392_v21  ;;  %v3426_v34 = vstv %s2323_s30  ;;  %v1771_v8 = vld [vmem:[%s4396_s6 + $0x58] sm:$0xff]  ;;  %s3476_s30 = sld [smem:[#allocation2 + $0x10f]] }
  0x77   :  { %1055 = vmatmul.f32.vlgmr.msra.gmra.mxu2 %v3380_v12  ;;  %1177 = vmatmul.f32.vlgmr.msra.gmra.mxu3 %v3380_v12  ;;  %v680_v60 = vadd.f32 %v679_v54, %v673_v52  ;;  %v2328_v37 = vadd.f32 -8.0, %v3392_v21  ;;  %v1773_v52 = vld [vmem:[%s4396_s6 + $0x68] sm:$0xff]  ;;  %v707_v54 = vmul.f32 %v3426_v34, %v704_v28  ;;  %v2330_v5 = vadd.f32 -9.0, %v3392_v21 }
  0x78   :  { %1776 = vmatpush.msra.mxu0 %v1775_v22  ;;  %v711_v39 = vmin.f32 %v710_v47, 1.0  ;;  %v717_v45 = vmax.f32 %v2326_v36, 0.0  ;;  %v2332_v22 = vadd.f32 -10.0, %v3392_v21  ;;  %v3519_v24 = vstv %s3472_s29  ;;  %s4005_s29 = sld [smem:[#allocation2 + $0x302]] }
  0x79   :  { %v687_v13 = vadd.f32 %v686_v59, %v680_v60  ;;  %v3433_v60 = vstv %s2325_s9  ;;  %v724_v3 = vmax.f32 %v2328_v37, 0.0  ;;  %v731_v36 = vmax.f32 %v2330_v5, 0.0  ;;  %v1769_v37 = vld [vmem:[%s4396_s6 + $0x48] sm:$0xff]  ;;  %s4010_s9 = sld [smem:[#allocation2 + $0x303]] }
  0x7a   :  { %1777 = vmatpush.msra.mxu0 %v1774_v23  ;;  %v714_v2 = vmul.f32 %v3433_v60, %v711_v39  ;;  %v718_v59 = vmin.f32 %v717_v45, 1.0  ;;  %v1770_v23 = vld [vmem:[%s4396_s6 + $0x50] sm:$0xff]  ;;  %v738_v39 = vmax.f32 %v2332_v22, 0.0  ;;  %v2334_v45 = vadd.f32 -11.0, %v3392_v21 }
  0x7b   :  { %v694_v44 = vadd.f32 %v693_v18, %v687_v13  ;;  %v815_v13 = vperm.slane %v3380_v12, 0  ;;  %v3444_v18 = vstv %s2327_s17  ;;  %v725_v47 = vmin.f32 %v724_v3, 1.0  ;;  %s4015_s17 = sld [smem:[#allocation2 + $0x9]] }
  0x7c   :  { %1778 = vmatpush.msra.mxu0 %v1773_v52  ;;  %v721_v28 = vmul.f32 %v3444_v18, %v718_v59  ;;  %v732_v59 = vmin.f32 %v731_v36, 1.0  ;;  %v937_v5 = vperm.slane %v3380_v12, 1  ;;  %v3474_v22 = vstv %s2331_s22  ;;  %s4079_s22 = sld [smem:[#allocation2 + $0x30a]] }
  0x7d   :  { %v701_v58 = vadd.f32 %v700_v25, %v694_v44  ;;  %v4463_v29 = vperm.slane %v3380_v12, 2 }
  0x7e   :  { %1299 = vmatmul.f32.vlgmr.msrb.gmra.mxu0 %v3380_v12  ;;  %1421 = vmatmul.f32.vlgmr.msrb.gmra.mxu1 %v3380_v12 }
  0x7f   :  { %1543 = vmatmul.f32.vlgmr.msrb.gmra.mxu2 %v3380_v12  ;;  %1665 = vmatmul.f32.vlgmr.msrb.gmra.mxu3 %v3380_v12  ;;  %v708_v6 = vadd.f32 %v707_v54, %v701_v58  ;;  %v3456_v54 = vstv %s2329_s28  ;;  %v1768_v58 = vld [vmem:[%s4396_s6 + $0x40] sm:$0xff]  ;;  %s4046_s28 = sld [smem:[#allocation2 + $0x308]] }
  0x80   :  { %1779 = vmatpush.msra.mxu0 %v1772_v63 }
  0x81   :  { %v715_v25 = vadd.f32 %v714_v2, %v708_v6  ;;  %v728_v2 = vmul.f32 %v3456_v54, %v725_v47  ;;  %v1766_v47 = vld [vmem:[%s4396_s6 + $0x30] sm:$0xff] }
  0x82   :  { %1780 = vmatpush.msra.mxu0 %v1771_v8  ;;  %v1767_v8 = vld [vmem:[%s4396_s6 + $0x38] sm:$0xff] }
  0x83   :  { %v722_v63 = vadd.f32 %v721_v28, %v715_v25  ;;  %v745_v25 = vmax.f32 %v2334_v45, 0.0  ;;  %v3502_v28 = vstv %s3459_s11  ;;  %s3983_s11 = sld [smem:[#allocation2 + $0x4]] }
  0x84   :  { %1781 = vmatpush.msra.mxu0 %v1770_v23  ;;  %v739_v23 = vmin.f32 %v738_v39, 1.0 }
  0x85   :  { %v729_v36 = vadd.f32 %v728_v2, %v722_v63  ;;  %v1765_v2 = vld [vmem:[%s4396_s6 + $0x28] sm:$0xff]  ;;  %v746_v45 = vmin.f32 %v745_v25, 1.0  ;;  %v1764_v63 = vld [vmem:[%s4396_s6 + $0x20] sm:$0xff]  ;;  %v2342_v25 = vadd.f32 -15.0, %v3392_v21 }
  0x86   :  { %1782 = vmatpush.msra.mxu0 %v1769_v37  ;;  %v2336_v37 = vadd.f32 -12.0, %v3392_v21 }
  0x87   :  { %v749_v26 = vmul.f32 %v3502_v28, %v746_v45 }
  0x88   :  { %1783 = vmatpush.msra.mxu0 %v1768_v58  ;;  %v2338_v58 = vadd.f32 -13.0, %v3392_v21  ;;  %v752_v32 = vmax.f32 %v2336_v37, 0.0 }
  0x8a   :  { %1784 = vmatpush.msra.mxu0 %v1767_v8 }
  0x8c   :  { %1785 = vmatpush.msra.mxu0 %v1766_v47  ;;  %v3511_v47 = vstv %s3465_s27  ;;  %s3994_s27 = sld [smem:[#allocation2 + $0x7]] }
  0x8e   :  { %1786 = vmatpush.msra.mxu0 %v1765_v2  ;;  %v3522_v2 = vstv %s3476_s30  ;;  %s4008_s30 = sld [smem:[#allocation2 + $0x8]] }
  0x90   :  { %1787 = vmatpush.msra.mxu0 %v1764_v63  ;;  %v3529_v63 = vstv %s3489_s14  ;;  %s4017_s14 = sld [smem:[#allocation2 + $0x304]] }
  0x92   :  { %1788 = vmatpush.msra.mxu0 %v1763_v35 }
  0xf3   :  { %v812_v44 = vpop.f32.mrf.mxu0  ;;  %v934_v39 = vpop.f32.mrf.mxu1 }
  0xf4   :  { %v816_v52 = vsub.f32 %v812_v44, %v815_v13  ;;  %v735_v44 = vmul.f32 %v3474_v22, %v732_v59  ;;  %v3497_v59 = vstv %s3454_s13  ;;  %v938_v43 = vsub.f32 %v934_v39, %v937_v5  ;;  %s3977_s13 = sld [smem:[#allocation2 + $0x2]] }
  0xf5   :  { %v742_v8 = vmul.f32 %v3497_v59, %v739_v23  ;;  %v759_v23 = vmax.f32 %v2338_v58, 0.0  ;;  %v753_v39 = vmin.f32 %v752_v32, 1.0 }
  0xf6   :  { %v817_v3 = vand.u32 2147483647, %v816_v52  ;;  %v736_v6 = vadd.f32 %v735_v44, %v729_v36  ;;  %v939_v19 = vand.u32 2147483647, %v938_v43  ;;  %v1760_v43 = vld [vmem:[%s4396_s6] sm:$0xff] }
  0xf8   :  { %v818_v13 = vsub.f32 1.0, %v817_v3  ;;  %v743_v5 = vadd.f32 %v742_v8, %v736_v6  ;;  %v940_v30 = vsub.f32 1.0, %v939_v19 }
  0xfa   :  { %v3484_v52 = vmul.f32 16.0, %v818_v13  ;;  %v2340_v13 = vadd.f32 -14.0, %v3392_v21  ;;  %v1762_v21 = vld [vmem:[%s4396_s6 + $0x10] sm:$0xff]  ;;  %v1056_v32 = vpop.f32.mrf.mxu2 }
  0xfb   :  { %1789 = vmatpush.msra.mxu0 %v1762_v21  ;;  %v1060_v17 = vsub.f32 %v1056_v32, %v4463_v29  ;;  %v1300_v57 = vpop.f32.mrf.mxu0  ;;  %v4465_v29 = vperm.slane %v3380_v12, 4 }
  0xfc   :  { %v820_v3 = vmax.f32 %v3484_v52, 0.0  ;;  %v2344_v38 = vadd.f32 -1.0, %v3484_v52  ;;  %v2345_v55 = vadd.f32 -2.0, %v3484_v52  ;;  %v766_v36 = vmax.f32 %v2340_v13, 0.0 }
  0xfd   :  { %v2346_v35 = vadd.f32 -3.0, %v3484_v52  ;;  %v2347_v8 = vadd.f32 -4.0, %v3484_v52  ;;  %v2351_v19 = vadd.f32 -8.0, %v3484_v52  ;;  %v3555_v32 = vsub.f32 %v1300_v57, %v4465_v29 }
  0xfe   :  { %v821_v10 = vmin.f32 %v820_v3, 1.0  ;;  %v825_v44 = vmax.f32 %v2344_v38, 0.0  ;;  %v830_v37 = vmax.f32 %v2345_v55, 0.0  ;;  %v760_v38 = vmin.f32 %v759_v23, 1.0 }
  0xff   :  { %v773_v55 = vmax.f32 %v2342_v25, 0.0  ;;  %v767_v61 = vmin.f32 %v766_v36, 1.0  ;;  %v2348_v23 = vadd.f32 -5.0, %v3484_v52  ;;  %v2349_v25 = vadd.f32 -6.0, %v3484_v52 }
 0x100   :  { %v822_v58 = vmul.f32 %v821_v10, %v3397_v31  ;;  %v826_v3 = vmin.f32 %v825_v44, 1.0  ;;  %v831_v13 = vmin.f32 %v830_v37, 1.0  ;;  %v1761_v10 = vld [vmem:[%s4396_s6 + $0x8] sm:$0xff]  ;;  %v750_v44 = vadd.f32 %v749_v26, %v743_v5  ;;  %v1422_v5 = vpop.f32.mrf.mxu1  ;;  %s4093_s6 = sld [smem:[#allocation2 + $0x30b]] }
 0x101   :  { %v756_v36 = vmul.f32 %v3511_v47, %v753_v39  ;;  %1790 = vmatpush.msra.mxu0 %v1761_v10  ;;  %v774_v21 = vmin.f32 %v773_v55, 1.0  ;;  %v840_v49 = vmax.f32 %v2347_v8, 0.0  ;;  %v845_v41 = vmax.f32 %v2348_v23, 0.0 }
 0x102   :  { %v823_v45 = vadd.f32 %v822_v58, %v3400_v51  ;;  %v827_v56 = vmul.f32 %v826_v3, %v3402_v33  ;;  %v832_v6 = vmul.f32 %v831_v13, %v3408_v62  ;;  %v2350_v58 = vadd.f32 -7.0, %v3484_v52  ;;  %v1178_v3 = vpop.f32.mrf.mxu3 }
 0x103   :  { %v835_v13 = vmax.f32 %v2346_v35, 0.0  ;;  %v763_v53 = vmul.f32 %v3519_v24, %v760_v38  ;;  %v770_v26 = vmul.f32 %v3522_v2, %v767_v61  ;;  %1791 = vmatpush.msra.mxu0 %v1760_v43  ;;  %v850_v16 = vmax.f32 %v2349_v25, 0.0 }
 0x104   :  { %v828_v37 = vadd.f32 %v827_v56, %v823_v45  ;;  %v841_v45 = vmin.f32 %v840_v49, 1.0  ;;  %v4464_v55 = vperm.slane %v3380_v12, 3  ;;  %v757_v35 = vadd.f32 %v756_v36, %v750_v44 }
 0x105   :  { %v836_v39 = vmin.f32 %v835_v13, 1.0  ;;  %v855_v8 = vmax.f32 %v2350_v58, 0.0  ;;  %v3558_v38 = vmul.f32 %v3529_v63, %v774_v21  ;;  %v4466_v49 = vperm.slane %v3380_v12, 5 }
 0x106   :  { %v833_v56 = vadd.f32 %v832_v6, %v828_v37  ;;  %v1182_v10 = vsub.f32 %v1178_v3, %v4464_v55  ;;  %v846_v6 = vmin.f32 %v845_v41, 1.0  ;;  %v860_v25 = vmax.f32 %v2351_v19, 0.0 }
 0x107   :  { %v837_v61 = vmul.f32 %v836_v39, %v3412_v46  ;;  %v3563_v23 = vsub.f32 %v1422_v5, %v4466_v49  ;;  %v2352_v43 = vadd.f32 -9.0, %v3484_v52  ;;  %v2353_v44 = vadd.f32 -10.0, %v3484_v52 }
 0x108   :  { %v1061_v36 = vand.u32 2147483647, %v1060_v17  ;;  %v842_v57 = vmul.f32 %v841_v45, %v3416_v20  ;;  %v851_v58 = vmin.f32 %v850_v16, 1.0  ;;  %v1183_v3 = vand.u32 2147483647, %v1182_v10 }
 0x109   :  { %v838_v37 = vadd.f32 %v837_v61, %v833_v56  ;;  %v764_v21 = vadd.f32 %v763_v53, %v757_v35  ;;  %v856_v13 = vmin.f32 %v855_v8, 1.0  ;;  %v865_v55 = vmax.f32 %v2352_v43, 0.0 }
 0x10a   :  { %v847_v41 = vmul.f32 %v846_v6, %v3426_v34  ;;  %v2354_v5 = vadd.f32 -11.0, %v3484_v52  ;;  %v2355_v19 = vadd.f32 -12.0, %v3484_v52  ;;  %v3571_v29 = vmul.f32 16.0, %v940_v30 }
 0x10b   :  { %v843_v39 = vadd.f32 %v842_v57, %v838_v37  ;;  %v861_v17 = vmin.f32 %v860_v25, 1.0  ;;  %v870_v56 = vmax.f32 %v2353_v44, 0.0  ;;  %v3574_v61 = vsub.f32 1.0, %v1061_v36 }
 0x10c   :  { %v852_v45 = vmul.f32 %v851_v58, %v3433_v60  ;;  %v3578_v10 = vsub.f32 1.0, %v1183_v3  ;;  %v3580_v35 = vadd.f32 %v770_v26, %v764_v21  ;;  %v857_v8 = vmul.f32 %v856_v13, %v3444_v18 }
 0x10d   :  { %v848_v53 = vadd.f32 %v847_v41, %v843_v39  ;;  %v866_v6 = vmin.f32 %v865_v55, 1.0  ;;  %v875_v43 = vmax.f32 %v2354_v5, 0.0  ;;  %v880_v37 = vmax.f32 %v2355_v19, 0.0 }
 0x10e   :  { %v2356_v25 = vadd.f32 -13.0, %v3484_v52  ;;  %v862_v44 = vmul.f32 %v861_v17, %v3456_v54  ;;  %v871_v36 = vmin.f32 %v870_v56, 1.0  ;;  %v942_v57 = vmax.f32 %v3571_v29, 0.0 }
 0x10f   :  { %v853_v30 = vadd.f32 %v852_v45, %v848_v53  ;;  %v2375_v39 = vadd.f32 -1.0, %v3571_v29  ;;  %v2376_v3 = vadd.f32 -2.0, %v3571_v29  ;;  %v2377_v26 = vadd.f32 -3.0, %v3571_v29 }
 0x110   :  { %v2378_v21 = vadd.f32 -4.0, %v3571_v29  ;;  %v867_v13 = vmul.f32 %v866_v6, %v3474_v22  ;;  %v943_v55 = vmin.f32 %v942_v57, 1.0  ;;  %v2379_v5 = vadd.f32 -5.0, %v3571_v29 }
 0x111   :  { %v858_v58 = vadd.f32 %v857_v8, %v853_v30  ;;  %v947_v41 = vmax.f32 %v2375_v39, 0.0  ;;  %v952_v17 = vmax.f32 %v2376_v3, 0.0  ;;  %v957_v56 = vmax.f32 %v2377_v26, 0.0 }
 0x112   :  { %v962_v53 = vmax.f32 %v2378_v21, 0.0  ;;  %v876_v45 = vmin.f32 %v875_v43, 1.0  ;;  %v885_v16 = vmax.f32 %v2356_v25, 0.0  ;;  %v944_v8 = vmul.f32 %v943_v55, %v3397_v31 }
 0x113   :  { %v863_v19 = vadd.f32 %v862_v44, %v858_v58  ;;  %v948_v30 = vmin.f32 %v947_v41, 1.0  ;;  %v872_v50 = vmul.f32 %v871_v36, %v3497_v59  ;;  %v953_v7 = vmin.f32 %v952_v17, 1.0 }
 0x114   :  { %v958_v1 = vmin.f32 %v957_v56, 1.0  ;;  %v945_v6 = vadd.f32 %v944_v8, %v3400_v51  ;;  %v967_v39 = vmax.f32 %v2379_v5, 0.0  ;;  %v2380_v44 = vadd.f32 -6.0, %v3571_v29  ;;  %v1544_v8 = vpop.f32.mrf.mxu2 }
 0x115   :  { %v868_v49 = vadd.f32 %v867_v13, %v863_v19  ;;  %v949_v57 = vmul.f32 %v948_v30, %v3402_v33  ;;  %v881_v3 = vmin.f32 %v880_v37, 1.0  ;;  %v954_v43 = vmul.f32 %v953_v7, %v3408_v62 }
 0x116   :  { %v963_v25 = vmin.f32 %v962_v53, 1.0  ;;  %v959_v21 = vmul.f32 %v958_v1, %v3412_v46  ;;  %v972_v13 = vmax.f32 %v2380_v44, 0.0  ;;  %v2381_v36 = vadd.f32 -7.0, %v3571_v29 }
 0x117   :  { %v873_v58 = vadd.f32 %v872_v50, %v868_v49  ;;  %v950_v26 = vadd.f32 %v949_v57, %v945_v6  ;;  %v877_v55 = vmul.f32 %v876_v45, %v3502_v28  ;;  %v2382_v41 = vadd.f32 -8.0, %v3571_v29 }
 0x118   :  { %v2383_v19 = vadd.f32 -9.0, %v3571_v29  ;;  %v2384_v5 = vadd.f32 -10.0, %v3571_v29  ;;  %v2357_v50 = vadd.f32 -14.0, %v3484_v52  ;;  %v968_v37 = vmin.f32 %v967_v39, 1.0 }
 0x119   :  { %v955_v49 = vadd.f32 %v954_v43, %v950_v26  ;;  %v977_v7 = vmax.f32 %v2381_v36, 0.0  ;;  %v878_v17 = vadd.f32 %v877_v55, %v873_v58  ;;  %v2358_v56 = vadd.f32 -15.0, %v3484_v52 }
 0x11a   :  { %v964_v1 = vmul.f32 %v963_v25, %v3416_v20  ;;  %v2385_v53 = vadd.f32 -11.0, %v3571_v29  ;;  %v973_v30 = vmin.f32 %v972_v13, 1.0  ;;  %v982_v6 = vmax.f32 %v2382_v41, 0.0 }
 0x11b   :  { %v960_v45 = vadd.f32 %v959_v21, %v955_v49  ;;  %v987_v57 = vmax.f32 %v2383_v19, 0.0  ;;  %v3609_v44 = vmul.f32 16.0, %v3574_v61  ;;  %v882_v40 = vmul.f32 %v881_v3, %v3511_v47 }
 0x11c   :  { %v886_v43 = vmin.f32 %v885_v16, 1.0  ;;  %v992_v39 = vmax.f32 %v2384_v5, 0.0  ;;  %v890_v26 = vmax.f32 %v2357_v50, 0.0  ;;  %v969_v52 = vmul.f32 %v968_v37, %v3426_v34 }
 0x11d   :  { %v965_v58 = vadd.f32 %v964_v1, %v960_v45  ;;  %v978_v36 = vmin.f32 %v977_v7, 1.0  ;;  %v4467_v25 = vperm.slane %v3380_v12, 6  ;;  %v883_v21 = vadd.f32 %v882_v40, %v878_v17 }
 0x11e   :  { %v895_v13 = vmax.f32 %v2358_v56, 0.0  ;;  %v997_v41 = vmax.f32 %v2385_v53, 0.0  ;;  %v974_v61 = vmul.f32 %v973_v30, %v3433_v60  ;;  %v983_v49 = vmin.f32 %v982_v6, 1.0 }
 0x11f   :  { %v3615_v55 = vsub.f32 %v1544_v8, %v4467_v25  ;;  %v970_v19 = vadd.f32 %v969_v52, %v965_v58  ;;  %v988_v42 = vmin.f32 %v987_v57, 1.0  ;;  %v887_v16 = vmul.f32 %v886_v43, %v3519_v24 }
 0x120   :  { %v993_v3 = vmin.f32 %v992_v39, 1.0  ;;  %v2386_v5 = vadd.f32 -12.0, %v3571_v29  ;;  %v1064_v50 = vmax.f32 %v3609_v44, 0.0  ;;  %v891_v37 = vmin.f32 %v890_v26, 1.0 }
 0x121   :  { %v975_v7 = vadd.f32 %v974_v61, %v970_v19  ;;  %v979_v1 = vmul.f32 %v978_v36, %v3444_v18  ;;  %v2406_v40 = vadd.f32 -1.0, %v3609_v44  ;;  %v888_v17 = vadd.f32 %v887_v16, %v883_v21 }
 0x122   :  { %v896_v56 = vmin.f32 %v895_v13, 1.0  ;;  %v998_v53 = vmin.f32 %v997_v41, 1.0  ;;  %v1065_v8 = vmin.f32 %v1064_v50, 1.0  ;;  %v984_v30 = vmul.f32 %v983_v49, %v3456_v54 }
 0x123   :  { %v980_v45 = vadd.f32 %v979_v1, %v975_v7  ;;  %v989_v6 = vmul.f32 %v988_v42, %v3474_v22  ;;  %v1069_v57 = vmax.f32 %v2406_v40, 0.0  ;;  %v994_v43 = vmul.f32 %v993_v3, %v3497_v59 }
 0x124   :  { %v1002_v39 = vmax.f32 %v2386_v5, 0.0  ;;  %v1066_v26 = vmul.f32 %v1065_v8, %v3397_v31  ;;  %v2407_v58 = vadd.f32 -2.0, %v3609_v44  ;;  %v2387_v36 = vadd.f32 -13.0, %v3571_v29 }
 0x125   :  { %v985_v52 = vadd.f32 %v984_v30, %v980_v45  ;;  %v1070_v25 = vmin.f32 %v1069_v57, 1.0  ;;  %v2408_v21 = vadd.f32 -3.0, %v3609_v44  ;;  %v2388_v13 = vadd.f32 -14.0, %v3571_v29 }
 0x126   :  { %v2389_v41 = vadd.f32 -15.0, %v3571_v29  ;;  %v1067_v42 = vadd.f32 %v1066_v26, %v3400_v51  ;;  %v1074_v19 = vmax.f32 %v2407_v58, 0.0  ;;  %v2409_v3 = vadd.f32 -4.0, %v3609_v44 }
 0x127   :  { %v990_v61 = vadd.f32 %v989_v6, %v985_v52  ;;  %v1071_v49 = vmul.f32 %v1070_v25, %v3402_v33  ;;  %v1079_v16 = vmax.f32 %v2408_v21, 0.0  ;;  %v2410_v50 = vadd.f32 -5.0, %v3609_v44 }
 0x128   :  { %v1075_v5 = vmin.f32 %v1074_v19, 1.0  ;;  %v2411_v7 = vadd.f32 -6.0, %v3609_v44  ;;  %v2412_v1 = vadd.f32 -7.0, %v3609_v44  ;;  %v1084_v29 = vmax.f32 %v2409_v3, 0.0 }
 0x129   :  { %v995_v40 = vadd.f32 %v994_v43, %v990_v61  ;;  %v1072_v8 = vadd.f32 %v1071_v49, %v1067_v42  ;;  %v1080_v45 = vmin.f32 %v1079_v16, 1.0  ;;  %v892_v30 = vmul.f32 %v891_v37, %v3522_v2  ;;  %v1666_v42 = vpop.f32.mrf.mxu3 }
 0x12a   :  { %v897_v6 = vmul.f32 %v896_v56, %v3529_v63  ;;  %v1076_v57 = vmul.f32 %v1075_v5, %v3408_v62  ;;  %v1089_v26 = vmax.f32 %v2410_v50, 0.0  ;;  %v999_v58 = vmul.f32 %v998_v53, %v3502_v28 }
 0x12b   :  { %v1003_v52 = vmin.f32 %v1002_v39, 1.0  ;;  %v1007_v25 = vmax.f32 %v2387_v36, 0.0  ;;  %v1085_v21 = vmin.f32 %v1084_v29, 1.0  ;;  %v893_v19 = vadd.f32 %v892_v30, %v888_v17 }
 0x12c   :  { %v1012_v4 = vmax.f32 %v2388_v13, 0.0  ;;  %v1077_v48 = vadd.f32 %v1076_v57, %v1072_v8  ;;  %v1081_v43 = vmul.f32 %v1080_v45, %v3412_v46  ;;  %v1000_v61 = vadd.f32 %v999_v58, %v995_v40 }
 0x12d   :  { %v1017_v49 = vmax.f32 %v2389_v41, 0.0  ;;  %v1094_v16 = vmax.f32 %v2411_v7, 0.0  ;;  %v1099_v37 = vmax.f32 %v2412_v1, 0.0  ;;  %v1086_v56 = vmul.f32 %v1085_v21, %v3416_v20 }
 0x12e   :  { %v1082_v3 = vadd.f32 %v1081_v43, %v1077_v48  ;;  %v1090_v5 = vmin.f32 %v1089_v26, 1.0  ;;  %v2413_v50 = vadd.f32 -8.0, %v3609_v44  ;;  %v4468_v53 = vand.u32 2147483647, %v3555_v32 }
 0x12f   :  { %v778_v17 = vadd.f32 %v3558_v38, %v3580_v35  ;;  %v1004_v36 = vmul.f32 %v1003_v52, %v3511_v47  ;;  %v1008_v13 = vmin.f32 %v1007_v25, 1.0  ;;  %v1549_v40 = vand.u32 2147483647, %v3615_v55 }
 0x130   :  { %v1306_v39 = vsub.f32 1.0, %v4468_v53  ;;  %v4469_v41 = vperm.slane %v3380_v12, 7  ;;  %v898_v48 = vadd.f32 %v897_v6, %v893_v19  ;;  %v1087_v1 = vadd.f32 %v1086_v56, %v1082_v3 }
 0x131   :  { %v1005_v8 = vadd.f32 %v1004_v36, %v1000_v61  ;;  %v1013_v45 = vmin.f32 %v1012_v4, 1.0  ;;  %v1018_v29 = vmin.f32 %v1017_v49, 1.0  ;;  %v1095_v30 = vmin.f32 %v1094_v16, 1.0 }
 0x132   :  { %v3653_v7 = vsub.f32 %v1666_v42, %v4469_v41  ;;  %v1091_v32 = vmul.f32 %v1090_v5, %v3426_v34  ;;  %v1100_v57 = vmin.f32 %v1099_v37, 1.0  ;;  %v1104_v26 = vmax.f32 %v2413_v50, 0.0 }
 0x133   :  { %v2414_v38 = vadd.f32 -9.0, %v3609_v44  ;;  %v3658_v35 = vmul.f32 16.0, %v3578_v10  ;;  %v3660_v55 = vmul.f32 16.0, %v1306_v39  ;;  %v4470_v12 = vand.u32 2147483647, %v3563_v23 }
 0x134   :  { %v1009_v6 = vmul.f32 %v1008_v13, %v3519_v24  ;;  %v3667_v4 = vsub.f32 1.0, %v1549_v40  ;;  %v3670_v25 = vmul.f32 %v898_v48, %v778_v17  ;;  %v1092_v21 = vadd.f32 %v1091_v32, %v1087_v1 }
 0x135   :  { %v3664_v58 = vsub.f32 1.0, %v4470_v12  ;;  %v1014_v43 = vmul.f32 %v1013_v45, %v3522_v2  ;;  %v3674_v10 = vmul.f32 %v1018_v29, %v3529_v63  ;;  %v1096_v42 = vmul.f32 %v1095_v30, %v3433_v60 }
 0x136   :  { %v1010_v19 = vadd.f32 %v1009_v6, %v1005_v8  ;;  %v1101_v23 = vmul.f32 %v1100_v57, %v3444_v18  ;;  %v1105_v61 = vmin.f32 %v1104_v26, 1.0  ;;  %v1109_v49 = vmax.f32 %v2414_v38, 0.0 }
 0x137   :  { %v2415_v16 = vadd.f32 -10.0, %v3609_v44  ;;  %v2416_v37 = vadd.f32 -11.0, %v3609_v44  ;;  %v2417_v3 = vadd.f32 -12.0, %v3609_v44  ;;  %v1186_v56 = vmax.f32 %v3658_v35, 0.0 }
 0x138   :  { %v2437_v5 = vadd.f32 -1.0, %v3658_v35  ;;  %v1097_v50 = vadd.f32 %v1096_v42, %v1092_v21  ;;  %v2438_v53 = vadd.f32 -2.0, %v3658_v35  ;;  %v2439_v39 = vadd.f32 -3.0, %v3658_v35 }
 0x139   :  { %v2440_v17 = vadd.f32 -4.0, %v3658_v35  ;;  %v3686_v36 = vadd.f32 %v1014_v43, %v1010_v19  ;;  %v2418_v13 = vadd.f32 -13.0, %v3609_v44  ;;  %v1187_v40 = vmin.f32 %v1186_v56, 1.0 }
 0x13a   :  { %v1191_v41 = vmax.f32 %v2437_v5, 0.0  ;;  %v1106_v48 = vmul.f32 %v1105_v61, %v3456_v54  ;;  %v1110_v1 = vmin.f32 %v1109_v49, 1.0  ;;  %v1196_v8 = vmax.f32 %v2438_v53, 0.0 }
 0x13b   :  { %v1201_v45 = vmax.f32 %v2439_v39, 0.0  ;;  %v1188_v29 = vmul.f32 %v1187_v40, %v3397_v31  ;;  %v1206_v32 = vmax.f32 %v2440_v17, 0.0  ;;  %v2441_v57 = vadd.f32 -5.0, %v3658_v35 }
 0x13c   :  { %v1192_v30 = vmin.f32 %v1191_v41, 1.0  ;;  %v1102_v26 = vadd.f32 %v1101_v23, %v1097_v50  ;;  %v1114_v38 = vmax.f32 %v2415_v16, 0.0  ;;  %v1197_v12 = vmin.f32 %v1196_v8, 1.0 }
 0x13d   :  { %v1202_v6 = vmin.f32 %v1201_v45, 1.0  ;;  %v1189_v21 = vadd.f32 %v1188_v29, %v3400_v51  ;;  %v1211_v43 = vmax.f32 %v2441_v57, 0.0  ;;  %v2442_v42 = vadd.f32 -6.0, %v3658_v35 }
 0x13e   :  { %v1193_v19 = vmul.f32 %v1192_v30, %v3402_v33  ;;  %v1119_v61 = vmax.f32 %v2416_v37, 0.0  ;;  %v1124_v49 = vmax.f32 %v2417_v3, 0.0  ;;  %v1129_v56 = vmax.f32 %v2418_v13, 0.0 }
 0x13f   :  { %v1198_v5 = vmul.f32 %v1197_v12, %v3408_v62  ;;  %v1207_v39 = vmin.f32 %v1206_v32, 1.0  ;;  %v1216_v17 = vmax.f32 %v2442_v42, 0.0  ;;  %v2443_v23 = vadd.f32 -7.0, %v3658_v35 }
 0x140   :  { %v1194_v53 = vadd.f32 %v1193_v19, %v1189_v21  ;;  %v1107_v16 = vadd.f32 %v1106_v48, %v1102_v26  ;;  %v1203_v50 = vmul.f32 %v1202_v6, %v3412_v46  ;;  %v2444_v40 = vadd.f32 -8.0, %v3658_v35 }
 0x141   :  { %v2445_v41 = vadd.f32 -9.0, %v3658_v35  ;;  %v1212_v45 = vmin.f32 %v1211_v43, 1.0  ;;  %v1221_v29 = vmax.f32 %v2443_v23, 0.0  ;;  %v2446_v37 = vadd.f32 -10.0, %v3658_v35 }
 0x142   :  { %v1199_v8 = vadd.f32 %v1198_v5, %v1194_v53  ;;  %v1111_v3 = vmul.f32 %v1110_v1, %v3474_v22  ;;  %v1115_v13 = vmin.f32 %v1114_v38, 1.0  ;;  %v1120_v30 = vmin.f32 %v1119_v61, 1.0 }
 0x143   :  { %v3703_v32 = vadd.f32 -14.0, %v3609_v44  ;;  %v1208_v48 = vmul.f32 %v1207_v39, %v3416_v20  ;;  %v1217_v26 = vmin.f32 %v1216_v17, 1.0  ;;  %v1226_v12 = vmax.f32 %v2444_v40, 0.0 }
 0x144   :  { %v1204_v57 = vadd.f32 %v1203_v50, %v1199_v8  ;;  %v1112_v6 = vadd.f32 %v1111_v3, %v1107_v16  ;;  %v1125_v21 = vmin.f32 %v1124_v49, 1.0  ;;  %v1130_v19 = vmin.f32 %v1129_v56, 1.0 }
 0x145   :  { %v1231_v42 = vmax.f32 %v2445_v41, 0.0  ;;  %v1213_v5 = vmul.f32 %v1212_v45, %v3426_v34  ;;  %v1222_v53 = vmin.f32 %v1221_v29, 1.0  ;;  %v1236_v23 = vmax.f32 %v2446_v37, 0.0 }
 0x146   :  { %v1209_v43 = vadd.f32 %v1208_v48, %v1204_v57  ;;  %v1116_v1 = vmul.f32 %v1115_v13, %v3497_v59  ;;  %v3710_v61 = vadd.f32 -15.0, %v3609_v44  ;;  %v2447_v39 = vadd.f32 -11.0, %v3658_v35 }
 0x147   :  { %v1121_v17 = vmul.f32 %v1120_v30, %v3502_v28  ;;  %v1218_v49 = vmul.f32 %v1217_v26, %v3433_v60  ;;  %v1227_v56 = vmin.f32 %v1226_v12, 1.0  ;;  %v1126_v40 = vmul.f32 %v1125_v21, %v3511_v47 }
 0x148   :  { %v1214_v16 = vadd.f32 %v1213_v5, %v1209_v43  ;;  %v1117_v50 = vadd.f32 %v1116_v1, %v1112_v6  ;;  %v1232_v41 = vmin.f32 %v1231_v42, 1.0  ;;  %v1308_v8 = vmax.f32 %v3660_v55, 0.0 }
 0x149   :  { %v1131_v45 = vmul.f32 %v1130_v19, %v3519_v24  ;;  %v1223_v44 = vmul.f32 %v1222_v53, %v3444_v18  ;;  %v1237_v37 = vmin.f32 %v1236_v23, 1.0  ;;  %v1241_v3 = vmax.f32 %v2447_v39, 0.0 }
 0x14a   :  { %v1219_v29 = vadd.f32 %v1218_v49, %v1214_v16  ;;  %v2448_v13 = vadd.f32 -12.0, %v3658_v35  ;;  %v1309_v30 = vmin.f32 %v1308_v8, 1.0  ;;  %v2468_v57 = vadd.f32 -1.0, %v3660_v55 }
 0x14b   :  { %v1139_v48 = vmax.f32 %v3710_v61, 0.0  ;;  %v1228_v12 = vmul.f32 %v1227_v56, %v3456_v54  ;;  %v2469_v6 = vadd.f32 -2.0, %v3660_v55  ;;  %v1122_v21 = vadd.f32 %v1121_v17, %v1117_v50 }
 0x14c   :  { %v1224_v26 = vadd.f32 %v1223_v44, %v1219_v29  ;;  %v1233_v19 = vmul.f32 %v1232_v41, %v3474_v22  ;;  %v1310_v42 = vmul.f32 %v1309_v30, %v3397_v31  ;;  %v1313_v43 = vmax.f32 %v2468_v57, 0.0 }
 0x14d   :  { %v1238_v53 = vmul.f32 %v1237_v37, %v3497_v59  ;;  %v1318_v23 = vmax.f32 %v2469_v6, 0.0  ;;  %v2470_v1 = vadd.f32 -3.0, %v3660_v55  ;;  %v1242_v39 = vmin.f32 %v1241_v3, 1.0 }
 0x14e   :  { %v1229_v5 = vadd.f32 %v1228_v12, %v1224_v26  ;;  %v1246_v16 = vmax.f32 %v2448_v13, 0.0  ;;  %v1311_v61 = vadd.f32 %v1310_v42, %v3400_v51  ;;  %v1314_v49 = vmin.f32 %v1313_v43, 1.0 }
 0x14f   :  { %v1319_v8 = vmin.f32 %v1318_v23, 1.0  ;;  %v1323_v29 = vmax.f32 %v2470_v1, 0.0  ;;  %v2471_v17 = vadd.f32 -4.0, %v3660_v55  ;;  %v2449_v50 = vadd.f32 -13.0, %v3658_v35 }
 0x150   :  { %v1234_v56 = vadd.f32 %v1233_v19, %v1229_v5  ;;  %v1315_v41 = vmul.f32 %v1314_v49, %v3402_v33  ;;  %v2472_v44 = vadd.f32 -5.0, %v3660_v55  ;;  %v2473_v37 = vadd.f32 -6.0, %v3660_v55 }
 0x151   :  { %v1320_v30 = vmul.f32 %v1319_v8, %v3408_v62  ;;  %v1324_v3 = vmin.f32 %v1323_v29, 1.0  ;;  %v1328_v13 = vmax.f32 %v2471_v17, 0.0  ;;  %v2474_v57 = vadd.f32 -7.0, %v3660_v55 }
 0x152   :  { %v1239_v26 = vadd.f32 %v1238_v53, %v1234_v56  ;;  %v1316_v12 = vadd.f32 %v1315_v41, %v1311_v61  ;;  %v1333_v6 = vmax.f32 %v2472_v44, 0.0  ;;  %v1338_v19 = vmax.f32 %v2473_v37, 0.0 }
 0x153   :  { %v1127_v42 = vadd.f32 %v1126_v40, %v1122_v21  ;;  %v1243_v43 = vmul.f32 %v1242_v39, %v3502_v28  ;;  %v1247_v5 = vmin.f32 %v1246_v16, 1.0  ;;  %v1329_v23 = vmin.f32 %v1328_v13, 1.0 }
 0x154   :  { %v1251_v1 = vmax.f32 %v2449_v50, 0.0  ;;  %v1321_v49 = vadd.f32 %v1320_v30, %v1316_v12  ;;  %v1325_v52 = vmul.f32 %v1324_v3, %v3412_v46  ;;  %v1334_v38 = vmin.f32 %v1333_v6, 1.0 }
 0x155   :  { %v2450_v8 = vadd.f32 -14.0, %v3658_v35  ;;  %v2451_v29 = vadd.f32 -15.0, %v3658_v35  ;;  %v1343_v17 = vmax.f32 %v2474_v57, 0.0  ;;  %v2475_v53 = vadd.f32 -8.0, %v3660_v55 }
 0x156   :  { %v1244_v61 = vadd.f32 %v1243_v43, %v1239_v26  ;;  %v1326_v56 = vadd.f32 %v1325_v52, %v1321_v49  ;;  %v1330_v40 = vmul.f32 %v1329_v23, %v3416_v20  ;;  %v1339_v21 = vmin.f32 %v1338_v19, 1.0 }
 0x157   :  { %v1020_v39 = vadd.f32 %v3674_v10, %v3686_v36  ;;  %v1132_v16 = vadd.f32 %v1131_v45, %v1127_v42  ;;  %v4471_v50 = vmax.f32 %v3703_v32, 0.0  ;;  %v1140_v44 = vmin.f32 %v1139_v48, 1.0 }
 0x158   :  { %v1248_v37 = vmul.f32 %v1247_v5, %v3511_v47  ;;  %v1252_v30 = vmin.f32 %v1251_v1, 1.0  ;;  %v1331_v35 = vadd.f32 %v1330_v40, %v1326_v56  ;;  %v1335_v3 = vmul.f32 %v1334_v38, %v3426_v34 }
 0x159   :  { %v1135_v41 = vmin.f32 %v4471_v50, 1.0  ;;  %v1256_v13 = vmax.f32 %v2450_v8, 0.0  ;;  %v1261_v57 = vmax.f32 %v2451_v29, 0.0  ;;  %v1344_v52 = vmin.f32 %v1343_v17, 1.0 }
 0x15a   :  { %v1348_v26 = vmax.f32 %v2475_v53, 0.0  ;;  %v1249_v12 = vadd.f32 %v1248_v37, %v1244_v61  ;;  %v1336_v6 = vadd.f32 %v1335_v3, %v1331_v35  ;;  %v1340_v19 = vmul.f32 %v1339_v21, %v3433_v60 }
 0x15b   :  { %v2476_v10 = vadd.f32 -9.0, %v3660_v55  ;;  %v3751_v36 = vmul.f32 16.0, %v3664_v58  ;;  %v3754_v32 = vmul.f32 16.0, %v3667_v4  ;;  %v4472_v45 = vand.u32 2147483647, %v3653_v7 }
 0x15c   :  { %v1136_v38 = vmul.f32 %v1135_v41, %v3522_v2  ;;  %v3762_v42 = vmul.f32 %v1020_v39, %v3670_v25  ;;  %v1141_v43 = vmul.f32 %v1140_v44, %v3529_v63  ;;  %v1253_v5 = vmul.f32 %v1252_v30, %v3519_v24 }
 0x15d   :  { %v3758_v48 = vsub.f32 1.0, %v4472_v45  ;;  %v1341_v23 = vadd.f32 %v1340_v19, %v1336_v6  ;;  %v1257_v58 = vmin.f32 %v1256_v13, 1.0  ;;  %v1262_v49 = vmin.f32 %v1261_v57, 1.0 }
 0x15e   :  { %v1137_v1 = vadd.f32 %v1136_v38, %v1132_v16  ;;  %v1349_v8 = vmin.f32 %v1348_v26, 1.0  ;;  %v1254_v4 = vadd.f32 %v1253_v5, %v1249_v12  ;;  %v1345_v29 = vmul.f32 %v1344_v52, %v3444_v18 }
 0x15f   :  { %v1353_v7 = vmax.f32 %v2476_v10, 0.0  ;;  %v2477_v17 = vadd.f32 -10.0, %v3660_v55  ;;  %v2478_v53 = vadd.f32 -11.0, %v3660_v55  ;;  %v2479_v25 = vadd.f32 -12.0, %v3660_v55 }
 0x160   :  { %v1430_v61 = vmax.f32 %v3751_v36, 0.0  ;;  %v2499_v56 = vadd.f32 -1.0, %v3751_v36  ;;  %v1346_v40 = vadd.f32 %v1345_v29, %v1341_v23  ;;  %v2500_v21 = vadd.f32 -2.0, %v3751_v36 }
 0x161   :  { %v2501_v39 = vadd.f32 -3.0, %v3751_v36  ;;  %v2502_v16 = vadd.f32 -4.0, %v3751_v36  ;;  %v1350_v50 = vmul.f32 %v1349_v8, %v3456_v54  ;;  %v2480_v41 = vadd.f32 -13.0, %v3660_v55 }
 0x162   :  { %v1431_v44 = vmin.f32 %v1430_v61, 1.0  ;;  %v1435_v37 = vmax.f32 %v2499_v56, 0.0  ;;  %v1354_v30 = vmin.f32 %v1353_v7, 1.0  ;;  %v1358_v35 = vmax.f32 %v2477_v17, 0.0 }
 0x163   :  { %v1440_v3 = vmax.f32 %v2500_v21, 0.0  ;;  %v1445_v13 = vmax.f32 %v2501_v39, 0.0  ;;  %v1450_v26 = vmax.f32 %v2502_v16, 0.0  ;;  %v2503_v12 = vadd.f32 -5.0, %v3751_v36 }
 0x164   :  { %v1432_v57 = vmul.f32 %v1431_v44, %v3397_v31  ;;  %v1436_v52 = vmin.f32 %v1435_v37, 1.0  ;;  %v1351_v6 = vadd.f32 %v1350_v50, %v1346_v40  ;;  %v1363_v19 = vmax.f32 %v2478_v53, 0.0 }
 0x165   :  { %v1441_v10 = vmin.f32 %v1440_v3, 1.0  ;;  %v1446_v45 = vmin.f32 %v1445_v13, 1.0  ;;  %v1455_v23 = vmax.f32 %v2503_v12, 0.0  ;;  %v2504_v8 = vadd.f32 -6.0, %v3751_v36 }
 0x166   :  { %v1433_v38 = vadd.f32 %v1432_v57, %v3400_v51  ;;  %v1437_v5 = vmul.f32 %v1436_v52, %v3402_v33  ;;  %v1355_v29 = vmul.f32 %v1354_v30, %v3474_v22  ;;  %v1359_v7 = vmin.f32 %v1358_v35, 1.0 }
 0x167   :  { %v1368_v17 = vmax.f32 %v2479_v25, 0.0  ;;  %v1442_v61 = vmul.f32 %v1441_v10, %v3408_v62  ;;  %v2481_v56 = vadd.f32 -14.0, %v3660_v55  ;;  %v1447_v53 = vmul.f32 %v1446_v45, %v3412_v46 }
 0x168   :  { %v1438_v21 = vadd.f32 %v1437_v5, %v1433_v38  ;;  %v1451_v40 = vmin.f32 %v1450_v26, 1.0  ;;  %v1142_v39 = vadd.f32 %v1141_v43, %v1137_v1  ;;  %v1258_v16 = vmul.f32 %v1257_v58, %v3522_v2 }
 0x169   :  { %v1356_v50 = vadd.f32 %v1355_v29, %v1351_v6  ;;  %v1373_v44 = vmax.f32 %v2480_v41, 0.0  ;;  %v1456_v3 = vmin.f32 %v1455_v23, 1.0  ;;  %v1460_v13 = vmax.f32 %v2504_v8, 0.0 }
 0x16a   :  { %v1443_v37 = vadd.f32 %v1442_v61, %v1438_v21  ;;  %v2505_v30 = vadd.f32 -7.0, %v3751_v36  ;;  %v1259_v35 = vadd.f32 %v1258_v16, %v1254_v4  ;;  %v1263_v25 = vmul.f32 %v1262_v49, %v3529_v63 }
 0x16b   :  { %v1360_v57 = vmul.f32 %v1359_v7, %v3497_v59  ;;  %v1364_v52 = vmin.f32 %v1363_v19, 1.0  ;;  %v1369_v12 = vmin.f32 %v1368_v17, 1.0  ;;  %v1378_v10 = vmax.f32 %v2481_v56, 0.0 }
 0x16c   :  { %v1448_v45 = vadd.f32 %v1447_v53, %v1443_v37  ;;  %v1452_v43 = vmul.f32 %v1451_v40, %v3416_v20  ;;  %v1374_v58 = vmin.f32 %v1373_v44, 1.0  ;;  %v2506_v41 = vadd.f32 -8.0, %v3751_v36 }
 0x16d   :  { %v1361_v1 = vadd.f32 %v1360_v57, %v1356_v50  ;;  %v2507_v26 = vadd.f32 -9.0, %v3751_v36  ;;  %v1457_v38 = vmul.f32 %v1456_v3, %v3426_v34  ;;  %v1461_v4 = vmin.f32 %v1460_v13, 1.0 }
 0x16e   :  { %v1453_v6 = vadd.f32 %v1452_v43, %v1448_v45  ;;  %v1465_v5 = vmax.f32 %v2505_v30, 0.0  ;;  %v3795_v49 = vmul.f32 16.0, %v3758_v48  ;;  %v3798_v19 = vmul.f32 %v1142_v39, %v3762_v42 }
 0x16f   :  { %v1365_v23 = vmul.f32 %v1364_v52, %v3502_v28  ;;  %v2508_v8 = vadd.f32 -10.0, %v3751_v36  ;;  %v3802_v29 = vadd.f32 %v1263_v25, %v1259_v35  ;;  %v1379_v7 = vmin.f32 %v1378_v10, 1.0 }
 0x170   :  { %v2482_v17 = vadd.f32 -15.0, %v3660_v55  ;;  %v1458_v61 = vadd.f32 %v1457_v38, %v1453_v6  ;;  %v1370_v21 = vmul.f32 %v1369_v12, %v3511_v47  ;;  %v1470_v53 = vmax.f32 %v2506_v41, 0.0 }
 0x171   :  { %v1366_v56 = vadd.f32 %v1365_v23, %v1361_v1  ;;  %v1552_v48 = vmax.f32 %v3754_v32, 0.0  ;;  %v1375_v40 = vmul.f32 %v1374_v58, %v3519_v24  ;;  %v1462_v42 = vmul.f32 %v1461_v4, %v3433_v60 }
 0x172   :  { %v1466_v39 = vmin.f32 %v1465_v5, 1.0  ;;  %v1475_v16 = vmax.f32 %v2507_v26, 0.0  ;;  %v1480_v50 = vmax.f32 %v2508_v8, 0.0  ;;  %v2509_v44 = vadd.f32 -11.0, %v3751_v36 }
 0x173   :  { %v1553_v37 = vmin.f32 %v1552_v48, 1.0  ;;  %v2530_v3 = vadd.f32 -1.0, %v3754_v32  ;;  %v3812_v55 = vmul.f32 %v1379_v7, %v3522_v2  ;;  %v1383_v13 = vmax.f32 %v2482_v17, 0.0 }
 0x174   :  { %v1463_v30 = vadd.f32 %v1462_v42, %v1458_v61  ;;  %v2531_v35 = vadd.f32 -2.0, %v3754_v32  ;;  %v1371_v25 = vadd.f32 %v1370_v21, %v1366_v56  ;;  %v1471_v57 = vmin.f32 %v1470_v53, 1.0 }
 0x175   :  { %v1554_v52 = vmul.f32 %v1553_v37, %v3397_v31  ;;  %v1557_v12 = vmax.f32 %v2530_v3, 0.0  ;;  %v1467_v10 = vmul.f32 %v1466_v39, %v3444_v18  ;;  %v1476_v45 = vmin.f32 %v1475_v16, 1.0 }
 0x176   :  { %v1562_v43 = vmax.f32 %v2531_v35, 0.0  ;;  %v2532_v1 = vadd.f32 -3.0, %v3754_v32  ;;  %v1481_v58 = vmin.f32 %v1480_v50, 1.0  ;;  %v1485_v41 = vmax.f32 %v2509_v44, 0.0 }
 0x177   :  { %v1555_v26 = vadd.f32 %v1554_v52, %v3400_v51  ;;  %v1558_v6 = vmin.f32 %v1557_v12, 1.0  ;;  %v1468_v38 = vadd.f32 %v1467_v10, %v1463_v30  ;;  %v2533_v23 = vadd.f32 -4.0, %v3754_v32 }
 0x178   :  { %v1563_v4 = vmin.f32 %v1562_v43, 1.0  ;;  %v1567_v5 = vmax.f32 %v2532_v1, 0.0  ;;  %v2534_v7 = vadd.f32 -5.0, %v3754_v32  ;;  %v2535_v17 = vadd.f32 -6.0, %v3754_v32 }
 0x179   :  { %v1559_v8 = vmul.f32 %v1558_v6, %v3402_v33  ;;  %v2536_v61 = vadd.f32 -7.0, %v3754_v32  ;;  %v1472_v56 = vmul.f32 %v1471_v57, %v3456_v54  ;;  %v2510_v21 = vadd.f32 -12.0, %v3751_v36 }
 0x17a   :  { %v1568_v53 = vmin.f32 %v1567_v5, 1.0  ;;  %v1572_v48 = vmax.f32 %v2533_v23, 0.0  ;;  %v1564_v39 = vmul.f32 %v1563_v4, %v3408_v62  ;;  %v1577_v16 = vmax.f32 %v2534_v7, 0.0 }
 0x17b   :  { %v1560_v42 = vadd.f32 %v1559_v8, %v1555_v26  ;;  %v1582_v50 = vmax.f32 %v2535_v17, 0.0  ;;  %v1473_v44 = vadd.f32 %v1472_v56, %v1468_v38  ;;  %v2511_v37 = vadd.f32 -13.0, %v3751_v36 }
 0x17c   :  { %v1573_v3 = vmin.f32 %v1572_v48, 1.0  ;;  %v2537_v30 = vadd.f32 -8.0, %v3754_v32  ;;  %v1569_v52 = vmul.f32 %v1568_v53, %v3412_v46  ;;  %v1578_v12 = vmin.f32 %v1577_v16, 1.0 }
 0x17d   :  { %v1565_v35 = vadd.f32 %v1564_v39, %v1560_v42  ;;  %v1587_v57 = vmax.f32 %v2536_v61, 0.0  ;;  %v1384_v10 = vmin.f32 %v1383_v13, 1.0  ;;  %v1477_v43 = vmul.f32 %v1476_v45, %v3474_v22 }
 0x17e   :  { %v1490_v1 = vmax.f32 %v2510_v21, 0.0  ;;  %v1583_v26 = vmin.f32 %v1582_v50, 1.0  ;;  %v1574_v4 = vmul.f32 %v1573_v3, %v3416_v20  ;;  %v1592_v5 = vmax.f32 %v2537_v30, 0.0 }
 0x17f   :  { %v1570_v6 = vadd.f32 %v1569_v52, %v1565_v35  ;;  %v2538_v38 = vadd.f32 -9.0, %v3754_v32  ;;  %v1376_v23 = vadd.f32 %v1375_v40, %v1371_v25  ;;  %v1478_v8 = vadd.f32 %v1477_v43, %v1473_v44 }
 0x180   :  { %v1482_v7 = vmul.f32 %v1481_v58, %v3497_v59  ;;  %v1495_v17 = vmax.f32 %v2511_v37, 0.0  ;;  %v1486_v56 = vmin.f32 %v1485_v41, 1.0  ;;  %v1579_v61 = vmul.f32 %v1578_v12, %v3426_v34 }
 0x181   :  { %v1575_v53 = vadd.f32 %v1574_v4, %v1570_v6  ;;  %v1588_v13 = vmin.f32 %v1587_v57, 1.0  ;;  %v1491_v48 = vmin.f32 %v1490_v1, 1.0  ;;  %v3836_v45 = vadd.f32 -14.0, %v3751_v36 }
 0x182   :  { %v3839_v21 = vadd.f32 -15.0, %v3751_v36  ;;  %v1584_v42 = vmul.f32 %v1583_v26, %v3433_v60  ;;  %v1593_v40 = vmin.f32 %v1592_v5, 1.0  ;;  %v1597_v25 = vmax.f32 %v2538_v38, 0.0 }
 0x183   :  { %v1580_v39 = vadd.f32 %v1579_v61, %v1575_v53  ;;  %v2539_v58 = vadd.f32 -10.0, %v3754_v32  ;;  %v3845_v41 = vmul.f32 %v3802_v29, %v3798_v19  ;;  %v3848_v16 = vmul.f32 %v1384_v10, %v3529_v63 }
 0x184   :  { %v1483_v50 = vadd.f32 %v1482_v7, %v1478_v8  ;;  %v1496_v44 = vmin.f32 %v1495_v17, 1.0  ;;  %v3851_v37 = vadd.f32 %v3812_v55, %v1376_v23  ;;  %v1487_v36 = vmul.f32 %v1486_v56, %v3502_v28 }
 0x185   :  { %v1585_v3 = vadd.f32 %v1584_v42, %v1580_v39  ;;  %v1589_v30 = vmul.f32 %v1588_v13, %v3444_v18  ;;  %v1492_v35 = vmul.f32 %v1491_v48, %v3511_v47  ;;  %v1500_v52 = vmax.f32 %v3836_v45, 0.0 }
 0x186   :  { %v1505_v19 = vmax.f32 %v3839_v21, 0.0  ;;  %v2540_v29 = vadd.f32 -11.0, %v3754_v32  ;;  %v1594_v57 = vmul.f32 %v1593_v40, %v3456_v54  ;;  %v1598_v10 = vmin.f32 %v1597_v25, 1.0 }
 0x187   :  { %v1590_v12 = vadd.f32 %v1589_v30, %v1585_v3  ;;  %v1602_v43 = vmax.f32 %v2539_v58, 0.0  ;;  %v1488_v55 = vadd.f32 %v1487_v36, %v1483_v50  ;;  %v3861_v1 = vmul.f32 %v1496_v44, %v3519_v24 }
 0x188   :  { %v1674_v26 = vmax.f32 %v3795_v49, 0.0  ;;  %v2561_v6 = vadd.f32 -1.0, %v3795_v49  ;;  %v2562_v5 = vadd.f32 -2.0, %v3795_v49  ;;  %v2563_v38 = vadd.f32 -3.0, %v3795_v49 }
 0x189   :  { %v1595_v4 = vadd.f32 %v1594_v57, %v1590_v12  ;;  %v2564_v23 = vadd.f32 -4.0, %v3795_v49  ;;  %v1607_v8 = vmax.f32 %v2540_v29, 0.0  ;;  %v2541_v7 = vadd.f32 -12.0, %v3754_v32 }
 0x18a   :  { %v1675_v17 = vmin.f32 %v1674_v26, 1.0  ;;  %v1679_v56 = vmax.f32 %v2561_v6, 0.0  ;;  %v1599_v53 = vmul.f32 %v1598_v10, %v3474_v22  ;;  %v1603_v61 = vmin.f32 %v1602_v43, 1.0 }
 0x18b   :  { %v1684_v13 = vmax.f32 %v2562_v5, 0.0  ;;  %v1689_v48 = vmax.f32 %v2563_v38, 0.0  ;;  %v1694_v40 = vmax.f32 %v2564_v23, 0.0  ;;  %v2565_v25 = vadd.f32 -5.0, %v3795_v49 }
 0x18c   :  { %v1676_v42 = vmul.f32 %v1675_v17, %v3397_v31  ;;  %v1680_v39 = vmin.f32 %v1679_v56, 1.0  ;;  %v1600_v58 = vadd.f32 %v1599_v53, %v1595_v4  ;;  %v2542_v50 = vadd.f32 -13.0, %v3754_v32 }
 0x18d   :  { %v1685_v44 = vmin.f32 %v1684_v13, 1.0  ;;  %v1690_v36 = vmin.f32 %v1689_v48, 1.0  ;;  %v1699_v29 = vmax.f32 %v2565_v25, 0.0  ;;  %v2566_v12 = vadd.f32 -6.0, %v3795_v49 }
 0x18e   :  { %v1677_v3 = vadd.f32 %v1676_v42, %v3400_v51  ;;  %v1681_v30 = vmul.f32 %v1680_v39, %v3402_v33  ;;  %v1604_v57 = vmul.f32 %v1603_v61, %v3497_v59  ;;  %v1608_v10 = vmin.f32 %v1607_v8, 1.0 }
 0x18f   :  { %v1612_v31 = vmax.f32 %v2541_v7, 0.0  ;;  %v1686_v43 = vmul.f32 %v1685_v44, %v3408_v62  ;;  %v1695_v6 = vmin.f32 %v1694_v40, 1.0  ;;  %v1704_v4 = vmax.f32 %v2566_v12, 0.0 }
 0x190   :  { %v1682_v26 = vadd.f32 %v1681_v30, %v1677_v3  ;;  %v2567_v5 = vadd.f32 -7.0, %v3795_v49  ;;  %v1605_v38 = vadd.f32 %v1604_v57, %v1600_v58  ;;  %v1617_v23 = vmax.f32 %v2542_v50, 0.0 }
 0x191   :  { %v2568_v51 = vadd.f32 -8.0, %v3795_v49  ;;  %v2569_v33 = vadd.f32 -9.0, %v3795_v49  ;;  %v1691_v56 = vmul.f32 %v1690_v36, %v3412_v46  ;;  %v1700_v53 = vmin.f32 %v1699_v29, 1.0 }
 0x192   :  { %v1687_v17 = vadd.f32 %v1686_v43, %v1682_v26  ;;  %v1709_v61 = vmax.f32 %v2567_v5, 0.0  ;;  %v1609_v8 = vmul.f32 %v1608_v10, %v3502_v28  ;;  %v1613_v7 = vmin.f32 %v1612_v31, 1.0 }
 0x193   :  { %v2543_v62 = vadd.f32 -14.0, %v3754_v32  ;;  %v2570_v13 = vadd.f32 -10.0, %v3795_v49  ;;  %v1696_v42 = vmul.f32 %v1695_v6, %v3416_v20  ;;  %v1705_v39 = vmin.f32 %v1704_v4, 1.0 }
 0x194   :  { %v1692_v48 = vadd.f32 %v1691_v56, %v1687_v17  ;;  %v1714_v40 = vmax.f32 %v2568_v51, 0.0  ;;  %v1493_v25 = vadd.f32 %v1492_v35, %v1488_v55  ;;  %v1610_v58 = vadd.f32 %v1609_v8, %v1605_v38 }
 0x195   :  { %v1618_v50 = vmin.f32 %v1617_v23, 1.0  ;;  %v1719_v44 = vmax.f32 %v2569_v33, 0.0  ;;  %v1701_v46 = vmul.f32 %v1700_v53, %v3426_v34  ;;  %v1710_v36 = vmin.f32 %v1709_v61, 1.0 }
 0x196   :  { %v1697_v3 = vadd.f32 %v1696_v42, %v1692_v48  ;;  %v2571_v30 = vadd.f32 -11.0, %v3795_v49  ;;  %v1614_v29 = vmul.f32 %v1613_v7, %v3511_v47  ;;  %v1622_v12 = vmax.f32 %v2543_v62, 0.0  ;;  %v1928_v42 = vld [vmem:[%s4397_s7 + $0x68] sm:$0xff] }
 0x197   :  { %v2544_v57 = vadd.f32 -15.0, %v3754_v32  ;;  %v1724_v10 = vmax.f32 %v2570_v13, 0.0  ;;  %v1706_v20 = vmul.f32 %v1705_v39, %v3433_v60  ;;  %v1715_v43 = vmin.f32 %v1714_v40, 1.0 }
 0x198   :  { %v1702_v31 = vadd.f32 %v1701_v46, %v1697_v3  ;;  %v2572_v35 = vadd.f32 -12.0, %v3795_v49  ;;  %v1498_v55 = vadd.f32 %v3861_v1, %v1493_v25  ;;  %v1501_v34 = vmin.f32 %v1500_v52, 1.0  ;;  %v1930_v52 = vld [vmem:[%s4397_s7 + $0x78] sm:$0xff] }
 0x199   :  { %v1615_v26 = vadd.f32 %v1614_v29, %v1610_v58  ;;  %v1720_v6 = vmin.f32 %v1719_v44, 1.0  ;;  %v1711_v5 = vmul.f32 %v1710_v36, %v3444_v18  ;;  %v1729_v38 = vmax.f32 %v2571_v30, 0.0  ;;  %v1929_v18 = vld [vmem:[%s4397_s7 + $0x70] sm:$0xff]  ;;  %1980 = vmatpush.msra.mxu2 %v1930_v52  ;;  %1931 = vmatpush.msra.mxu1 %v1930_v52 }
 0x19a   :  { %v1707_v4 = vadd.f32 %v1706_v20, %v1702_v31  ;;  %v2573_v32 = vadd.f32 -13.0, %v3795_v49  ;;  %v1619_v23 = vmul.f32 %v1618_v50, %v3519_v24  ;;  %v1623_v51 = vmin.f32 %v1622_v12, 1.0  ;;  %v1925_v31 = vld [vmem:[%s4397_s7 + $0x50] sm:$0xff] }
 0x19b   :  { %v1627_v60 = vmax.f32 %v2544_v57, 0.0  ;;  %v1725_v33 = vmin.f32 %v1724_v10, 1.0  ;;  %v1716_v56 = vmul.f32 %v1715_v43, %v3456_v54  ;;  %v1734_v1 = vmax.f32 %v2572_v35, 0.0  ;;  %1981 = vmatpush.msra.mxu2 %v1929_v18  ;;  %1932 = vmatpush.msra.mxu1 %v1929_v18 }
 0x19c   :  { %v1712_v17 = vadd.f32 %v1711_v5, %v1707_v4  ;;  %v2574_v45 = vadd.f32 -14.0, %v3795_v49  ;;  %v1502_v53 = vmul.f32 %v1501_v34, %v3522_v2  ;;  %v1506_v61 = vmin.f32 %v1505_v19, 1.0  ;;  %v1924_v34 = vld [vmem:[%s4397_s7 + $0x48] sm:$0xff] }
 0x19d   :  { %v1620_v8 = vadd.f32 %v1619_v23, %v1615_v26  ;;  %v1721_v7 = vmul.f32 %v1720_v6, %v3474_v22  ;;  %v1730_v62 = vmin.f32 %v1729_v38, 1.0  ;;  %v1739_v13 = vmax.f32 %v2573_v32, 0.0  ;;  %1982 = vmatpush.msra.mxu2 %v1928_v42  ;;  %1933 = vmatpush.msra.mxu1 %v1928_v42  ;;  %v1923_v6 = vld [vmem:[%s4397_s7 + $0x40] sm:$0xff]  ;;  %v1922_v38 = vld [vmem:[%s4397_s7 + $0x38] sm:$0xff] }
 0x19e   :  { %v1717_v54 = vadd.f32 %v1716_v56, %v1712_v17  ;;  %v2575_v48 = vadd.f32 -15.0, %v3795_v49  ;;  %v1386_v39 = vadd.f32 %v3848_v16, %v3851_v37  ;;  %v1503_v40 = vadd.f32 %v1502_v53, %v1498_v55  ;;  %v1927_v49 = vld [vmem:[%s4397_s7 + $0x60] sm:$0xff] }
 0x19f   :  { %v1624_v21 = vmul.f32 %v1623_v51, %v3522_v2  ;;  %v1628_v19 = vmin.f32 %v1627_v60, 1.0  ;;  %v1726_v25 = vmul.f32 %v1725_v33, %v3497_v59  ;;  %v1735_v58 = vmin.f32 %v1734_v1, 1.0  ;;  %v1926_v59 = vld [vmem:[%s4397_s7 + $0x58] sm:$0xff]  ;;  %1983 = vmatpush.msra.mxu2 %v1927_v49  ;;  %1934 = vmatpush.msra.mxu1 %v1927_v49  ;;  %v1920_v51 = vld [vmem:[%s4397_s7 + $0x28] sm:$0xff]  ;;  %v1917_v33 = vld [vmem:[%s4397_s7 + $0x10] sm:$0xff] }
 0x1a0   :  { %v1722_v22 = vadd.f32 %v1721_v7, %v1717_v54  ;;  %v1744_v50 = vmax.f32 %v2574_v45, 0.0  ;;  %v1387_v44 = vmul.f32 %v1386_v39, %v3845_v41  ;;  %v1507_v3 = vmul.f32 %v1506_v61, %v3529_v63  ;;  %v1918_v60 = vld [vmem:[%s4397_s7 + $0x18] sm:$0xff]  ;;  %v3965_v17 = vld [vmem:[%s4391_s1] sm:$0x1]  ;;  %s3981_s1 = sld [smem:[#allocation2 + $0x3]] }
 0x1a1   :  { %v1625_v16 = vadd.f32 %v1624_v21, %v1620_v8  ;;  %v1731_v46 = vmul.f32 %v1730_v62, %v3502_v28  ;;  %v1740_v36 = vmin.f32 %v1739_v13, 1.0  ;;  %v1749_v30 = vmax.f32 %v2575_v48, 0.0  ;;  %1984 = vmatpush.msra.mxu2 %v1926_v59  ;;  %1935 = vmatpush.msra.mxu1 %v1926_v59 }
 0x1a2   :  { %v1727_v37 = vadd.f32 %v1726_v25, %v1722_v22  ;;  %v1508_v29 = vadd.f32 %v1507_v3, %v1503_v40  ;;  %v1629_v12 = vmul.f32 %v1628_v19, %v3529_v63  ;;  %v1736_v57 = vmul.f32 %v1735_v58, %v3511_v47 }
 0x1a3   :  { %v1745_v10 = vmin.f32 %v1744_v50, 1.0  ;;  %v1741_v35 = vmul.f32 %v1740_v36, %v3519_v24  ;;  %v1750_v55 = vmin.f32 %v1749_v30, 1.0  ;;  %1985 = vmatpush.msra.mxu2 %v1925_v31  ;;  %1936 = vmatpush.msra.mxu1 %v1925_v31  ;;  %v1812_v56 = vmul.f32 %v3965_v17, %v3965_v17 }
 0x1a4   :  { %v1732_v41 = vadd.f32 %v1731_v46, %v1727_v37  ;;  %v1509_v28 = vmul.f32 %v1508_v29, %v1387_v44  ;;  %v1630_v20 = vadd.f32 %v1629_v12, %v1625_v16  ;;  %v113_v8 = vstv %s3971_s10  ;;  %s4216_s10 = sld [smem:[#allocation2 + $0x84]] }
 0x1a5   :  { %v1746_v26 = vmul.f32 %v1745_v10, %v3522_v2  ;;  %1986 = vmatpush.msra.mxu2 %v1924_v34  ;;  %1937 = vmatpush.msra.mxu1 %v1924_v34  ;;  %v1751_v24 = vmul.f32 %v1750_v55, %v3529_v63  ;;  %v1921_v2 = vld [vmem:[%s4397_s7 + $0x30] sm:$0xff]  ;;  %v1919_v63 = vld [vmem:[%s4397_s7 + $0x20] sm:$0xff]  ;;  %v3969_v1 = vmul.f32 16.0, %v1812_v56  ;;  %v105_v48 = vstv %s3973_s5  ;;  %s4224_s5 = sld [smem:[#allocation2 + $0x85]] }
 0x1a6   :  { %v1737_v43 = vadd.f32 %v1736_v57, %v1732_v41  ;;  %v1631_v4 = vmul.f32 %v1630_v20, %v1509_v28  ;;  %v124_v42 = vstv %s3977_s13  ;;  %v135_v25 = vstv %s3981_s1  ;;  %s4226_s13 = sld [smem:[#allocation2 + $0x86]] }
 0x1a7   :  { %1987 = vmatpush.msra.mxu2 %v1923_v6  ;;  %1938 = vmatpush.msra.mxu1 %v1923_v6  ;;  %v1814_v45 = vmax.f32 %v3969_v1, 0.0  ;;  %v2576_v52 = vadd.f32 -1.0, %v3969_v1  ;;  %v2577_v61 = vadd.f32 -2.0, %v3969_v1  ;;  %v2578_v13 = vadd.f32 -3.0, %v3969_v1  ;;  %s2612_s1 = sld [smem:[#allocation2 + $0x38b]] }
 0x1a8   :  { %v1742_v47 = vadd.f32 %v1741_v35, %v1737_v43  ;;  %v2579_v39 = vadd.f32 -4.0, %v3969_v1  ;;  %v2580_v58 = vadd.f32 -5.0, %v3969_v1  ;;  %v2581_v50 = vadd.f32 -6.0, %v3969_v1 }
 0x1a9   :  { %1988 = vmatpush.msra.mxu2 %v1922_v38  ;;  %1939 = vmatpush.msra.mxu1 %v1922_v38  ;;  %v1815_v18 = vmin.f32 %v1814_v45, 1.0  ;;  %v1819_v53 = vmax.f32 %v2576_v52, 0.0  ;;  %v1824_v62 = vmax.f32 %v2577_v61, 0.0  ;;  %v1829_v22 = vmax.f32 %v2578_v13, 0.0 }
 0x1aa   :  { %v1747_v5 = vadd.f32 %v1746_v26, %v1742_v47  ;;  %v1834_v49 = vmax.f32 %v2579_v39, 0.0  ;;  %v146_v37 = vstv %s3983_s11  ;;  %v1839_v46 = vmax.f32 %v2580_v58, 0.0  ;;  %s2614_s11 = sld [smem:[#allocation2 + $0x38c]] }
 0x1ab   :  { %1989 = vmatpush.msra.mxu2 %v1921_v2  ;;  %1940 = vmatpush.msra.mxu1 %v1921_v2  ;;  %v1816_v7 = vmul.f32 %v1815_v18, %v113_v8  ;;  %v1820_v54 = vmin.f32 %v1819_v53, 1.0  ;;  %v1825_v19 = vmin.f32 %v1824_v62, 1.0  ;;  %v1830_v16 = vmin.f32 %v1829_v22, 1.0 }
 0x1ac   :  { %v1752_v32 = vadd.f32 %v1751_v24, %v1747_v5  ;;  %v1844_v36 = vmax.f32 %v2581_v50, 0.0  ;;  %v157_v30 = vstv %s3990_s24  ;;  %v1835_v59 = vmin.f32 %v1834_v49, 1.0  ;;  %s4238_s24 = sld [smem:[#allocation2 + $0x87]] }
 0x1ad   :  { %1990 = vmatpush.msra.mxu2 %v1920_v51  ;;  %1941 = vmatpush.msra.mxu1 %v1920_v51  ;;  %v1817_v40 = vadd.f32 %v1816_v7, %v105_v48  ;;  %v1821_v21 = vmul.f32 %v1820_v54, %v124_v42  ;;  %v1826_v3 = vmul.f32 %v1825_v19, %v135_v25  ;;  %v306_v29 = vstv %s2217_s4  ;;  %s4103_s4 = sld [smem:[#allocation2 + $0x30c]] }
 0x1ae   :  { %v3947_v23 = vmul.f32 %v1752_v32, %v1631_v4  ;;  %v1831_v41 = vmul.f32 %v1830_v16, %v146_v37  ;;  %v2582_v57 = vadd.f32 -7.0, %v3969_v1  ;;  %v307_v10 = vmul.f32 %v306_v29, %v3210_v0 }
 0x1af   :  { %1991 = vmatpush.msra.mxu2 %v1919_v63  ;;  %1942 = vmatpush.msra.mxu1 %v1919_v63  ;;  %v1822_v44 = vadd.f32 %v1821_v21, %v1817_v40  ;;  %v168_v31 = vstv %s3992_s21  ;;  %v179_v28 = vstv %s3994_s27  ;;  %v1840_v20 = vmin.f32 %v1839_v46, 1.0  ;;  %s4244_s21 = sld [smem:[#allocation2 + $0x88]] }
 0x1b0   :  { %1792 = vmatmul.f32.vlgmr.msra.gmra.mxu0 %v3947_v23  ;;  %v293_v43 = vstv %s4001_s12  ;;  %v321_v35 = vstv %s4005_s29  ;;  %v1845_v55 = vmin.f32 %v1844_v36, 1.0  ;;  %v2583_v34 = vadd.f32 -8.0, %v3969_v1  ;;  %s4108_s12 = sld [smem:[#allocation2 + $0x286]] }
 0x1b1   :  { %1992 = vmatpush.msra.mxu2 %v1918_v60  ;;  %1943 = vmatpush.msra.mxu1 %v1918_v60  ;;  %v1827_v12 = vadd.f32 %v1826_v3, %v1822_v44  ;;  %v308_v47 = vadd.f32 %v307_v10, %v293_v43  ;;  %v322_v26 = vmul.f32 %v321_v35, %v3217_v9  ;;  %v4043_v4 = vadd.f32 -9.0, %v3969_v1  ;;  %s4111_s29 = sld [smem:[#allocation2 + $0x30d]] }
 0x1b2   :  { %v1836_v6 = vmul.f32 %v1835_v59, %v157_v30  ;;  %v336_v5 = vstv %s4010_s9  ;;  %v1849_v38 = vmax.f32 %v2582_v57, 0.0  ;;  %v4049_v32 = vadd.f32 -10.0, %v3969_v1  ;;  %v4473_v57 = vld [vmem:[#allocation18_spill] sm:$0xff]  ;;  %s4116_s9 = sld [smem:[#allocation2 + $0x287]] }
 0x1b3   :  { %1993 = vmatpush.msra.mxu2 %v1917_v33  ;;  %1944 = vmatpush.msra.mxu1 %v1917_v33  ;;  %v1832_v24 = vadd.f32 %v1831_v41, %v1827_v12  ;;  %v323_v2 = vadd.f32 %v322_v26, %v308_v47  ;;  %v337_v51 = vmul.f32 %v336_v5, %v3219_v11  ;;  %v190_v63 = vstv %s4008_s30  ;;  %s4246_s27 = sld [smem:[#allocation2 + $0xc]] }
 0x1b4   :  { %v1841_v60 = vmul.f32 %v1840_v20, %v168_v31  ;;  %v351_v33 = vstv %s4017_s14  ;;  %v201_v56 = vstv %s4015_s17  ;;  %v4063_v45 = vmul.f32 %v1845_v55, %v179_v28  ;;  %s4119_s14 = sld [smem:[#allocation2 + $0x30e]] }
 0x1b5   :  { %v1854_v52 = vmax.f32 %v2583_v34, 0.0  ;;  %v338_v18 = vadd.f32 %v337_v51, %v323_v2  ;;  %v352_v53 = vmul.f32 %v351_v33, %v3222_v14  ;;  %v4069_v61 = vmul.f32 16.0, %v3965_v17  ;;  %s4260_s30 = sld [smem:[#allocation2 + $0xd]] }
 0x1b6   :  { %v1859_v7 = vmax.f32 %v4043_v4, 0.0  ;;  %v366_v54 = vstv %s4022_s15  ;;  %v1837_v62 = vadd.f32 %v1836_v6, %v1832_v24  ;;  %v4075_v13 = vmin.f32 %v1849_v38, 1.0  ;;  %v4474_v6 = vld [vmem:[#allocation19_spill] sm:$0xff]  ;;  %s4124_s15 = sld [smem:[#allocation2 + $0x288]] }
 0x1b7   :  { %v1864_v39 = vmax.f32 %v4049_v32, 0.0  ;;  %v353_v40 = vadd.f32 %v352_v53, %v338_v18  ;;  %v367_v21 = vmul.f32 %v366_v54, %v3224_v15  ;;  %v548_v17 = vmax.f32 %v4069_v61, 0.0  ;;  %v4475_v18 = vld [vmem:[#allocation20_spill] sm:$0xff]  ;;  %s4305_s17 = sld [smem:[#allocation2 + $0x8e]] }
 0x1b8   :  { %v2281_v19 = vadd.f32 -1.0, %v4069_v61  ;;  %v381_v22 = vstv %s4028_s2  ;;  %v212_v58 = vstv %s4020_s0  ;;  %v4087_v50 = vmin.f32 %v1854_v52, 1.0  ;;  %s4127_s2 = sld [smem:[#allocation2 + $0x30f]] }
 0x1b9   :  { %v4090_v49 = vadd.f32 -11.0, %v3969_v1  ;;  %v368_v44 = vadd.f32 %v367_v21, %v353_v40  ;;  %v382_v3 = vmul.f32 %v381_v22, %v3233_v27  ;;  %v549_v16 = vmin.f32 %v548_v17, 1.0  ;;  %s2592_s0 = sld [smem:[#allocation2 + $0x381]] }
 0x1ba   :  { %v555_v46 = vmax.f32 %v2281_v19, 0.0  ;;  %v396_v36 = vstv %s4034_s25  ;;  %v551_v59 = vstv %s4038_s23  ;;  %v2283_v29 = vadd.f32 -2.0, %v4069_v61  ;;  %s4132_s25 = sld [smem:[#allocation2 + $0x289]] }
 0x1bb   :  { %v4100_v12 = vadd.f32 %v1841_v60, %v1837_v62  ;;  %v383_v41 = vadd.f32 %v382_v3, %v368_v44  ;;  %v397_v10 = vmul.f32 %v396_v36, %v4473_v57  ;;  %v552_v20 = vmul.f32 %v551_v59, %v549_v16  ;;  %v4476_v44 = vld [vmem:[#allocation21_spill] sm:$0xff]  ;;  %s4135_s23 = sld [smem:[#allocation2 + $0x310]] }
 0x1bc   :  { %v556_v43 = vmin.f32 %v555_v46, 1.0  ;;  %v411_v35 = vstv %s4046_s28  ;;  %v546_v55 = vstv %s4052_s18  ;;  %v558_v34 = vstv %s4058_s16  ;;  %s4140_s28 = sld [smem:[#allocation2 + $0x28a]] }
 0x1bd   :  { %v562_v47 = vmax.f32 %v2283_v29, 0.0  ;;  %v398_v26 = vadd.f32 %v397_v10, %v383_v41  ;;  %v412_v5 = vmul.f32 %v411_v35, %v4474_v6  ;;  %v553_v24 = vadd.f32 %v552_v20, %v546_v55  ;;  %v4477_v20 = vld [vmem:[#allocation23_spill] sm:$0xff]  ;;  %s4145_s18 = sld [smem:[#allocation2 + $0x28b]] }
 0x1be   :  { %v559_v38 = vmul.f32 %v558_v34, %v556_v43  ;;  %v426_v2 = vstv %s4066_s19  ;;  %v565_v60 = vstv %s4073_s20  ;;  %v2285_v33 = vadd.f32 -3.0, %v4069_v61  ;;  %s4151_s16 = sld [smem:[#allocation2 + $0x28c]] }
 0x1bf   :  { %v563_v51 = vmin.f32 %v562_v47, 1.0  ;;  %v413_v52 = vadd.f32 %v412_v5, %v398_v26  ;;  %v427_v53 = vmul.f32 %v426_v2, %v4475_v18  ;;  %v2287_v62 = vadd.f32 -4.0, %v4069_v61  ;;  %s4157_s19 = sld [smem:[#allocation2 + $0x28d]] }
 0x1c0   :  { %v560_v54 = vadd.f32 %v559_v38, %v553_v24  ;;  %v441_v40 = vstv %s4079_s22  ;;  %v569_v17 = vmax.f32 %v2285_v33, 0.0  ;;  %v572_v19 = vstv %s4084_s3  ;;  %v4478_v38 = vld [vmem:[#allocation25_spill] sm:$0xff]  ;;  %s4164_s20 = sld [smem:[#allocation2 + $0x28e]] }
 0x1c1   :  { %v566_v21 = vmul.f32 %v565_v60, %v563_v51  ;;  %v428_v22 = vadd.f32 %v427_v53, %v413_v52  ;;  %v442_v3 = vmul.f32 %v441_v40, %v4476_v44  ;;  %v576_v16 = vmax.f32 %v2287_v62, 0.0  ;;  %v4479_v40 = vld [vmem:[#allocation26_spill] sm:$0xff]  ;;  %s4170_s22 = sld [smem:[#allocation2 + $0x28f]] }
 0x1c2   :  { %v2289_v46 = vadd.f32 -5.0, %v4069_v61  ;;  %v456_v36 = vstv %s4093_s6  ;;  %v570_v29 = vmin.f32 %v569_v17, 1.0  ;;  %v579_v41 = vstv %s4098_s26  ;;  %s4174_s3 = sld [smem:[#allocation2 + $0x290]] }
 0x1c3   :  { %v567_v59 = vadd.f32 %v566_v21, %v560_v54  ;;  %v443_v10 = vadd.f32 %v442_v3, %v428_v22  ;;  %v457_v43 = vmul.f32 %v456_v36, %v4477_v20  ;;  %v577_v35 = vmin.f32 %v576_v16, 1.0  ;;  %s4177_s6 = sld [smem:[#allocation2 + $0xb]] }
 0x1c4   :  { %v583_v55 = vmax.f32 %v2289_v46, 0.0  ;;  %v471_v34 = vstv %s4103_s4  ;;  %v573_v47 = vmul.f32 %v572_v19, %v570_v29  ;;  %v586_v26 = vstv %s4108_s12  ;;  %s4181_s26 = sld [smem:[#allocation2 + $0x81]] }
 0x1c5   :  { %v2291_v5 = vadd.f32 -6.0, %v4069_v61  ;;  %v458_v24 = vadd.f32 %v457_v43, %v443_v10  ;;  %v472_v2 = vmul.f32 %v471_v34, %v4478_v38  ;;  %v580_v51 = vmul.f32 %v579_v41, %v577_v35  ;;  %s4184_s4 = sld [smem:[#allocation2 + $0x82]] }
 0x1c6   :  { %v584_v60 = vmin.f32 %v583_v55, 1.0  ;;  %v486_v33 = vstv %s4111_s29  ;;  %v574_v52 = vadd.f32 %v573_v47, %v567_v59  ;;  %v593_v54 = vstv %s4116_s9  ;;  %v4480_v59 = vld [vmem:[#allocation27_spill] sm:$0xff]  ;;  %s4187_s12 = sld [smem:[#allocation2 + $0x80]] }
 0x1c7   :  { %v590_v53 = vmax.f32 %v2291_v5, 0.0  ;;  %v473_v62 = vadd.f32 %v472_v2, %v458_v24  ;;  %v487_v21 = vmul.f32 %v486_v33, %v4479_v40  ;;  %v2293_v19 = vadd.f32 -7.0, %v4069_v61  ;;  %s4194_s29 = sld [smem:[#allocation2 + $0x83]] }
 0x1c8   :  { %v587_v17 = vmul.f32 %v586_v26, %v584_v60  ;;  %v501_v22 = vstv %s4119_s14  ;;  %v581_v3 = vadd.f32 %v580_v51, %v574_v52  ;;  %v600_v46 = vstv %s4124_s15  ;;  %v4481_v26 = vld [vmem:[#allocation29_spill] sm:$0xff]  ;;  %s4265_s15 = sld [smem:[#allocation2 + $0x8a]] }
 0x1c9   :  { %v591_v16 = vmin.f32 %v590_v53, 1.0  ;;  %v488_v36 = vadd.f32 %v487_v21, %v473_v62  ;;  %v502_v29 = vmul.f32 %v501_v22, %v4480_v59  ;;  %v597_v41 = vmax.f32 %v2293_v19, 0.0  ;;  %v4482_v62 = vld [vmem:[#allocation30_spill] sm:$0xff]  ;;  %s2618_s9 = sld [smem:[#allocation2 + $0x38e]] }
 0x1ca   :  { %v2295_v10 = vadd.f32 -8.0, %v4069_v61  ;;  %v516_v43 = vstv %s4127_s2  ;;  %v588_v35 = vadd.f32 %v587_v17, %v581_v3  ;;  %v607_v34 = vstv %s4132_s25  ;;  %s4273_s2 = sld [smem:[#allocation2 + $0x8b]] }
 0x1cb   :  { %v594_v55 = vmul.f32 %v593_v54, %v591_v16  ;;  %v503_v47 = vadd.f32 %v502_v29, %v488_v36  ;;  %v517_v5 = vmul.f32 %v516_v43, %v4481_v26  ;;  %v598_v24 = vmin.f32 %v597_v41, 1.0  ;;  %s4278_s25 = sld [smem:[#allocation2 + $0xe]] }
 0x1cc   :  { %v604_v2 = vmax.f32 %v2295_v10, 0.0  ;;  %v531_v51 = vstv %s4135_s23  ;;  %v2297_v33 = vadd.f32 -9.0, %v4069_v61  ;;  %v614_v52 = vstv %s4140_s28  ;;  %s4283_s23 = sld [smem:[#allocation2 + $0x8c]] }
 0x1cd   :  { %v595_v60 = vadd.f32 %v594_v55, %v588_v35  ;;  %v518_v53 = vadd.f32 %v517_v5, %v503_v47  ;;  %v532_v21 = vmul.f32 %v531_v51, %v4482_v62  ;;  %v601_v17 = vmul.f32 %v600_v46, %v598_v24  ;;  %s4293_s28 = sld [smem:[#allocation2 + $0x8d]] }
 0x1ce   :  { %v605_v54 = vmin.f32 %v604_v2, 1.0  ;;  %v611_v19 = vmax.f32 %v2297_v33, 0.0  ;;  %v2299_v22 = vadd.f32 -10.0, %v4069_v61  ;;  %v621_v3 = vstv %s4145_s18  ;;  %s4298_s18 = sld [smem:[#allocation2 + $0xf]] }
 0x1cf   :  { %v2301_v16 = vadd.f32 -11.0, %v4069_v61  ;;  %v533_v36 = vadd.f32 %v532_v21, %v518_v53  ;;  %v602_v29 = vadd.f32 %v601_v17, %v595_v60  ;;  %v2303_v10 = vadd.f32 -12.0, %v4069_v61  ;;  %s2620_s14 = sld [smem:[#allocation2 + $0x38f]] }
 0x1d0   :  { %v608_v41 = vmul.f32 %v607_v34, %v605_v54  ;;  %v612_v43 = vmin.f32 %v611_v19, 1.0  ;;  %v618_v35 = vmax.f32 %v2299_v22, 0.0  ;;  %v628_v55 = vstv %s4151_s16  ;;  %s4311_s16 = sld [smem:[#allocation2 + $0x10]] }
 0x1d1   :  { %v625_v46 = vmax.f32 %v2301_v16, 0.0  ;;  %v2278_v47 = vadd.f32 -0.5, %v533_v36  ;;  %v632_v24 = vmax.f32 %v2303_v10, 0.0  ;;  %v2305_v2 = vadd.f32 -13.0, %v4069_v61 }
 0x1d2   :  { %v609_v5 = vadd.f32 %v608_v41, %v602_v29  ;;  %v615_v51 = vmul.f32 %v614_v52, %v612_v43  ;;  %v619_v60 = vmin.f32 %v618_v35, 1.0  ;;  %v635_v34 = vstv %s4157_s19  ;;  %s4320_s19 = sld [smem:[#allocation2 + $0x8f]] }
 0x1d3   :  { %v626_v33 = vmin.f32 %v625_v46, 1.0  ;;  %v537_v53 = vand.u32 2147483647, %v2278_v47  ;;  %v633_v21 = vmin.f32 %v632_v24, 1.0  ;;  %v639_v17 = vmax.f32 %v2305_v2, 0.0 }
 0x1d4   :  { %v2307_v54 = vadd.f32 -14.0, %v4069_v61  ;;  %v1754_v19 = vrot.slane %v3947_v23, 4  ;;  %v616_v22 = vadd.f32 %v615_v51, %v609_v5  ;;  %v622_v16 = vmul.f32 %v621_v3, %v619_v60 }
 0x1d5   :  { %v629_v36 = vmul.f32 %v628_v55, %v626_v33  ;;  %v538_v52 = vrot.slane %v537_v53, 4  ;;  %v640_v29 = vmin.f32 %v639_v17, 1.0  ;;  %v642_v41 = vstv %s4164_s20  ;;  %s4324_s20 = sld [smem:[#allocation2 + $0x90]] }
 0x1d6   :  { %v646_v10 = vmax.f32 %v2307_v54, 0.0  ;;  %v623_v43 = vadd.f32 %v622_v16, %v616_v22  ;;  %v636_v35 = vmul.f32 %v635_v34, %v633_v21  ;;  %v2309_v46 = vadd.f32 -15.0, %v4069_v61  ;;  %v4483_v61 = vld [vmem:[#allocation5_spill] sm:$0xff]  ;;  %v4484_v22 = vld [vmem:[#allocation6_spill] sm:$0xff] }
 0x1d7   :  { %v539_v47 = vadd.f32 %v538_v52, %v537_v53  ;;  %v649_v3 = vstv %s4170_s22  ;;  %v2661_v55 = vmov 8.0   ;;  %v643_v2 = vmul.f32 %v642_v41, %v640_v29  ;;  %v4485_v29 = vld [vmem:[#allocation7_spill] sm:$0xff]  ;;  %s2591_s22 = sld [smem:[#allocation2 + $0x380]] }
 0x1d8   :  { %v647_v5 = vmin.f32 %v646_v10, 1.0  ;;  %2636 = vrcp.f32 %v2661_v55  ;;  %v630_v24 = vadd.f32 %v629_v36, %v623_v43  ;;  %v653_v51 = vmax.f32 %v2309_v46, 0.0 }
 0x1d9   :  { %v540_v60 = vrot.slane %v539_v47, 2  ;;  %v656_v33 = vstv %s4174_s3  ;;  %v2662_v34 = vmov 64.0   ;;  %v114_v21 = vmul.f32 %v113_v8, %v4483_v61  ;;  %s2594_s3 = sld [smem:[#allocation2 + $0x382]] }
 0x1da   :  { %2638 = vrcp.f32 %v2662_v34  ;;  %v637_v53 = vadd.f32 %v636_v35, %v630_v24  ;;  %v650_v17 = vmul.f32 %v649_v3, %v647_v5  ;;  %v654_v54 = vmin.f32 %v653_v51, 1.0 }
 0x1db   :  { %v125_v16 = vmul.f32 %v124_v42, %v4484_v22  ;;  %v1755_v36 = vadd.f32 %v1754_v19, %v3947_v23  ;;  %v115_v52 = vadd.f32 %v114_v21, %v105_v48  ;;  %v136_v41 = vmul.f32 %v135_v25, %v4485_v29  ;;  %v4486_v42 = vld [vmem:[#allocation8_spill] sm:$0xff] }
 0x1dc   :  { %v4208_v8 = vmul.f32 %v4075_v13, %v190_v63  ;;  %v541_v10 = vadd.f32 %v540_v60, %v539_v47  ;;  %v644_v43 = vadd.f32 %v643_v2, %v637_v53  ;;  %v657_v35 = vmul.f32 %v656_v33, %v654_v54  ;;  %v4487_v60 = vld [vmem:[#allocation9_spill] sm:$0xff]  ;;  %v4488_v54 = vld [vmem:[#allocation10_spill] sm:$0xff] }
 0x1dd   :  { %v223_v46 = vstv %s4177_s6  ;;  %v126_v3 = vadd.f32 %v125_v16, %v115_v52  ;;  %v147_v23 = vmul.f32 %v146_v37, %v4486_v42  ;;  %v298_v19 = vstv %s4181_s26  ;;  %s2596_s6 = sld [smem:[#allocation2 + $0x383]] }
 0x1de   :  { %v2637_v5 = vpop.eup %2636  ;;  %v313_v55 = vstv %s4184_s4  ;;  %v651_v48 = vadd.f32 %v650_v17, %v644_v43  ;;  %v287_v24 = vstv %s4187_s12  ;;  %v299_v13 = vmul.f32 %v298_v19, %v3210_v0  ;;  %v1916_v0 = vld [vmem:[%s4397_s7 + $0x8] sm:$0xff]  ;;  %s2598_s26 = sld [smem:[#allocation2 + $0x384]] }
 0x1df   :  { %v1964_v25 = vmul.f32 8.0, %v2637_v5  ;;  %v1756_v2 = vrot.slane %v1755_v36, 2  ;;  %v137_v51 = vadd.f32 %v136_v41, %v126_v3  ;;  %v158_v33 = vmul.f32 %v157_v30, %v4487_v60  ;;  %1994 = vmatpush.msra.mxu2 %v1916_v0  ;;  %1945 = vmatpush.msra.mxu1 %v1916_v0  ;;  %v4489_v41 = vld [vmem:[#allocation11_spill] sm:$0xff]  ;;  %s2600_s4 = sld [smem:[#allocation2 + $0x385]] }
 0x1e0   :  { %v2639_v47 = vpop.eup %2638  ;;  %v314_v34 = vmul.f32 %v313_v55, %v3217_v9  ;;  %v542_v37 = vrot.slane %v541_v10, 1  ;;  %v658_v61 = vadd.f32 %v657_v35, %v651_v48  ;;  %v169_v22 = vmul.f32 %v168_v31, %v4488_v54  ;;  %v1915_v35 = vld [vmem:[%s4397_s7] sm:$0xff]  ;;  %s4253_s7 = sld [smem:[#allocation2 + $0x89]] }
 0x1e1   :  { %v1965_v21 = vsub.f32 1.0, %v1964_v25  ;;  %v1972_v53 = vmul.f32 64.0, %v2639_v47  ;;  %v148_v17 = vadd.f32 %v147_v23, %v137_v51  ;;  %v300_v30 = vadd.f32 %v299_v13, %v287_v24  ;;  %1995 = vmatpush.msra.mxu2 %v1915_v35  ;;  %1946 = vmatpush.msra.mxu1 %v1915_v35  ;;  %v4490_v25 = vld [vmem:[#allocation12_spill] sm:$0xff]  ;;  %s2602_s12 = sld [smem:[#allocation2 + $0x386]] }
 0x1e2   :  { %v328_v16 = vstv %s4194_s29  ;;  %v2311_v9 = vadd.f32 -0.5, %v658_v61  ;;  %v180_v43 = vmul.f32 %v179_v28, %v4489_v41  ;;  %vm1968_vm4 = vweird.f32 %v2637_v5  ;;  %v4494_v35 = vld [vmem:[#allocation16_spill] sm:$0xff]  ;;  %s2604_s29 = sld [smem:[#allocation2 + $0x387]] }
 0x1e3   :  { %v1966_v52 = vmul.f32 %v2637_v5, %v1965_v21  ;;  %v1973_v29 = vsub.f32 1.0, %v1972_v53  ;;  %v159_v31 = vadd.f32 %v158_v33, %v148_v17  ;;  %v315_v3 = vadd.f32 %v314_v34, %v300_v30  ;;  %v4492_v53 = vld [vmem:[#allocation14_spill] sm:$0xff] }
 0x1e4   :  { %v329_v42 = vmul.f32 %v328_v16, %v3219_v11  ;;  %v543_v23 = vadd.f32 %v542_v37, %v541_v10  ;;  %v660_v19 = vand.u32 2147483647, %v2311_v9  ;;  %vm1976_vm5 = vweird.f32 %v2639_v47  ;;  %v4491_v37 = vld [vmem:[#allocation13_spill] sm:$0xff]  ;;  %v4493_v9 = vld [vmem:[#allocation15_spill] sm:$0xff] }
 0x1e5   :  { %v1967_v28 = vadd.f32 %v2637_v5, %v1966_v52  ;;  %v1974_v55 = vmul.f32 %v2639_v47, %v1973_v29  ;;  %v170_v48 = vadd.f32 %v169_v22, %v159_v31  ;;  %v191_v24 = vmul.f32 %v190_v63, %v4490_v25 }
 0x1e6   :  { %v343_v13 = vstv %s4216_s10  ;;  %v1757_v11 = vadd.f32 %v1756_v2, %v1755_v36  ;;  %v1847_v60 = vadd.f32 %v4063_v45, %v4100_v12  ;;  %v202_v61 = vmul.f32 %v201_v56, %v4491_v37  ;;  %s2606_s10 = sld [smem:[#allocation2 + $0x388]] }
 0x1e7   :  { %v1969_v51 = vsel %vm1968_vm4, %v2637_v5, %v1967_v28  ;;  %v1975_v10 = vadd.f32 %v2639_v47, %v1974_v55  ;;  %v181_v34 = vadd.f32 %v180_v43, %v170_v48  ;;  %v330_v63 = vadd.f32 %v329_v42, %v315_v3 }
 0x1e8   :  { %v1970_v33 = vmul.f32 %v1969_v51, %v660_v19  ;;  %v344_v36 = vmul.f32 %v343_v13, %v3222_v14  ;;  %v358_v5 = vstv %s4224_s5  ;;  %v373_v2 = vstv %s4226_s13  ;;  %v4495_v13 = vld [vmem:[#allocation17_spill] sm:$0xff]  ;;  %s2608_s5 = sld [smem:[#allocation2 + $0x389]] }
 0x1e9   :  { %v1977_v21 = vsel %vm1976_vm5, %v2639_v47, %v1975_v10  ;;  %v192_v12 = vadd.f32 %v191_v24, %v181_v34  ;;  %v213_v0 = vmul.f32 %v212_v58, %v4492_v53  ;;  %v359_v17 = vmul.f32 %v358_v5, %v3224_v15  ;;  %s2610_s13 = sld [smem:[#allocation2 + $0x38a]] }
 0x1ea   :  { %v1978_v45 = vmul.f32 %v1977_v21, %v543_v23  ;;  %v1758_v54 = vrot.slane %v1757_v11, 1  ;;  %v345_v22 = vadd.f32 %v344_v36, %v330_v63  ;;  %v374_v47 = vmul.f32 %v373_v2, %v3233_v27  ;;  %v4496_v21 = vld [vmem:[#allocation22_spill] sm:$0xff] }
 0x1eb   :  { %v388_v30 = vstv %s4238_s24  ;;  %v203_v16 = vadd.f32 %v202_v61, %v192_v12  ;;  %v224_v52 = vmul.f32 %v223_v46, %v4493_v9  ;;  %v403_v29 = vstv %s4244_s21  ;;  %v4497_v9 = vld [vmem:[#allocation24_spill] sm:$0xff]  ;;  %s2616_s24 = sld [smem:[#allocation2 + $0x38d]] }
 0x1ec   :  { %v1979_v14 = vadd.f32 %v1978_v45, %v1970_v33  ;;  %v234_v41 = vstv %s4246_s27  ;;  %v360_v43 = vadd.f32 %v359_v17, %v345_v22  ;;  %v389_v15 = vmul.f32 %v388_v30, %v4473_v57  ;;  %s2622_s21 = sld [smem:[#allocation2 + $0x390]] }
 0x1ed   :  { %v214_v27 = vadd.f32 %v213_v0, %v203_v16  ;;  %v235_v31 = vmul.f32 %v234_v41, %v4494_v35  ;;  %v1856_v3 = vmul.f32 %v4087_v50, %v201_v56  ;;  %v1860_v42 = vmin.f32 %v1859_v7, 1.0 }
 0x1ee   :  { %1996 = vmatmul.f32.vlgmr.msra.gmra.mxu2 %v1979_v14  ;;  %v375_v23 = vadd.f32 %v374_v47, %v360_v43  ;;  %v404_v19 = vmul.f32 %v403_v29, %v4474_v6  ;;  %v418_v28 = vstv %s4253_s7  ;;  %v1852_v57 = vadd.f32 %v4208_v8, %v1847_v60 }
 0x1ef   :  { %v4296_v55 = vadd.f32 %v1758_v54, %v1757_v11  ;;  %v225_v48 = vadd.f32 %v224_v52, %v214_v27  ;;  %v1865_v4 = vmin.f32 %v1864_v39, 1.0  ;;  %v1869_v56 = vmax.f32 %v4090_v49, 0.0 }
 0x1f0   :  { %v245_v7 = vstv %s4260_s30  ;;  %v390_v50 = vadd.f32 %v389_v15, %v375_v23  ;;  %v433_v6 = vstv %s4265_s15  ;;  %v2587_v25 = vadd.f32 -12.0, %v3969_v1  ;;  %v4498_v23 = vld [vmem:[#allocation28_spill] sm:$0xff] }
 0x1f1   :  { %v236_v24 = vadd.f32 %v235_v31, %v225_v48  ;;  %v246_v11 = vmul.f32 %v245_v7, %v4495_v13  ;;  %v419_v32 = vmul.f32 %v418_v28, %v4475_v18  ;;  %v1861_v39 = vmul.f32 %v1860_v42, %v212_v58 }
 0x1f2   :  { %v405_v51 = vadd.f32 %v404_v19, %v390_v50  ;;  %v448_v10 = vstv %s4273_s2  ;;  %v1857_v60 = vadd.f32 %v1856_v3, %v1852_v57  ;;  %2640 = vrcp.f32 %v4296_v55 }
 0x1f3   :  { %v434_v33 = vmul.f32 %v433_v6, %v4476_v44  ;;  %v1870_v34 = vmin.f32 %v1869_v56, 1.0  ;;  %v2588_v18 = vadd.f32 -13.0, %v3969_v1  ;;  %v256_v58 = vstv %s4278_s25 }
 0x1f4   :  { %v463_v37 = vstv %s4283_s23  ;;  %v1874_v61 = vmax.f32 %v2587_v25, 0.0  ;;  %v247_v63 = vadd.f32 %v246_v11, %v236_v24  ;;  %v257_v36 = vmul.f32 %v256_v58, %v4496_v21 }
 0x1f5   :  { %v420_v5 = vadd.f32 %v419_v32, %v405_v51  ;;  %v449_v2 = vmul.f32 %v448_v10, %v4477_v20  ;;  %v478_v45 = vstv %s4293_s28  ;;  %v1862_v44 = vadd.f32 %v1861_v39, %v1857_v60 }
 0x1f6   :  { %v1866_v12 = vmul.f32 %v1865_v4, %v223_v46  ;;  %v2589_v53 = vadd.f32 -14.0, %v3969_v1  ;;  %v464_v17 = vmul.f32 %v463_v37, %v4478_v38  ;;  %v1871_v54 = vmul.f32 %v1870_v34, %v234_v41 }
 0x1f7   :  { %v435_v0 = vadd.f32 %v434_v33, %v420_v5  ;;  %v267_v22 = vstv %s4298_s18  ;;  %v493_v47 = vstv %s4305_s17  ;;  %v1875_v30 = vmin.f32 %v1874_v61, 1.0 }
 0x1f8   :  { %v1879_v14 = vmax.f32 %v2588_v18, 0.0  ;;  %v4339_v16 = vpop.eup %2640  ;;  %v258_v20 = vadd.f32 %v257_v36, %v247_v63  ;;  %v268_v52 = vmul.f32 %v267_v22, %v4497_v9  ;;  %v479_v46 = vmul.f32 %v478_v45, %v4479_v40 }
 0x1f9   :  { %v450_v29 = vadd.f32 %v449_v2, %v435_v0  ;;  %v278_v15 = vstv %s4311_s16  ;;  %v508_v27 = vstv %s4320_s19  ;;  %v1867_v35 = vadd.f32 %v1866_v12, %v1862_v44 }
 0x1fa   :  { %v1884_v31 = vmax.f32 %v2589_v53, 0.0  ;;  %v494_v3 = vmul.f32 %v493_v47, %v4480_v59  ;;  %v523_v42 = vstv %s4324_s20  ;;  %v279_v19 = vmul.f32 %v278_v15, %v4498_v23 }
 0x1fb   :  { %v465_v41 = vadd.f32 %v464_v17, %v450_v29  ;;  %v1880_v28 = vmin.f32 %v1879_v14, 1.0  ;;  %v2590_v57 = vadd.f32 -15.0, %v3969_v1  ;;  %v1894_v40 = vmul.f32 %v4339_v16, %v4296_v55 }
 0x1fc   :  { %v269_v4 = vadd.f32 %v268_v52, %v258_v20  ;;  %v509_v50 = vmul.f32 %v508_v27, %v4481_v26  ;;  %v524_v25 = vmul.f32 %v523_v42, %v4482_v62  ;;  %v1876_v59 = vmul.f32 %v1875_v30, %v245_v7 }
 0x1fd   :  { %v480_v56 = vadd.f32 %v479_v46, %v465_v41  ;;  %v1895_v11 = vsub.f32 1.0, %v1894_v40  ;;  %v1881_v10 = vmul.f32 %v1880_v28, %v256_v58  ;;  %v1885_v60 = vmin.f32 %v1884_v31, 1.0 }
 0x1fe   :  { %v280_v39 = vadd.f32 %v279_v19, %v269_v4  ;;  %v1889_v33 = vmax.f32 %v2590_v57, 0.0  ;;  %vm1899_vm10 = vweird.f32 %v4339_v16  ;;  %v1904_v45 = vand.u32 2147483648, %v4296_v55 }
 0x1ff   :  { %v495_v1 = vadd.f32 %v494_v3, %v480_v56  ;;  %v1896_v61 = vmul.f32 %v4339_v16, %v1895_v11  ;;  %v1886_v5 = vmul.f32 %v1885_v60, %v267_v22  ;;  %vm1898_vm11 = vweird.f32 %v4296_v55 }
 0x200   :  { %v1890_v63 = vmin.f32 %v1889_v33, 1.0  ;;  %v1902_v12 = vand.u32 2147483647, %v4296_v55  ;;  %vm1900_vm12 = vmor %vm1898_vm11, %vm1899_vm10  ;;  %v2002_v42 = vstv %s2591_s22  ;;  %v2014_v23 = vstv %s2594_s3 }
 0x201   :  { %v510_v51 = vadd.f32 %v509_v50, %v495_v1  ;;  %v2021_v4 = vstv %s2596_s6  ;;  %vm2152_vm5 = vcmask 130048  }
 0x202   :  { %v1891_v58 = vmul.f32 %v1890_v63, %v278_v15  ;;  %vm1903_vm13 = vcmp.eq.f32.partialorder %v1902_v12, 8.507059e+37  ;;  %v2049_v63 = vstv %s2604_s29 }
 0x203   :  { %v525_v34 = vadd.f32 %v524_v25, %v510_v51 }
 0x205   :  { %v534_v37 = vmul.f32 %v525_v34, %v280_v39  ;;  %v2035_v39 = vstv %s2600_s4 }
 0x22d   :  { %v1793_v8 = vpop.f32.mrf.mxu0 }
 0x22e   :  { %v4317_v49 = vmul.f32 %v1793_v8, %v4296_v55  ;;  %v1872_v8 = vadd.f32 %v1871_v54, %v1867_v35  ;;  %v1905_v54 = vor.u32 1.1754944e-38, %v1904_v45  ;;  %v2007_v35 = vstv %s2592_s0 }
 0x230   :  { %2642 = vrcp.f32 %v4317_v49  ;;  %v1808_v6 = vand.u32 2147483648, %v4317_v49  ;;  %v1806_v13 = vand.u32 2147483647, %v4317_v49  ;;  %vm1802_vm7 = vweird.f32 %v4317_v49 }
 0x231   :  { %v1877_v7 = vadd.f32 %v1876_v59, %v1872_v8  ;;  %v2028_v59 = vstv %s2598_s26 }
 0x232   :  { %v1809_v26 = vor.u32 1.1754944e-38, %v1808_v6  ;;  %vm1807_vm9 = vcmp.eq.f32.partialorder %v1806_v13, 8.507059e+37 }
 0x233   :  { %v1882_v36 = vadd.f32 %v1881_v10, %v1877_v7 }
 0x235   :  { %v1887_v44 = vadd.f32 %v1886_v5, %v1882_v36 }
 0x236   :  { %v2643_v43 = vpop.eup %2642 }
 0x237   :  { %v1798_v38 = vmul.f32 %v2643_v43, %v4317_v49  ;;  %vm1803_vm6 = vweird.f32 %v2643_v43  ;;  %v1897_v49 = vadd.f32 %v4339_v16, %v1896_v61  ;;  %v1892_v22 = vadd.f32 %v1891_v58, %v1887_v44 }
 0x238   :  { %vm1804_vm8 = vmor %vm1802_vm7, %vm1803_vm6  ;;  %v2056_v58 = vstv %s2606_s10  ;;  %vm2154_vm6 = vcmask 122880  }
 0x239   :  { %v1799_v48 = vsub.f32 1.0, %v1798_v38  ;;  %v1901_v0 = vsel %vm1900_vm12, %v4339_v16, %v1897_v49 }
 0x23a   :  { %v1906_v30 = vsel %vm1903_vm13, %v1905_v54, %v1901_v0 }
 0x23b   :  { %v1800_v24 = vmul.f32 %v2643_v43, %v1799_v48  ;;  %v1907_v20 = vmul.f32 %v1906_v30, %v1892_v22  ;;  %v2063_v22 = vstv %s2608_s5  ;;  %v2070_v30 = vstv %s2610_s13 }
 0x23d   :  { %v1801_v32 = vadd.f32 %v2643_v43, %v1800_v24 }
 0x23f   :  { %v1805_v62 = vsel %vm1804_vm8, %v2643_v43, %v1801_v32 }
 0x240   :  { %v1810_v18 = vsel %vm1807_vm9, %v1809_v26, %v1805_v62  ;;  %v2042_v26 = vstv %s2602_s12 }
 0x241   :  { %v1811_v21 = vmul.f32 %v1810_v18, %v534_v37 }
 0x243   :  { %v1908_v2 = vrot.slane %v1811_v21, 4 }
 0x245   :  { %v1909_v53 = vadd.f32 %v1908_v2, %v1811_v21 }
 0x247   :  { %v1910_v17 = vrot.slane %v1909_v53, 2 }
 0x249   :  { %v1911_v47 = vadd.f32 %v1910_v17, %v1909_v53 }
 0x24b   :  { %v1912_v14 = vrot.slane %v1911_v47, 1 }
 0x24d   :  { %v1913_v9 = vadd.f32 %v1912_v14, %v1911_v47 }
 0x24f   :  { %v1914_v52 = vadd.f32 %v1913_v9, %v1907_v20 }
 0x251   :  { %1947 = vmatmul.f32.vlgmr.msra.gmra.mxu1 %v1914_v52 }
 0x271   :  { %v1997_v29 = vpop.f32.mrf.mxu2 }
 0x272   :  { %v4366_v46 = vmul.f32 16.0, %v1997_v29 }
 0x274   :  { %v2004_v55 = vmax.f32 %v4366_v46, 0.0  ;;  %v2593_v16 = vadd.f32 -1.0, %v4366_v46  ;;  %v2595_v27 = vadd.f32 -2.0, %v4366_v46  ;;  %v2597_v3 = vadd.f32 -3.0, %v4366_v46 }
 0x275   :  { %v2599_v19 = vadd.f32 -4.0, %v4366_v46  ;;  %v2601_v56 = vadd.f32 -5.0, %v4366_v46  ;;  %v2603_v32 = vadd.f32 -6.0, %v4366_v46  ;;  %v2605_v62 = vadd.f32 -7.0, %v4366_v46 }
 0x276   :  { %v2005_v43 = vmin.f32 %v2004_v55, 1.0  ;;  %v2011_v15 = vmax.f32 %v2593_v16, 0.0  ;;  %v2018_v41 = vmax.f32 %v2595_v27, 0.0  ;;  %v2025_v48 = vmax.f32 %v2597_v3, 0.0 }
 0x277   :  { %v2032_v8 = vmax.f32 %v2599_v19, 0.0  ;;  %v2039_v24 = vmax.f32 %v2601_v56, 0.0  ;;  %v2046_v33 = vmax.f32 %v2603_v32, 0.0  ;;  %v2053_v37 = vmax.f32 %v2605_v62, 0.0 }
 0x278   :  { %v2008_v31 = vmul.f32 %v2007_v35, %v2005_v43  ;;  %v2012_v38 = vmin.f32 %v2011_v15, 1.0  ;;  %v2019_v40 = vmin.f32 %v2018_v41, 1.0  ;;  %v2026_v25 = vmin.f32 %v2025_v48, 1.0 }
 0x279   :  { %v2033_v11 = vmin.f32 %v2032_v8, 1.0  ;;  %v2040_v51 = vmin.f32 %v2039_v24, 1.0  ;;  %v2047_v18 = vmin.f32 %v2046_v33, 1.0  ;;  %v2607_v61 = vadd.f32 -8.0, %v4366_v46 }
 0x27a   :  { %v2009_v28 = vadd.f32 %v2008_v31, %v2002_v42  ;;  %v2015_v57 = vmul.f32 %v2014_v23, %v2012_v38  ;;  %v2022_v6 = vmul.f32 %v2021_v4, %v2019_v40  ;;  %v2029_v1 = vmul.f32 %v2028_v59, %v2026_v25 }
 0x27b   :  { %v2036_v60 = vmul.f32 %v2035_v39, %v2033_v11  ;;  %v2043_v34 = vmul.f32 %v2042_v26, %v2040_v51  ;;  %v2609_v21 = vadd.f32 -9.0, %v4366_v46  ;;  %v2050_v5 = vmul.f32 %v2049_v63, %v2047_v18 }
 0x27c   :  { %v2016_v50 = vadd.f32 %v2015_v57, %v2009_v28  ;;  %v2054_v49 = vmin.f32 %v2053_v37, 1.0  ;;  %v2060_v2 = vmax.f32 %v2607_v61, 0.0  ;;  %v2611_v12 = vadd.f32 -10.0, %v4366_v46 }
 0x27d   :  { %v2067_v44 = vmax.f32 %v2609_v21, 0.0  ;;  %v2613_v52 = vadd.f32 -11.0, %v4366_v46  ;;  %v2615_v27 = vadd.f32 -12.0, %v4366_v46  ;;  %v2077_v31 = vstv %s2612_s1 }
 0x27e   :  { %v2023_v13 = vadd.f32 %v2022_v6, %v2016_v50  ;;  %v2057_v17 = vmul.f32 %v2056_v58, %v2054_v49  ;;  %v2061_v54 = vmin.f32 %v2060_v2, 1.0  ;;  %v2074_v9 = vmax.f32 %v2611_v12, 0.0 }
 0x27f   :  { %v2068_v47 = vmin.f32 %v2067_v44, 1.0  ;;  %v2081_v15 = vmax.f32 %v2613_v52, 0.0  ;;  %v2617_v41 = vadd.f32 -13.0, %v4366_v46  ;;  %v2088_v19 = vmax.f32 %v2615_v27, 0.0 }
 0x280   :  { %v2030_v10 = vadd.f32 %v2029_v1, %v2023_v13  ;;  %v2064_v20 = vmul.f32 %v2063_v22, %v2061_v54  ;;  %v2075_v43 = vmin.f32 %v2074_v9, 1.0  ;;  %v2084_v57 = vstv %s2614_s11 }
 0x281   :  { %v2071_v29 = vmul.f32 %v2070_v30, %v2068_v47  ;;  %v2082_v23 = vmin.f32 %v2081_v15, 1.0  ;;  %v2095_v48 = vmax.f32 %v2617_v41, 0.0  ;;  %v2619_v4 = vadd.f32 -14.0, %v4366_v46 }
 0x282   :  { %v2037_v7 = vadd.f32 %v2036_v60, %v2030_v10  ;;  %v2078_v42 = vmul.f32 %v2077_v31, %v2075_v43  ;;  %v2089_v6 = vmin.f32 %v2088_v19, 1.0  ;;  %v2091_v8 = vstv %s2616_s24 }
 0x283   :  { %v2085_v50 = vmul.f32 %v2084_v57, %v2082_v23  ;;  %v2096_v24 = vmin.f32 %v2095_v48, 1.0  ;;  %v2102_v13 = vmax.f32 %v2619_v4, 0.0  ;;  %v2621_v1 = vadd.f32 -15.0, %v4366_v46 }
 0x284   :  { %v2044_v36 = vadd.f32 %v2043_v34, %v2037_v7  ;;  %v2092_v39 = vmul.f32 %v2091_v8, %v2089_v6  ;;  %v2098_v26 = vstv %s2618_s9  ;;  %v2123_v10 = vlaneseq }
 0x285   :  { %v2099_v34 = vmul.f32 %v2098_v26, %v2096_v24  ;;  %v2103_v7 = vmin.f32 %v2102_v13, 1.0  ;;  %v2109_v18 = vmax.f32 %v2621_v1, 0.0  ;;  %v2105_v37 = vstv %s2620_s14 }
 0x286   :  { %v2051_v0 = vadd.f32 %v2050_v5, %v2044_v36  ;;  %v2124_v63 = vshrl.u32 %v2123_v10, 7  ;;  %v2112_v49 = vstv %s2622_s21  ;;  %v2663_v30 = vmov 0.0  }
 0x287   :  { %v2106_v36 = vmul.f32 %v2105_v37, %v2103_v7  ;;  %v2110_v5 = vmin.f32 %v2109_v18, 1.0 }
 0x288   :  { %v2058_v14 = vadd.f32 %v2057_v17, %v2051_v0 }
 0x289   :  { %v2113_v17 = vmul.f32 %v2112_v49, %v2110_v5 }
 0x28a   :  { %v2065_v16 = vadd.f32 %v2064_v20, %v2058_v14 }
 0x28c   :  { %v2072_v3 = vadd.f32 %v2071_v29, %v2065_v16 }
 0x28e   :  { %v2079_v56 = vadd.f32 %v2078_v42, %v2072_v3 }
 0x290   :  { %v2086_v32 = vadd.f32 %v2085_v50, %v2079_v56 }
 0x292   :  { %v2093_v62 = vadd.f32 %v2092_v39, %v2086_v32 }
 0x294   :  { %v2100_v46 = vadd.f32 %v2099_v34, %v2093_v62 }
 0x296   :  { %v2107_v0 = vadd.f32 %v2106_v36, %v2100_v46 }
 0x298   :  { %v2114_v9 = vadd.f32 %v2113_v17, %v2107_v0 }
 0x2ce   :  { %v1948_v45 = vpop.f32.mrf.mxu1 }
 0x2cf   :  { %v1949_v53 = vadd.f32 1e-20, %v1948_v45  ;;  %v2125_v45 = vadd.s32 8, %v2124_v63 }
 0x2d1   :  { %2644 = vrsqrt.f32 %v1949_v53  ;;  %vm1958_vm14 = vcmp.eq.f32.partialorder %v1949_v53, inf  ;;  %v1961_v11 = vand.u32 2147483648, %v1949_v53  ;;  %vm1960_vm15 = vcmp.eq.f32.partialorder %v1949_v53, 0.0 }
 0x2d7   :  { %v2645_v55 = vpop.eup %2644 }
 0x2d8   :  { %v1952_v35 = vmul.f32 %v2645_v55, %v1949_v53 }
 0x2da   :  { %v1953_v38 = vmul.f32 %v2645_v55, %v1952_v35 }
 0x2dc   :  { %v1954_v28 = vmul.f32 0.5, %v1953_v38  ;;  %v2149_v38 = vperm.slane %v2114_v9, 0 }
 0x2de   :  { %v1955_v40 = vsub.f32 1.5, %v1954_v28 }
 0x2e0   :  { %v1956_v25 = vmul.f32 %v2645_v55, %v1955_v40 }
 0x2e2   :  { %v1957_v59 = vmul.f32 %v1956_v25, %v1949_v53 }
 0x2e4   :  { %v1959_v51 = vsel %vm1958_vm14, %v1949_v53, %v1957_v59 }
 0x2e5   :  { %v1962_v60 = vsel %vm1960_vm15, %v1961_v11, %v1959_v51 }
 0x2e6   :  { %v2115_v33 = vmax.f32 %v1962_v60, 0.0 }
 0x2e8   :  { %v2116_v61 = vmin.f32 %v2115_v33, 8.0 }
 0x2ea   :  { %v2117_v21 = vfloor.f32 %v2116_v61 }
 0x2ec   :  { %v2118_v2 = vsub.f32 %v2116_v61, %v2117_v21  ;;  %v2628_v58 = vcvt.f32.s32 %v2117_v21 }
 0x2ee   :  { %v2120_v44 = vadd.s32 1, %v2628_v58  ;;  %v2126_v12 = vsub.f32 1.0, %v2118_v2  ;;  %v2127_v53 = vperm.slane %v2628_v58, 0  ;;  %v2144_v52 = vperm.slane %v2118_v2, 0 }
 0x2f0   :  { %vm2121_vm0 = vcmp.lt.s32.totalorder %v2120_v44, 8  ;;  %vm2128_vm1 = vcmp.eq.s32.totalorder %v2124_v63, %v2127_v53  ;;  %vm2129_vm2 = vcmp.eq.s32.totalorder %v2125_v45, %v2127_v53  ;;  %v2134_v22 = vperm.slane %v2126_v12, 0 }
 0x2f1   :  { %v2122_v54 = vsel %vm2121_vm0, %v2120_v44, 8  ;;  %v2623_v14 = vsel %vm2128_vm1, 1.0, %v2663_v30  ;;  %v2624_v20 = vsel %vm2129_vm2, 1.0, %v2663_v30 }
 0x2f2   :  { %v2137_v47 = vperm.slane %v2122_v54, 0  ;;  %v2135_v16 = vmul.f32 %v2623_v14, %v2134_v22  ;;  %v2136_v43 = vmul.f32 %v2624_v20, %v2134_v22 }
 0x2f4   :  { %vm2138_vm3 = vcmp.eq.s32.totalorder %v2124_v63, %v2137_v47  ;;  %vm2139_vm4 = vcmp.eq.s32.totalorder %v2125_v45, %v2137_v47 }
 0x2f5   :  { %v2625_v29 = vsel %vm2138_vm3, 1.0, %v2663_v30  ;;  %v2626_v55 = vsel %vm2139_vm4, 1.0, %v2663_v30 }
 0x2f6   :  { %v2145_v15 = vmul.f32 %v2625_v29, %v2144_v52  ;;  %v2146_v27 = vmul.f32 %v2626_v55, %v2144_v52 }
 0x2f8   :  { %v2147_v35 = vadd.f32 %v2145_v15, %v2135_v16  ;;  %v2148_v31 = vadd.f32 %v2146_v27, %v2136_v43 }
 0x2fa   :  { %v2150_v41 = vmul.f32 %v2149_v38, %v2147_v35  ;;  %v2151_v3 = vmul.f32 %v2149_v38, %v2148_v31 }
 0x2fc   :  { %2153 = vst.msk [vmem:[%s4398_s8] sm:$0xff] %vm2152_vm5, %v2150_v41 }
 0x2fd   :  { %2155 = vst.msk [vmem:[%s4398_s8 + $0x8] sm:$0x1] %vm2154_vm6, %v2151_v3 }
 0x2fe   :  { %2160 = vsyncpa [#allocation3], 1 }

</bundles_post_ra>
